<compile_context>
chip_gen: v6e
topology: v6e:2x2x1
jax: 0.10.0
libtpu: 0.0.40
codegen_flags: <defaults>
</compile_context>

<pallas_src>
import functools

import jax
import jax.numpy as jnp
from jax.experimental import pallas as pl
from jax.experimental.pallas import tpu as pltpu

COMPUTE_DTYPE = jnp.bfloat16  # MXU operand dtype; all accumulation/epilogues in f32


def _round_up(x, m):
    return (x + m - 1) // m * m


# ---------------------------------------------------------------------------
# Fused conv stack: conv1 -> [conv2+ReLU+pool] -> [conv3+ReLU+pool], one kernel
# ---------------------------------------------------------------------------

def _conv3x3_bias_relu_pool(src_ref, w_ref, b_ref, colpool_ref, ho, wo, cin, cout):
    """3x3 stride-1 'same' conv (single K=9*cin MXU contraction) + bias + ReLU
    + 2x2 max-pool.  `src_ref` is a zero-halo-padded (ho+2, wo+2, cin) VMEM ref."""
    cols = []
    for di in range(3):
        for dj in range(3):
            cols.append(src_ref[di:di + ho, dj:dj + wo, :].reshape(ho * wo, cin))
    patch = jnp.concatenate(cols, axis=-1).astype(w_ref.dtype)      # (ho*wo, 9*cin)
    acc = jnp.dot(patch, w_ref[...], preferred_element_type=jnp.float32)
    acc = jnp.maximum(acc + b_ref[...], 0.0)                        # bias + ReLU
    y = acc.reshape(ho, wo, cout)
    # pool rows: outer-dim reshape + max (stays in vregs)
    yr = jnp.max(y.reshape(ho // 2, 2, wo, cout), axis=1)
    # pool columns: stride-2 sublane reads of a small VMEM scratch
    colpool_ref[...] = yr
    left = colpool_ref[:, pl.ds(0, wo // 2, 2), :]
    right = colpool_ref[:, pl.ds(1, wo // 2, 2), :]
    return jnp.maximum(left, right)                                 # (ho//2, wo//2, cout) f32


def _convnet_kernel(x_ref, w1_ref, w2_ref, w3_ref, b2_ref, b3_ref, o_ref,
                    pad2, pad3, cp2, cp3, *, h1, wd1, h2, wd2, h3, wd3):
    """Whole conv stack for one image, entirely in VMEM.

    x_ref : (1, h1+3, wd1+3, 4) bf16   space-to-depth conv1 input (already padded)
    w1    : (64, 8)   bf16             conv1 taps as one (k*k*cin, cout) matrix
    w2    : (72, 16)  bf16             conv2 taps
    w3    : (144, 32) bf16             conv3 taps
    b2/b3 : (1, 16)/(1, 32) f32
    o_ref : (1, h3, wd3, 32) bf16      pooled conv3 output (NHWC)
    """
    # fresh zero halo borders each image (interiors overwritten below)
    pad2[...] = jnp.zeros_like(pad2)
    pad3[...] = jnp.zeros_like(pad3)

    # ---- conv1: stride-1 4x4 conv over the 2x2 space-to-depth input (K = 64),
    #      no bias / no activation ----
    cols = []
    for di in range(4):
        for dj in range(4):
            cols.append(x_ref[0, di:di + h1, dj:dj + wd1, :].reshape(h1 * wd1, 4))
    patch1 = jnp.concatenate(cols, axis=-1)                          # (h1*wd1, 64) bf16
    y1 = jnp.dot(patch1, w1_ref[...], preferred_element_type=jnp.float32)
    pad2[1:h1 + 1, 1:wd1 + 1, :] = y1.reshape(h1, wd1, 8)            # halo-padded conv2 input

    # ---- conv2 + bias + ReLU + 2x2 max-pool (K = 72) ----
    y2 = _conv3x3_bias_relu_pool(pad2, w2_ref, b2_ref, cp2, h1, wd1, 8, 16)
    pad3[1:h2 + 1, 1:wd2 + 1, :] = y2                                # halo-padded conv3 input

    # ---- conv3 + bias + ReLU + 2x2 max-pool (K = 144) ----
    y3 = _conv3x3_bias_relu_pool(pad3, w3_ref, b3_ref, cp3, h2, wd2, 16, 32)
    o_ref[0] = y3.astype(o_ref.dtype)


def fused_conv_stack(x_s2d, w1, w2, b2, w3, b3):
    """x_s2d: (N, H/2+3, W/2+3, 4) space-to-depth conv1 input.
    Returns (N, H/8, W/8, 32) pooled conv3 features (bf16, NHWC)."""
    n, h0p, w0p, c0 = x_s2d.shape
    assert c0 == 4
    h1, wd1 = h0p - 3, w0p - 3
    assert h1 % 4 == 0 and wd1 % 4 == 0, "two 2x2 pools need H, W divisible by 8"
    h2, wd2 = h1 // 2, wd1 // 2
    h3, wd3 = h2 // 2, wd2 // 2
    assert w1.shape == (64, 8) and w2.shape == (72, 16) and w3.shape == (144, 32)

    kernel = functools.partial(_convnet_kernel, h1=h1, wd1=wd1, h2=h2, wd2=wd2,
                               h3=h3, wd3=wd3)
    return pl.pallas_call(
        kernel,
        out_shape=jax.ShapeDtypeStruct((n, h3, wd3, 32), COMPUTE_DTYPE),
        grid=(n,),
        in_specs=[
            pl.BlockSpec((1, h0p, w0p, 4), lambda b: (b, 0, 0, 0)),
            pl.BlockSpec((64, 8), lambda b: (0, 0)),
            pl.BlockSpec((72, 16), lambda b: (0, 0)),
            pl.BlockSpec((144, 32), lambda b: (0, 0)),
            pl.BlockSpec((1, 16), lambda b: (0, 0)),
            pl.BlockSpec((1, 32), lambda b: (0, 0)),
        ],
        out_specs=pl.BlockSpec((1, h3, wd3, 32), lambda b: (b, 0, 0, 0)),
        scratch_shapes=[
            pltpu.VMEM((h1 + 2, wd1 + 2, 8), jnp.float32),    # halo-padded conv2 input
            pltpu.VMEM((h2 + 2, wd2 + 2, 16), jnp.float32),   # halo-padded conv3 input
            pltpu.VMEM((h2, wd1, 16), jnp.float32),           # conv2 column-pool scratch
            pltpu.VMEM((h3, wd2, 32), jnp.float32),           # conv3 column-pool scratch
        ],
        compiler_params=pltpu.CompilerParams(
            dimension_semantics=("parallel",),
            vmem_limit_bytes=48 * 1024 * 1024,
        ),
    )(x_s2d.astype(COMPUTE_DTYPE),
      w1.astype(COMPUTE_DTYPE), w2.astype(COMPUTE_DTYPE), w3.astype(COMPUTE_DTYPE),
      b2.astype(jnp.float32).reshape(1, 16), b3.astype(jnp.float32).reshape(1, 32))


# ---------------------------------------------------------------------------
# Fused fc head: relu(A @ W1 + b1) @ W2 + b2 in one kernel (K-tiled reduction)
# ---------------------------------------------------------------------------

def _fc_head_kernel(a_ref, w1_ref, b1_ref, w2_ref, b2_ref, o_ref, acc_ref):
    @pl.when(pl.program_id(1) == 0)
    def _init():
        acc_ref[...] = jnp.zeros_like(acc_ref)

    acc_ref[...] += jnp.dot(a_ref[...], w1_ref[...],
                            preferred_element_type=jnp.float32)

    @pl.when(pl.program_id(1) == pl.num_programs(1) - 1)
    def _finalize():
        h = jnp.maximum(acc_ref[...] + b1_ref[...], 0.0)     # fc1 bias + ReLU
        # TODO(synk): nn.Dropout(0.3) is identity in eval mode; no kernel emitted.
        out = jnp.dot(h.astype(COMPUTE_DTYPE), w2_ref[...],
                      preferred_element_type=jnp.float32) + b2_ref[...]
        o_ref[...] = out.astype(o_ref.dtype)


def fc_head(a, w1, b1, w2, b2):
    """a: (M, K); w1: (K, 128) [hidden padded to 128]; w2: (128, 128) [out padded].
    Returns (Mp, 128) f32; caller slices valid rows / first 2 columns."""
    M, K = a.shape
    assert w1.shape[0] == K and w1.shape[1] == 128 and w2.shape == (128, 128)
    tm = min(128, _round_up(M, 8))
    tk = min(4096, _round_up(K, 128))
    Mp, Kp = _round_up(M, tm), _round_up(K, tk)

    a_p = a.astype(COMPUTE_DTYPE)
    if (Mp, Kp) != (M, K):
        a_p = jnp.pad(a_p, ((0, Mp - M), (0, Kp - K)))
    w1_p = w1.astype(COMPUTE_DTYPE)
    if Kp != K:
        w1_p = jnp.pad(w1_p, ((0, Kp - K), (0, 0)))

    return pl.pallas_call(
        _fc_head_kernel,
        out_shape=jax.ShapeDtypeStruct((Mp, 128), jnp.float32),
        grid=(Mp // tm, Kp // tk),
        in_specs=[
            pl.BlockSpec((tm, tk), lambda i, k: (i, k)),
            pl.BlockSpec((tk, 128), lambda i, k: (k, 0)),
            pl.BlockSpec((1, 128), lambda i, k: (0, 0)),
            pl.BlockSpec((128, 128), lambda i, k: (0, 0)),
            pl.BlockSpec((1, 128), lambda i, k: (0, 0)),
        ],
        out_specs=pl.BlockSpec((tm, 128), lambda i, k: (i, 0)),
        scratch_shapes=[pltpu.VMEM((tm, 128), jnp.float32)],
        compiler_params=pltpu.CompilerParams(
            dimension_semantics=("parallel", "arbitrary"),
            vmem_limit_bytes=32 * 1024 * 1024,
        ),
    )(a_p, w1_p, b1.astype(jnp.float32).reshape(1, 128),
      w2.astype(COMPUTE_DTYPE), b2.astype(jnp.float32).reshape(1, 128))


# ---------------------------------------------------------------------------
# Forward pass
# ---------------------------------------------------------------------------

def modified_resnet18_forward(x_nchw, params):
    n, _, H, W = x_nchw.shape
    x = jnp.transpose(x_nchw, (0, 2, 3, 1)).astype(COMPUTE_DTYPE)   # NCHW -> NHWC

    # conv1 (Conv2d(1, 8, k=7, s=2, p=3, bias=False)): exact rewrite as a stride-1
    # 4x4 conv over the 2x2 space-to-depth input (taps folded at prep time).
    x = jnp.pad(x, ((0, 0), (3, 3), (3, 3), (0, 0)))
    hp, wp = H + 6, W + 6
    x = x.reshape(n, hp // 2, 2, wp // 2, 2, 1)
    x = jnp.transpose(x, (0, 1, 3, 2, 4, 5)).reshape(n, hp // 2, wp // 2, 4)

    # conv1 -> [conv2+ReLU+pool] -> [conv3+ReLU+pool]: ONE fused Pallas kernel,
    # intermediates never leave VMEM.
    feats = fused_conv_stack(x, params["conv1_w"],
                             params["conv2_w"], params["conv2_b"],
                             params["conv3_w"], params["conv3_b"])   # (n, H/8, W/8, 32)

    # flatten: torch flattens NCHW; that permutation is folded into fc1's rows at
    # prep time, so the NHWC activation is flattened directly (free HBM reshape).
    feats = feats.reshape(n, -1)

    # fc head: Linear(fc_in, 64)+ReLU (+Dropout identity) + Linear(64, 2), fused.
    logits = fc_head(feats, params["fc1_w"], params["fc1_b"],
                     params["fc2_w"], params["fc2_b"])
    return logits[:n, :2]


# ---------------------------------------------------------------------------
# Parameters: torch-layout init + one-time layout preparation (outside jit)
# ---------------------------------------------------------------------------

def init_params(key, fc_input_size):
    """Deterministic parameters in the original torch layouts (OIHW / (out, in))."""
    ks = jax.random.split(key, 9)
    return {
        "conv1_w": 0.1 * jax.random.normal(ks[0], (8, 1, 7, 7), jnp.float32),
        "conv2_w": 0.1 * jax.random.normal(ks[1], (16, 8, 3, 3), jnp.float32),
        "conv2_b": 0.1 * jax.random.normal(ks[2], (16,), jnp.float32),
        "conv3_w": 0.1 * jax.random.normal(ks[3], (32, 16, 3, 3), jnp.float32),
        "conv3_b": 0.1 * jax.random.normal(ks[4], (32,), jnp.float32),
        "fc1_w": 0.05 * jax.random.normal(ks[5], (64, fc_input_size), jnp.float32),
        "fc1_b": 0.05 * jax.random.normal(ks[6], (64,), jnp.float32),
        "fc2_w": 0.05 * jax.random.normal(ks[7], (2, 64), jnp.float32),
        "fc2_b": 0.05 * jax.random.normal(ks[8], (2,), jnp.float32),
    }


def prepare_params(p, height, width):
    """One-time conversion of torch-layout weights to kernel-friendly layouts."""
    cd = COMPUTE_DTYPE

    # conv1: 7x7/stride-2 taps -> stride-1 4x4 taps over the 2x2 space-to-depth
    # input, flattened to one (k*k*cin, cout) = (64, 8) matrix:
    #   row (a*4+b)*4 + (2p+q) = w[o, 0, 2a+p, 2b+q] (out-of-range taps zeroed).
    w = p["conv1_w"][:, 0]                                   # (8, 7, 7)
    w = jnp.pad(w, ((0, 0), (0, 1), (0, 1)))                 # (8, 8, 8)
    w = w.reshape(8, 4, 2, 4, 2)                             # (o, a, p, b, q)
    conv1_w = jnp.transpose(w, (1, 3, 2, 4, 0)).reshape(64, 8)

    def conv_mat(w_oihw):                                    # OIHW -> (k*k*cin, cout)
        cout, cin, kh, kw = w_oihw.shape
        return jnp.transpose(w_oihw, (2, 3, 1, 0)).reshape(kh * kw * cin, cout)

    # fc1: (out=64, C*H*W) torch weight -> (K, 128): rows permuted from NCHW
    # flatten order to NHWC flatten order, hidden dim zero-padded to 128 lanes.
    h3, w3 = height // 8, width // 8
    fc1 = p["fc1_w"].reshape(64, 32, h3, w3)
    fc1 = jnp.transpose(fc1, (2, 3, 1, 0)).reshape(h3 * w3 * 32, 64)
    fc1 = jnp.pad(fc1, ((0, 0), (0, 64)))
    fc1_b = jnp.pad(p["fc1_b"], (0, 64))
    # fc2: (2, 64) -> (128, 128) (hidden rows / output lanes zero-padded).
    fc2 = jnp.pad(p["fc2_w"].T, ((0, 64), (0, 126)))
    fc2_b = jnp.pad(p["fc2_b"], (0, 126))

    return {
        "conv1_w": conv1_w.astype(cd),
        "conv2_w": conv_mat(p["conv2_w"]).astype(cd),
        "conv2_b": p["conv2_b"],
        "conv3_w": conv_mat(p["conv3_w"]).astype(cd),
        "conv3_b": p["conv3_b"],
        "fc1_w": fc1.astype(cd),
        "fc1_b": fc1_b,
        "fc2_w": fc2.astype(cd),
        "fc2_b": fc2_b,
    }


if __name__ == "__main__":
    key = jax.random.PRNGKey(0)
    k_x, k_p = jax.random.split(key)

    batch, in_ch, height, width = 2, 1, 32, 32   # small test size (original: 224)
    x = jax.random.normal(k_x, (batch, in_ch, height, width), jnp.float32)

    # _calculate_fc_input_size(): 32 channels * (H/8) * (W/8)   (25088 at 224x224)
    fc_input_size = 32 * (height // 8) * (width // 8)
    torch_params = init_params(k_p, fc_input_size)
    params = prepare_params(torch_params, height, width)

    fwd = jax.jit(modified_resnet18_forward)
    out = jax.block_until_ready(fwd(x, params))
    assert out.shape == (batch, 2), out.shape
    assert out.dtype == jnp.float32, out.dtype
    print("KERNEL_OK")
</pallas_src>

<mosaic_0001>
module attributes {stable_mosaic.version = 11 : i64} {
  func.func @_convnet_kernel(%arg0: i32, %arg1: memref<1x19x19x4xbf16, #tpu.memory_space<vmem>>, %arg2: memref<64x8xbf16, #tpu.memory_space<vmem>>, %arg3: memref<72x16xbf16, #tpu.memory_space<vmem>>, %arg4: memref<144x32xbf16, #tpu.memory_space<vmem>>, %arg5: memref<1x16xf32, #tpu.memory_space<vmem>>, %arg6: memref<1x32xf32, #tpu.memory_space<vmem>>, %arg7: memref<1x4x4x32xbf16, #tpu.memory_space<vmem>>, %arg8: memref<18x18x8xf32, #tpu.memory_space<vmem>>, %arg9: memref<10x10x16xf32, #tpu.memory_space<vmem>>, %arg10: memref<8x16x16xf32, #tpu.memory_space<vmem>>, %arg11: memref<4x8x32xf32, #tpu.memory_space<vmem>>) attributes {dimension_semantics = [#tpu.dimension_semantics<parallel>], iteration_bounds = array<i64: 2>, scalar_prefetch = 0 : i64, scratch_operands = 4 : i64, tpu.core_type = #tpu.core_type<tc>, window_params = [{transform_indices = @transform_0, window_bounds = array<i64: 1, 19, 19, 4>}, {pipeline_mode = #tpu.pipeline_mode<synchronous>, transform_indices = @transform_1, window_bounds = array<i64: 64, 8>}, {pipeline_mode = #tpu.pipeline_mode<synchronous>, transform_indices = @transform_2, window_bounds = array<i64: 72, 16>}, {pipeline_mode = #tpu.pipeline_mode<synchronous>, transform_indices = @transform_3, window_bounds = array<i64: 144, 32>}, {pipeline_mode = #tpu.pipeline_mode<synchronous>, transform_indices = @transform_4, window_bounds = array<i64: 1, 16>}, {pipeline_mode = #tpu.pipeline_mode<synchronous>, transform_indices = @transform_5, window_bounds = array<i64: 1, 32>}, {transform_indices = @transform_6, window_bounds = array<i64: 1, 4, 4, 32>}]} {
    %cst = arith.constant 0.000000e+00 : f32
    %0 = vector.broadcast %cst : f32 to vector<18x18x8xf32>
    %c0 = arith.constant 0 : index
    %c0_0 = arith.constant 0 : index
    %c0_1 = arith.constant 0 : index
    %1 = vector.load %arg8[%c0, %c0_0, %c0_1] : memref<18x18x8xf32, #tpu.memory_space<vmem>>, vector<18x18x8xf32>
    tpu.vector_store %arg8[%c0, %c0_0, %c0_1], %0 {strides = array<i32>} : memref<18x18x8xf32, #tpu.memory_space<vmem>>, vector<18x18x8xf32>,
    %cst_2 = arith.constant 0.000000e+00 : f32
    %2 = vector.broadcast %cst_2 : f32 to vector<10x10x16xf32>
    %c0_3 = arith.constant 0 : index
    %c0_4 = arith.constant 0 : index
    %c0_5 = arith.constant 0 : index
    %3 = vector.load %arg9[%c0_3, %c0_4, %c0_5] : memref<10x10x16xf32, #tpu.memory_space<vmem>>, vector<10x10x16xf32>
    tpu.vector_store %arg9[%c0_3, %c0_4, %c0_5], %2 {strides = array<i32>} : memref<10x10x16xf32, #tpu.memory_space<vmem>>, vector<10x10x16xf32>,
    %c0_6 = arith.constant 0 : index
    %c0_7 = arith.constant 0 : index
    %c0_8 = arith.constant 0 : index
    %c0_9 = arith.constant 0 : index
    %4 = vector.load %arg1[%c0_6, %c0_7, %c0_8, %c0_9] : memref<1x19x19x4xbf16, #tpu.memory_space<vmem>>, vector<1x16x16x4xbf16>
    %5 = vector.shape_cast %4 : vector<1x16x16x4xbf16> to vector<16x16x4xbf16>
    %6 = vector.shape_cast %5 : vector<16x16x4xbf16> to vector<256x4xbf16>
    %c0_10 = arith.constant 0 : index
    %c0_11 = arith.constant 0 : index
    %c1 = arith.constant 1 : index
    %c0_12 = arith.constant 0 : index
    %7 = vector.load %arg1[%c0_10, %c0_11, %c1, %c0_12] : memref<1x19x19x4xbf16, #tpu.memory_space<vmem>>, vector<1x16x16x4xbf16>
    %8 = vector.shape_cast %7 : vector<1x16x16x4xbf16> to vector<16x16x4xbf16>
    %9 = vector.shape_cast %8 : vector<16x16x4xbf16> to vector<256x4xbf16>
    %c0_13 = arith.constant 0 : index
    %c0_14 = arith.constant 0 : index
    %c2 = arith.constant 2 : index
    %c0_15 = arith.constant 0 : index
    %10 = vector.load %arg1[%c0_13, %c0_14, %c2, %c0_15] : memref<1x19x19x4xbf16, #tpu.memory_space<vmem>>, vector<1x16x16x4xbf16>
    %11 = vector.shape_cast %10 : vector<1x16x16x4xbf16> to vector<16x16x4xbf16>
    %12 = vector.shape_cast %11 : vector<16x16x4xbf16> to vector<256x4xbf16>
    %c0_16 = arith.constant 0 : index
    %c0_17 = arith.constant 0 : index
    %c3 = arith.constant 3 : index
    %c0_18 = arith.constant 0 : index
    %13 = vector.load %arg1[%c0_16, %c0_17, %c3, %c0_18] : memref<1x19x19x4xbf16, #tpu.memory_space<vmem>>, vector<1x16x16x4xbf16>
    %14 = vector.shape_cast %13 : vector<1x16x16x4xbf16> to vector<16x16x4xbf16>
    %15 = vector.shape_cast %14 : vector<16x16x4xbf16> to vector<256x4xbf16>
    %c0_19 = arith.constant 0 : index
    %c1_20 = arith.constant 1 : index
    %c0_21 = arith.constant 0 : index
    %c0_22 = arith.constant 0 : index
    %16 = vector.load %arg1[%c0_19, %c1_20, %c0_21, %c0_22] : memref<1x19x19x4xbf16, #tpu.memory_space<vmem>>, vector<1x16x16x4xbf16>
    %17 = vector.shape_cast %16 : vector<1x16x16x4xbf16> to vector<16x16x4xbf16>
    %18 = vector.shape_cast %17 : vector<16x16x4xbf16> to vector<256x4xbf16>
    %c0_23 = arith.constant 0 : index
    %c1_24 = arith.constant 1 : index
    %c1_25 = arith.constant 1 : index
    %c0_26 = arith.constant 0 : index
    %19 = vector.load %arg1[%c0_23, %c1_24, %c1_25, %c0_26] : memref<1x19x19x4xbf16, #tpu.memory_space<vmem>>, vector<1x16x16x4xbf16>
    %20 = vector.shape_cast %19 : vector<1x16x16x4xbf16> to vector<16x16x4xbf16>
    %21 = vector.shape_cast %20 : vector<16x16x4xbf16> to vector<256x4xbf16>
    %c0_27 = arith.constant 0 : index
    %c1_28 = arith.constant 1 : index
    %c2_29 = arith.constant 2 : index
    %c0_30 = arith.constant 0 : index
    %22 = vector.load %arg1[%c0_27, %c1_28, %c2_29, %c0_30] : memref<1x19x19x4xbf16, #tpu.memory_space<vmem>>, vector<1x16x16x4xbf16>
    %23 = vector.shape_cast %22 : vector<1x16x16x4xbf16> to vector<16x16x4xbf16>
    %24 = vector.shape_cast %23 : vector<16x16x4xbf16> to vector<256x4xbf16>
    %c0_31 = arith.constant 0 : index
    %c1_32 = arith.constant 1 : index
    %c3_33 = arith.constant 3 : index
    %c0_34 = arith.constant 0 : index
    %25 = vector.load %arg1[%c0_31, %c1_32, %c3_33, %c0_34] : memref<1x19x19x4xbf16, #tpu.memory_space<vmem>>, vector<1x16x16x4xbf16>
    %26 = vector.shape_cast %25 : vector<1x16x16x4xbf16> to vector<16x16x4xbf16>
    %27 = vector.shape_cast %26 : vector<16x16x4xbf16> to vector<256x4xbf16>
    %c0_35 = arith.constant 0 : index
    %c2_36 = arith.constant 2 : index
    %c0_37 = arith.constant 0 : index
    %c0_38 = arith.constant 0 : index
    %28 = vector.load %arg1[%c0_35, %c2_36, %c0_37, %c0_38] : memref<1x19x19x4xbf16, #tpu.memory_space<vmem>>, vector<1x16x16x4xbf16>
    %29 = vector.shape_cast %28 : vector<1x16x16x4xbf16> to vector<16x16x4xbf16>
    %30 = vector.shape_cast %29 : vector<16x16x4xbf16> to vector<256x4xbf16>
    %c0_39 = arith.constant 0 : index
    %c2_40 = arith.constant 2 : index
    %c1_41 = arith.constant 1 : index
    %c0_42 = arith.constant 0 : index
    %31 = vector.load %arg1[%c0_39, %c2_40, %c1_41, %c0_42] : memref<1x19x19x4xbf16, #tpu.memory_space<vmem>>, vector<1x16x16x4xbf16>
    %32 = vector.shape_cast %31 : vector<1x16x16x4xbf16> to vector<16x16x4xbf16>
    %33 = vector.shape_cast %32 : vector<16x16x4xbf16> to vector<256x4xbf16>
    %c0_43 = arith.constant 0 : index
    %c2_44 = arith.constant 2 : index
    %c2_45 = arith.constant 2 : index
    %c0_46 = arith.constant 0 : index
    %34 = vector.load %arg1[%c0_43, %c2_44, %c2_45, %c0_46] : memref<1x19x19x4xbf16, #tpu.memory_space<vmem>>, vector<1x16x16x4xbf16>
    %35 = vector.shape_cast %34 : vector<1x16x16x4xbf16> to vector<16x16x4xbf16>
    %36 = vector.shape_cast %35 : vector<16x16x4xbf16> to vector<256x4xbf16>
    %c0_47 = arith.constant 0 : index
    %c2_48 = arith.constant 2 : index
    %c3_49 = arith.constant 3 : index
    %c0_50 = arith.constant 0 : index
    %37 = vector.load %arg1[%c0_47, %c2_48, %c3_49, %c0_50] : memref<1x19x19x4xbf16, #tpu.memory_space<vmem>>, vector<1x16x16x4xbf16>
    %38 = vector.shape_cast %37 : vector<1x16x16x4xbf16> to vector<16x16x4xbf16>
    %39 = vector.shape_cast %38 : vector<16x16x4xbf16> to vector<256x4xbf16>
    %c0_51 = arith.constant 0 : index
    %c3_52 = arith.constant 3 : index
    %c0_53 = arith.constant 0 : index
    %c0_54 = arith.constant 0 : index
    %40 = vector.load %arg1[%c0_51, %c3_52, %c0_53, %c0_54] : memref<1x19x19x4xbf16, #tpu.memory_space<vmem>>, vector<1x16x16x4xbf16>
    %41 = vector.shape_cast %40 : vector<1x16x16x4xbf16> to vector<16x16x4xbf16>
    %42 = vector.shape_cast %41 : vector<16x16x4xbf16> to vector<256x4xbf16>
    %c0_55 = arith.constant 0 : index
    %c3_56 = arith.constant 3 : index
    %c1_57 = arith.constant 1 : index
    %c0_58 = arith.constant 0 : index
    %43 = vector.load %arg1[%c0_55, %c3_56, %c1_57, %c0_58] : memref<1x19x19x4xbf16, #tpu.memory_space<vmem>>, vector<1x16x16x4xbf16>
    %44 = vector.shape_cast %43 : vector<1x16x16x4xbf16> to vector<16x16x4xbf16>
    %45 = vector.shape_cast %44 : vector<16x16x4xbf16> to vector<256x4xbf16>
    %c0_59 = arith.constant 0 : index
    %c3_60 = arith.constant 3 : index
    %c2_61 = arith.constant 2 : index
    %c0_62 = arith.constant 0 : index
    %46 = vector.load %arg1[%c0_59, %c3_60, %c2_61, %c0_62] : memref<1x19x19x4xbf16, #tpu.memory_space<vmem>>, vector<1x16x16x4xbf16>
    %47 = vector.shape_cast %46 : vector<1x16x16x4xbf16> to vector<16x16x4xbf16>
    %48 = vector.shape_cast %47 : vector<16x16x4xbf16> to vector<256x4xbf16>
    %c0_63 = arith.constant 0 : index
    %c3_64 = arith.constant 3 : index
    %c3_65 = arith.constant 3 : index
    %c0_66 = arith.constant 0 : index
    %49 = vector.load %arg1[%c0_63, %c3_64, %c3_65, %c0_66] : memref<1x19x19x4xbf16, #tpu.memory_space<vmem>>, vector<1x16x16x4xbf16>
    %50 = vector.shape_cast %49 : vector<1x16x16x4xbf16> to vector<16x16x4xbf16>
    %51 = vector.shape_cast %50 : vector<16x16x4xbf16> to vector<256x4xbf16>
    %52 = tpu.concatenate %6, %9, %12, %15, %18, %21, %24, %27, %30, %33, %36, %39, %42, %45, %48, %51 in 1 : vector<256x4xbf16>, vector<256x4xbf16>, vector<256x4xbf16>, vector<256x4xbf16>, vector<256x4xbf16>, vector<256x4xbf16>, vector<256x4xbf16>, vector<256x4xbf16>, vector<256x4xbf16>, vector<256x4xbf16>, vector<256x4xbf16>, vector<256x4xbf16>, vector<256x4xbf16>, vector<256x4xbf16>, vector<256x4xbf16>, vector<256x4xbf16> -> vector<256x64xbf16>
    %c0_67 = arith.constant 0 : index
    %c0_68 = arith.constant 0 : index
    %53 = vector.load %arg2[%c0_67, %c0_68] : memref<64x8xbf16, #tpu.memory_space<vmem>>, vector<64x8xbf16>
    %cst_69 = arith.constant dense<0.000000e+00> : vector<256x8xf32>
    %54 = tpu.matmul %52, %53, %cst_69 {dimension_numbers = #tpu.dot_dimension_numbers<[1], [0], [0], [1], [0, 0, 1, 1], [], []>} : vector<256x64xbf16>, vector<64x8xbf16>, vector<256x8xf32> -> vector<256x8xf32>
    %55 = vector.shape_cast %54 : vector<256x8xf32> to vector<16x16x8xf32>
    %c1_70 = arith.constant 1 : index
    %c1_71 = arith.constant 1 : index
    %c0_72 = arith.constant 0 : index
    %56 = vector.load %arg8[%c1_70, %c1_71, %c0_72] : memref<18x18x8xf32, #tpu.memory_space<vmem>>, vector<16x16x8xf32>
    tpu.vector_store %arg8[%c1_70, %c1_71, %c0_72], %55 {strides = array<i32>} : memref<18x18x8xf32, #tpu.memory_space<vmem>>, vector<16x16x8xf32>,
    %c0_73 = arith.constant 0 : index
    %c0_74 = arith.constant 0 : index
    %c0_75 = arith.constant 0 : index
    %57 = vector.load %arg8[%c0_73, %c0_74, %c0_75] : memref<18x18x8xf32, #tpu.memory_space<vmem>>, vector<16x16x8xf32>
    %58 = vector.shape_cast %57 : vector<16x16x8xf32> to vector<256x8xf32>
    %c0_76 = arith.constant 0 : index
    %c1_77 = arith.constant 1 : index
    %c0_78 = arith.constant 0 : index
    %59 = vector.load %arg8[%c0_76, %c1_77, %c0_78] : memref<18x18x8xf32, #tpu.memory_space<vmem>>, vector<16x16x8xf32>
    %60 = vector.shape_cast %59 : vector<16x16x8xf32> to vector<256x8xf32>
    %c0_79 = arith.constant 0 : index
    %c2_80 = arith.constant 2 : index
    %c0_81 = arith.constant 0 : index
    %61 = vector.load %arg8[%c0_79, %c2_80, %c0_81] : memref<18x18x8xf32, #tpu.memory_space<vmem>>, vector<16x16x8xf32>
    %62 = vector.shape_cast %61 : vector<16x16x8xf32> to vector<256x8xf32>
    %c1_82 = arith.constant 1 : index
    %c0_83 = arith.constant 0 : index
    %c0_84 = arith.constant 0 : index
    %63 = vector.load %arg8[%c1_82, %c0_83, %c0_84] : memref<18x18x8xf32, #tpu.memory_space<vmem>>, vector<16x16x8xf32>
    %64 = vector.shape_cast %63 : vector<16x16x8xf32> to vector<256x8xf32>
    %c1_85 = arith.constant 1 : index
    %c1_86 = arith.constant 1 : index
    %c0_87 = arith.constant 0 : index
    %65 = vector.load %arg8[%c1_85, %c1_86, %c0_87] : memref<18x18x8xf32, #tpu.memory_space<vmem>>, vector<16x16x8xf32>
    %66 = vector.shape_cast %65 : vector<16x16x8xf32> to vector<256x8xf32>
    %c1_88 = arith.constant 1 : index
    %c2_89 = arith.constant 2 : index
    %c0_90 = arith.constant 0 : index
    %67 = vector.load %arg8[%c1_88, %c2_89, %c0_90] : memref<18x18x8xf32, #tpu.memory_space<vmem>>, vector<16x16x8xf32>
    %68 = vector.shape_cast %67 : vector<16x16x8xf32> to vector<256x8xf32>
    %c2_91 = arith.constant 2 : index
    %c0_92 = arith.constant 0 : index
    %c0_93 = arith.constant 0 : index
    %69 = vector.load %arg8[%c2_91, %c0_92, %c0_93] : memref<18x18x8xf32, #tpu.memory_space<vmem>>, vector<16x16x8xf32>
    %70 = vector.shape_cast %69 : vector<16x16x8xf32> to vector<256x8xf32>
    %c2_94 = arith.constant 2 : index
    %c1_95 = arith.constant 1 : index
    %c0_96 = arith.constant 0 : index
    %71 = vector.load %arg8[%c2_94, %c1_95, %c0_96] : memref<18x18x8xf32, #tpu.memory_space<vmem>>, vector<16x16x8xf32>
    %72 = vector.shape_cast %71 : vector<16x16x8xf32> to vector<256x8xf32>
    %c2_97 = arith.constant 2 : index
    %c2_98 = arith.constant 2 : index
    %c0_99 = arith.constant 0 : index
    %73 = vector.load %arg8[%c2_97, %c2_98, %c0_99] : memref<18x18x8xf32, #tpu.memory_space<vmem>>, vector<16x16x8xf32>
    %74 = vector.shape_cast %73 : vector<16x16x8xf32> to vector<256x8xf32>
    %75 = tpu.concatenate %58, %60, %62, %64, %66, %68, %70, %72, %74 in 1 : vector<256x8xf32>, vector<256x8xf32>, vector<256x8xf32>, vector<256x8xf32>, vector<256x8xf32>, vector<256x8xf32>, vector<256x8xf32>, vector<256x8xf32>, vector<256x8xf32> -> vector<256x72xf32>
    %76 = arith.truncf %75 : vector<256x72xf32> to vector<256x72xbf16>
    %c0_100 = arith.constant 0 : index
    %c0_101 = arith.constant 0 : index
    %77 = vector.load %arg3[%c0_100, %c0_101] : memref<72x16xbf16, #tpu.memory_space<vmem>>, vector<72x16xbf16>
    %cst_102 = arith.constant dense<0.000000e+00> : vector<256x16xf32>
    %78 = tpu.matmul %76, %77, %cst_102 {dimension_numbers = #tpu.dot_dimension_numbers<[1], [0], [0], [1], [0, 0, 1, 1], [], []>} : vector<256x72xbf16>, vector<72x16xbf16>, vector<256x16xf32> -> vector<256x16xf32>
    %c0_103 = arith.constant 0 : index
    %c0_104 = arith.constant 0 : index
    %79 = vector.load %arg5[%c0_103, %c0_104] : memref<1x16xf32, #tpu.memory_space<vmem>>, vector<1x16xf32>
    %80 = vector.broadcast %79 : vector<1x16xf32> to vector<256x16xf32>
    %81 = arith.addf %78, %80 : vector<256x16xf32>
    %cst_105 = arith.constant 0.000000e+00 : f32
    %82 = vector.broadcast %cst_105 : f32 to vector<256x16xf32>
    %83 = arith.maximumf %81, %82 : vector<256x16xf32>
    %84 = vector.shape_cast %83 : vector<256x16xf32> to vector<16x16x16xf32>
    %85 = vector.shape_cast %84 : vector<16x16x16xf32> to vector<8x2x16x16xf32>
    %cst_106 = arith.constant dense<0xFF800000> : vector<8x16x16xf32>
    %86 = vector.multi_reduction <maximumf>, %85, %cst_106 [1] : vector<8x2x16x16xf32> to vector<8x16x16xf32>
    %c0_107 = arith.constant 0 : index
    %c0_108 = arith.constant 0 : index
    %c0_109 = arith.constant 0 : index
    %87 = vector.load %arg10[%c0_107, %c0_108, %c0_109] : memref<8x16x16xf32, #tpu.memory_space<vmem>>, vector<8x16x16xf32>
    tpu.vector_store %arg10[%c0_107, %c0_108, %c0_109], %86 {strides = array<i32>} : memref<8x16x16xf32, #tpu.memory_space<vmem>>, vector<8x16x16xf32>,
    %c0_110 = arith.constant 0 : index
    %c0_111 = arith.constant 0 : index
    %c0_112 = arith.constant 0 : index
    %88 = tpu.strided_load %arg10[%c0_110, %c0_111, %c0_112] {strides = array<i32: 1, 2, 1>} : memref<8x16x16xf32, #tpu.memory_space<vmem>>, vector<8x8x16xf32>
    %c0_113 = arith.constant 0 : index
    %c1_114 = arith.constant 1 : index
    %c0_115 = arith.constant 0 : index
    %89 = tpu.strided_load %arg10[%c0_113, %c1_114, %c0_115] {strides = array<i32: 1, 2, 1>} : memref<8x16x16xf32, #tpu.memory_space<vmem>>, vector<8x8x16xf32>
    %90 = arith.maximumf %88, %89 : vector<8x8x16xf32>
    %c1_116 = arith.constant 1 : index
    %c1_117 = arith.constant 1 : index
    %c0_118 = arith.constant 0 : index
    %91 = vector.load %arg9[%c1_116, %c1_117, %c0_118] : memref<10x10x16xf32, #tpu.memory_space<vmem>>, vector<8x8x16xf32>
    tpu.vector_store %arg9[%c1_116, %c1_117, %c0_118], %90 {strides = array<i32>} : memref<10x10x16xf32, #tpu.memory_space<vmem>>, vector<8x8x16xf32>,
    %c0_119 = arith.constant 0 : index
    %c0_120 = arith.constant 0 : index
    %c0_121 = arith.constant 0 : index
    %92 = vector.load %arg9[%c0_119, %c0_120, %c0_121] : memref<10x10x16xf32, #tpu.memory_space<vmem>>, vector<8x8x16xf32>
    %93 = vector.shape_cast %92 : vector<8x8x16xf32> to vector<64x16xf32>
    %c0_122 = arith.constant 0 : index
    %c1_123 = arith.constant 1 : index
    %c0_124 = arith.constant 0 : index
    %94 = vector.load %arg9[%c0_122, %c1_123, %c0_124] : memref<10x10x16xf32, #tpu.memory_space<vmem>>, vector<8x8x16xf32>
    %95 = vector.shape_cast %94 : vector<8x8x16xf32> to vector<64x16xf32>
    %c0_125 = arith.constant 0 : index
    %c2_126 = arith.constant 2 : index
    %c0_127 = arith.constant 0 : index
    %96 = vector.load %arg9[%c0_125, %c2_126, %c0_127] : memref<10x10x16xf32, #tpu.memory_space<vmem>>, vector<8x8x16xf32>
    %97 = vector.shape_cast %96 : vector<8x8x16xf32> to vector<64x16xf32>
    %c1_128 = arith.constant 1 : index
    %c0_129 = arith.constant 0 : index
    %c0_130 = arith.constant 0 : index
    %98 = vector.load %arg9[%c1_128, %c0_129, %c0_130] : memref<10x10x16xf32, #tpu.memory_space<vmem>>, vector<8x8x16xf32>
    %99 = vector.shape_cast %98 : vector<8x8x16xf32> to vector<64x16xf32>
    %c1_131 = arith.constant 1 : index
    %c1_132 = arith.constant 1 : index
    %c0_133 = arith.constant 0 : index
    %100 = vector.load %arg9[%c1_131, %c1_132, %c0_133] : memref<10x10x16xf32, #tpu.memory_space<vmem>>, vector<8x8x16xf32>
    %101 = vector.shape_cast %100 : vector<8x8x16xf32> to vector<64x16xf32>
    %c1_134 = arith.constant 1 : index
    %c2_135 = arith.constant 2 : index
    %c0_136 = arith.constant 0 : index
    %102 = vector.load %arg9[%c1_134, %c2_135, %c0_136] : memref<10x10x16xf32, #tpu.memory_space<vmem>>, vector<8x8x16xf32>
    %103 = vector.shape_cast %102 : vector<8x8x16xf32> to vector<64x16xf32>
    %c2_137 = arith.constant 2 : index
    %c0_138 = arith.constant 0 : index
    %c0_139 = arith.constant 0 : index
    %104 = vector.load %arg9[%c2_137, %c0_138, %c0_139] : memref<10x10x16xf32, #tpu.memory_space<vmem>>, vector<8x8x16xf32>
    %105 = vector.shape_cast %104 : vector<8x8x16xf32> to vector<64x16xf32>
    %c2_140 = arith.constant 2 : index
    %c1_141 = arith.constant 1 : index
    %c0_142 = arith.constant 0 : index
    %106 = vector.load %arg9[%c2_140, %c1_141, %c0_142] : memref<10x10x16xf32, #tpu.memory_space<vmem>>, vector<8x8x16xf32>
    %107 = vector.shape_cast %106 : vector<8x8x16xf32> to vector<64x16xf32>
    %c2_143 = arith.constant 2 : index
    %c2_144 = arith.constant 2 : index
    %c0_145 = arith.constant 0 : index
    %108 = vector.load %arg9[%c2_143, %c2_144, %c0_145] : memref<10x10x16xf32, #tpu.memory_space<vmem>>, vector<8x8x16xf32>
    %109 = vector.shape_cast %108 : vector<8x8x16xf32> to vector<64x16xf32>
    %110 = tpu.concatenate %93, %95, %97, %99, %101, %103, %105, %107, %109 in 1 : vector<64x16xf32>, vector<64x16xf32>, vector<64x16xf32>, vector<64x16xf32>, vector<64x16xf32>, vector<64x16xf32>, vector<64x16xf32>, vector<64x16xf32>, vector<64x16xf32> -> vector<64x144xf32>
    %111 = arith.truncf %110 : vector<64x144xf32> to vector<64x144xbf16>
    %c0_146 = arith.constant 0 : index
    %c0_147 = arith.constant 0 : index
    %112 = vector.load %arg4[%c0_146, %c0_147] : memref<144x32xbf16, #tpu.memory_space<vmem>>, vector<144x32xbf16>
    %cst_148 = arith.constant dense<0.000000e+00> : vector<64x32xf32>
    %113 = tpu.matmul %111, %112, %cst_148 {dimension_numbers = #tpu.dot_dimension_numbers<[1], [0], [0], [1], [0, 0, 1, 1], [], []>} : vector<64x144xbf16>, vector<144x32xbf16>, vector<64x32xf32> -> vector<64x32xf32>
    %c0_149 = arith.constant 0 : index
    %c0_150 = arith.constant 0 : index
    %114 = vector.load %arg6[%c0_149, %c0_150] : memref<1x32xf32, #tpu.memory_space<vmem>>, vector<1x32xf32>
    %115 = vector.broadcast %114 : vector<1x32xf32> to vector<64x32xf32>
    %116 = arith.addf %113, %115 : vector<64x32xf32>
    %cst_151 = arith.constant 0.000000e+00 : f32
    %117 = vector.broadcast %cst_151 : f32 to vector<64x32xf32>
    %118 = arith.maximumf %116, %117 : vector<64x32xf32>
    %119 = vector.shape_cast %118 : vector<64x32xf32> to vector<8x8x32xf32>
    %120 = vector.shape_cast %119 : vector<8x8x32xf32> to vector<4x2x8x32xf32>
    %cst_152 = arith.constant dense<0xFF800000> : vector<4x8x32xf32>
    %121 = vector.multi_reduction <maximumf>, %120, %cst_152 [1] : vector<4x2x8x32xf32> to vector<4x8x32xf32>
    %c0_153 = arith.constant 0 : index
    %c0_154 = arith.constant 0 : index
    %c0_155 = arith.constant 0 : index
    %122 = vector.load %arg11[%c0_153, %c0_154, %c0_155] : memref<4x8x32xf32, #tpu.memory_space<vmem>>, vector<4x8x32xf32>
    tpu.vector_store %arg11[%c0_153, %c0_154, %c0_155], %121 {strides = array<i32>} : memref<4x8x32xf32, #tpu.memory_space<vmem>>, vector<4x8x32xf32>,
    %c0_156 = arith.constant 0 : index
    %c0_157 = arith.constant 0 : index
    %c0_158 = arith.constant 0 : index
    %123 = tpu.strided_load %arg11[%c0_156, %c0_157, %c0_158] {strides = array<i32: 1, 2, 1>} : memref<4x8x32xf32, #tpu.memory_space<vmem>>, vector<4x4x32xf32>
    %c0_159 = arith.constant 0 : index
    %c1_160 = arith.constant 1 : index
    %c0_161 = arith.constant 0 : index
    %124 = tpu.strided_load %arg11[%c0_159, %c1_160, %c0_161] {strides = array<i32: 1, 2, 1>} : memref<4x8x32xf32, #tpu.memory_space<vmem>>, vector<4x4x32xf32>
    %125 = arith.maximumf %123, %124 : vector<4x4x32xf32>
    %126 = arith.truncf %125 : vector<4x4x32xf32> to vector<4x4x32xbf16>
    %c0_162 = arith.constant 0 : index
    %c0_163 = arith.constant 0 : index
    %c0_164 = arith.constant 0 : index
    %c0_165 = arith.constant 0 : index
    %127 = vector.load %arg7[%c0_162, %c0_163, %c0_164, %c0_165] : memref<1x4x4x32xbf16, #tpu.memory_space<vmem>>, vector<1x4x4x32xbf16>
    %128 = vector.shape_cast %127 : vector<1x4x4x32xbf16> to vector<4x4x32xbf16>
    %129 = vector.shape_cast %126 : vector<4x4x32xbf16> to vector<1x4x4x32xbf16>
    tpu.vector_store %arg7[%c0_162, %c0_163, %c0_164, %c0_165], %129 {strides = array<i32>} : memref<1x4x4x32xbf16, #tpu.memory_space<vmem>>, vector<1x4x4x32xbf16>,
    return
  }
  func.func @transform_0(%arg0: i32) -> (i32, i32, i32, i32) {
    %c0_i32 = arith.constant 0 : i32
    %c0_i32_0 = arith.constant 0 : i32
    %c0_i32_1 = arith.constant 0 : i32
    %c0_i32_2 = arith.constant 0 : i32
    return %arg0, %c0_i32, %c0_i32_0, %c0_i32_1 : i32, i32, i32, i32
  }
  func.func @transform_1(%arg0: i32) -> (i32, i32) {
    %c0_i32 = arith.constant 0 : i32
    %c0_i32_0 = arith.constant 0 : i32
    %c0_i32_1 = arith.constant 0 : i32
    return %c0_i32, %c0_i32_0 : i32, i32
  }
  func.func @transform_2(%arg0: i32) -> (i32, i32) {
    %c0_i32 = arith.constant 0 : i32
    %c0_i32_0 = arith.constant 0 : i32
    %c0_i32_1 = arith.constant 0 : i32
    return %c0_i32, %c0_i32_0 : i32, i32
  }
  func.func @transform_3(%arg0: i32) -> (i32, i32) {
    %c0_i32 = arith.constant 0 : i32
    %c0_i32_0 = arith.constant 0 : i32
    %c0_i32_1 = arith.constant 0 : i32
    return %c0_i32, %c0_i32_0 : i32, i32
  }
  func.func @transform_4(%arg0: i32) -> (i32, i32) {
    %c0_i32 = arith.constant 0 : i32
    %c0_i32_0 = arith.constant 0 : i32
    %c0_i32_1 = arith.constant 0 : i32
    return %c0_i32, %c0_i32_0 : i32, i32
  }
  func.func @transform_5(%arg0: i32) -> (i32, i32) {
    %c0_i32 = arith.constant 0 : i32
    %c0_i32_0 = arith.constant 0 : i32
    %c0_i32_1 = arith.constant 0 : i32
    return %c0_i32, %c0_i32_0 : i32, i32
  }
  func.func @transform_6(%arg0: i32) -> (i32, i32, i32, i32) {
    %c0_i32 = arith.constant 0 : i32
    %c0_i32_0 = arith.constant 0 : i32
    %c0_i32_1 = arith.constant 0 : i32
    %c0_i32_2 = arith.constant 0 : i32
    return %arg0, %c0_i32, %c0_i32_0, %c0_i32_1 : i32, i32, i32, i32
  }
}

module attributes {stable_mosaic.version = 11 : i64} {
  func.func @_fc_head_kernel(%arg0: i32, %arg1: i32, %arg2: memref<8x512xbf16, #tpu.memory_space<vmem>>, %arg3: memref<512x128xbf16, #tpu.memory_space<vmem>>, %arg4: memref<1x128xf32, #tpu.memory_space<vmem>>, %arg5: memref<128x128xbf16, #tpu.memory_space<vmem>>, %arg6: memref<1x128xf32, #tpu.memory_space<vmem>>, %arg7: memref<8x128xf32, #tpu.memory_space<vmem>>, %arg8: memref<8x128xf32, #tpu.memory_space<vmem>>) attributes {dimension_semantics = [#tpu.dimension_semantics<parallel>, #tpu.dimension_semantics<arbitrary>], iteration_bounds = array<i64: 1, 1>, scalar_prefetch = 0 : i64, scratch_operands = 1 : i64, tpu.core_type = #tpu.core_type<tc>, window_params = [{transform_indices = @transform_0, window_bounds = array<i64: 8, 512>}, {transform_indices = @transform_1, window_bounds = array<i64: 512, 128>}, {pipeline_mode = #tpu.pipeline_mode<synchronous>, transform_indices = @transform_2, window_bounds = array<i64: 1, 128>}, {pipeline_mode = #tpu.pipeline_mode<synchronous>, transform_indices = @transform_3, window_bounds = array<i64: 128, 128>}, {pipeline_mode = #tpu.pipeline_mode<synchronous>, transform_indices = @transform_4, window_bounds = array<i64: 1, 128>}, {transform_indices = @transform_5, window_bounds = array<i64: 8, 128>}]} {
    %c0_i32 = arith.constant 0 : i32
    %0 = arith.cmpi eq, %arg1, %c0_i32 : i32
    %1 = arith.extui %0 : i1 to i32
    %c0_i32_0 = arith.constant 0 : i32
    %2 = arith.cmpi ne, %1, %c0_i32_0 : i32
    scf.if %2 {
      %cst_10 = arith.constant 0.000000e+00 : f32
      %12 = vector.broadcast %cst_10 : f32 to vector<8x128xf32>
      %c0_11 = arith.constant 0 : index
      %c0_12 = arith.constant 0 : index
      %13 = vector.load %arg8[%c0_11, %c0_12] : memref<8x128xf32, #tpu.memory_space<vmem>>, vector<8x128xf32>
      tpu.vector_store %arg8[%c0_11, %c0_12], %12 {strides = array<i32>} : memref<8x128xf32, #tpu.memory_space<vmem>>, vector<8x128xf32>,
    } else {
    }
    %c0 = arith.constant 0 : index
    %c0_1 = arith.constant 0 : index
    %3 = vector.load %arg8[%c0, %c0_1] : memref<8x128xf32, #tpu.memory_space<vmem>>, vector<8x128xf32>
    %c0_2 = arith.constant 0 : index
    %c0_3 = arith.constant 0 : index
    %4 = vector.load %arg2[%c0_2, %c0_3] : memref<8x512xbf16, #tpu.memory_space<vmem>>, vector<8x512xbf16>
    %c0_4 = arith.constant 0 : index
    %c0_5 = arith.constant 0 : index
    %5 = vector.load %arg3[%c0_4, %c0_5] : memref<512x128xbf16, #tpu.memory_space<vmem>>, vector<512x128xbf16>
    %cst = arith.constant dense<0.000000e+00> : vector<8x128xf32>
    %6 = tpu.matmul %4, %5, %cst {dimension_numbers = #tpu.dot_dimension_numbers<[1], [0], [0], [1], [0, 0, 1, 1], [], []>} : vector<8x512xbf16>, vector<512x128xbf16>, vector<8x128xf32> -> vector<8x128xf32>
    %7 = arith.addf %3, %6 : vector<8x128xf32>
    %c0_6 = arith.constant 0 : index
    %c0_7 = arith.constant 0 : index
    %8 = vector.load %arg8[%c0_6, %c0_7] : memref<8x128xf32, #tpu.memory_space<vmem>>, vector<8x128xf32>
    tpu.vector_store %arg8[%c0_6, %c0_7], %7 {strides = array<i32>} : memref<8x128xf32, #tpu.memory_space<vmem>>, vector<8x128xf32>,
    %c0_i32_8 = arith.constant 0 : i32
    %9 = arith.cmpi eq, %arg1, %c0_i32_8 : i32
    %10 = arith.extui %9 : i1 to i32
    %c0_i32_9 = arith.constant 0 : i32
    %11 = arith.cmpi ne, %10, %c0_i32_9 : i32
    scf.if %11 {
      %c0_10 = arith.constant 0 : index
      %c0_11 = arith.constant 0 : index
      %12 = vector.load %arg8[%c0_10, %c0_11] : memref<8x128xf32, #tpu.memory_space<vmem>>, vector<8x128xf32>
      %c0_12 = arith.constant 0 : index
      %c0_13 = arith.constant 0 : index
      %13 = vector.load %arg4[%c0_12, %c0_13] : memref<1x128xf32, #tpu.memory_space<vmem>>, vector<1x128xf32>
      %14 = vector.broadcast %13 : vector<1x128xf32> to vector<8x128xf32>
      %15 = arith.addf %12, %14 : vector<8x128xf32>
      %cst_14 = arith.constant 0.000000e+00 : f32
      %16 = vector.broadcast %cst_14 : f32 to vector<8x128xf32>
      %17 = arith.maximumf %15, %16 : vector<8x128xf32>
      %18 = arith.truncf %17 : vector<8x128xf32> to vector<8x128xbf16>
      %c0_15 = arith.constant 0 : index
      %c0_16 = arith.constant 0 : index
      %19 = vector.load %arg5[%c0_15, %c0_16] : memref<128x128xbf16, #tpu.memory_space<vmem>>, vector<128x128xbf16>
      %cst_17 = arith.constant dense<0.000000e+00> : vector<8x128xf32>
      %20 = tpu.matmul %18, %19, %cst_17 {dimension_numbers = #tpu.dot_dimension_numbers<[1], [0], [0], [1], [0, 0, 1, 1], [], []>} : vector<8x128xbf16>, vector<128x128xbf16>, vector<8x128xf32> -> vector<8x128xf32>
      %c0_18 = arith.constant 0 : index
      %c0_19 = arith.constant 0 : index
      %21 = vector.load %arg6[%c0_18, %c0_19] : memref<1x128xf32, #tpu.memory_space<vmem>>, vector<1x128xf32>
      %22 = vector.broadcast %21 : vector<1x128xf32> to vector<8x128xf32>
      %23 = arith.addf %20, %22 : vector<8x128xf32>
      %c0_20 = arith.constant 0 : index
      %c0_21 = arith.constant 0 : index
      %24 = vector.load %arg7[%c0_20, %c0_21] : memref<8x128xf32, #tpu.memory_space<vmem>>, vector<8x128xf32>
      tpu.vector_store %arg7[%c0_20, %c0_21], %23 {strides = array<i32>} : memref<8x128xf32, #tpu.memory_space<vmem>>, vector<8x128xf32>,
    } else {
    }
    return
  }
  func.func @transform_0(%arg0: i32, %arg1: i32) -> (i32, i32) {
    %c0_i32 = arith.constant 0 : i32
    return %arg0, %arg1 : i32, i32
  }
  func.func @transform_1(%arg0: i32, %arg1: i32) -> (i32, i32) {
    %c0_i32 = arith.constant 0 : i32
    %c0_i32_0 = arith.constant 0 : i32
    return %arg1, %c0_i32 : i32, i32
  }
  func.func @transform_2(%arg0: i32, %arg1: i32) -> (i32, i32) {
    %c0_i32 = arith.constant 0 : i32
    %c0_i32_0 = arith.constant 0 : i32
    %c0_i32_1 = arith.constant 0 : i32
    return %c0_i32, %c0_i32_0 : i32, i32
  }
  func.func @transform_3(%arg0: i32, %arg1: i32) -> (i32, i32) {
    %c0_i32 = arith.constant 0 : i32
    %c0_i32_0 = arith.constant 0 : i32
    %c0_i32_1 = arith.constant 0 : i32
    return %c0_i32, %c0_i32_0 : i32, i32
  }
  func.func @transform_4(%arg0: i32, %arg1: i32) -> (i32, i32) {
    %c0_i32 = arith.constant 0 : i32
    %c0_i32_0 = arith.constant 0 : i32
    %c0_i32_1 = arith.constant 0 : i32
    return %c0_i32, %c0_i32_0 : i32, i32
  }
  func.func @transform_5(%arg0: i32, %arg1: i32) -> (i32, i32) {
    %c0_i32 = arith.constant 0 : i32
    %c0_i32_0 = arith.constant 0 : i32
    return %arg0, %c0_i32 : i32, i32
  }
}

</mosaic_0001>

<bundles_post_ra>
// kernel: modified_resnet18_forward.3
= control target key start
LH: loop header
LB: loop body
LE: loop exit
PB: predicated region body
PF: predicated region fallthrough
CT: control target
= control target key end

     0   :  { %v676_v39 = vmov 0.0   ;;  %vm677_vm0 = vmmov 0   ;;  %s843_s1 = inlined_call_operand.vmem [shape: bf16[512,128], index: 1, kind: input, shape index: {}]   ;;  %s844_s0 = inlined_call_operand.vmem [shape: bf16[8,512], index: 0, kind: input, shape index: {}]   ;;  %s845_s3 = inlined_call_operand.vmem [shape: bf16[128,128], index: 3, kind: input, shape index: {}]   ;;  %s846_s2 = inlined_call_operand.vmem [shape: f32[1,128], index: 2, kind: input, shape index: {}]   ;;  %s847_s4 = inlined_call_operand.vmem [shape: f32[1,128], index: 4, kind: input, shape index: {}]   ;;  %s848_s5 = inlined_call_operand.vmem [shape: f32[8,128], index: 5, kind: output, shape index: {}]  }
   0x1   :  { %v632_v0 = vld [vmem:[%s843_s1 + $0x78] sm:$0xff]   ;;  %v636_v4 = vld [vmem:[%s843_s1 + $0x70] sm:$0xff]   ;;  %v640_v8 = vld [vmem:[%s843_s1 + $0x68] sm:$0xff]  }
   0x2   :  { %v633_v1 = vld [vmem:[%s843_s1 + $0xf8] sm:$0xff]   ;;  %557 = vmatprep.subr.bf16.mxu0 %v632_v0  ;;  %v637_v5 = vld [vmem:[%s843_s1 + $0xf0] sm:$0xff]   ;;  %v641_v9 = vld [vmem:[%s843_s1 + $0xe8] sm:$0xff]  }
   0x3   :  { %v634_v2 = vld [vmem:[%s843_s1 + $0x38] sm:$0xff]   ;;  %579 = vmatprep.subr.bf16.mxu1 %v633_v1  ;;  %v638_v6 = vld [vmem:[%s843_s1 + $0x30] sm:$0xff]   ;;  %v642_v10 = vld [vmem:[%s843_s1 + $0x28] sm:$0xff]  }
   0x4   :  { %v635_v3 = vld [vmem:[%s843_s1 + $0xb8] sm:$0xff]   ;;  %558 = vmatpush3.bf16.msra.mxu0 %v634_v2  ;;  %v639_v7 = vld [vmem:[%s843_s1 + $0xb0] sm:$0xff]   ;;  %v643_v11 = vld [vmem:[%s843_s1 + $0xa8] sm:$0xff]  }
   0x5   :  { %580 = vmatpush3.bf16.msra.mxu1 %v635_v3  ;;  %559 = vmatprep.subr.bf16.mxu0 %v636_v4  ;;  %v644_v12 = vld [vmem:[%s843_s1 + $0x60] sm:$0xff]   ;;  %v648_v16 = vld [vmem:[%s843_s1 + $0x58] sm:$0xff]   ;;  %v652_v20 = vld [vmem:[%s843_s1 + $0x50] sm:$0xff]  }
   0x6   :  { %581 = vmatprep.subr.bf16.mxu1 %v637_v5  ;;  %v645_v13 = vld [vmem:[%s843_s1 + $0xe0] sm:$0xff]   ;;  %v649_v17 = vld [vmem:[%s843_s1 + $0xd8] sm:$0xff]   ;;  %v653_v21 = vld [vmem:[%s843_s1 + $0xd0] sm:$0xff]  }
   0x7   :  { %v646_v14 = vld [vmem:[%s843_s1 + $0x20] sm:$0xff]   ;;  %v650_v18 = vld [vmem:[%s843_s1 + $0x18] sm:$0xff]   ;;  %v654_v22 = vld [vmem:[%s843_s1 + $0x10] sm:$0xff]  }
   0x8   :  { %560 = vmatpush3.bf16.msra.mxu0 %v638_v6  ;;  %v647_v15 = vld [vmem:[%s843_s1 + $0xa0] sm:$0xff]   ;;  %v651_v19 = vld [vmem:[%s843_s1 + $0x98] sm:$0xff]   ;;  %v655_v23 = vld [vmem:[%s843_s1 + $0x90] sm:$0xff]  }
   0x9   :  { %582 = vmatpush3.bf16.msra.mxu1 %v639_v7  ;;  %561 = vmatprep.subr.bf16.mxu0 %v640_v8  ;;  %v656_v24 = vld [vmem:[%s843_s1 + $0x48] sm:$0xff]   ;;  %v660_v28 = vld [vmem:[%s843_s1 + $0x40] sm:$0xff]   ;;  %v668_v38 = vld [vmem:[%s845_s3 + $0x38] sm:$0xff]  }
   0xa   :  { %583 = vmatprep.subr.bf16.mxu1 %v641_v9  ;;  %v657_v25 = vld [vmem:[%s843_s1 + $0xc8] sm:$0xff]   ;;  %v661_v29 = vld [vmem:[%s843_s1 + $0xc0] sm:$0xff]   ;;  %v669_v40 = vld [vmem:[%s845_s3 + $0x30] sm:$0xff]  }
   0xb   :  { %v658_v26 = vld [vmem:[%s843_s1 + $0x8] sm:$0xff]   ;;  %v662_v30 = vld [vmem:[%s843_s1] sm:$0xff]   ;;  %v672_v43 = vld [vmem:[%s845_s3 + $0x18] sm:$0xff]  }
   0xc   :  { %562 = vmatpush3.bf16.msra.mxu0 %v642_v10  ;;  %v659_v27 = vld [vmem:[%s843_s1 + $0x88] sm:$0xff]   ;;  %v663_v31 = vld [vmem:[%s843_s1 + $0x80] sm:$0xff]   ;;  %v673_v44 = vld [vmem:[%s845_s3 + $0x10] sm:$0xff]  }
   0xd   :  { %584 = vmatpush3.bf16.msra.mxu1 %v643_v11  ;;  %563 = vmatprep.subr.bf16.mxu0 %v644_v12  ;;  %v27_v32 = vld [vmem:[%s844_s0] sm:$0xff]  ;;  %v28_v33 = vld [vmem:[%s844_s0 + $0x8] sm:$0xff] }
   0xe   :  { %585 = vmatprep.subr.bf16.mxu1 %v645_v13  ;;  %v511_v34 = vcombine.low %v27_v32, %v27_v32  ;;  %v512_v35 = vcombine.high %v27_v32, %v27_v32  ;;  %v513_v36 = vcombine.low %v28_v33, %v28_v33  ;;  %v514_v37 = vcombine.high %v28_v33, %v28_v33  ;;  %v670_v41 = vld [vmem:[%s845_s3 + $0x28] sm:$0xff]   ;;  %v671_v42 = vld [vmem:[%s845_s3 + $0x20] sm:$0xff]  }
   0xf   :  { %v674_v45 = vld [vmem:[%s845_s3 + $0x8] sm:$0xff]   ;;  %v675_v46 = vld [vmem:[%s845_s3] sm:$0xff]  }
  0x10   :  { %564 = vmatpush3.bf16.msra.mxu0 %v646_v14  ;;  %331 = vmatprep.mubr.bf16.mxu0 %v512_v35  ;;  %v547_v53 = vld [vmem:[%s846_s2] ss:$0 sm:$0xff] }
  0x11   :  { %586 = vmatpush3.bf16.msra.mxu1 %v647_v15  ;;  %565 = vmatprep.subr.bf16.mxu0 %v648_v16  ;;  %v548_v62 = vld [vmem:[%s847_s4] ss:$0 sm:$0xff] }
  0x12   :  { %587 = vmatprep.subr.bf16.mxu1 %v649_v17  ;;  %371 = vmatprep.mubr.bf16.mxu1 %v514_v37 }
  0x14   :  { %566 = vmatpush3.bf16.msra.mxu0 %v650_v18 }
  0x15   :  { %588 = vmatpush3.bf16.msra.mxu1 %v651_v19  ;;  %567 = vmatprep.subr.bf16.mxu0 %v652_v20 }
  0x16   :  { %589 = vmatprep.subr.bf16.mxu1 %v653_v21 }
  0x18   :  { %568 = vmatpush3.bf16.msra.mxu0 %v654_v22 }
  0x19   :  { %590 = vmatpush3.bf16.msra.mxu1 %v655_v23  ;;  %569 = vmatprep.subr.bf16.mxu0 %v656_v24 }
  0x1a   :  { %591 = vmatprep.subr.bf16.mxu1 %v657_v25 }
  0x1c   :  { %570 = vmatpush3.bf16.msra.mxu0 %v658_v26 }
  0x1d   :  { %592 = vmatpush3.bf16.msra.mxu1 %v659_v27  ;;  %571 = vmatprep.subr.bf16.mxu0 %v660_v28 }
  0x1e   :  { %593 = vmatprep.subr.bf16.mxu1 %v661_v29 }
  0x20   :  { %572 = vmatpush3.bf16.msra.mxu0 %v662_v30 }
  0x21   :  { %594 = vmatpush3.bf16.msra.mxu1 %v663_v31  ;;  %610 = vmatprep.subr.bf16.mxu0 %v676_v39 }
  0x23   :  { %332 = vmatmul.mubr.bf16.vlgmr.msra.gmra.mxu0 %v511_v34 }
  0x24   :  { %372 = vmatmul.mubr.bf16.vlgmr.msra.gmra.mxu1 %v513_v36  ;;  %611 = vmatpush3.bf16.msra.mxu0 %v668_v38 }
  0x25   :  { %612 = vmatprep.subr.bf16.mxu0 %v676_v39  ;;  %626 = vmatprep.mubr.msk.bf16.mxu0 %vm677_vm0, %v676_v39 }
  0x28   :  { %613 = vmatpush3.bf16.msra.mxu0 %v669_v40 }
  0x29   :  { %614 = vmatprep.subr.bf16.mxu0 %v676_v39 }
  0x2c   :  { %615 = vmatpush3.bf16.msra.mxu0 %v670_v41 }
  0x2d   :  { %616 = vmatprep.subr.bf16.mxu0 %v676_v39 }
  0x30   :  { %617 = vmatpush3.bf16.msra.mxu0 %v671_v42 }
  0x31   :  { %618 = vmatprep.subr.bf16.mxu0 %v676_v39 }
  0x34   :  { %619 = vmatpush3.bf16.msra.mxu0 %v672_v43 }
  0x35   :  { %620 = vmatprep.subr.bf16.mxu0 %v676_v39 }
  0x38   :  { %621 = vmatpush3.bf16.msra.mxu0 %v673_v44 }
  0x39   :  { %622 = vmatprep.subr.bf16.mxu0 %v676_v39 }
  0x3c   :  { %623 = vmatpush3.bf16.msra.mxu0 %v674_v45 }
  0x3d   :  { %624 = vmatprep.subr.bf16.mxu0 %v676_v39 }
  0x40   :  { %625 = vmatpush3.bf16.msra.mxu0 %v675_v46 }
  0xe3   :  { %v573_v47 = vpop.f32.mrf.mxu0 }
  0xe4   :  { %v595_v48 = vpop.f32.mrf.mxu1 }
  0xe5   :  { %v574_v49 = vpop.f32.mrf.mxu0 }
  0xe6   :  { %v596_v50 = vpop.f32.mrf.mxu1  ;;  %v575_v51 = vadd.f32 %v574_v49, %v573_v47 }
  0xe7   :  { %v597_v52 = vadd.f32 %v596_v50, %v595_v48  ;;  %v576_v54 = vpop.f32.mrf.mxu0 }
  0xe8   :  { %v598_v55 = vpop.f32.mrf.mxu1 }
  0xe9   :  { %v374_v56 = vadd.f32 %v597_v52, %v575_v51  ;;  %v577_v57 = vpop.f32.mrf.mxu0 }
  0xea   :  { %v599_v58 = vpop.f32.mrf.mxu1 }
  0xeb   :  { %v392_v59 = vadd.f32 %v547_v53, %v374_v56 }
  0xed   :  { %v393_v60 = vmax.f32 %v392_v59, 0.0 }
  0xef   :  { %v394_v61 = vpack.c.bf16 %v393_v60, %v393_v60 }
  0xf1   :  { %627 = vmatmul.mubr.bf16.vlgmr.msra.gmra.mxu0 %v394_v61 }
 0x1b1   :  { %v500_v63 = vpop.f32.mrf.mxu0 }
 0x1b2   :  { %v501_v0 = vadd.f32 %v548_v62, %v500_v63 }
 0x1b3   :  { %v628_v1 = vpop.f32.mrf.mxu0 }
 0x1b4   :  { %506 = vst [vmem:[%s848_s5] sm:$0xff] %v501_v0 }
 0x1b5   :  { %v503_v2 = vpop.f32.mrf.mxu0 }
 0x1b7   :  { %v629_v3 = vpop.f32.mrf.mxu0 }

// kernel: modified_resnet18_forward.2
= control target key start
LH: loop header
LB: loop body
LE: loop exit
PB: predicated region body
PF: predicated region fallthrough
CT: control target
= control target key end

     0   :  { %s10754_s21 = smov 0   ;;  %s15929_s0 = inlined_call_operand.vmem [shape: bf16[2,19,19,4], index: 0, kind: input, shape index: {}]   ;;  %s15930_s1 = inlined_call_operand.vmem [shape: bf16[64,8], index: 1, kind: input, shape index: {}]   ;;  %s15931_s2 = inlined_call_operand.vmem [shape: bf16[72,16], index: 2, kind: input, shape index: {}]   ;;  %s15932_s3 = inlined_call_operand.vmem [shape: bf16[144,32], index: 3, kind: input, shape index: {}]   ;;  %s15933_s4 = inlined_call_operand.vmem [shape: f32[1,16], index: 4, kind: input, shape index: {}]   ;;  %s15934_s5 = inlined_call_operand.vmem [shape: f32[1,32], index: 5, kind: input, shape index: {}]   ;;  %s15935_s6 = inlined_call_operand.vmem [shape: bf16[2,4,4,32], index: 6, kind: output, shape index: {}]  }
   0x1 LB: > { %s9004_s22 = sadd.s32 4294967295, %s10696_s21   ;;  %p9008_p0 = scmp.ge.s32.totalorder %s10696_s21, 1  ;;  %s10696_s21 = sphi %s10754_s21, %s16_s21  }
   0x2   : > { %p212_p1 = scmp.lt.s32.totalorder %s10696_s21, 3 }
   0x4   : > { %p213_p2 = pnand %p9008_p0, %p212_p1 }
   0x6   : > { %216 = sbr.rel (%p213_p2) target bundleno = 1838 (0x72e), region = 44 }
   0xb   : > { %p242_p3 = scmp.lt.s32.totalorder %s9004_s22, 1  ;;  %vm379_vm0 = vsmask.f32 3328  ;;  %vm380_vm1 = vsmask.f32 7440  ;;  %s10698_s27 = smov 4  }
   0xc   : > { %vm10796_vm2 = vmor %vm379_vm0, %vm380_vm1  ;;  %vm830_vm3 = vcmask 1042432   ;;  %vm831_vm4 = vcmask 1046532   ;;  %s10699_s28 = smov 8   ;;  %vm961_vm6 = vsmask.f32 2304  ;;  %s10700_s29 = smov 12  }
   0xd   : > { %s16363_s22 = smov (!%p242_p3, %s9004_s22), 1  ;;  %vm11079_vm5 = vmor %vm830_vm3, %vm831_vm4  ;;  %vm962_vm7 = vsmask.f32 6416  ;;  %s10701_s30 = smov 16   ;;  %vm5623_vm9 = vcmask 31744   ;;  %vm253_vm10 = vcmask 64512  }
   0xe   : > { %s9763_s23 = smul.u32 228, %s16363_s22  ;;  %vm11273_vm8 = vmor %vm961_vm6, %vm962_vm7  ;;  %s10702_s7 = smov 20   ;;  %vm5704_vm11 = vcmask 97280   ;;  %vm309_vm12 = vcmask 130048   ;;  %vm5769_vm13 = vcmask 162816   ;;  %vm5802_vm14 = vcmask 195584  }
   0xf   : > { %s10703_s8 = smov 24   ;;  %s10704_s9 = smov 28   ;;  %vm5835_vm15 = vcmask 228352   ;;  %vm5868_vm0 = vcmask 261120   ;;  %vm5901_vm1 = vcmask 293888   ;;  %vm5934_vm3 = vcmask 326656  }
  0x10   : > { %s10768_s26 = scalar_lea.vmem %s15929_s0, %s9763_s23  ;;  %s10705_s10 = smov 32   ;;  %vm5967_vm4 = vcmask 359424   ;;  %vm6000_vm6 = vcmask 392192   ;;  %vm6033_vm7 = vcmask 424960  }
  0x11   : > { %v335_v0 = vld [vmem:[%s10768_s26 + $0x18] sm:$0xf]  ;;  %v10772_v1 = vld [vmem:[%s10768_s26 + $0x1c] sm:$0xf]  ;;  %v10775_v2 = vld [vmem:[%s10768_s26 + $0x20] sm:$0x1] }
  0x12   : > { %v431_v3 = vshrl.u32 %v335_v0, 16  ;;  %v434_v4 = vshll.u32 %v335_v0, 16  ;;  %v440_v5 = vshll.u32 %v10772_v1, 16  ;;  %v15960_v6 = vshrl.u32 %v10772_v1, 16  ;;  %v331_v7 = vld [vmem:[%s10768_s26] sm:$0xf] }
  0x13   : > { %v450_v8 = vshll.u32 %v10775_v2, 16  ;;  %v10782_v9 = vld [vmem:[%s10768_s26 + $0x4] sm:$0xf]  ;;  %v10785_v10 = vld [vmem:[%s10768_s26 + $0x8] sm:$0x1]  ;;  %v383_v11 = vshrl.u32 %v331_v7, 16 }
  0x14   : > { %v433_v12 = vrot.slane %v431_v3, 4  ;;  %v436_v13 = vrot.slane %v434_v4, 5  ;;  %v442_v14 = vrot.slane %v440_v5, 5  ;;  %v446_v15 = vrot.slane %v15960_v6, 4  ;;  %v337_v16 = vld [vmem:[%s10768_s26 + $0x24] sm:$0xf] }
  0x15   : > { %v452_v17 = vrot.slane %v450_v8, 5  ;;  %v10790_v18 = vrot.slane %v440_v5, 6  ;;  %v385_v19 = vrot.slane %v383_v11, 4  ;;  %v386_v20 = vshll.u32 %v331_v7, 16  ;;  %v10802_v28 = vld [vmem:[%s10768_s26 + $0x28] sm:$0xf] }
  0x16   : > { %v437_v21 = vor.u32 %v436_v13, %v433_v12  ;;  %v447_v22 = vor.u32 %v446_v15, %v442_v14  ;;  %v392_v23 = vshll.u32 %v10782_v9, 16  ;;  %v396_v24 = vshrl.u32 %v10782_v9, 16  ;;  %v10807_v35 = vld [vmem:[%s10768_s26 + $0x2c] sm:$0x1]  ;;  %v10819_v49 = vld [vmem:[%s10768_s26 + $0x10] sm:$0xf] }
  0x17   : > { %v388_v26 = vrot.slane %v386_v20, 5  ;;  %v402_v27 = vshll.u32 %v10785_v10, 16  ;;  %v455_v29 = vshrl.u32 %v337_v16, 16  ;;  %v458_v30 = vshll.u32 %v337_v16, 16  ;;  %v333_v40 = vld [vmem:[%s10768_s26 + $0xc] sm:$0xf] }
  0x18   : > { %v438_v31 = vrot.slane %v437_v21, 4  ;;  %v448_v32 = vrot.slane %v447_v22, 4  ;;  %v394_v33 = vrot.slane %v392_v23, 5  ;;  %v398_v34 = vrot.slane %v396_v24, 4  ;;  %v10823_v53 = vld [vmem:[%s10768_s26 + $0x14] sm:$0x1] }
  0x19   : > { %v389_v36 = vor.u32 %v388_v26, %v385_v19  ;;  %v404_v37 = vrot.slane %v402_v27, 5  ;;  %v10809_v38 = vrot.slane %v392_v23, 6  ;;  %v457_v39 = vrot.slane %v455_v29, 4  ;;  %v341_v59 = vld [vmem:[%s10768_s26 + $0x3c] sm:$0xf]  ;;  %s10706_s11 = smov 36  }
  0x1a   : > { %v443_v41 = vsel %vm10796_vm2, %v438_v31, %v442_v14  ;;  %v453_v42 = vsel %vm10796_vm2, %v448_v32, %v452_v17  ;;  %v399_v43 = vor.u32 %v398_v34, %v394_v33  ;;  %v460_v44 = vrot.slane %v458_v30, 5  ;;  %v10837_v7 = vld [vmem:[%s10768_s26 + $0x40] sm:$0xf]  ;;  %v10847_v17 = vld [vmem:[%s10768_s26 + $0x44] sm:$0x1]  ;;  %s10707_s12 = smov 40  }
  0x1b   : > { %v9334_v45 = vcombine.low %v443_v41, %v453_v42  ;;  %v390_v46 = vrot.slane %v389_v36, 4  ;;  %v15961_v47 = vshll.u32 %v10802_v28, 16  ;;  %v15962_v48 = vshrl.u32 %v10802_v28, 16  ;;  %v339_v26 = vld [vmem:[%s10768_s26 + $0x30] sm:$0xf]  ;;  %s10708_s13 = smov 44  }
  0x1c   : > { %v400_v50 = vrot.slane %v399_v43, 4  ;;  %v461_v51 = vor.u32 %v460_v44, %v457_v39  ;;  %v474_v52 = vshll.u32 %v10807_v35, 16  ;;  %v407_v54 = vshrl.u32 %v333_v40, 16  ;;  %v10857_v32 = vld [vmem:[%s10768_s26 + $0x34] sm:$0xf]  ;;  %s10709_s14 = smov 48  }
  0x1d   : > { %4427 = vrot.lane.b32.xlu1 %v9334_v45, %s10698_s27  ;;  %v395_v55 = vsel %vm10796_vm2, %v390_v46, %v394_v33  ;;  %v466_v56 = vrot.slane %v15961_v47, 5  ;;  %v470_v57 = vrot.slane %v15962_v48, 4  ;;  %v410_v58 = vshll.u32 %v333_v40, 16  ;;  %v10867_v42 = vld [vmem:[%s10768_s26 + $0x38] sm:$0x1]  ;;  %s10710_s15 = smov 52  }
  0x1e   : > { %v405_v60 = vsel %vm10796_vm2, %v400_v50, %v404_v37  ;;  %v462_v61 = vrot.slane %v461_v51, 4  ;;  %v476_v62 = vrot.slane %v474_v52, 5  ;;  %v409_v63 = vrot.slane %v407_v54, 4  ;;  %v11219_v48 = vld [vmem:[%s10768_s26 + $0xa8] sm:$0xe]  ;;  %s10711_s16 = smov 56  }
  0x1f   : > { %v9332_v0 = vcombine.low %v395_v55, %v405_v60  ;;  %v471_v3 = vor.u32 %v470_v57, %v466_v56  ;;  %v412_v4 = vrot.slane %v410_v58, 5  ;;  %v416_v5 = vshll.u32 %v10819_v49, 16  ;;  %s10712_s17 = smov 60   ;;  %s10717_s19 = smov 96  }
  0x20   : > { %v467_v8 = vsel %vm10796_vm2, %v462_v61, %v466_v56  ;;  %v420_v11 = vshrl.u32 %v10819_v49, 16  ;;  %v426_v12 = vshll.u32 %v10823_v53, 16  ;;  %v503_v13 = vshrl.u32 %v341_v59, 16  ;;  %v345_v56 = vld [vmem:[%s10768_s26 + $0x54] sm:$0xf]  ;;  %s10718_s20 = smov 112  }
  0x21   : > { %4423 = vrot.lane.b32.xlu0 %v9332_v0, %s10698_s27  ;;  %v472_v14 = vrot.slane %v471_v3, 4  ;;  %v413_v15 = vor.u32 %v412_v4, %v409_v63  ;;  %v418_v16 = vrot.slane %v416_v5, 5  ;;  %v506_v19 = vshll.u32 %v341_v59, 16  ;;  %v10879_v61 = vld [vmem:[%s10768_s26 + $0x58] sm:$0xf] }
  0x22   : > { %v422_v20 = vrot.slane %v420_v11, 4  ;;  %v428_v21 = vrot.slane %v426_v12, 5  ;;  %v505_v22 = vrot.slane %v503_v13, 4  ;;  %v15956_v23 = vshll.u32 %v10837_v7, 16  ;;  %v10886_v12 = vld [vmem:[%s10768_s26 + $0x5c] sm:$0x1] }
  0x23   : > { %v477_v27 = vsel %vm10796_vm2, %v472_v14, %v476_v62  ;;  %v414_v29 = vrot.slane %v413_v15, 4  ;;  %v508_v30 = vrot.slane %v506_v19, 5  ;;  %v15957_v31 = vshrl.u32 %v10837_v7, 16 }
  0x24   : > { %v9335_v33 = vcombine.low %v467_v8, %v477_v27  ;;  %v423_v34 = vor.u32 %v422_v20, %v418_v16  ;;  %v514_v36 = vrot.slane %v15956_v23, 5  ;;  %v522_v37 = vshll.u32 %v10847_v17, 16 }
  0x25   : > { %v419_v39 = vsel %vm10796_vm2, %v414_v29, %v418_v16  ;;  %v509_v40 = vor.u32 %v508_v30, %v505_v22  ;;  %v518_v41 = vrot.slane %v15957_v31, 4  ;;  %v479_v43 = vshrl.u32 %v339_v26, 16  ;;  %v10895_v30 = vld [vmem:[%s10768_s26 + $0x4c] sm:$0xf] }
  0x26   : > { %4429 = vrot.lane.b32.xlu1 %v9335_v33, %s10698_s27  ;;  %v424_v44 = vrot.slane %v423_v34, 4  ;;  %v524_v45 = vrot.slane %v522_v37, 5  ;;  %v482_v46 = vshll.u32 %v339_v26, 16  ;;  %v15951_v50 = vshll.u32 %v10857_v32, 16 }
  0x27   : > { %v510_v51 = vrot.slane %v509_v40, 4  ;;  %v519_v52 = vor.u32 %v518_v41, %v514_v36  ;;  %v481_v54 = vrot.slane %v479_v43, 4  ;;  %v15952_v55 = vshrl.u32 %v10857_v32, 16  ;;  %v10906_v41 = vld [vmem:[%s10768_s26 + $0x50] sm:$0x1] }
  0x28   : > { %v429_v57 = vsel %vm10796_vm2, %v424_v44, %v428_v21  ;;  %v484_v58 = vrot.slane %v482_v46, 5  ;;  %v490_v59 = vrot.slane %v15951_v50, 5  ;;  %v498_v60 = vshll.u32 %v10867_v42, 16  ;;  %v343_v21 = vld [vmem:[%s10768_s26 + $0x48] sm:$0xf] }
  0x29   : > { %v9333_v62 = vcombine.low %v419_v39, %v429_v57  ;;  %v515_v63 = vsel %vm10796_vm2, %v510_v51, %v514_v36  ;;  %v520_v0 = vrot.slane %v519_v52, 4  ;;  %v494_v3 = vrot.slane %v15952_v55, 4 }
  0x2a   : > { %v485_v4 = vor.u32 %v484_v58, %v481_v54  ;;  %v500_v8 = vrot.slane %v498_v60, 5  ;;  %v551_v13 = vshrl.u32 %v345_v56, 16  ;;  %v554_v14 = vshll.u32 %v345_v56, 16  ;;  %v349_v54 = vld [vmem:[%s10768_s26 + $0x6c] sm:$0xf] }
  0x2b   : > { %4425 = vrot.lane.b32.xlu0 %v9333_v62, %s10698_s27  ;;  %v525_v15 = vsel %vm10796_vm2, %v520_v0, %v524_v45  ;;  %v495_v16 = vor.u32 %v494_v3, %v490_v59  ;;  %v15949_v19 = vshll.u32 %v10879_v61, 16  ;;  %v15950_v20 = vshrl.u32 %v10879_v61, 16 }
  0x2c   : > { %v9337_v22 = vcombine.low %v515_v63, %v525_v15  ;;  %v486_v26 = vrot.slane %v485_v4, 4  ;;  %v553_v27 = vrot.slane %v551_v13, 4  ;;  %v556_v29 = vrot.slane %v554_v14, 5  ;;  %v10923_v13 = vld [vmem:[%s10768_s26 + $0x74] sm:$0x1] }
  0x2d   : > { %v496_v33 = vrot.slane %v495_v16, 4  ;;  %v562_v34 = vrot.slane %v15949_v19, 5  ;;  %v566_v36 = vrot.slane %v15950_v20, 4  ;;  %v570_v37 = vshll.u32 %v10886_v12, 16 }
  0x2e   : > { %4433 = vrot.lane.b32.xlu1 %v9337_v22, %s10698_s27  ;;  %v491_v39 = vsel %vm10796_vm2, %v486_v26, %v490_v59  ;;  %v557_v40 = vor.u32 %v556_v29, %v553_v27  ;;  %v527_v43 = vshrl.u32 %v343_v21, 16  ;;  %v530_v44 = vshll.u32 %v343_v21, 16  ;;  %v10913_v59 = vld [vmem:[%s10768_s26 + $0x70] sm:$0xf]  ;;  %v347_v27 = vld [vmem:[%s10768_s26 + $0x60] sm:$0xf] }
  0x2f   : > { %v501_v45 = vsel %vm10796_vm2, %v496_v33, %v500_v8  ;;  %v567_v46 = vor.u32 %v566_v36, %v562_v34  ;;  %v572_v51 = vrot.slane %v570_v37, 5  ;;  %v15944_v52 = vshll.u32 %v10895_v30, 16  ;;  %v10932_v37 = vld [vmem:[%s10768_s26 + $0x64] sm:$0xf] }
  0x30   : > { %v9336_v56 = vcombine.low %v491_v39, %v501_v45  ;;  %v558_v57 = vrot.slane %v557_v40, 4  ;;  %v529_v58 = vrot.slane %v527_v43, 4  ;;  %v532_v60 = vrot.slane %v530_v44, 5 }
  0x31   : > { %v568_v62 = vrot.slane %v567_v46, 4  ;;  %v538_v63 = vrot.slane %v15944_v52, 5  ;;  %v15945_v0 = vshrl.u32 %v10895_v30, 16  ;;  %v546_v3 = vshll.u32 %v10906_v41, 16 }
  0x32   : > { %4431 = vrot.lane.b32.xlu0 %v9336_v56, %s10698_s27  ;;  %v563_v4 = vsel %vm10796_vm2, %v558_v57, %v562_v34  ;;  %v533_v8 = vor.u32 %v532_v60, %v529_v58  ;;  %v599_v14 = vshrl.u32 %v349_v54, 16  ;;  %v602_v15 = vshll.u32 %v349_v54, 16 }
  0x33   : > { %v573_v16 = vsel %vm10796_vm2, %v568_v62, %v572_v51  ;;  %v542_v21 = vrot.slane %v15945_v0, 4  ;;  %v548_v22 = vrot.slane %v546_v3, 5  ;;  %v15940_v26 = vshll.u32 %v10913_v59, 16  ;;  %v10942_v51 = vld [vmem:[%s10768_s26 + $0x68] sm:$0x1] }
  0x34   : > { %v9339_v29 = vcombine.low %v563_v4, %v573_v16  ;;  %v534_v33 = vrot.slane %v533_v8, 4  ;;  %v601_v36 = vrot.slane %v599_v14, 4  ;;  %v604_v34 = vrot.slane %v602_v15, 5 }
  0x35   : > { %v543_v39 = vor.u32 %v542_v21, %v538_v63  ;;  %v610_v40 = vrot.slane %v15940_v26, 5  ;;  %v15942_v43 = vshrl.u32 %v10913_v59, 16  ;;  %v618_v44 = vshll.u32 %v10923_v13, 16  ;;  %v11001_v26 = vld [vmem:[%s10768_s26 + $0xa4] sm:$0x1] }
  0x36   : > { %4437 = vrot.lane.b32.xlu1 %v9339_v29, %s10698_s27  ;;  %v539_v45 = vsel %vm10796_vm2, %v534_v33, %v538_v63  ;;  %v605_v46 = vor.u32 %v604_v34, %v601_v36  ;;  %v575_v54 = vshrl.u32 %v347_v27, 16  ;;  %v578_v56 = vshll.u32 %v347_v27, 16  ;;  %v353_v63 = vld [vmem:[%s10768_s26 + $0x84] sm:$0xf]  ;;  %v10955_v29 = vld [vmem:[%s10768_s26 + $0x88] sm:$0xf] }
  0x37   : > { %v544_v57 = vrot.slane %v543_v39, 4  ;;  %v614_v58 = vrot.slane %v15942_v43, 4  ;;  %v620_v60 = vrot.slane %v618_v44, 5  ;;  %v15936_v62 = vshll.u32 %v10932_v37, 16  ;;  %v10962_v44 = vld [vmem:[%s10768_s26 + $0x8c] sm:$0x1] }
  0x38   : > { %v606_v3 = vrot.slane %v605_v46, 4  ;;  %v577_v4 = vrot.slane %v575_v54, 4  ;;  %v580_v8 = vrot.slane %v578_v56, 5  ;;  %v15939_v14 = vshrl.u32 %v10932_v37, 16  ;;  %v355_v43 = vld [vmem:[%s10768_s26 + $0x90] sm:$0xf] }
  0x39   : > { %v549_v15 = vsel %vm10796_vm2, %v544_v57, %v548_v22  ;;  %v615_v16 = vor.u32 %v614_v58, %v610_v40  ;;  %v586_v21 = vrot.slane %v15936_v62, 5  ;;  %v594_v27 = vshll.u32 %v10942_v51, 16 }
  0x3a   : > { %v9338_v33 = vcombine.low %v539_v45, %v549_v15  ;;  %v611_v36 = vsel %vm10796_vm2, %v606_v3, %v610_v40  ;;  %v581_v34 = vor.u32 %v580_v8, %v577_v4  ;;  %v590_v39 = vrot.slane %v15939_v14, 4  ;;  %v351_v3 = vld [vmem:[%s10768_s26 + $0x78] sm:$0xf] }
  0x3b   : > { %v616_v22 = vrot.slane %v615_v16, 4  ;;  %v596_v46 = vrot.slane %v594_v27, 5  ;;  %v647_v54 = vshrl.u32 %v353_v63, 16  ;;  %v650_v56 = vshll.u32 %v353_v63, 16  ;;  %v10972_v27 = vld [vmem:[%s10768_s26 + $0x7c] sm:$0xf] }
  0x3c   : > { %4435 = vrot.lane.b32.xlu0 %v9338_v33, %s10698_s27  ;;  %v582_v57 = vrot.slane %v581_v34, 4  ;;  %v591_v58 = vor.u32 %v590_v39, %v586_v21  ;;  %v15937_v45 = vshll.u32 %v10955_v29, 16  ;;  %v15938_v40 = vshrl.u32 %v10955_v29, 16 }
  0x3d   : > { %v621_v4 = vsel %vm10796_vm2, %v616_v22, %v620_v60  ;;  %v649_v8 = vrot.slane %v647_v54, 4  ;;  %v652_v15 = vrot.slane %v650_v56, 5  ;;  %v666_v16 = vshll.u32 %v10962_v44, 16  ;;  %v10981_v54 = vld [vmem:[%s10768_s26 + $0x80] sm:$0x1] }
  0x3e   : > { %v9341_v63 = vcombine.low %v611_v36, %v621_v4  ;;  %v587_v33 = vsel %vm10796_vm2, %v582_v57, %v586_v21  ;;  %v592_v34 = vrot.slane %v591_v58, 4  ;;  %v658_v39 = vrot.slane %v15937_v45, 5  ;;  %v357_v58 = vld [vmem:[%s10768_s26 + $0x9c] sm:$0xf] }
  0x3f   : > { %v653_v62 = vor.u32 %v652_v15, %v649_v8  ;;  %v662_v60 = vrot.slane %v15938_v40, 4  ;;  %v668_v22 = vrot.slane %v666_v16, 5  ;;  %v623_v56 = vshrl.u32 %v351_v3, 16  ;;  %v10990_v16 = vld [vmem:[%s10768_s26 + $0xa0] sm:$0xf] }
  0x40   : > { %4441 = vrot.lane.b32.xlu1 %v9341_v63, %s10698_s27  ;;  %v597_v36 = vsel %vm10796_vm2, %v592_v34, %v596_v46  ;;  %v626_v4 = vshll.u32 %v351_v3, 16  ;;  %v15941_v21 = vshll.u32 %v10972_v27, 16  ;;  %v15943_v57 = vshrl.u32 %v10972_v27, 16 }
  0x41   : > { %v9340_v45 = vcombine.low %v587_v33, %v597_v36  ;;  %v654_v8 = vrot.slane %v653_v62, 4  ;;  %v663_v15 = vor.u32 %v662_v60, %v658_v39  ;;  %v625_v40 = vrot.slane %v623_v56, 4 }
  0x42   : > { %v628_v14 = vrot.slane %v626_v4, 5  ;;  %v634_v63 = vrot.slane %v15941_v21, 5  ;;  %v638_v46 = vrot.slane %v15943_v57, 4  ;;  %v642_v3 = vshll.u32 %v10981_v54, 16 }
  0x43   : > { %4439 = vrot.lane.b32.xlu0 %v9340_v45, %s10698_s27  ;;  %v659_v62 = vsel %vm10796_vm2, %v654_v8, %v658_v39  ;;  %v664_v33 = vrot.slane %v663_v15, 4  ;;  %v695_v34 = vshrl.u32 %v357_v58, 16  ;;  %v698_v60 = vshll.u32 %v357_v58, 16  ;;  %v11009_v39 = vld [vmem:[%s10768_s26 + $0x94] sm:$0xf] }
  0x44   : > { %v629_v56 = vor.u32 %v628_v14, %v625_v40  ;;  %v639_v36 = vor.u32 %v638_v46, %v634_v63  ;;  %v644_v4 = vrot.slane %v642_v3, 5  ;;  %v15946_v21 = vshll.u32 %v10990_v16, 16 }
  0x45   : > { %v669_v57 = vsel %vm10796_vm2, %v664_v33, %v668_v22  ;;  %v697_v52 = vrot.slane %v695_v34, 4  ;;  %v700_v45 = vrot.slane %v698_v60, 5  ;;  %v15947_v0 = vshrl.u32 %v10990_v16, 16 }
  0x46   : > { %v9343_v58 = vcombine.low %v659_v62, %v669_v57  ;;  %v630_v14 = vrot.slane %v629_v56, 4  ;;  %v640_v40 = vrot.slane %v639_v36, 4  ;;  %v706_v8 = vrot.slane %v15946_v21, 5  ;;  %v11022_v62 = vld [vmem:[%s10768_s26 + $0x98] sm:$0x1] }
  0x47   : > { %v701_v15 = vor.u32 %v700_v45, %v697_v52  ;;  %v710_v46 = vrot.slane %v15947_v0, 4  ;;  %v714_v22 = vshll.u32 %v11001_v26, 16  ;;  %v671_v3 = vshrl.u32 %v355_v43, 16  ;;  %v361_v52 = vld [vmem:[%s10768_s26 + $0xb4] sm:$0xf] }
  0x48   : > { %4445 = vrot.lane.b32.xlu1 %v9343_v58, %s10698_s27  ;;  %v635_v33 = vsel %vm10796_vm2, %v630_v14, %v634_v63  ;;  %v645_v57 = vsel %vm10796_vm2, %v640_v40, %v644_v4  ;;  %v674_v34 = vshll.u32 %v355_v43, 16  ;;  %v15948_v60 = vshll.u32 %v11009_v39, 16  ;;  %v11027_v0 = vld [vmem:[%s10768_s26 + $0xb8] sm:$0xf] }
  0x49   : > { %v9342_v56 = vcombine.low %v635_v33, %v645_v57  ;;  %v702_v36 = vrot.slane %v701_v15, 4  ;;  %v711_v45 = vor.u32 %v710_v46, %v706_v8  ;;  %v716_v21 = vrot.slane %v714_v22, 5  ;;  %v11037_v46 = vld [vmem:[%s10768_s26 + $0xbc] sm:$0x1] }
  0x4a   : > { %v673_v63 = vrot.slane %v671_v3, 4  ;;  %v676_v58 = vrot.slane %v674_v34, 5  ;;  %v682_v4 = vrot.slane %v15948_v60, 5  ;;  %v15954_v43 = vshrl.u32 %v11009_v39, 16  ;;  %v359_v60 = vld [vmem:[%s10768_s26 + $0xa8] sm:$0xf] }
  0x4b   : > { %4443 = vrot.lane.b32.xlu0 %v9342_v56, %s10698_s27  ;;  %v707_v14 = vsel %vm10796_vm2, %v702_v36, %v706_v8  ;;  %v712_v40 = vrot.slane %v711_v45, 4  ;;  %v690_v15 = vshll.u32 %v11022_v62, 16  ;;  %v743_v22 = vshrl.u32 %v361_v52, 16 }
  0x4c   : > { %v677_v33 = vor.u32 %v676_v58, %v673_v63  ;;  %v686_v3 = vrot.slane %v15954_v43, 4  ;;  %v746_v57 = vshll.u32 %v361_v52, 16  ;;  %v15953_v34 = vshll.u32 %v11027_v0, 16  ;;  %v11047_v63 = vld [vmem:[%s10768_s26 + $0xac] sm:$0xf] }
  0x4d   : > { %v717_v56 = vsel %vm10796_vm2, %v712_v40, %v716_v21  ;;  %v692_v19 = vrot.slane %v690_v15, 5  ;;  %v745_v8 = vrot.slane %v743_v22, 4  ;;  %v15955_v36 = vshrl.u32 %v11027_v0, 16 }
  0x4e   : > { %v9345_v45 = vcombine.low %v707_v14, %v717_v56  ;;  %v678_v20 = vrot.slane %v677_v33, 4  ;;  %v687_v50 = vor.u32 %v686_v3, %v682_v4  ;;  %v748_v55 = vrot.slane %v746_v57, 5  ;;  %v11058_v33 = vld [vmem:[%s10768_s26 + $0xb0] sm:$0x1] }
  0x4f   : > { %v754_v52 = vrot.slane %v15953_v34, 5  ;;  %v758_v58 = vrot.slane %v15955_v36, 4  ;;  %v762_v21 = vshll.u32 %v11037_v46, 16  ;;  %v719_v40 = vshrl.u32 %v359_v60, 16  ;;  %v11062_v36 = vld [vmem:[%s10768_s26 + $0xc] sm:$0xe] }
  0x50   : > { %4449 = vrot.lane.b32.xlu1 %v9345_v45, %s10698_s27  ;;  %v683_v14 = vsel %vm10796_vm2, %v678_v20, %v682_v4  ;;  %v688_v15 = vrot.slane %v687_v50, 4  ;;  %v749_v22 = vor.u32 %v748_v55, %v745_v8  ;;  %v722_v3 = vshll.u32 %v359_v60, 16  ;;  %v11071_v8 = vld [vmem:[%s10768_s26] sm:$0xe] }
  0x51   : > { %v759_v57 = vor.u32 %v758_v58, %v754_v52  ;;  %v764_v56 = vrot.slane %v762_v21, 5  ;;  %v721_v34 = vrot.slane %v719_v40, 4  ;;  %v15958_v43 = vshll.u32 %v11047_v63, 16 }
  0x52   : > { %v693_v23 = vsel %vm10796_vm2, %v688_v15, %v692_v19  ;;  %v750_v45 = vrot.slane %v749_v22, 4  ;;  %v724_v31 = vrot.slane %v722_v3, 5  ;;  %v15959_v20 = vshrl.u32 %v11047_v63, 16 }
  0x53   : > { %v9344_v50 = vcombine.low %v683_v14, %v693_v23  ;;  %v760_v55 = vrot.slane %v759_v57, 4  ;;  %v730_v60 = vrot.slane %v15958_v43, 5  ;;  %v738_v4 = vshll.u32 %v11058_v33, 16 }
  0x54   : > { %v755_v58 = vsel %vm10796_vm2, %v750_v45, %v754_v52  ;;  %v725_v21 = vor.u32 %v724_v31, %v721_v34  ;;  %v734_v19 = vrot.slane %v15959_v20, 4  ;;  %v16034_v40 = vmov 0  ;;  %v11090_v34 = vld [vmem:[%s10768_s26 + $0x24] sm:$0xe] }
  0x55   : > { %v16035_v40 = vsel %vm11079_vm5, 4294967295, %v16034_v40  ;;  %v9013_v23 = vrot.slane %v11062_v36, 9  ;;  %4447 = vrot.lane.b32.xlu0 %v9344_v50, %s10698_s27  ;;  %v765_v14 = vsel %vm10796_vm2, %v760_v55, %v764_v56  ;;  %v740_v15 = vrot.slane %v738_v4, 5 }
  0x56   : > { %16036 = vst [vmem:[#allocation6_spill] sm:$0xff] %v16035_v40  ;;  %v842_v52 = vrot.slane %v10819_v49, 5  ;;  %v845_v31 = vrot.slane %v10823_v53, 5  ;;  %v9347_v22 = vcombine.low %v755_v58, %v765_v14  ;;  %v726_v3 = vrot.slane %v725_v21, 4  ;;  %v11668_v40 = vld [vmem:[%s10768_s26 + $0x88] sm:$0xf] }
  0x57   : > { %v735_v57 = vor.u32 %v734_v19, %v730_v60  ;;  %v9012_v45 = vrot.slane %v11071_v8, 9  ;;  %v835_v56 = vrot.slane %v10782_v9, 5  ;;  %v838_v55 = vrot.slane %v10785_v10, 5  ;;  %v11103_v19 = vld [vmem:[%s10768_s26 + $0x18] sm:$0xe]  ;;  %16085 = vst [vmem:[#allocation25_spill] sm:$0xff] %v11668_v40 }
  0x58   : > { %v843_v50 = vsel %vm11079_vm5, %v9013_v23, %v842_v52  ;;  %v844_v43 = vrot.slane %v842_v52, 4  ;;  %4453 = vrot.lane.b32.xlu1 %v9347_v22, %s10698_s27  ;;  %v731_v53 = vsel %vm10796_vm2, %v726_v3, %v730_v60  ;;  %v9015_v58 = vrot.slane %v11090_v34, 9  ;;  %v11111_v22 = vld [vmem:[%s10768_s26 + $0x3c] sm:$0xe] }
  0x59   : > { %v736_v4 = vrot.slane %v735_v57, 4  ;;  %v856_v21 = vrot.slane %v10802_v28, 5  ;;  %v836_v14 = vsel %vm11079_vm5, %v9012_v45, %v835_v56  ;;  %v837_v10 = vrot.slane %v835_v56, 4 }
  0x5a   : > { %v846_v23 = vsel %vm11079_vm5, %v844_v43, %v845_v31  ;;  %v859_v52 = vrot.slane %v10807_v35, 5  ;;  %v9014_v31 = vrot.slane %v11103_v19, 9  ;;  %v849_v45 = vrot.slane %v10772_v1, 5  ;;  %v11122_v35 = vld [vmem:[%s10768_s26 + $0x30] sm:$0xe] }
  0x5b   : > { %v741_v60 = vsel %vm10796_vm2, %v736_v4, %v740_v15  ;;  %v9349_v3 = vcombine.low %v843_v50, %v846_v23  ;;  %v857_v57 = vsel %vm11079_vm5, %v9015_v58, %v856_v21  ;;  %v858_v20 = vrot.slane %v856_v21, 4  ;;  %v11130_v4 = vld [vmem:[%s10768_s26 + $0x54] sm:$0xe] }
  0x5c   : > { %v9346_v6 = vcombine.low %v731_v53, %v741_v60  ;;  %v839_v43 = vsel %vm11079_vm5, %v837_v10, %v838_v55  ;;  %v852_v56 = vrot.slane %v10775_v2, 5  ;;  %v9017_v53 = vrot.slane %v11111_v22, 9 }
  0x5d   : > { %4505 = vrot.lane.b32.xlu1 %v9349_v3, %s10699_s28  ;;  %v9348_v15 = vcombine.low %v836_v14, %v839_v43  ;;  %v860_v50 = vsel %vm11079_vm5, %v858_v20, %v859_v52  ;;  %v850_v58 = vsel %vm11079_vm5, %v9014_v31, %v849_v45  ;;  %v851_v21 = vrot.slane %v849_v45, 4  ;;  %v11141_v52 = vld [vmem:[%s10768_s26 + $0x48] sm:$0xe] }
  0x5e   : > { %4451 = vrot.lane.b32.xlu0 %v9346_v6, %s10698_s27  ;;  %v9351_v55 = vcombine.low %v857_v57, %v860_v50  ;;  %v870_v23 = vrot.slane %v10837_v7, 5  ;;  %v873_v14 = vrot.slane %v10847_v17, 5  ;;  %v9016_v10 = vrot.slane %v11122_v35, 9 }
  0x5f   : > { %v863_v20 = vrot.slane %v10857_v32, 5  ;;  %v866_v2 = vrot.slane %v10867_v42, 5  ;;  %v853_v6 = vsel %vm11079_vm5, %v851_v21, %v852_v56  ;;  %v9019_v57 = vrot.slane %v11130_v4, 9 }
  0x60   : > { %v871_v60 = vsel %vm11079_vm5, %v9017_v53, %v870_v23  ;;  %v872_v3 = vrot.slane %v870_v23, 4  ;;  %v9350_v17 = vcombine.low %v850_v58, %v853_v6  ;;  %v884_v31 = vrot.slane %v10879_v61, 5 }
  0x61   : > { %4509 = vrot.lane.b32.xlu1 %v9351_v55, %s10699_s28  ;;  %v864_v43 = vsel %vm11079_vm5, %v9016_v10, %v863_v20  ;;  %v865_v42 = vrot.slane %v863_v20, 4  ;;  %v887_v50 = vrot.slane %v10886_v12, 5  ;;  %v9018_v56 = vrot.slane %v11141_v52, 9  ;;  %v11159_v55 = vld [vmem:[%s10768_s26 + $0x6c] sm:$0xe] }
  0x62   : > { %4503 = vrot.lane.b32.xlu0 %v9348_v15, %s10699_s28  ;;  %v874_v45 = vsel %vm11079_vm5, %v872_v3, %v873_v14  ;;  %v877_v53 = vrot.slane %v10895_v30, 5  ;;  %v885_v23 = vsel %vm11079_vm5, %v9019_v57, %v884_v31  ;;  %v886_v15 = vrot.slane %v884_v31, 4  ;;  %v11166_v10 = vld [vmem:[%s10768_s26 + $0x60] sm:$0xe]  ;;  %v11172_v3 = vld [vmem:[%s10768_s26 + $0x84] sm:$0xe] }
  0x63   : > { %v9353_v58 = vcombine.low %v871_v60, %v874_v45  ;;  %v867_v21 = vsel %vm11079_vm5, %v865_v42, %v866_v2  ;;  %v880_v6 = vrot.slane %v10906_v41, 5  ;;  %v11175_v60 = vld [vmem:[%s10768_s26 + $0x78] sm:$0xe]  ;;  %v9021_v57 = vrot.slane %v11159_v55, 9 }
  0x64   : > { %v9352_v20 = vcombine.low %v864_v43, %v867_v21  ;;  %v878_v12 = vsel %vm11079_vm5, %v9018_v56, %v877_v53  ;;  %v879_v14 = vrot.slane %v877_v53, 4  ;;  %v888_v2 = vsel %vm11079_vm5, %v886_v15, %v887_v50  ;;  %v11192_v15 = vld [vmem:[%s10768_s26 + $0x9c] sm:$0xe] }
  0x65   : > { %4513 = vrot.lane.b32.xlu1 %v9353_v58, %s10699_s28  ;;  %v898_v43 = vrot.slane %v10913_v59, 5  ;;  %v901_v42 = vrot.slane %v10923_v13, 5  ;;  %v9355_v41 = vcombine.low %v885_v23, %v888_v2  ;;  %v9020_v45 = vrot.slane %v11166_v10, 9 }
  0x66   : > { %4507 = vrot.lane.b32.xlu0 %v9350_v17, %s10699_s28  ;;  %v881_v31 = vsel %vm11079_vm5, %v879_v14, %v880_v6  ;;  %v891_v56 = vrot.slane %v10932_v37, 5  ;;  %v894_v21 = vrot.slane %v10942_v51, 5  ;;  %v9023_v23 = vrot.slane %v11172_v3, 9  ;;  %v11199_v6 = vld [vmem:[%s10768_s26 + $0x90] sm:$0xe] }
  0x67   : > { %v9354_v53 = vcombine.low %v878_v12, %v881_v31  ;;  %v899_v50 = vsel %vm11079_vm5, %v9021_v57, %v898_v43  ;;  %v900_v58 = vrot.slane %v898_v43, 4  ;;  %v912_v14 = vrot.slane %v10955_v29, 5 }
  0x68   : > { %v892_v13 = vsel %vm11079_vm5, %v9020_v45, %v891_v56  ;;  %v893_v17 = vrot.slane %v891_v56, 4  ;;  %v915_v51 = vrot.slane %v10962_v44, 5  ;;  %v9022_v2 = vrot.slane %v11175_v60, 9 }
  0x69   : > { %4517 = vrot.lane.b32.xlu1 %v9355_v41, %s10699_s28  ;;  %v902_v12 = vsel %vm11079_vm5, %v900_v58, %v901_v42  ;;  %v905_v57 = vrot.slane %v10972_v27, 5  ;;  %v913_v45 = vsel %vm11079_vm5, %v9023_v23, %v912_v14  ;;  %v914_v56 = vrot.slane %v912_v14, 4  ;;  %v11213_v41 = vld [vmem:[%s10768_s26 + $0xb4] sm:$0xe] }
  0x6a   : > { %4511 = vrot.lane.b32.xlu0 %v9352_v20, %s10699_s28  ;;  %v9357_v43 = vcombine.low %v899_v50, %v902_v12  ;;  %v895_v31 = vsel %vm11079_vm5, %v893_v17, %v894_v21  ;;  %v908_v58 = vrot.slane %v10981_v54, 5  ;;  %v9025_v50 = vrot.slane %v11192_v15, 9 }
  0x6b   : > { %v9356_v47 = vcombine.low %v892_v13, %v895_v31  ;;  %v906_v44 = vsel %vm11079_vm5, %v9022_v2, %v905_v57  ;;  %v907_v42 = vrot.slane %v905_v57, 4  ;;  %v916_v20 = vsel %vm11079_vm5, %v914_v56, %v915_v51  ;;  %v946_v56 = vld [vmem:[%s10768_s26 + $0x14] sm:$0x3] }
  0x6c   : > { %v926_v21 = vrot.slane %v10990_v16, 5  ;;  %v929_v17 = vrot.slane %v11001_v26, 5  ;;  %v9359_v13 = vcombine.low %v913_v45, %v916_v20  ;;  %v9024_v54 = vrot.slane %v11199_v6, 9 }
  0x6d   : > { %4521 = vrot.lane.b32.xlu1 %v9357_v43, %s10699_s28  ;;  %v909_v23 = vsel %vm11079_vm5, %v907_v42, %v908_v58  ;;  %v919_v14 = vrot.slane %v11009_v39, 5  ;;  %v922_v2 = vrot.slane %v11022_v62, 5  ;;  %v9027_v31 = vrot.slane %v11213_v41, 9 }
  0x6e   : > { %4515 = vrot.lane.b32.xlu0 %v9354_v53, %s10699_s28  ;;  %v9358_v12 = vcombine.low %v906_v44, %v909_v23  ;;  %v927_v51 = vsel %vm11079_vm5, %v9025_v50, %v926_v21  ;;  %v928_v26 = vrot.slane %v926_v21, 4  ;;  %v940_v45 = vrot.slane %v11027_v0, 5 }
  0x6f   : > { %v920_v57 = vsel %vm11079_vm5, %v9024_v54, %v919_v14  ;;  %v921_v43 = vrot.slane %v919_v14, 4  ;;  %v943_v44 = vrot.slane %v11037_v46, 5  ;;  %v9026_v42 = vrot.slane %v11219_v48, 9  ;;  %v945_v14 = vld [vmem:[%s10768_s26 + $0x8] sm:$0x3] }
  0x70   : > { %v930_v53 = vsel %vm11079_vm5, %v928_v26, %v929_v17  ;;  %v933_v58 = vrot.slane %v11047_v63, 5  ;;  %v941_v50 = vsel %vm11079_vm5, %v9027_v31, %v940_v45  ;;  %v942_v21 = vrot.slane %v940_v45, 4 }
  0x71   : > { %4525 = vrot.lane.b32.xlu1 %v9359_v13, %s10699_s28  ;;  %v9361_v62 = vcombine.low %v927_v51, %v930_v53  ;;  %v923_v20 = vsel %vm11079_vm5, %v921_v43, %v922_v2  ;;  %v936_v54 = vrot.slane %v11058_v33, 5  ;;  %v988_v51 = vshrl.u32 %v11062_v36, 16 }
  0x72   : > { %4519 = vrot.lane.b32.xlu0 %v9356_v47, %s10699_s28  ;;  %v9360_v23 = vcombine.low %v920_v57, %v923_v20  ;;  %v934_v46 = vsel %vm11079_vm5, %v9026_v42, %v933_v58  ;;  %v935_v17 = vrot.slane %v933_v58, 4  ;;  %v944_v13 = vsel %vm11079_vm5, %v942_v21, %v943_v44 }
  0x73   : > { %v991_v26 = vshll.u32 %v11062_v36, 16  ;;  %v996_v2 = vrot.slane %v420_v11, 5  ;;  %v9363_v43 = vcombine.low %v941_v50, %v944_v13  ;;  %v997_v57 = vrot.slane %v416_v5, 6 }
  0x74   : > { %v937_v47 = vsel %vm11079_vm5, %v935_v17, %v936_v54  ;;  %v1002_v31 = vshrl.u32 %v946_v56, 16  ;;  %v990_v45 = vrot.slane %v988_v51, 5  ;;  %v1005_v44 = vshll.u32 %v946_v56, 16  ;;  %v948_v51 = vld [vmem:[%s10768_s26 + $0x2c] sm:$0x3] }
  0x75   : > { %4529 = vrot.lane.b32.xlu1 %v9361_v62, %s10699_s28  ;;  %v9362_v33 = vcombine.low %v934_v46, %v937_v47  ;;  %v993_v53 = vrot.slane %v991_v26, 6  ;;  %v998_v36 = vor.u32 %v997_v57, %v996_v2  ;;  %v965_v11 = vshrl.u32 %v11071_v8, 16 }
  0x76   : > { %4523 = vrot.lane.b32.xlu0 %v9358_v12, %s10699_s28  ;;  %v1004_v42 = vrot.slane %v1002_v31, 5  ;;  %v968_v58 = vshll.u32 %v11071_v8, 16  ;;  %v1007_v50 = vrot.slane %v1005_v44, 6  ;;  %v973_v49 = vrot.slane %v396_v24, 5 }
  0x77   : > { %v994_v20 = vor.u32 %v993_v53, %v990_v45  ;;  %v979_v5 = vshrl.u32 %v945_v14, 16  ;;  %v16037_v62 = vmov 0  ;;  %v1000_v12 = vrot.slane %v998_v36, 4 }
  0x78   : > { %v16038_v62 = vsel %vm11273_vm8, 4294967295, %v16037_v62  ;;  %v967_v56 = vrot.slane %v965_v11, 5  ;;  %v970_v21 = vrot.slane %v968_v58, 6  ;;  %v982_v46 = vshll.u32 %v945_v14, 16 }
  0x79   : > { %16039 = vst [vmem:[#allocation7_spill] sm:$0xff] %v16038_v62  ;;  %4533 = vrot.lane.b32.xlu1 %v9363_v43, %s10699_s28  ;;  %v995_v8 = vrot.slane %v994_v20, 4  ;;  %v1008_v17 = vor.u32 %v1007_v50, %v1004_v42  ;;  %v975_v54 = vor.u32 %v10809_v38, %v973_v49  ;;  %v981_v9 = vrot.slane %v979_v5, 5  ;;  %v947_v50 = vld [vmem:[%s10768_s26 + $0x20] sm:$0x3] }
  0x7a   : > { %4527 = vrot.lane.b32.xlu0 %v9360_v23, %s10699_s28  ;;  %v971_v24 = vor.u32 %v970_v21, %v967_v56  ;;  %v984_v13 = vrot.slane %v982_v46, 6  ;;  %v1034_v26 = vshrl.u32 %v11090_v34, 16  ;;  %v1037_v2 = vshll.u32 %v11090_v34, 16 }
  0x7b   : > { %v999_v47 = vsel %vm11273_vm8, %v995_v8, %v998_v36  ;;  %v1009_v14 = vsel %vm11273_vm8, %v1000_v12, %v1008_v17  ;;  %v977_v43 = vrot.slane %v975_v54, 4  ;;  %v16040_v38 = vshrl.u32 %v10802_v28, 16 }
  0x7c   : > { %v9365_v31 = vcombine.low %v999_v47, %v1009_v14  ;;  %v972_v23 = vrot.slane %v971_v24, 4  ;;  %v985_v45 = vor.u32 %v984_v13, %v981_v9  ;;  %v1036_v53 = vrot.slane %v1034_v26, 5 }
  0x7d   : > { %v1042_v57 = vrot.slane %v16040_v38, 5  ;;  %v1039_v44 = vrot.slane %v1037_v2, 6  ;;  %v16041_v42 = vshll.u32 %v10802_v28, 16  ;;  %v1048_v34 = vshrl.u32 %v948_v51, 16 }
  0x7e   : > { %v1051_v58 = vshll.u32 %v948_v51, 16  ;;  %4531 = vrot.lane.b32.xlu0 %v9362_v33, %s10699_s28  ;;  %4585 = vrot.lane.b32.xlu1 %v9365_v31, %s10700_s29  ;;  %v976_v36 = vsel %vm11273_vm8, %v972_v23, %v975_v54  ;;  %v986_v20 = vsel %vm11273_vm8, %v977_v43, %v985_v45  ;;  %v1011_v49 = vshrl.u32 %v11103_v19, 16 }
  0x7f   : > { %v1043_v11 = vrot.slane %v16041_v42, 6  ;;  %v1014_v5 = vshll.u32 %v11103_v19, 16  ;;  %v9364_v28 = vcombine.low %v976_v36, %v986_v20  ;;  %v1040_v12 = vor.u32 %v1039_v44, %v1036_v53 }
  0x80   : > { %v1050_v21 = vrot.slane %v1048_v34, 5  ;;  %v1053_v46 = vrot.slane %v1051_v58, 6  ;;  %v1013_v33 = vrot.slane %v1011_v49, 5  ;;  %v16042_v17 = vshrl.u32 %v10772_v1, 16 }
  0x81   : > { %v1044_v56 = vor.u32 %v1043_v11, %v1042_v57  ;;  %v1016_v8 = vrot.slane %v1014_v5, 6  ;;  %v1041_v54 = vrot.slane %v1040_v12, 4  ;;  %v1025_v13 = vshrl.u32 %v947_v50, 16  ;;  %v950_v57 = vld [vmem:[%s10768_s26 + $0x44] sm:$0x3] }
  0x82   : > { %v1019_v9 = vrot.slane %v16042_v17, 5  ;;  %v1028_v51 = vshll.u32 %v947_v50, 16  ;;  %4583 = vrot.lane.b32.xlu0 %v9364_v28, %s10700_s29  ;;  %v1054_v26 = vor.u32 %v1053_v46, %v1050_v21  ;;  %v1080_v47 = vshrl.u32 %v11111_v22, 16  ;;  %v949_v28 = vld [vmem:[%s10768_s26 + $0x38] sm:$0x3] }
  0x83   : > { %v1046_v24 = vrot.slane %v1044_v56, 4  ;;  %v1017_v2 = vor.u32 %v1016_v8, %v1013_v33  ;;  %v1045_v14 = vsel %vm11273_vm8, %v1041_v54, %v1044_v56  ;;  %v1027_v43 = vrot.slane %v1025_v13, 5 }
  0x84   : > { %v1021_v19 = vor.u32 %v10790_v18, %v1019_v9  ;;  %v1030_v38 = vrot.slane %v1028_v51, 6  ;;  %v1083_v1 = vshll.u32 %v11111_v22, 16  ;;  %v1082_v53 = vrot.slane %v1080_v47, 5 }
  0x85   : > { %v1055_v31 = vsel %vm11273_vm8, %v1046_v24, %v1054_v26  ;;  %v1018_v23 = vrot.slane %v1017_v2, 4  ;;  %v16043_v11 = vshrl.u32 %v10837_v7, 16  ;;  %v16044_v36 = vshll.u32 %v10837_v7, 16 }
  0x86   : > { %v1023_v45 = vrot.slane %v1021_v19, 4  ;;  %v9367_v44 = vcombine.low %v1045_v14, %v1055_v31  ;;  %v1031_v42 = vor.u32 %v1030_v38, %v1027_v43  ;;  %v1085_v18 = vrot.slane %v1083_v1, 6  ;;  %v952_v31 = vld [vmem:[%s10768_s26 + $0x5c] sm:$0x3] }
  0x87   : > { %v1088_v34 = vrot.slane %v16043_v11, 5  ;;  %v1022_v58 = vsel %vm11273_vm8, %v1018_v23, %v1021_v19  ;;  %v1089_v20 = vrot.slane %v16044_v36, 6  ;;  %v1094_v22 = vshrl.u32 %v950_v57, 16 }
  0x88   : > { %v1097_v50 = vshll.u32 %v950_v57, 16  ;;  %4589 = vrot.lane.b32.xlu1 %v9367_v44, %s10700_s29  ;;  %v1032_v49 = vsel %vm11273_vm8, %v1023_v45, %v1031_v42  ;;  %v1086_v5 = vor.u32 %v1085_v18, %v1082_v53  ;;  %v1057_v12 = vshrl.u32 %v11122_v35, 16 }
  0x89   : > { %v1060_v56 = vshll.u32 %v11122_v35, 16  ;;  %v9366_v21 = vcombine.low %v1022_v58, %v1032_v49  ;;  %v1090_v46 = vor.u32 %v1089_v20, %v1088_v34  ;;  %v1096_v33 = vrot.slane %v1094_v22, 5 }
  0x8a   : > { %v1099_v8 = vrot.slane %v1097_v50, 6  ;;  %v1087_v17 = vrot.slane %v1086_v5, 4  ;;  %v1059_v7 = vrot.slane %v1057_v12, 5  ;;  %v16045_v54 = vshrl.u32 %v10857_v32, 16 }
  0x8b   : > { %v1062_v9 = vrot.slane %v1060_v56, 6  ;;  %4587 = vrot.lane.b32.xlu0 %v9366_v21, %s10700_s29  ;;  %v1092_v13 = vrot.slane %v1090_v46, 4  ;;  %v16046_v26 = vshll.u32 %v10857_v32, 16  ;;  %v1071_v19 = vshrl.u32 %v949_v28, 16 }
  0x8c   : > { %v1065_v24 = vrot.slane %v16045_v54, 5  ;;  %v1100_v51 = vor.u32 %v1099_v8, %v1096_v33  ;;  %v1091_v35 = vsel %vm11273_vm8, %v1087_v17, %v1090_v46  ;;  %v1074_v14 = vshll.u32 %v949_v28, 16  ;;  %v951_v28 = vld [vmem:[%s10768_s26 + $0x50] sm:$0x3] }
  0x8d   : > { %v1066_v2 = vrot.slane %v16046_v26, 6  ;;  %v1063_v47 = vor.u32 %v1062_v9, %v1059_v7  ;;  %v1126_v43 = vshrl.u32 %v11130_v4, 16  ;;  %v1073_v1 = vrot.slane %v1071_v19, 5 }
  0x8e   : > { %v1101_v38 = vsel %vm11273_vm8, %v1092_v13, %v1100_v51  ;;  %v1129_v23 = vshll.u32 %v11130_v4, 16  ;;  %v1076_v53 = vrot.slane %v1074_v14, 6  ;;  %v16047_v11 = vshrl.u32 %v10879_v61, 16 }
  0x8f   : > { %v1067_v57 = vor.u32 %v1066_v2, %v1065_v24  ;;  %v9369_v45 = vcombine.low %v1091_v35, %v1101_v38  ;;  %v1064_v32 = vrot.slane %v1063_v47, 4  ;;  %v1128_v44 = vrot.slane %v1126_v43, 5 }
  0x90   : > { %v1131_v18 = vrot.slane %v1129_v23, 6  ;;  %v1134_v34 = vrot.slane %v16047_v11, 5  ;;  %v16048_v58 = vshll.u32 %v10879_v61, 16  ;;  %v1077_v22 = vor.u32 %v1076_v53, %v1073_v1  ;;  %v954_v1 = vld [vmem:[%s10768_s26 + $0x74] sm:$0x3] }
  0x91   : > { %v1069_v42 = vrot.slane %v1067_v57, 4  ;;  %4593 = vrot.lane.b32.xlu1 %v9369_v45, %s10700_s29  ;;  %v1068_v20 = vsel %vm11273_vm8, %v1064_v32, %v1067_v57  ;;  %v1140_v4 = vshrl.u32 %v952_v31, 16  ;;  %v1143_v50 = vshll.u32 %v952_v31, 16 }
  0x92   : > { %v1135_v36 = vrot.slane %v16048_v58, 6  ;;  %v1132_v49 = vor.u32 %v1131_v18, %v1128_v44  ;;  %v1103_v12 = vshrl.u32 %v11141_v52, 16  ;;  %v1106_v56 = vshll.u32 %v11141_v52, 16 }
  0x93   : > { %v1078_v21 = vsel %vm11273_vm8, %v1069_v42, %v1077_v22  ;;  %v1142_v61 = vrot.slane %v1140_v4, 5  ;;  %v1145_v46 = vrot.slane %v1143_v50, 6  ;;  %v16049_v33 = vshrl.u32 %v10895_v30, 16 }
  0x94   : > { %v1136_v5 = vor.u32 %v1135_v36, %v1134_v34  ;;  %v9368_v17 = vcombine.low %v1068_v20, %v1078_v21  ;;  %v1133_v7 = vrot.slane %v1132_v49, 4  ;;  %v1105_v54 = vrot.slane %v1103_v12, 5  ;;  %v953_v12 = vld [vmem:[%s10768_s26 + $0x68] sm:$0x3] }
  0x95   : > { %v1111_v8 = vrot.slane %v16049_v33, 5  ;;  %v1146_v24 = vor.u32 %v1145_v46, %v1142_v61  ;;  %v1108_v13 = vrot.slane %v1106_v56, 6  ;;  %v16050_v51 = vshll.u32 %v10895_v30, 16 }
  0x96   : > { %v1138_v9 = vrot.slane %v1136_v5, 4  ;;  %v1117_v2 = vshrl.u32 %v951_v28, 16  ;;  %4591 = vrot.lane.b32.xlu0 %v9368_v17, %s10700_s29  ;;  %v1137_v52 = vsel %vm11273_vm8, %v1133_v7, %v1136_v5  ;;  %v1120_v19 = vshll.u32 %v951_v28, 16 }
  0x97   : > { %v1112_v26 = vrot.slane %v16050_v51, 6  ;;  %v1172_v35 = vshrl.u32 %v11159_v55, 16  ;;  %v1175_v47 = vshll.u32 %v11159_v55, 16  ;;  %v1109_v43 = vor.u32 %v1108_v13, %v1105_v54 }
  0x98   : > { %v1147_v14 = vsel %vm11273_vm8, %v1138_v9, %v1146_v24  ;;  %v1119_v57 = vrot.slane %v1117_v2, 5  ;;  %v1122_v31 = vrot.slane %v1120_v19, 6  ;;  %v16051_v44 = vshrl.u32 %v10913_v59, 16 }
  0x99   : > { %v1113_v38 = vor.u32 %v1112_v26, %v1111_v8  ;;  %v9371_v30 = vcombine.low %v1137_v52, %v1147_v14  ;;  %v1174_v23 = vrot.slane %v1172_v35, 5  ;;  %v1177_v45 = vrot.slane %v1175_v47, 6  ;;  %v956_v52 = vld [vmem:[%s10768_s26 + $0x8c] sm:$0x3] }
  0x9a   : > { %v1110_v32 = vrot.slane %v1109_v43, 4  ;;  %v1180_v42 = vrot.slane %v16051_v44, 5  ;;  %v16052_v18 = vshll.u32 %v10913_v59, 16  ;;  %v1123_v11 = vor.u32 %v1122_v31, %v1119_v57 }
  0x9b   : > { %v1115_v53 = vrot.slane %v1113_v38, 4  ;;  %4597 = vrot.lane.b32.xlu1 %v9371_v30, %s10700_s29  ;;  %v1178_v34 = vor.u32 %v1177_v45, %v1174_v23  ;;  %v1186_v58 = vshrl.u32 %v954_v1, 16  ;;  %v1189_v36 = vshll.u32 %v954_v1, 16 }
  0x9c   : > { %v1181_v55 = vrot.slane %v16052_v18, 6  ;;  %v1114_v20 = vsel %vm11273_vm8, %v1110_v32, %v1113_v38  ;;  %v1149_v4 = vshrl.u32 %v11166_v10, 16  ;;  %v1152_v50 = vshll.u32 %v11166_v10, 16  ;;  %v955_v18 = vld [vmem:[%s10768_s26 + $0x80] sm:$0x3] }
  0x9d   : > { %v1124_v49 = vsel %vm11273_vm8, %v1115_v53, %v1123_v11  ;;  %v1179_v5 = vrot.slane %v1178_v34, 4  ;;  %v1188_v59 = vrot.slane %v1186_v58, 5  ;;  %v1191_v28 = vrot.slane %v1189_v36, 6 }
  0x9e   : > { %v1182_v22 = vor.u32 %v1181_v55, %v1180_v42  ;;  %v9370_v56 = vcombine.low %v1114_v20, %v1124_v49  ;;  %v1151_v61 = vrot.slane %v1149_v4, 5  ;;  %v1154_v46 = vrot.slane %v1152_v50, 6 }
  0x9f   : > { %v1192_v8 = vor.u32 %v1191_v28, %v1188_v59  ;;  %v16053_v17 = vshrl.u32 %v10932_v37, 16  ;;  %v16054_v10 = vshll.u32 %v10932_v37, 16  ;;  %v1163_v24 = vshrl.u32 %v953_v12, 16 }
  0xa0   : > { %v1184_v21 = vrot.slane %v1182_v22, 4  ;;  %v1183_v33 = vsel %vm11273_vm8, %v1179_v5, %v1182_v22  ;;  %4595 = vrot.lane.b32.xlu0 %v9370_v56, %s10700_s29  ;;  %v1155_v54 = vor.u32 %v1154_v46, %v1151_v61  ;;  %v1166_v13 = vshll.u32 %v953_v12, 16  ;;  %v11397_v5 = vpop.permute.xlu1 %4427 }
  0xa1   : > { %v1157_v7 = vrot.slane %v16053_v17, 5  ;;  %v1158_v9 = vrot.slane %v16054_v10, 6  ;;  %v1218_v51 = vshrl.u32 %v11172_v3, 16  ;;  %v1221_v19 = vshll.u32 %v11172_v3, 16 }
  0xa2   : > { %v1193_v26 = vsel %vm11273_vm8, %v1184_v21, %v1192_v8  ;;  %v16055_v35 = vshrl.u32 %v10955_v29, 16  ;;  %v1156_v14 = vrot.slane %v1155_v54, 4  ;;  %v1165_v43 = vrot.slane %v1163_v24, 5 }
  0xa3   : > { %v1159_v2 = vor.u32 %v1158_v9, %v1157_v7  ;;  %v9373_v37 = vcombine.low %v1183_v33, %v1193_v26  ;;  %v1168_v38 = vrot.slane %v1166_v13, 6  ;;  %v1220_v1 = vrot.slane %v1218_v51, 5  ;;  %v958_v9 = vld [vmem:[%s10768_s26 + $0xa4] sm:$0x3] }
  0xa4   : > { %v1226_v47 = vrot.slane %v16055_v35, 5  ;;  %v1223_v30 = vrot.slane %v1221_v19, 6  ;;  %v16056_v31 = vshll.u32 %v10955_v29, 16  ;;  %v1232_v32 = vshrl.u32 %v956_v52, 16 }
  0xa5   : > { %v1161_v57 = vrot.slane %v1159_v2, 4  ;;  %4601 = vrot.lane.b32.xlu1 %v9373_v37, %s10700_s29  ;;  %v1160_v45 = vsel %vm11273_vm8, %v1156_v14, %v1159_v2  ;;  %v1169_v3 = vor.u32 %v1168_v38, %v1165_v43  ;;  %v1235_v53 = vshll.u32 %v956_v52, 16  ;;  %v11416_v38 = vpop.permute.xlu1 %4429 }
  0xa6   : > { %v1227_v23 = vrot.slane %v16056_v31, 6  ;;  %v1224_v44 = vor.u32 %v1223_v30, %v1220_v1  ;;  %v1195_v55 = vshrl.u32 %v11175_v60, 16  ;;  %v1198_v11 = vshll.u32 %v11175_v60, 16 }
  0xa7   : > { %v1170_v34 = vsel %vm11273_vm8, %v1161_v57, %v1169_v3  ;;  %v1234_v29 = vrot.slane %v1232_v32, 5  ;;  %v1237_v58 = vrot.slane %v1235_v53, 6  ;;  %v16057_v36 = vshrl.u32 %v10972_v27, 16  ;;  %v957_v32 = vld [vmem:[%s10768_s26 + $0x98] sm:$0x3] }
  0xa8   : > { %v1228_v42 = vor.u32 %v1227_v23, %v1226_v47  ;;  %v9372_v22 = vcombine.low %v1160_v45, %v1170_v34  ;;  %v1225_v4 = vrot.slane %v1224_v44, 4  ;;  %v1197_v49 = vrot.slane %v1195_v55, 5 }
  0xa9   : > { %v1203_v20 = vrot.slane %v16057_v36, 5  ;;  %v1238_v59 = vor.u32 %v1237_v58, %v1234_v29  ;;  %v1200_v28 = vrot.slane %v1198_v11, 6  ;;  %v16058_v12 = vshll.u32 %v10972_v27, 16 }
  0xaa   : > { %v1230_v50 = vrot.slane %v1228_v42, 4  ;;  %v1209_v56 = vshrl.u32 %v955_v18, 16  ;;  %4599 = vrot.lane.b32.xlu0 %v9372_v22, %s10700_s29  ;;  %v1229_v21 = vsel %vm11273_vm8, %v1225_v4, %v1228_v42  ;;  %v1212_v61 = vshll.u32 %v955_v18, 16 }
  0xab   : > { %v1204_v60 = vrot.slane %v16058_v12, 6  ;;  %v1264_v46 = vshrl.u32 %v11192_v15, 16  ;;  %v1267_v33 = vshll.u32 %v11192_v15, 16  ;;  %v1201_v17 = vor.u32 %v1200_v28, %v1197_v49  ;;  %v11413_v15 = vpop.permute.xlu0 %4423  ;;  %v960_v28 = vld [vmem:[%s10768_s26 + $0xbc] sm:$0x3] }
  0xac   : > { %v1239_v8 = vsel %vm11273_vm8, %v1230_v50, %v1238_v59  ;;  %v1211_v10 = vrot.slane %v1209_v56, 5  ;;  %v1214_v54 = vrot.slane %v1212_v61, 6  ;;  %v16059_v2 = vshrl.u32 %v10990_v16, 16  ;;  %v11441_v56 = vpop.permute.xlu1 %4433 }
  0xad   : > { %v1205_v7 = vor.u32 %v1204_v60, %v1203_v20  ;;  %v9375_v27 = vcombine.low %v1229_v21, %v1239_v8  ;;  %v1266_v24 = vrot.slane %v1264_v46, 5  ;;  %v1269_v13 = vrot.slane %v1267_v33, 6 }
  0xae   : > { %v1202_v51 = vrot.slane %v1201_v17, 4  ;;  %v1272_v52 = vrot.slane %v16059_v2, 5  ;;  %v16060_v19 = vshll.u32 %v10990_v16, 16  ;;  %v1215_v47 = vor.u32 %v1214_v54, %v1211_v10 }
  0xaf   : > { %v1207_v26 = vrot.slane %v1205_v7, 4  ;;  %4605 = vrot.lane.b32.xlu1 %v9375_v27, %s10700_s29  ;;  %v1270_v37 = vor.u32 %v1269_v13, %v1266_v24  ;;  %v1278_v14 = vshrl.u32 %v958_v9, 16  ;;  %v1281_v43 = vshll.u32 %v958_v9, 16  ;;  %v11433_v50 = vpop.permute.xlu0 %4425 }
  0xb0   : > { %v1273_v35 = vrot.slane %v16060_v19, 6  ;;  %v1206_v57 = vsel %vm11273_vm8, %v1202_v51, %v1205_v7  ;;  %v1241_v30 = vshrl.u32 %v11199_v6, 16  ;;  %v1244_v16 = vshll.u32 %v11199_v6, 16 }
  0xb1   : > { %v1216_v31 = vsel %vm11273_vm8, %v1207_v26, %v1215_v47  ;;  %v1271_v23 = vrot.slane %v1270_v37, 4  ;;  %v1280_v45 = vrot.slane %v1278_v14, 5  ;;  %v1283_v3 = vrot.slane %v1281_v43, 6  ;;  %v959_v26 = vld [vmem:[%s10768_s26 + $0xb0] sm:$0x3] }
  0xb2   : > { %v1274_v1 = vor.u32 %v1273_v35, %v1272_v52  ;;  %v9374_v53 = vcombine.low %v1206_v57, %v1216_v31  ;;  %v1243_v42 = vrot.slane %v1241_v30, 5  ;;  %v1246_v18 = vrot.slane %v1244_v16, 6  ;;  %v11457_v16 = vpop.permute.xlu1 %4437 }
  0xb3   : > { %v1284_v11 = vor.u32 %v1283_v3, %v1280_v45  ;;  %v16061_v34 = vshrl.u32 %v11009_v39, 16  ;;  %v16062_v6 = vshll.u32 %v11009_v39, 16  ;;  %v1255_v20 = vshrl.u32 %v957_v32, 16  ;;  %v11455_v14 = vpop.permute.xlu0 %4431 }
  0xb4   : > { %v1276_v44 = vrot.slane %v1274_v1, 4  ;;  %v1275_v55 = vsel %vm11273_vm8, %v1271_v23, %v1274_v1  ;;  %4603 = vrot.lane.b32.xlu0 %v9374_v53, %s10700_s29  ;;  %v1247_v36 = vor.u32 %v1246_v18, %v1243_v42  ;;  %v1258_v22 = vshll.u32 %v957_v32, 16 }
  0xb5   : > { %v1249_v29 = vrot.slane %v16061_v34, 5  ;;  %v1250_v58 = vrot.slane %v16062_v6, 6  ;;  %v1310_v4 = vshrl.u32 %v11213_v41, 16  ;;  %v1313_v12 = vshll.u32 %v11213_v41, 16  ;;  %v11468_v34 = vld [vmem:[%s10768_s26 + $0x1c] sm:$0xf] }
  0xb6   : > { %v1285_v49 = vsel %vm11273_vm8, %v1276_v44, %v1284_v11  ;;  %v16063_v60 = vshrl.u32 %v11027_v0, 16  ;;  %v1248_v61 = vrot.slane %v1247_v36, 4  ;;  %v1257_v46 = vrot.slane %v1255_v20, 5  ;;  %v9030_v11 = vld [vmem:[%s10768_s26 + $0x18] sm:$0xf]  ;;  %16067 = vst [vmem:[#allocation8_spill] sm:$0xff] %v11468_v34 }
  0xb7   : > { %v1251_v59 = vor.u32 %v1250_v58, %v1249_v29  ;;  %v9377_v21 = vcombine.low %v1275_v55, %v1285_v49  ;;  %v1260_v33 = vrot.slane %v1258_v22, 6  ;;  %v1312_v17 = vrot.slane %v1310_v4, 5  ;;  %v11470_v22 = vpop.permute.xlu0 %4435 }
  0xb8   : > { %v1318_v39 = vrot.slane %v16063_v60, 5  ;;  %v1315_v7 = vrot.slane %v1313_v12, 6  ;;  %v16064_v10 = vshll.u32 %v11027_v0, 16  ;;  %v1324_v54 = vshrl.u32 %v960_v28, 16  ;;  %v9034_v12 = vld [vmem:[%s10768_s26 + $0x30] sm:$0xf]  ;;  %v11479_v60 = vpop.permute.xlu1 %4441 }
  0xb9   : > { %v1253_v8 = vrot.slane %v1251_v59, 4  ;;  %4609 = vrot.lane.b32.xlu1 %v9377_v21, %s10700_s29  ;;  %v1252_v41 = vsel %vm11273_vm8, %v1248_v61, %v1251_v59  ;;  %v1261_v27 = vor.u32 %v1260_v33, %v1257_v46  ;;  %v1327_v24 = vshll.u32 %v960_v28, 16  ;;  %v9028_v59 = vld [vmem:[%s10768_s26 + $0xc] sm:$0xf]  ;;  %v11476_v28 = vld [vmem:[%s10768_s26 + $0x10] sm:$0xf] }
  0xba   : > { %v1319_v9 = vrot.slane %v16064_v10, 6  ;;  %v1316_v13 = vor.u32 %v1315_v7, %v1312_v17  ;;  %v1287_v2 = vshrl.u32 %v11219_v48, 16  ;;  %v1290_v52 = vshll.u32 %v11219_v48, 16  ;;  %16068 = vst [vmem:[#allocation9_spill] sm:$0xff] %v11476_v28  ;;  %v11484_v46 = vld [vmem:[%s10768_s26 + $0x34] sm:$0xf] }
  0xbb   : > { %v1262_v19 = vsel %vm11273_vm8, %v1253_v8, %v1261_v27  ;;  %v1326_v0 = vrot.slane %v1324_v54, 5  ;;  %v1329_v35 = vrot.slane %v1327_v24, 6  ;;  %v16065_v47 = vshrl.u32 %v11047_v63, 16  ;;  %v11487_v33 = vld [vmem:[%s10768_s26 + $0x24] sm:$0xf] }
  0xbc   : > { %v1320_v51 = vor.u32 %v1319_v9, %v1318_v39  ;;  %v9376_v43 = vcombine.low %v1252_v41, %v1262_v19  ;;  %v1317_v57 = vrot.slane %v1316_v13, 4  ;;  %v1289_v30 = vrot.slane %v1287_v2, 5  ;;  %v11494_v9 = vld [vmem:[%s10768_s26 + $0x28] sm:$0xf]  ;;  %v11507_v19 = vld [vmem:[%s10768_s26 + $0x4c] sm:$0xf] }
  0xbd   : > { %v1295_v37 = vrot.slane %v16065_v47, 5  ;;  %v1330_v31 = vor.u32 %v1329_v35, %v1326_v0  ;;  %v1292_v48 = vrot.slane %v1290_v52, 6  ;;  %v16066_v23 = vshll.u32 %v11047_v63, 16  ;;  %16069 = vst [vmem:[#allocation10_spill] sm:$0xff] %v11494_v9  ;;  %v9038_v13 = vld [vmem:[%s10768_s26 + $0x48] sm:$0xf] }
  0xbe   : > { %v1322_v1 = vrot.slane %v1320_v51, 4  ;;  %v1301_v3 = vshrl.u32 %v959_v26, 16  ;;  %4607 = vrot.lane.b32.xlu0 %v9376_v43, %s10700_s29  ;;  %v1321_v32 = vsel %vm11273_vm8, %v1317_v57, %v1320_v51  ;;  %v1304_v53 = vshll.u32 %v959_v26, 16  ;;  %v11516_v43 = vld [vmem:[%s10768_s26 + $0x3c] sm:$0xf]  ;;  %v11518_v57 = vpop.permute.xlu0 %4439 }
  0xbf   : > { %v1296_v45 = vrot.slane %v16066_v23, 6  ;;  %v1293_v42 = vor.u32 %v1292_v48, %v1289_v30  ;;  %v1406_v6 = vshrl.u32 %v9030_v11, 16  ;;  %v1409_v20 = vshll.u32 %v9030_v11, 16  ;;  %v11529_v23 = vld [vmem:[%s10768_s26 + $0x40] sm:$0xf] }
  0xc0   : > { %v1331_v44 = vsel %vm11273_vm8, %v1322_v1, %v1330_v31  ;;  %v1303_v55 = vrot.slane %v1301_v3, 5  ;;  %v1306_v29 = vrot.slane %v1304_v53, 6  ;;  %v9381_v49 = vcombine.low %v9030_v11, %v11468_v34  ;;  %v10655_v24 = vld [vmem:[%s10768_s26 + $0x18] sm:$0xf]  ;;  %v10656_v54 = vld [vmem:[%s10768_s26 + $0x1c] sm:$0xf] }
  0xc1   : > { %v1297_v18 = vor.u32 %v1296_v45, %v1295_v37  ;;  %v9379_v63 = vcombine.low %v1321_v32, %v1331_v44  ;;  %v1294_v58 = vrot.slane %v1293_v42, 4  ;;  %v1382_v21 = vshrl.u32 %v9028_v59, 16  ;;  %v11531_v45 = vpop.permute.xlu1 %4445  ;;  %v9042_v42 = vld [vmem:[%s10768_s26 + $0x60] sm:$0xf] }
  0xc2   : > { %v1307_v4 = vor.u32 %v1306_v29, %v1303_v55  ;;  %v1385_v61 = vshll.u32 %v9028_v59, 16  ;;  %v11491_v17 = vrot.slane %v1406_v6, 4  ;;  %v1454_v7 = vshrl.u32 %v9034_v12, 16  ;;  %v11547_v29 = vld [vmem:[%s10768_s26 + $0x64] sm:$0xf] }
  0xc3   : > { %v1299_v36 = vrot.slane %v1297_v18, 4  ;;  %4613 = vrot.lane.b32.xlu1 %v9379_v63, %s10700_s29  ;;  %v1298_v39 = vsel %vm11273_vm8, %v1294_v58, %v1297_v18  ;;  %v1457_v10 = vshll.u32 %v9034_v12, 16  ;;  %v11496_v27 = vrot.slane %v1409_v20, 5 }
  0xc4   : > { %v15967_v51 = vshrl.u32 %v11484_v46, 16  ;;  %v9383_v26 = vcombine.low %v9034_v12, %v11484_v46  ;;  %v1430_v2 = vshrl.u32 %v11487_v33, 16  ;;  %v1433_v52 = vshll.u32 %v11487_v33, 16 }
  0xc5   : > { %v1308_v8 = vsel %vm11273_vm8, %v1299_v36, %v1307_v4  ;;  %v11510_v0 = vrot.slane %v1382_v21, 4  ;;  %v11512_v35 = vrot.slane %v1385_v61, 5  ;;  %v9380_v47 = vcombine.low %v9028_v59, %v11476_v28  ;;  %v11557_v4 = vld [vmem:[%s10768_s26 + $0x54] sm:$0xf] }
  0xc6   : > { %v9378_v41 = vcombine.low %v1298_v39, %v1308_v8  ;;  %v1502_v37 = vshrl.u32 %v9038_v13, 16  ;;  %v11520_v1 = vrot.slane %v1454_v7, 4  ;;  %v11522_v30 = vrot.slane %v1457_v10, 5  ;;  %v11567_v39 = vld [vmem:[%s10768_s26 + $0x58] sm:$0xf] }
  0xc7   : > { %4681 = vrot.lane.b32.xlu1 %v9381_v49, %s10701_s30  ;;  %v11526_v31 = vrot.slane %v15967_v51, 5  ;;  %v1505_v48 = vshll.u32 %v9038_v13, 16  ;;  %v15965_v3 = vshrl.u32 %v11494_v9, 16  ;;  %v9382_v32 = vcombine.low %v11487_v33, %v11494_v9  ;;  %v9046_v10 = vld [vmem:[%s10768_s26 + $0x78] sm:$0xf] }
  0xc8   : > { %4611 = vrot.lane.b32.xlu0 %v9378_v41, %s10700_s29  ;;  %v15964_v53 = vshrl.u32 %v11507_v19, 16  ;;  %v1478_v44 = vshrl.u32 %v11516_v43, 16  ;;  %v11540_v18 = vrot.slane %v1430_v2, 4  ;;  %v11542_v55 = vrot.slane %v1433_v52, 5  ;;  %v11577_v41 = vpop.permute.xlu0 %4443  ;;  %v11584_v2 = vld [vmem:[%s10768_s26 + $0x7c] sm:$0xf] }
  0xc9   : > { %16070 = vst [vmem:[#allocation11_spill] sm:$0xff] %v11526_v31  ;;  %v9385_v11 = vcombine.low %v9038_v13, %v11507_v19  ;;  %v1481_v63 = vshll.u32 %v11516_v43, 16  ;;  %v11552_v6 = vrot.slane %v15965_v3, 5  ;;  %v11554_v58 = vrot.slane %v1502_v37, 4  ;;  %v11586_v37 = vpop.permute.xlu1 %4449 }
  0xca   : > { %v1550_v36 = vshrl.u32 %v9042_v42, 16  ;;  %v1553_v20 = vshll.u32 %v9042_v42, 16  ;;  %v11559_v49 = vrot.slane %v1505_v48, 5  ;;  %v11563_v59 = vrot.slane %v15964_v53, 5 }
  0xcb   : > { %4685 = vrot.lane.b32.xlu1 %v9383_v26, %s10701_s30  ;;  %16071 = vst [vmem:[#allocation12_spill] sm:$0xff] %v11552_v6  ;;  %v15963_v12 = vshrl.u32 %v11529_v23, 16  ;;  %v1526_v21 = vshrl.u32 %v11557_v4, 16  ;;  %v11570_v61 = vrot.slane %v1478_v44, 4  ;;  %v9384_v33 = vcombine.low %v11516_v43, %v11529_v23 }
  0xcc   : > { %4679 = vrot.lane.b32.xlu0 %v9380_v47, %s10701_s30  ;;  %16072 = vst [vmem:[#allocation13_spill] sm:$0xff] %v11563_v59  ;;  %v15966_v8 = vshrl.u32 %v11547_v29, 16  ;;  %v1529_v7 = vshll.u32 %v11557_v4, 16  ;;  %v11580_v13 = vrot.slane %v1481_v63, 5  ;;  %v9387_v26 = vcombine.low %v9042_v42, %v11547_v29 }
  0xcd   : > { %v1598_v52 = vshrl.u32 %v9046_v10, 16  ;;  %v1601_v47 = vshll.u32 %v9046_v10, 16  ;;  %v11591_v43 = vrot.slane %v15963_v12, 5  ;;  %v11593_v48 = vrot.slane %v1550_v36, 4  ;;  %v11650_v59 = vpop.permute.xlu1 %4453 }
  0xce   : > { %v11595_v44 = vrot.slane %v1553_v20, 5  ;;  %v15968_v42 = vshrl.u32 %v11567_v39, 16  ;;  %v11603_v63 = vrot.slane %v15966_v8, 5  ;;  %v9386_v12 = vcombine.low %v11557_v4, %v11567_v39  ;;  %v11618_v8 = vld [vmem:[%s10768_s26 + $0x70] sm:$0xf]  ;;  %16080 = vst [vmem:[#allocation21_spill] sm:$0xff] %v11650_v59 }
  0xcf   : > { %4689 = vrot.lane.b32.xlu1 %v9385_v11, %s10701_s30  ;;  %16073 = vst [vmem:[#allocation14_spill] sm:$0xff] %v11591_v43  ;;  %v11599_v11 = vld [vmem:[%s10768_s26 + $0x6c] sm:$0xf]  ;;  %v11610_v20 = vrot.slane %v1529_v7, 5  ;;  %v15969_v3 = vshrl.u32 %v11584_v2, 16  ;;  %16076 = vst [vmem:[#allocation17_spill] sm:$0xff] %v11618_v8  ;;  %v9389_v7 = vcombine.low %v9046_v10, %v11584_v2  ;;  %v11641_v10 = vpop.permute.xlu0 %4447 }
  0xd0   : > { %4683 = vrot.lane.b32.xlu0 %v9382_v32, %s10701_s30  ;;  %16074 = vst [vmem:[#allocation15_spill] sm:$0xff] %v11603_v63  ;;  %v11605_v32 = vrot.slane %v1526_v21, 4  ;;  %v1574_v36 = vshrl.u32 %v11599_v11, 16  ;;  %v11614_v53 = vrot.slane %v15968_v42, 5  ;;  %v1577_v21 = vshll.u32 %v11599_v11, 16 }
  0xd1   : > { %v11622_v4 = vrot.slane %v1598_v52, 4  ;;  %v11624_v51 = vrot.slane %v1601_v47, 5  ;;  %v9318_v42 = vcombine.low %v10655_v24, %v10656_v54  ;;  %v9050_v63 = vld [vmem:[%s10768_s26 + $0x90] sm:$0xf]  ;;  %v10658_v52 = vld [vmem:[%s10768_s26 + $0x4] sm:$0xf]  ;;  %v9388_v24 = vcombine.low %v11599_v11, %v11618_v8 }
  0xd2   : > { %16075 = vst [vmem:[#allocation16_spill] sm:$0xff] %v11614_v53  ;;  %v11633_v53 = vrot.slane %v15969_v3, 5  ;;  %v11639_v47 = vld [vmem:[%s10768_s26 + $0x94] sm:$0xf]  ;;  %v1646_v31 = vshrl.u32 %v9050_v63, 16  ;;  %v11643_v54 = vrot.slane %v1574_v36, 4 }
  0xd3   : > { %4693 = vrot.lane.b32.xlu1 %v9387_v26, %s10701_s30  ;;  %v10657_v26 = vld [vmem:[%s10768_s26] sm:$0xf]  ;;  %16078 = vst [vmem:[#allocation19_spill] sm:$0xff] %v11639_v47  ;;  %v11648_v3 = vld [vmem:[%s10768_s26 + $0x84] sm:$0xf]  ;;  %v11663_v11 = vsel %vm5623_vm9, %v9318_v42, %v11397_v5  ;;  %v9391_v62 = vcombine.low %v9050_v63, %v11639_v47  ;;  %v15976_v5 = vshrl.u32 %v11668_v40, 16 }
  0xd4   : > { %4687 = vrot.lane.b32.xlu0 %v9384_v33, %s10701_s30  ;;  %16077 = vst [vmem:[#allocation18_spill] sm:$0xff] %v11633_v53  ;;  %v9316_v43 = vcombine.low %v10657_v26, %v10658_v52  ;;  %16079 = vst [vmem:[#allocation20_spill] sm:$0xff] %v11643_v54  ;;  %v1649_v33 = vshll.u32 %v9050_v63, 16  ;;  %v11652_v26 = vrot.slane %v1577_v21, 5  ;;  %v16082_v52 = vshrl.u32 %v11618_v8, 16 }
  0xd5   : > { %v1622_v36 = vshrl.u32 %v11648_v3, 16  ;;  %v1625_v6 = vshll.u32 %v11648_v3, 16  ;;  %16084 = vst [vmem:[#allocation24_spill] sm:$0xff] %v11663_v11  ;;  %v10661_v42 = vld [vmem:[%s10768_s26 + $0xc] sm:$0xf] }
  0xd6   : > { %16081 = vst [vmem:[#allocation22_spill] sm:$0xff] %v11652_v26  ;;  %v11656_v53 = vrot.slane %v16082_v52, 5  ;;  %v10659_v52 = vld [vmem:[%s10768_s26 + $0x24] sm:$0xf]  ;;  %v11675_v8 = vsel %vm5623_vm9, %v9316_v43, %v11413_v15  ;;  %v10662_v21 = vld [vmem:[%s10768_s26 + $0x10] sm:$0xf] }
  0xd7   : > { %4697 = vrot.lane.b32.xlu1 %v9389_v7, %s10701_s30  ;;  %16086 = vst [vmem:[#allocation26_spill] sm:$0xff] %v11675_v8  ;;  %v11677_v7 = vrot.slane %v1646_v31, 4  ;;  %v9317_v11 = vcombine.low %v10661_v42, %v10662_v21  ;;  %v9054_v63 = vld [vmem:[%s10768_s26 + $0xa8] sm:$0xf]  ;;  %v11684_v26 = vld [vmem:[%s10768_s26 + $0xac] sm:$0xf] }
  0xd8   : > { %16083 = vst [vmem:[#allocation23_spill] sm:$0xff] %v11656_v53  ;;  %v10660_v53 = vld [vmem:[%s10768_s26 + $0x28] sm:$0xf]  ;;  %4691 = vrot.lane.b32.xlu0 %v9386_v12, %s10701_s30  ;;  %16087 = vst [vmem:[#allocation27_spill] sm:$0xff] %v11684_v26  ;;  %v11686_v54 = vrot.slane %v1649_v33, 5  ;;  %v1694_v15 = vshrl.u32 %v9054_v63, 16  ;;  %v9390_v33 = vcombine.low %v11648_v3, %v11668_v40  ;;  %v11714_v3 = vpop.permute.xlu1 %4505 }
  0xd9   : > { %v9319_v59 = vcombine.low %v10659_v52, %v10660_v53  ;;  %v16089_v53 = vshrl.u32 %v11639_v47, 16  ;;  %v1697_v43 = vshll.u32 %v9054_v63, 16  ;;  %v11692_v52 = vrot.slane %v1622_v36, 4  ;;  %v9052_v42 = vld [vmem:[%s10768_s26 + $0x9c] sm:$0xf]  ;;  %16097 = vst [vmem:[#allocation36_spill] sm:$0xff] %v11714_v3 }
  0xda   : > { %16088 = vst [vmem:[#allocation28_spill] sm:$0xff] %v11686_v54  ;;  %v11694_v31 = vrot.slane %v1625_v6, 5  ;;  %v11698_v21 = vrot.slane %v15976_v5, 5  ;;  %v9393_v36 = vcombine.low %v9054_v63, %v11684_v26  ;;  %v11712_v5 = vld [vmem:[%s10768_s26 + $0xa0] sm:$0xf]  ;;  %v15983_v8 = vshrl.u32 %v11684_v26, 16 }
  0xdb   : > { %v11690_v12 = vrot.slane %v16089_v53, 5  ;;  %16091 = vst [vmem:[#allocation30_spill] sm:$0xff] %v11692_v52  ;;  %v11703_v53 = vpop.permute.xlu0 %4451  ;;  %4701 = vrot.lane.b32.xlu1 %v9391_v62, %s10701_s30  ;;  %v11708_v6 = vsel %vm5623_vm9, %v9319_v59, %v11416_v38  ;;  %16096 = vst [vmem:[#allocation35_spill] sm:$0xff] %v11712_v5  ;;  %v11719_v62 = vsel %vm5623_vm9, %v9317_v11, %v11433_v50  ;;  %v10663_v38 = vld [vmem:[%s10768_s26 + $0x3c] sm:$0xf]  ;;  %v11730_v3 = vrot.slane %v1694_v15, 4 }
  0xdc   : > { %16092 = vst [vmem:[#allocation31_spill] sm:$0xff] %v11694_v31  ;;  %16093 = vst [vmem:[#allocation32_spill] sm:$0xff] %v11698_v21  ;;  %v1673_v21 = vshll.u32 %v9052_v42, 16  ;;  %4695 = vrot.lane.b32.xlu0 %v9388_v24, %s10701_s30  ;;  %v10664_v59 = vld [vmem:[%s10768_s26 + $0x40] sm:$0xf]  ;;  %v11732_v47 = vrot.slane %v1697_v43, 5 }
  0xdd   : > { %16090 = vst [vmem:[#allocation29_spill] sm:$0xff] %v11690_v12  ;;  %16094 = vst [vmem:[#allocation33_spill] sm:$0xff] %v11703_v53  ;;  %v1670_v12 = vshrl.u32 %v9052_v42, 16  ;;  %v10665_v40 = vld [vmem:[%s10768_s26 + $0x30] sm:$0xf]  ;;  %v11737_v11 = vrot.slane %v15983_v8, 5 }
  0xde   : > { %16095 = vst [vmem:[#allocation34_spill] sm:$0xff] %v11708_v6  ;;  %16098 = vst [vmem:[#allocation37_spill] sm:$0xff] %v11719_v62  ;;  %v9321_v6 = vcombine.low %v10663_v38, %v10664_v59  ;;  %v10666_v63 = vld [vmem:[%s10768_s26 + $0x34] sm:$0xf]  ;;  %v9058_v52 = vld [vmem:[%s10768_s26 + $0xc0] sm:$0xf] }
  0xdf   : > { %v9320_v31 = vcombine.low %v10665_v40, %v10666_v63  ;;  %v11728_v53 = vld [vmem:[%s10768_s26 + $0xc4] sm:$0xf]  ;;  %v1742_v24 = vshrl.u32 %v9058_v52, 16  ;;  %v1745_v54 = vshll.u32 %v9058_v52, 16  ;;  %v9056_v50 = vld [vmem:[%s10768_s26 + $0xb4] sm:$0xf]  ;;  %v9392_v40 = vcombine.low %v9052_v42, %v11712_v5  ;;  %4705 = vrot.lane.b32.xlu1 %v9393_v36, %s10701_s30 }
  0xe0   : > { %16099 = vst [vmem:[#allocation38_spill] sm:$0xff] %v11728_v53  ;;  %16100 = vst [vmem:[#allocation39_spill] sm:$0xff] %v11737_v11  ;;  %v15984_v38 = vshrl.u32 %v11712_v5, 16  ;;  %v1718_v59 = vshrl.u32 %v9056_v50, 16  ;;  %v11742_v63 = vrot.slane %v1670_v12, 4  ;;  %v11744_v15 = vrot.slane %v1673_v21, 5  ;;  %4699 = vrot.lane.b32.xlu0 %v9390_v33, %s10701_s30 }
  0xe1   : > { %v9395_v62 = vcombine.low %v9058_v52, %v11728_v53  ;;  %v11749_v26 = vld [vmem:[%s10768_s26 + $0x20] sm:$0x1]  ;;  %v11758_v42 = vsel %vm5623_vm9, %v9321_v6, %v11441_v56  ;;  %v11762_v12 = vsel %vm5623_vm9, %v9320_v31, %v11455_v14  ;;  %v11764_v21 = vrot.slane %v1742_v24, 4  ;;  %v11767_v36 = vld [vmem:[%s10768_s26 + $0xb8] sm:$0xf]  ;;  %v11769_v52 = vpop.permute.xlu0 %4503  ;;  %v11783_v14 = vpop.permute.xlu1 %4509 }
  0xe2   : > { %16101 = vst [vmem:[#allocation40_spill] sm:$0xff] %v11749_v26  ;;  %v11754_v8 = vrot.slane %v15984_v38, 5  ;;  %16103 = vst [vmem:[#allocation42_spill] sm:$0xff] %v11758_v42  ;;  %v11771_v43 = vrot.slane %v1745_v54, 5  ;;  %v16107_v33 = vshrl.u32 %v11728_v53, 16  ;;  %v1412_v56 = vor.u32 %v11496_v27, %v11491_v17 }
  0xe3   : > { %16104 = vst [vmem:[#allocation43_spill] sm:$0xff] %v11762_v12  ;;  %16105 = vst [vmem:[#allocation44_spill] sm:$0xff] %v11767_v36  ;;  %v15988_v6 = vshll.u32 %v11468_v34, 16  ;;  %v11781_v11 = vld [vmem:[%s10768_s26 + $0x14] sm:$0x1]  ;;  %v11785_v31 = vrot.slane %v1718_v59, 4  ;;  %4709 = vrot.lane.b32.xlu1 %v9395_v62, %s10701_s30  ;;  %v1388_v59 = vor.u32 %v11512_v35, %v11510_v0 }
  0xe4   : > { %16102 = vst [vmem:[#allocation41_spill] sm:$0xff] %v11754_v8  ;;  %16106 = vst [vmem:[#allocation45_spill] sm:$0xff] %v11771_v43  ;;  %v11775_v38 = vrot.slane %v16107_v33, 5  ;;  %v1721_v24 = vshll.u32 %v9056_v50, 16  ;;  %v16112_v54 = vshrl.u32 %v11468_v34, 16  ;;  %v1425_v33 = vshll.u32 %v11749_v26, 16  ;;  %4703 = vrot.lane.b32.xlu0 %v9392_v40, %s10701_s30 }
  0xe5   : > { %16109 = vst [vmem:[#allocation47_spill] sm:$0xff] %v11781_v11  ;;  %16110 = vst [vmem:[#allocation48_spill] sm:$0xff] %v11783_v14  ;;  %v1413_v27 = vrot.slane %v1412_v56, 4  ;;  %v15992_v12 = vshll.u32 %v11476_v28, 16  ;;  %v16113_v62 = vshrl.u32 %v11476_v28, 16  ;;  %v1401_v17 = vshll.u32 %v11781_v11, 16  ;;  %v11815_v11 = vpop.permute.xlu0 %4507 }
  0xe6   : > { %16108 = vst [vmem:[#allocation46_spill] sm:$0xff] %v11775_v38  ;;  %16111 = vst [vmem:[#allocation49_spill] sm:$0xff] %v11785_v31  ;;  %v1421_v8 = vrot.slane %v16112_v54, 4  ;;  %v1417_v38 = vrot.slane %v15988_v6, 5  ;;  %v9394_v54 = vcombine.low %v9056_v50, %v11767_v36  ;;  %v10667_v56 = vld [vmem:[%s10768_s26 + $0x54] sm:$0xf] }
  0xe7   : > { %v1397_v42 = vrot.slane %v16113_v62, 4  ;;  %v10668_v26 = vld [vmem:[%s10768_s26 + $0x58] sm:$0xf]  ;;  %v1427_v6 = vrot.slane %v1425_v33, 5  ;;  %v1389_v31 = vrot.slane %v1388_v59, 4  ;;  %v11804_v53 = vrot.slane %v1721_v24, 5 }
  0xe8   : > { %v9323_v34 = vcombine.low %v10667_v56, %v10668_v26  ;;  %v1422_v14 = vor.u32 %v1421_v8, %v1417_v38  ;;  %v10669_v0 = vld [vmem:[%s10768_s26 + $0x48] sm:$0xf]  ;;  %v10670_v35 = vld [vmem:[%s10768_s26 + $0x4c] sm:$0xf]  ;;  %v1393_v50 = vrot.slane %v15992_v12, 5  ;;  %v1460_v62 = vor.u32 %v11522_v30, %v11520_v1  ;;  %v11822_v56 = vpop.permute.xlu1 %4513  ;;  %4707 = vrot.lane.b32.xlu0 %v9394_v54, %s10701_s30 }
  0xe9   : > { %v9322_v40 = vcombine.low %v10669_v0, %v10670_v35  ;;  %v11811_v43 = vld [vmem:[%s10768_s26 + $0x38] sm:$0x1]  ;;  %v1418_v8 = vsel %vm10796_vm2, %v1413_v27, %v1417_v38  ;;  %v15993_v24 = vshll.u32 %v11484_v46, 16  ;;  %v16115_v33 = vshrl.u32 %v11484_v46, 16  ;;  %16116 = vst [vmem:[#allocation51_spill] sm:$0xff] %v11822_v56 }
  0xea   : > { %16114 = vst [vmem:[#allocation50_spill] sm:$0xff] %v11811_v43  ;;  %v1423_v26 = vrot.slane %v1422_v14, 4  ;;  %v16117_v0 = vshrl.u32 %v11767_v36, 16  ;;  %v1394_v1 = vsel %vm10796_vm2, %v1389_v31, %v1393_v50  ;;  %v1398_v30 = vor.u32 %v1397_v42, %v1393_v50  ;;  %v11837_v56 = vld [vmem:[%s10768_s26 + $0x2c] sm:$0x1] }
  0xeb   : > { %v1469_v59 = vrot.slane %v16115_v33, 4  ;;  %v1403_v38 = vrot.slane %v1401_v17, 5  ;;  %v1461_v27 = vrot.slane %v1460_v62, 4  ;;  %v1465_v33 = vrot.slane %v15993_v24, 5  ;;  %v10671_v31 = vld [vmem:[%s10768_s26 + $0x6c] sm:$0xf] }
  0xec   : > { %v11826_v35 = vrot.slane %v16117_v0, 5  ;;  %v1428_v14 = vsel %vm10796_vm2, %v1423_v26, %v1427_v6  ;;  %v1473_v12 = vshll.u32 %v11811_v43, 16  ;;  %v1436_v54 = vor.u32 %v11542_v55, %v11540_v18  ;;  %v10672_v17 = vld [vmem:[%s10768_s26 + $0x70] sm:$0xf] }
  0xed   : > { %v9397_v0 = vcombine.low %v1418_v8, %v1428_v14  ;;  %v1439_v42 = vshll.u32 %v11494_v9, 16  ;;  %v9325_v6 = vcombine.low %v10671_v31, %v10672_v17  ;;  %v1470_v50 = vor.u32 %v1469_v59, %v1465_v33  ;;  %v11850_v14 = vpop.permute.xlu0 %4511  ;;  %v10673_v31 = vld [vmem:[%s10768_s26 + $0x60] sm:$0xf]  ;;  %v10674_v59 = vld [vmem:[%s10768_s26 + $0x64] sm:$0xf] }
  0xee   : > { %16118 = vst [vmem:[#allocation52_spill] sm:$0xff] %v11826_v35  ;;  %v1399_v35 = vrot.slane %v1398_v30, 4  ;;  %v1475_v62 = vrot.slane %v1473_v12, 5  ;;  %v16119_v26 = vshrl.u32 %v11494_v9, 16  ;;  %v1437_v18 = vrot.slane %v1436_v54, 4  ;;  %v11856_v9 = vpop.permute.xlu1 %4517 }
  0xef   : > { %4761 = vrot.lane.b32.xlu1 %v9397_v0, %s10702_s7  ;;  %v1441_v55 = vrot.slane %v1439_v42, 5  ;;  %v1449_v30 = vshll.u32 %v11837_v56, 16  ;;  %v9324_v12 = vcombine.low %v10673_v31, %v10674_v59  ;;  %v1466_v17 = vsel %vm10796_vm2, %v1461_v27, %v1465_v33  ;;  %v11867_v54 = vld [vmem:[%s10768_s26 + $0x50] sm:$0x1] }
  0xf0   : > { %v1445_v24 = vrot.slane %v16119_v26, 4  ;;  %v1404_v8 = vsel %vm10796_vm2, %v1399_v35, %v1403_v38  ;;  %v1471_v26 = vrot.slane %v1470_v50, 4  ;;  %v11860_v35 = vsel %vm5623_vm9, %v9323_v34, %v11457_v16 }
  0xf1   : > { %v9396_v43 = vcombine.low %v1394_v1, %v1404_v8  ;;  %v11864_v38 = vsel %vm5623_vm9, %v9322_v40, %v11470_v22  ;;  %v1451_v1 = vrot.slane %v1449_v30, 5  ;;  %v11872_v27 = vsel %vm5623_vm9, %v9325_v6, %v11479_v60  ;;  %v11901_v31 = vpop.permute.xlu0 %4515 }
  0xf2   : > { %v1446_v0 = vor.u32 %v1445_v24, %v1441_v55  ;;  %v1476_v33 = vsel %vm10796_vm2, %v1471_v26, %v1475_v62  ;;  %v1508_v16 = vor.u32 %v11559_v49, %v11554_v58  ;;  %v15996_v34 = vshll.u32 %v11507_v19, 16  ;;  %v11891_v62 = vld [vmem:[%s10768_s26 + $0x44] sm:$0x1] }
  0xf3   : > { %4759 = vrot.lane.b32.xlu0 %v9396_v43, %s10702_s7  ;;  %v9399_v22 = vcombine.low %v1466_v17, %v1476_v33  ;;  %v1442_v40 = vsel %vm10796_vm2, %v1437_v18, %v1441_v55  ;;  %v16120_v43 = vshrl.u32 %v11507_v19, 16  ;;  %v11885_v60 = vsel %vm5623_vm9, %v9324_v12, %v11518_v57  ;;  %v10675_v12 = vld [vmem:[%s10768_s26 + $0x84] sm:$0xf]  ;;  %v10676_v17 = vld [vmem:[%s10768_s26 + $0x88] sm:$0xf] }
  0xf4   : > { %v1447_v24 = vrot.slane %v1446_v0, 4  ;;  %v1509_v6 = vrot.slane %v1508_v16, 4  ;;  %v1513_v58 = vrot.slane %v15996_v34, 5  ;;  %v1521_v49 = vshll.u32 %v11867_v54, 16 }
  0xf5   : > { %v1517_v50 = vrot.slane %v16120_v43, 4  ;;  %4765 = vrot.lane.b32.xlu1 %v9399_v22, %s10702_s7  ;;  %v1484_v18 = vor.u32 %v11580_v13, %v11570_v61  ;;  %v1487_v55 = vshll.u32 %v11529_v23, 16  ;;  %v16121_v57 = vshrl.u32 %v11529_v23, 16 }
  0xf6   : > { %v1452_v8 = vsel %vm10796_vm2, %v1447_v24, %v1451_v1  ;;  %v9327_v26 = vcombine.low %v10675_v12, %v10676_v17  ;;  %v1523_v33 = vrot.slane %v1521_v49, 5  ;;  %v11905_v1 = vpop.permute.xlu1 %4521  ;;  %v16122_v61 = vshll.u32 %v11484_v46, 16 }
  0xf7   : > { %v1493_v30 = vrot.slane %v16121_v57, 4  ;;  %v9398_v59 = vcombine.low %v1442_v40, %v1452_v8  ;;  %v1518_v0 = vor.u32 %v1517_v50, %v1513_v58  ;;  %v1485_v16 = vrot.slane %v1484_v18, 4  ;;  %v10677_v8 = vld [vmem:[%s10768_s26 + $0x78] sm:$0xf]  ;;  %v10678_v57 = vld [vmem:[%s10768_s26 + $0x7c] sm:$0xf] }
  0xf8   : > { %v11909_v13 = vrot.slane %v16122_v61, 6  ;;  %v1489_v22 = vrot.slane %v1487_v55, 5  ;;  %v1497_v24 = vshll.u32 %v11891_v62, 16  ;;  %v11912_v43 = vrot.slane %v1439_v42, 6  ;;  %v11922_v61 = vld [vmem:[%s10768_s26 + $0x68] sm:$0x1] }
  0xf9   : > { %4763 = vrot.lane.b32.xlu0 %v9398_v59, %s10702_s7  ;;  %v1514_v40 = vsel %vm10796_vm2, %v1509_v6, %v1513_v58  ;;  %v1519_v50 = vrot.slane %v1518_v0, 4  ;;  %v1556_v49 = vor.u32 %v11595_v44, %v11593_v48  ;;  %v9326_v12 = vcombine.low %v10677_v8, %v10678_v57  ;;  %16125 = vst [vmem:[#allocation55_spill] sm:$0xff] %v11922_v61  ;;  %v11937_v57 = vpop.permute.xlu0 %4519 }
  0xfa   : > { %16123 = vst [vmem:[#allocation53_spill] sm:$0xff] %v11909_v13  ;;  %16124 = vst [vmem:[#allocation54_spill] sm:$0xff] %v11912_v43  ;;  %v1494_v18 = vor.u32 %v1493_v30, %v1489_v22  ;;  %v1499_v17 = vrot.slane %v1497_v24, 5  ;;  %v15997_v42 = vshll.u32 %v11547_v29, 16  ;;  %v11927_v59 = vsel %vm5623_vm9, %v9327_v26, %v11531_v45  ;;  %v10679_v45 = vld [vmem:[%s10768_s26 + $0x9c] sm:$0xf] }
  0xfb   : > { %v1524_v6 = vsel %vm10796_vm2, %v1519_v50, %v1523_v33  ;;  %v1490_v48 = vsel %vm10796_vm2, %v1485_v16, %v1489_v22  ;;  %v1557_v44 = vrot.slane %v1556_v49, 4  ;;  %v16126_v24 = vshrl.u32 %v11547_v29, 16  ;;  %v10680_v26 = vld [vmem:[%s10768_s26 + $0xa0] sm:$0xf]  ;;  %v11943_v50 = vld [vmem:[%s10768_s26 + $0x5c] sm:$0x1] }
  0xfc   : > { %v9401_v58 = vcombine.low %v1514_v40, %v1524_v6  ;;  %v1495_v30 = vrot.slane %v1494_v18, 4  ;;  %v1561_v0 = vrot.slane %v15997_v42, 5  ;;  %v9329_v34 = vcombine.low %v10679_v45, %v10680_v26  ;;  %16127 = vst [vmem:[#allocation56_spill] sm:$0xff] %v11943_v50  ;;  %v11948_v40 = vpop.permute.xlu1 %4525  ;;  %v10681_v18 = vld [vmem:[%s10768_s26 + $0x90] sm:$0xf] }
  0xfd   : > { %v1565_v8 = vrot.slane %v16126_v24, 4  ;;  %v1569_v33 = vshll.u32 %v11922_v61, 16  ;;  %v1532_v16 = vor.u32 %v11610_v20, %v11605_v32  ;;  %v1535_v22 = vshll.u32 %v11567_v39, 16  ;;  %v10682_v6 = vld [vmem:[%s10768_s26 + $0x94] sm:$0xf] }
  0xfe   : > { %4769 = vrot.lane.b32.xlu1 %v9401_v58, %s10702_s7  ;;  %v1500_v49 = vsel %vm10796_vm2, %v1495_v30, %v1499_v17  ;;  %v9328_v24 = vcombine.low %v10681_v18, %v10682_v6  ;;  %v16128_v26 = vshrl.u32 %v11567_v39, 16  ;;  %v11959_v61 = vsel %vm5623_vm9, %v9326_v12, %v11577_v41 }
  0xff   : > { %v1566_v45 = vor.u32 %v1565_v8, %v1561_v0  ;;  %v9400_v13 = vcombine.low %v1490_v48, %v1500_v49  ;;  %v1571_v43 = vrot.slane %v1569_v33, 5  ;;  %v1533_v32 = vrot.slane %v1532_v16, 4  ;;  %v11972_v33 = vld [vmem:[%s10768_s26 + $0x80] sm:$0x1]  ;;  %v11983_v16 = vpop.permute.xlu0 %4523 }
 0x100   : > { %v1541_v42 = vrot.slane %v16128_v26, 4  ;;  %v1537_v20 = vrot.slane %v1535_v22, 5  ;;  %v1562_v58 = vsel %vm10796_vm2, %v1557_v44, %v1561_v0  ;;  %v1545_v30 = vshll.u32 %v11943_v50, 16  ;;  %16132 = vst [vmem:[#allocation59_spill] sm:$0xff] %v11972_v33 }
 0x101   : > { %v1567_v17 = vrot.slane %v1566_v45, 4  ;;  %v16129_v18 = vshll.u32 %v11507_v19, 16  ;;  %v11968_v6 = vrot.slane %v1487_v55, 6  ;;  %4767 = vrot.lane.b32.xlu0 %v9400_v13, %s10702_s7  ;;  %v1604_v41 = vor.u32 %v11624_v51, %v11622_v4  ;;  %v11991_v4 = vpop.permute.xlu1 %4529 }
 0x102   : > { %v1542_v48 = vor.u32 %v1541_v42, %v1537_v20  ;;  %v11978_v12 = vsel %vm5623_vm9, %v9329_v34, %v11586_v37  ;;  %v1547_v0 = vrot.slane %v1545_v30, 5  ;;  %v15999_v55 = vshll.u32 %v11584_v2, 16 }
 0x103   : > { %v11966_v8 = vrot.slane %v16129_v18, 6  ;;  %16131 = vst [vmem:[#allocation58_spill] sm:$0xff] %v11968_v6  ;;  %v1572_v44 = vsel %vm10796_vm2, %v1567_v17, %v1571_v43  ;;  %v11987_v13 = vsel %vm5623_vm9, %v9328_v24, %v11641_v10  ;;  %v1538_v51 = vsel %vm10796_vm2, %v1533_v32, %v1537_v20  ;;  %v11999_v24 = vld [vmem:[%s10768_s26 + $0x74] sm:$0x1]  ;;  %v16136_v32 = vld [vmem:[#allocation20_spill] sm:$0xff]  ;;  %v16138_v17 = vld [vmem:[#allocation17_spill] sm:$0xff] }
 0x104   : > { %16133 = vst [vmem:[#allocation60_spill] sm:$0xff] %v11987_v13  ;;  %v9403_v42 = vcombine.low %v1562_v58, %v1572_v44  ;;  %v1543_v37 = vrot.slane %v1542_v48, 4  ;;  %v1605_v34 = vrot.slane %v1604_v41, 4  ;;  %v1609_v43 = vrot.slane %v15999_v55, 5  ;;  %16135 = vst [vmem:[#allocation61_spill] sm:$0xff] %v11999_v24  ;;  %v16137_v20 = vld [vmem:[#allocation22_spill] sm:$0xff] }
 0x105   : > { %16130 = vst [vmem:[#allocation57_spill] sm:$0xff] %v11966_v8  ;;  %v16134_v49 = vshrl.u32 %v11584_v2, 16  ;;  %v1617_v10 = vshll.u32 %v11972_v33, 16  ;;  %v1580_v58 = vor.u32 %v16137_v20, %v16136_v32  ;;  %v16002_v30 = vshll.u32 %v16138_v17, 16  ;;  %v10683_v44 = vld [vmem:[%s10768_s26 + $0xb4] sm:$0xf] }
 0x106   : > { %4773 = vrot.lane.b32.xlu1 %v9403_v42, %s10702_s7  ;;  %v1548_v26 = vsel %vm10796_vm2, %v1543_v37, %v1547_v0  ;;  %v16139_v18 = vshrl.u32 %v16138_v17, 16  ;;  %v10685_v33 = vld [vmem:[%s10768_s26 + $0xa8] sm:$0xf]  ;;  %v10686_v42 = vld [vmem:[%s10768_s26 + $0xac] sm:$0xf]  ;;  %v1593_v37 = vshll.u32 %v11999_v24, 16  ;;  %v1610_v32 = vsel %vm10796_vm2, %v1605_v34, %v1609_v43  ;;  %v12033_v34 = vpop.permute.xlu1 %4533 }
 0x107   : > { %v1613_v45 = vrot.slane %v16134_v49, 4  ;;  %v9402_v41 = vcombine.low %v1538_v51, %v1548_v26  ;;  %v10684_v49 = vld [vmem:[%s10768_s26 + $0xb8] sm:$0xf]  ;;  %v1619_v6 = vrot.slane %v1617_v10, 5  ;;  %v9330_v13 = vcombine.low %v10685_v33, %v10686_v42 }
 0x108   : > { %v1589_v48 = vrot.slane %v16139_v18, 4  ;;  %v9331_v55 = vcombine.low %v10683_v44, %v10684_v49  ;;  %v1581_v50 = vrot.slane %v1580_v58, 4  ;;  %v1585_v0 = vrot.slane %v16002_v30, 5  ;;  %v12020_v26 = vld [vmem:[%s10768_s26 + $0x98] sm:$0x1]  ;;  %v12025_v58 = vpop.permute.xlu0 %4527 }
 0x109   : > { %v1614_v8 = vor.u32 %v1613_v45, %v1609_v43  ;;  %4771 = vrot.lane.b32.xlu0 %v9402_v41, %s10702_s7  ;;  %16140 = vst [vmem:[#allocation20_spill] sm:$0xff] %v12020_v26  ;;  %v16141_v45 = vld [vmem:[#allocation28_spill] sm:$0xff]  ;;  %v16142_v20 = vld [vmem:[#allocation19_spill] sm:$0xff]  ;;  %v16143_v18 = vshll.u32 %v11547_v29, 16  ;;  %v12031_v49 = vrot.slane %v1535_v22, 6  ;;  %v1595_v42 = vrot.slane %v1593_v37, 5 }
 0x10a   : > { %v1652_v10 = vor.u32 %v16141_v45, %v11677_v7  ;;  %v16004_v33 = vshll.u32 %v16142_v20, 16  ;;  %v1590_v41 = vor.u32 %v1589_v48, %v1585_v0  ;;  %v1586_v7 = vsel %vm10796_vm2, %v1581_v50, %v1585_v0  ;;  %v12045_v37 = vld [vmem:[%s10768_s26 + $0x8c] sm:$0x1]  ;;  %v16151_v0 = vld [vmem:[#allocation30_spill] sm:$0xff] }
 0x10b   : > { %v1615_v51 = vrot.slane %v1614_v8, 4  ;;  %v12029_v44 = vrot.slane %v16143_v18, 6  ;;  %16145 = vst [vmem:[#allocation17_spill] sm:$0xff] %v12031_v49  ;;  %v16146_v18 = vshrl.u32 %v16142_v20, 16  ;;  %v1665_v48 = vshll.u32 %v12020_v26, 16  ;;  %16147 = vst [vmem:[#allocation28_spill] sm:$0xff] %v12045_v37 }
 0x10c   : > { %v1653_v43 = vrot.slane %v1652_v10, 4  ;;  %v1657_v45 = vrot.slane %v16004_v33, 5  ;;  %v1591_v24 = vrot.slane %v1590_v41, 4  ;;  %v16152_v10 = vld [vmem:[#allocation31_spill] sm:$0xff]  ;;  %v16153_v41 = vld [vmem:[#allocation25_spill] sm:$0xff] }
 0x10d   : > { %16144 = vst [vmem:[#allocation22_spill] sm:$0xff] %v12029_v44  ;;  %v1620_v8 = vsel %vm10796_vm2, %v1615_v51, %v1619_v6  ;;  %v1661_v22 = vrot.slane %v16146_v18, 4  ;;  %v16148_v44 = vld [vmem:[#allocation21_spill] sm:$0xff]  ;;  %v1667_v49 = vrot.slane %v1665_v48, 5  ;;  %v16154_v26 = vshrl.u32 %v16153_v41, 16 }
 0x10e   : > { %v9405_v30 = vcombine.low %v1610_v32, %v1620_v8  ;;  %v12049_v6 = vsel %vm5623_vm9, %v9331_v55, %v16148_v44  ;;  %v16150_v51 = vld [vmem:[#allocation33_spill] sm:$0xff]  ;;  %v1628_v32 = vor.u32 %v16152_v10, %v16151_v0  ;;  %v16006_v8 = vshll.u32 %v16153_v41, 16  ;;  %v12067_v0 = vld [vmem:[%s10768_s26 + $0xb0] sm:$0x1]  ;;  %v12069_v10 = vpop.permute.xlu0 %4531 }
 0x10f   : > { %16149 = vst [vmem:[#allocation19_spill] sm:$0xff] %v12049_v6  ;;  %v12053_v50 = vsel %vm5623_vm9, %v9330_v13, %v16150_v51  ;;  %v1596_v18 = vsel %vm10796_vm2, %v1591_v24, %v1595_v42  ;;  %v1662_v33 = vor.u32 %v1661_v22, %v1657_v45  ;;  %v1637_v55 = vrot.slane %v16154_v26, 4  ;;  %16155 = vst [vmem:[#allocation21_spill] sm:$0xff] %v12067_v0 }
 0x110   : > { %4777 = vrot.lane.b32.xlu1 %v9405_v30, %s10702_s7  ;;  %v9404_v44 = vcombine.low %v1586_v7, %v1596_v18  ;;  %v1629_v6 = vrot.slane %v1628_v32, 4  ;;  %v1633_v13 = vrot.slane %v16006_v8, 5  ;;  %v1641_v51 = vshll.u32 %v12045_v37, 16  ;;  %v12077_v7 = vpop.permute.xlu1 %4585  ;;  %v16159_v8 = vld [vmem:[#allocation27_spill] sm:$0xff] }
 0x111   : > { %v16156_v30 = vshll.u32 %v11584_v2, 16  ;;  %v1658_v26 = vsel %vm10796_vm2, %v1653_v43, %v1657_v45  ;;  %v1663_v42 = vrot.slane %v1662_v33, 4  ;;  %16158 = vst [vmem:[#allocation30_spill] sm:$0xff] %v12077_v7  ;;  %v1700_v18 = vor.u32 %v11732_v47, %v11730_v3  ;;  %v12091_v7 = vld [vmem:[%s10768_s26 + $0xa4] sm:$0x1] }
 0x112   : > { %4775 = vrot.lane.b32.xlu0 %v9404_v44, %s10702_s7  ;;  %v1634_v22 = vsel %vm10796_vm2, %v1629_v6, %v1633_v13  ;;  %v1638_v48 = vor.u32 %v1637_v55, %v1633_v13  ;;  %v1643_v32 = vrot.slane %v1641_v51, 5  ;;  %v16160_v43 = vshrl.u32 %v16159_v8, 16  ;;  %16161 = vst [vmem:[#allocation31_spill] sm:$0xff] %v12091_v7  ;;  %v16165_v13 = vld [vmem:[#allocation37_spill] sm:$0xff] }
 0x113   : > { %v12073_v24 = vrot.slane %v16156_v30, 6  ;;  %v1668_v30 = vsel %vm10796_vm2, %v1663_v42, %v1667_v49  ;;  %v1713_v45 = vshll.u32 %v12067_v0, 16  ;;  %v1701_v6 = vrot.slane %v1700_v18, 4  ;;  %v16164_v49 = vld [vmem:[#allocation36_spill] sm:$0xff] }
 0x114   : > { %v1709_v33 = vrot.slane %v16160_v43, 4  ;;  %v9407_v44 = vcombine.low %v1658_v26, %v1668_v30  ;;  %v1639_v37 = vrot.slane %v1638_v48, 4  ;;  %v1676_v55 = vor.u32 %v11744_v15, %v11742_v63  ;;  %v12111_v30 = vpop.permute.xlu0 %4583  ;;  %v12116_v0 = vpop.permute.xlu1 %4589 }
 0x115   : > { %16157 = vst [vmem:[#allocation33_spill] sm:$0xff] %v12073_v24  ;;  %v1703_v24 = vshll.u32 %v16159_v8, 16  ;;  %v16162_v47 = vshll.u32 %v16138_v17, 16  ;;  %v12102_v8 = vsel %vm253_vm10, %v16165_v13, %v16164_v49  ;;  %v1679_v42 = vshll.u32 %v11712_v5, 16  ;;  %16168 = vst [vmem:[#allocation36_spill] sm:$0xff] %v12116_v0  ;;  %v16173_v0 = vld [vmem:[#allocation45_spill] sm:$0xff] }
 0x116   : > { %4781 = vrot.lane.b32.xlu1 %v9407_v44, %s10702_s7  ;;  %v1644_v26 = vsel %vm10796_vm2, %v1639_v37, %v1643_v32  ;;  %v1677_v48 = vrot.slane %v1676_v55, 4  ;;  %v16166_v63 = vshrl.u32 %v11712_v5, 16  ;;  %v1689_v18 = vshll.u32 %v12091_v7, 16  ;;  %v16169_v44 = vld [vmem:[#allocation26_spill] sm:$0xff] }
 0x117   : > { %v12097_v3 = vrot.slane %v16162_v47, 6  ;;  %v1705_v51 = vrot.slane %v1703_v24, 5  ;;  %v9406_v43 = vcombine.low %v1634_v22, %v1644_v26  ;;  %v1715_v49 = vrot.slane %v1713_v45, 5 }
 0x118   : > { %v1685_v15 = vrot.slane %v16166_v63, 4  ;;  %v1681_v13 = vrot.slane %v1679_v42, 5  ;;  %v12121_v37 = vsel %vm253_vm10, %v16169_v44, %v11769_v52  ;;  %v16171_v32 = vshll.u32 %v16142_v20, 16  ;;  %v16174_v44 = vld [vmem:[#allocation38_spill] sm:$0xff] }
 0x119   : > { %16163 = vst [vmem:[#allocation25_spill] sm:$0xff] %v12097_v3  ;;  %v1710_v47 = vor.u32 %v1709_v33, %v1705_v51  ;;  %v12114_v3 = vld [vmem:[%s10768_s26 + $0xc8] sm:$0x1]  ;;  %16170 = vst [vmem:[#allocation37_spill] sm:$0xff] %v12121_v37  ;;  %v1706_v22 = vsel %vm10796_vm2, %v1701_v6, %v1705_v51  ;;  %v1691_v33 = vrot.slane %v1689_v18, 5  ;;  %4779 = vrot.lane.b32.xlu0 %v9406_v43, %s10702_s7  ;;  %v1751_v7 = vshll.u32 %v16174_v44, 16 }
 0x11a   : > { %16167 = vst [vmem:[#allocation27_spill] sm:$0xff] %v12114_v3  ;;  %v12125_v55 = vrot.slane %v16171_v32, 6  ;;  %v1682_v26 = vsel %vm10796_vm2, %v1677_v48, %v1681_v13  ;;  %v1686_v63 = vor.u32 %v1685_v15, %v1681_v13  ;;  %v1748_v52 = vor.u32 %v16173_v0, %v11764_v21  ;;  %v16176_v37 = vld [vmem:[#allocation49_spill] sm:$0xff]  ;;  %v12143_v15 = vld [vmem:[%s10768_s26 + $0xbc] sm:$0x1] }
 0x11b   : > { %v1711_v45 = vrot.slane %v1710_v47, 4  ;;  %v16175_v5 = vshrl.u32 %v16174_v44, 16  ;;  %v1724_v6 = vor.u32 %v11804_v53, %v16176_v37  ;;  %16177 = vst [vmem:[#allocation45_spill] sm:$0xff] %v12143_v15  ;;  %v1727_v21 = vshll.u32 %v11767_v36, 16  ;;  %v16181_v47 = vld [vmem:[#allocation34_spill] sm:$0xff]  ;;  %v12155_v44 = vpop.permute.xlu0 %4587 }
 0x11c   : > { %16172 = vst [vmem:[#allocation26_spill] sm:$0xff] %v12125_v55  ;;  %v1761_v55 = vshll.u32 %v12114_v3, 16  ;;  %v1687_v18 = vrot.slane %v1686_v63, 4  ;;  %v1749_v48 = vrot.slane %v1748_v52, 4  ;;  %v16178_v0 = vshll.u32 %v16153_v41, 16  ;;  %16182 = vst [vmem:[#allocation49_spill] sm:$0xff] %v12155_v44 }
 0x11d   : > { %v1757_v32 = vrot.slane %v16175_v5, 4  ;;  %v1716_v51 = vsel %vm10796_vm2, %v1711_v45, %v1715_v49  ;;  %v16180_v5 = vld [vmem:[#allocation48_spill] sm:$0xff]  ;;  %v1753_v37 = vrot.slane %v1751_v7, 5  ;;  %v1725_v45 = vrot.slane %v1724_v6, 4  ;;  %v12169_v44 = vld [vmem:[%s10768_s26 + $0xc] sm:$0xe] }
 0x11e   : > { %v12148_v43 = vrot.slane %v16178_v0, 6  ;;  %v12153_v13 = vsel %vm253_vm10, %v16181_v47, %v16180_v5  ;;  %v9409_v53 = vcombine.low %v1706_v22, %v1716_v51  ;;  %v1692_v49 = vsel %vm10796_vm2, %v1687_v18, %v1691_v33  ;;  %v12162_v0 = vld [vmem:[%s10768_s26 + $0x18] sm:$0xe]  ;;  %16184 = vst [vmem:[#allocation48_spill] sm:$0xff] %v12169_v44  ;;  %v16185_v33 = vld [vmem:[#allocation24_spill] sm:$0xff] }
 0x11f   : > { %v1729_v63 = vrot.slane %v1727_v21, 5  ;;  %v16183_v52 = vshrl.u32 %v11767_v36, 16  ;;  %v9408_v5 = vcombine.low %v1682_v26, %v1692_v49  ;;  %v1758_v47 = vor.u32 %v1757_v32, %v1753_v37 }
 0x120   : > { %16179 = vst [vmem:[#allocation38_spill] sm:$0xff] %v12148_v43  ;;  %v12164_v43 = vpop.permute.xlu1 %4593  ;;  %4785 = vrot.lane.b32.xlu1 %v9409_v53, %s10702_s7  ;;  %v1763_v22 = vrot.slane %v1761_v55, 5  ;;  %v1737_v51 = vshll.u32 %v12143_v15, 16  ;;  %v12174_v6 = vsel %vm253_vm10, %v16185_v33, %v11815_v11  ;;  %v12176_v18 = vrot.slane %v1703_v24, 6  ;;  %v16188_v15 = vld [vmem:[#allocation8_spill] sm:$0xff] }
 0x121   : > { %v1733_v3 = vrot.slane %v16183_v52, 4  ;;  %16186 = vst [vmem:[#allocation34_spill] sm:$0xff] %v12174_v6  ;;  %v1754_v52 = vsel %vm10796_vm2, %v1749_v48, %v1753_v37  ;;  %4783 = vrot.lane.b32.xlu0 %v9408_v5, %s10702_s7  ;;  %v1759_v26 = vrot.slane %v1758_v47, 4  ;;  %v1730_v55 = vsel %vm10796_vm2, %v1725_v45, %v1729_v63  ;;  %v16189_v33 = vld [vmem:[#allocation40_spill] sm:$0xff]  ;;  %v16191_v37 = vld [vmem:[#allocation47_spill] sm:$0xff]  ;;  %v12194_v5 = vpop.permute.xlu0 %4591 }
 0x122   : > { %16187 = vst [vmem:[#allocation24_spill] sm:$0xff] %v12176_v18  ;;  %v1739_v32 = vrot.slane %v1737_v51, 5  ;;  %v9093_v53 = vrot.slane %v12162_v0, 9  ;;  %v1838_v11 = vrot.slane %v16188_v15, 5  ;;  %v1841_v24 = vrot.slane %v16189_v33, 5  ;;  %v16194_v15 = vld [vmem:[#allocation42_spill] sm:$0xff] }
 0x123   : > { %v1734_v36 = vor.u32 %v1733_v3, %v1729_v63  ;;  %v9092_v18 = vrot.slane %v12169_v44, 9  ;;  %v12187_v6 = vrot.slane %v1679_v42, 6  ;;  %v1764_v3 = vsel %vm10796_vm2, %v1759_v26, %v1763_v22  ;;  %v9079_v63 = vld [vmem:[%s10768_s26 + $0x30] sm:$0xe] }
 0x124   : > { %v1831_v48 = vrot.slane %v11476_v28, 5  ;;  %v1834_v45 = vrot.slane %v16191_v37, 5  ;;  %v1839_v33 = vsel %vm11079_vm5, %v9093_v53, %v1838_v11  ;;  %v1840_v44 = vrot.slane %v1838_v11, 4  ;;  %v12200_v42 = vpop.permute.xlu1 %4597  ;;  %v16195_v11 = vld [vmem:[#allocation50_spill] sm:$0xff] }
 0x125   : > { %v1735_v49 = vrot.slane %v1734_v36, 4  ;;  %16190 = vst [vmem:[#allocation40_spill] sm:$0xff] %v12187_v6  ;;  %v9411_v36 = vcombine.low %v1754_v52, %v1764_v3  ;;  %v16193_v6 = vld [vmem:[#allocation51_spill] sm:$0xff]  ;;  %v12210_v52 = vld [vmem:[%s10768_s26 + $0x24] sm:$0xe]  ;;  %v9095_v53 = vrot.slane %v9079_v63, 9 }
 0x126   : > { %v12205_v22 = vsel %vm253_vm10, %v16194_v15, %v16193_v6  ;;  %v1832_v37 = vsel %vm11079_vm5, %v9092_v18, %v1831_v48  ;;  %v1833_v28 = vrot.slane %v1831_v48, 4  ;;  %v1855_v3 = vrot.slane %v16195_v11, 5  ;;  %v16196_v15 = vld [vmem:[#allocation43_spill] sm:$0xff] }
 0x127   : > { %v1740_v47 = vsel %vm10796_vm2, %v1735_v49, %v1739_v32  ;;  %4789 = vrot.lane.b32.xlu1 %v9411_v36, %s10702_s7  ;;  %v1842_v32 = vsel %vm11079_vm5, %v1840_v44, %v1841_v24  ;;  %v1852_v49 = vrot.slane %v11484_v46, 5  ;;  %v12220_v6 = vsel %vm253_vm10, %v16196_v15, %v11850_v14  ;;  %v16199_v14 = vld [vmem:[#allocation10_spill] sm:$0xff] }
 0x128   : > { %v9410_v26 = vcombine.low %v1730_v55, %v1740_v47  ;;  %v12222_v18 = vrot.slane %v1751_v7, 6  ;;  %v9413_v55 = vcombine.low %v1839_v33, %v1842_v32  ;;  %v1835_v48 = vsel %vm11079_vm5, %v1833_v28, %v1834_v45  ;;  %v12235_v33 = vpop.permute.xlu0 %4595  ;;  %v9080_v32 = vld [vmem:[%s10768_s26 + $0x3c] sm:$0xe] }
 0x129   : > { %v9412_v44 = vcombine.low %v1832_v37, %v1835_v48  ;;  %v1853_v24 = vsel %vm11079_vm5, %v9095_v53, %v1852_v49  ;;  %v1854_v46 = vrot.slane %v1852_v49, 4  ;;  %v9094_v36 = vrot.slane %v12210_v52, 9  ;;  %v12255_v37 = vpop.permute.xlu1 %4601 }
 0x12a   : > { %16197 = vst [vmem:[#allocation47_spill] sm:$0xff] %v12222_v18  ;;  %4787 = vrot.lane.b32.xlu0 %v9410_v26, %s10702_s7  ;;  %v12230_v47 = vrot.slane %v1727_v21, 6  ;;  %v2027_v11 = vshrl.u32 %v9079_v63, 16  ;;  %v1845_v15 = vrot.slane %v16199_v14, 5  ;;  %v1848_v7 = vrot.slane %v11837_v56, 5  ;;  %v16207_v18 = vld [vmem:[#allocation61_spill] sm:$0xff] }
 0x12b   : > { %v9081_v26 = vld [vmem:[%s10768_s26 + $0x48] sm:$0xe]  ;;  %v12240_v28 = vsel %vm253_vm10, %v11860_v35, %v11856_v9  ;;  %v12245_v45 = vsel %vm253_vm10, %v11864_v38, %v11901_v31  ;;  %4841 = vrot.lane.b32.xlu1 %v9413_v55, %s10703_s8  ;;  %v12251_v56 = vsel %vm253_vm10, %v11872_v27, %v11905_v1  ;;  %v1856_v21 = vsel %vm11079_vm5, %v1854_v46, %v1855_v3  ;;  %v9083_v14 = vld [vmem:[%s10768_s26 + $0x60] sm:$0xe] }
 0x12c   : > { %16198 = vst [vmem:[#allocation6_spill] sm:$0xff] %v12230_v47  ;;  %v2030_v9 = vshll.u32 %v9079_v63, 16  ;;  %v9415_v35 = vcombine.low %v1853_v24, %v1856_v21  ;;  %v1846_v38 = vsel %vm11079_vm5, %v9094_v36, %v1845_v15  ;;  %v1847_v31 = vrot.slane %v1845_v15, 4 }
 0x12d   : > { %v12264_v53 = vsel %vm253_vm10, %v11885_v60, %v11937_v57  ;;  %v2004_v27 = vshrl.u32 %v12210_v52, 16  ;;  %v9097_v1 = vrot.slane %v9081_v26, 9  ;;  %v1866_v49 = vrot.slane %v11507_v19, 5 }
 0x12e   : > { %4839 = vrot.lane.b32.xlu0 %v9412_v44, %s10703_s8  ;;  %v12268_v3 = vrot.slane %v2027_v11, 5  ;;  %v1849_v63 = vsel %vm11079_vm5, %v1847_v31, %v1848_v7  ;;  %v2007_v55 = vshll.u32 %v12210_v52, 16  ;;  %v1869_v48 = vrot.slane %v11867_v54, 5  ;;  %v12282_v52 = vpop.permute.xlu0 %4599  ;;  %v9082_v31 = vld [vmem:[%s10768_s26 + $0x54] sm:$0xe] }
 0x12f   : > { %4845 = vrot.lane.b32.xlu1 %v9415_v35, %s10703_s8  ;;  %v9414_v44 = vcombine.low %v1846_v38, %v1849_v63  ;;  %v1867_v60 = vsel %vm11079_vm5, %v9097_v1, %v1866_v49  ;;  %v1868_v57 = vrot.slane %v1866_v49, 4  ;;  %v9096_v24 = vrot.slane %v9080_v32, 9  ;;  %v16200_v49 = vld [vmem:[#allocation55_spill] sm:$0xff] }
 0x130   : > { %v12277_v46 = vrot.slane %v2030_v9, 6  ;;  %v2073_v19 = vshrl.u32 %v9081_v26, 16  ;;  %v1859_v36 = vrot.slane %v11529_v23, 5  ;;  %v1862_v11 = vrot.slane %v11891_v62, 5  ;;  %v12299_v62 = vpop.permute.xlu1 %4605 }
 0x131   : > { %v12284_v54 = vrot.slane %v2004_v27, 5  ;;  %v12290_v15 = vsel %vm253_vm10, %v11927_v59, %v11948_v40  ;;  %v12295_v7 = vsel %vm253_vm10, %v11959_v61, %v11983_v16  ;;  %v1870_v23 = vsel %vm11079_vm5, %v1868_v57, %v1869_v48 }
 0x132   : > { %4843 = vrot.lane.b32.xlu0 %v9414_v44, %s10703_s8  ;;  %v2076_v21 = vshll.u32 %v9081_v26, 16  ;;  %v9417_v9 = vcombine.low %v1867_v60, %v1870_v23  ;;  %v1860_v35 = vsel %vm11079_vm5, %v9096_v24, %v1859_v36  ;;  %v1861_v38 = vrot.slane %v1859_v36, 4  ;;  %v12325_v36 = vld [vmem:[%s10768_s26 + $0x78] sm:$0xe] }
 0x133   : > { %v12304_v27 = vrot.slane %v2007_v55, 6  ;;  %v2050_v59 = vshrl.u32 %v9080_v32, 16  ;;  %v9099_v40 = vrot.slane %v9083_v14, 9  ;;  %v1880_v61 = vrot.slane %v11547_v29, 5 }
 0x134   : > { %v12307_v16 = vrot.slane %v2073_v19, 5  ;;  %4849 = vrot.lane.b32.xlu1 %v9417_v9, %s10703_s8  ;;  %v1863_v26 = vsel %vm11079_vm5, %v1861_v38, %v1862_v11  ;;  %v2053_v1 = vshll.u32 %v9080_v32, 16  ;;  %v1883_v63 = vrot.slane %v16200_v49, 5  ;;  %v16202_v19 = vld [vmem:[#allocation56_spill] sm:$0xff]  ;;  %v12327_v11 = vpop.permute.xlu0 %4603 }
 0x135   : > { %v9416_v48 = vcombine.low %v1860_v35, %v1863_v26  ;;  %v1881_v55 = vsel %vm11079_vm5, %v9099_v40, %v1880_v61  ;;  %v1882_v44 = vrot.slane %v1880_v61, 4  ;;  %v9098_v60 = vrot.slane %v9082_v31, 9  ;;  %v9084_v61 = vld [vmem:[%s10768_s26 + $0x6c] sm:$0xe] }
 0x136   : > { %v12315_v57 = vrot.slane %v2076_v21, 6  ;;  %v12320_v29 = vsel %vm253_vm10, %v11978_v12, %v11991_v4  ;;  %v1873_v24 = vrot.slane %v11567_v39, 5  ;;  %v1876_v32 = vrot.slane %v16202_v19, 5  ;;  %v16203_v21 = vld [vmem:[#allocation60_spill] sm:$0xff]  ;;  %v12339_v39 = vpop.permute.xlu1 %4609 }
 0x137   : > { %v12329_v23 = vrot.slane %v2050_v59, 5  ;;  %4847 = vrot.lane.b32.xlu0 %v9416_v48, %s10703_s8  ;;  %v12335_v9 = vsel %vm253_vm10, %v16203_v21, %v12025_v58  ;;  %v1884_v12 = vsel %vm11079_vm5, %v1882_v44, %v1883_v63  ;;  %v2119_v4 = vshrl.u32 %v9083_v14, 16 }
 0x138   : > { %16201 = vst [vmem:[#allocation51_spill] sm:$0xff] %v12315_v57  ;;  %v2122_v35 = vshll.u32 %v9083_v14, 16  ;;  %v9419_v38 = vcombine.low %v1881_v55, %v1884_v12  ;;  %v1874_v40 = vsel %vm11079_vm5, %v9098_v60, %v1873_v24  ;;  %v1875_v59 = vrot.slane %v1873_v24, 4  ;;  %v16204_v55 = vld [vmem:[#allocation59_spill] sm:$0xff] }
 0x139   : > { %v12344_v26 = vrot.slane %v2053_v1, 6  ;;  %v2096_v49 = vshrl.u32 %v9082_v31, 16  ;;  %v9101_v58 = vrot.slane %v12325_v36, 9  ;;  %v1894_v48 = vrot.slane %v11584_v2, 5  ;;  %v9124_v57 = vld [vmem:[%s10768_s26 + $0x18] sm:$0xf] }
 0x13a   : > { %4853 = vrot.lane.b32.xlu1 %v9419_v38, %s10703_s8  ;;  %v1877_v63 = vsel %vm11079_vm5, %v1875_v59, %v1876_v32  ;;  %v2099_v14 = vshll.u32 %v9082_v31, 16  ;;  %v1897_v44 = vrot.slane %v16204_v55, 5  ;;  %v2165_v60 = vshrl.u32 %v12325_v36, 16  ;;  %v9087_v31 = vld [vmem:[%s10768_s26 + $0x90] sm:$0xe]  ;;  %v12362_v59 = vpop.permute.xlu0 %4607 }
 0x13b   : > { %v9418_v24 = vcombine.low %v1874_v40, %v1877_v63  ;;  %v1895_v1 = vsel %vm11079_vm5, %v9101_v58, %v1894_v48  ;;  %v1896_v19 = vrot.slane %v1894_v48, 4  ;;  %v9100_v21 = vrot.slane %v9084_v61, 9  ;;  %v16209_v40 = vld [vmem:[#allocation19_spill] sm:$0xff] }
 0x13c   : > { %v12355_v12 = vrot.slane %v2119_v4, 5  ;;  %v12357_v2 = vrot.slane %v2122_v35, 6  ;;  %v1887_v38 = vrot.slane %v16138_v17, 5  ;;  %v1890_v32 = vrot.slane %v16207_v18, 5  ;;  %v12379_v18 = vpop.permute.xlu1 %4613 }
 0x13d   : > { %v12364_v55 = vrot.slane %v2096_v49, 5  ;;  %4851 = vrot.lane.b32.xlu0 %v9418_v24, %s10703_s8  ;;  %v12370_v58 = vsel %vm253_vm10, %v16209_v40, %v12033_v34  ;;  %v12375_v4 = vsel %vm253_vm10, %v12053_v50, %v12069_v10  ;;  %v1898_v17 = vsel %vm11079_vm5, %v1896_v19, %v1897_v44  ;;  %v12386_v24 = vld [vmem:[%s10768_s26 + $0x84] sm:$0xe] }
 0x13e   : > { %16205 = vst [vmem:[#allocation42_spill] sm:$0xff] %v12355_v12  ;;  %16206 = vst [vmem:[#allocation50_spill] sm:$0xff] %v12357_v2  ;;  %v12381_v35 = vrot.slane %v2099_v14, 6  ;;  %v9421_v49 = vcombine.low %v1895_v1, %v1898_v17  ;;  %v1888_v48 = vsel %vm11079_vm5, %v9100_v21, %v1887_v38  ;;  %v1889_v63 = vrot.slane %v1887_v38, 4  ;;  %v16212_v19 = vld [vmem:[#allocation20_spill] sm:$0xff] }
 0x13f   : > { %16208 = vst [vmem:[#allocation43_spill] sm:$0xff] %v12364_v55  ;;  %v12388_v34 = vrot.slane %v2165_v60, 5  ;;  %v2168_v40 = vshll.u32 %v12325_v36, 16  ;;  %v2142_v50 = vshrl.u32 %v9084_v61, 16  ;;  %v9103_v10 = vrot.slane %v9087_v31, 9 }
 0x140   : > { %16210 = vst [vmem:[#allocation10_spill] sm:$0xff] %v12381_v35  ;;  %4857 = vrot.lane.b32.xlu1 %v9421_v49, %s10703_s8  ;;  %v1891_v14 = vsel %vm11079_vm5, %v1889_v63, %v1890_v32  ;;  %v2145_v44 = vshll.u32 %v9084_v61, 16  ;;  %v1908_v1 = vrot.slane %v16142_v20, 5  ;;  %v1911_v21 = vrot.slane %v16212_v19, 5  ;;  %v12398_v36 = vpop.permute.xlu1 %4681  ;;  %v16213_v32 = vld [vmem:[#allocation28_spill] sm:$0xff]  ;;  %v12406_v20 = vpop.permute.xlu0 %4611 }
 0x141   : > { %16211 = vst [vmem:[#allocation55_spill] sm:$0xff] %v12388_v34  ;;  %v9420_v38 = vcombine.low %v1888_v48, %v1891_v14  ;;  %v9102_v60 = vrot.slane %v12386_v24, 9  ;;  %v1901_v17 = vrot.slane %v16153_v41, 5  ;;  %v2211_v34 = vshrl.u32 %v9087_v31, 16  ;;  %v12404_v63 = vld [vmem:[%s10768_s26 + $0xa8] sm:$0xe] }
 0x142   : > { %v1909_v49 = vsel %vm11079_vm5, %v9103_v10, %v1908_v1  ;;  %v1910_v47 = vrot.slane %v1908_v1, 4  ;;  %v1904_v61 = vrot.slane %v16213_v32, 5  ;;  %v12408_v48 = vrot.slane %v2168_v40, 6  ;;  %v16217_v1 = vld [vmem:[#allocation30_spill] sm:$0xff]  ;;  %v10688_v35 = vld [vmem:[%s10768_s26 + $0xc4] sm:$0xf] }
 0x143   : > { %4855 = vrot.lane.b32.xlu0 %v9420_v38, %s10703_s8  ;;  %v2214_v41 = vshll.u32 %v9087_v31, 16  ;;  %v1902_v14 = vsel %vm11079_vm5, %v9102_v60, %v1901_v17  ;;  %v1903_v19 = vrot.slane %v1901_v17, 4  ;;  %v12413_v2 = vrot.slane %v2142_v50, 5  ;;  %v16218_v31 = vld [vmem:[#allocation37_spill] sm:$0xff] }
 0x144   : > { %16214 = vst [vmem:[#allocation56_spill] sm:$0xff] %v12408_v48  ;;  %v12415_v10 = vrot.slane %v2145_v44, 6  ;;  %v12420_v32 = vsel %vm5704_vm11, %v12102_v8, %v16217_v1  ;;  %v1912_v40 = vsel %vm11079_vm5, %v1910_v47, %v1911_v21  ;;  %v12425_v48 = vld [vmem:[%s10768_s26 + $0x9c] sm:$0xe]  ;;  %v12430_v38 = vsel %vm5704_vm11, %v16218_v31, %v12111_v30  ;;  %v10687_v1 = vld [vmem:[%s10768_s26 + $0xac] sm:$0xf] }
 0x145   : > { %16215 = vst [vmem:[#allocation60_spill] sm:$0xff] %v12413_v2  ;;  %16219 = vst [vmem:[#allocation61_spill] sm:$0xff] %v12430_v38  ;;  %v9423_v60 = vcombine.low %v1909_v49, %v1912_v40  ;;  %v1905_v50 = vsel %vm11079_vm5, %v1903_v19, %v1904_v61  ;;  %v9105_v44 = vrot.slane %v12404_v63, 9  ;;  %v12435_v17 = vrot.slane %v2211_v34, 5  ;;  %v16221_v47 = vld [vmem:[#allocation21_spill] sm:$0xff]  ;;  %v12439_v2 = vpop.permute.xlu0 %4679  ;;  %v16224_v61 = vld [vmem:[#allocation35_spill] sm:$0xff]  ;;  %v12447_v34 = vpop.permute.xlu1 %4685 }
 0x146   : > { %16216 = vst [vmem:[#allocation59_spill] sm:$0xff] %v12415_v10  ;;  %v9422_v8 = vcombine.low %v1902_v14, %v1905_v50  ;;  %v1922_v10 = vrot.slane %v10687_v1, 5  ;;  %v1925_v21 = vrot.slane %v16221_v47, 5  ;;  %16222 = vst [vmem:[#allocation20_spill] sm:$0xff] %v12439_v2  ;;  %v12441_v12 = vrot.slane %v2214_v41, 6  ;;  %v16226_v31 = vld [vmem:[#allocation31_spill] sm:$0xff] }
 0x147   : > { %16220 = vst [vmem:[#allocation19_spill] sm:$0xff] %v12435_v17  ;;  %4861 = vrot.lane.b32.xlu1 %v9423_v60, %s10703_s8  ;;  %v2188_v30 = vshrl.u32 %v12386_v24, 16  ;;  %v9104_v49 = vrot.slane %v12425_v48, 9  ;;  %v1915_v19 = vrot.slane %v16224_v61, 5  ;;  %16225 = vst [vmem:[#allocation30_spill] sm:$0xff] %v12447_v34  ;;  %v2191_v14 = vshll.u32 %v12386_v24, 16 }
 0x148   : > { %16223 = vst [vmem:[#allocation28_spill] sm:$0xff] %v12441_v12  ;;  %4859 = vrot.lane.b32.xlu0 %v9422_v8, %s10703_s8  ;;  %v1923_v40 = vsel %vm11079_vm5, %v9105_v44, %v1922_v10  ;;  %v1924_v41 = vrot.slane %v1922_v10, 4  ;;  %v1918_v50 = vrot.slane %v16226_v31, 5  ;;  %v12455_v60 = vld [vmem:[%s10768_s26 + $0xc0] sm:$0xe]  ;;  %v2257_v61 = vshrl.u32 %v12404_v63, 16 }
 0x149   : > { %v16227_v1 = vld [vmem:[#allocation36_spill] sm:$0xff]  ;;  %v1916_v24 = vsel %vm11079_vm5, %v9104_v49, %v1915_v19  ;;  %v1917_v8 = vrot.slane %v1915_v19, 4  ;;  %v2260_v10 = vshll.u32 %v12404_v63, 16  ;;  %v2234_v31 = vshrl.u32 %v12425_v48, 16  ;;  %v16230_v19 = vld [vmem:[#allocation49_spill] sm:$0xff] }
 0x14a   : > { %v12460_v47 = vsel %vm5704_vm11, %v12153_v13, %v16227_v1  ;;  %v1926_v44 = vsel %vm11079_vm5, %v1924_v41, %v1925_v21  ;;  %v12472_v12 = vsel %vm5704_vm11, %v12205_v22, %v12164_v43  ;;  %v12475_v13 = vld [vmem:[%s10768_s26 + $0xb4] sm:$0xe]  ;;  %v12477_v1 = vpop.permute.xlu0 %4683  ;;  %v12484_v21 = vsel %vm5704_vm11, %v12220_v6, %v12194_v5  ;;  %v16236_v6 = vld [vmem:[#allocation44_spill] sm:$0xff] }
 0x14b   : > { %16228 = vst [vmem:[#allocation37_spill] sm:$0xff] %v12460_v47  ;;  %16229 = vst [vmem:[#allocation21_spill] sm:$0xff] %v12477_v1  ;;  %v9425_v17 = vcombine.low %v1923_v40, %v1926_v44  ;;  %v1919_v49 = vsel %vm11079_vm5, %v1917_v8, %v1918_v50  ;;  %v9107_v63 = vrot.slane %v12455_v60, 9  ;;  %v16231_v41 = vld [vmem:[#allocation34_spill] sm:$0xff]  ;;  %v1936_v55 = vrot.slane %v10688_v35, 5  ;;  %v16233_v1 = vld [vmem:[#allocation27_spill] sm:$0xff]  ;;  %v12501_v47 = vpop.permute.xlu1 %4689 }
 0x14c   : > { %v12490_v43 = vsel %vm5704_vm11, %v16231_v41, %v16230_v19  ;;  %v9424_v22 = vcombine.low %v1916_v24, %v1919_v49  ;;  %v1939_v40 = vrot.slane %v16233_v1, 5  ;;  %v12494_v44 = vrot.slane %v2188_v30, 5  ;;  %v16238_v24 = vld [vmem:[#allocation45_spill] sm:$0xff] }
 0x14d   : > { %16232 = vst [vmem:[#allocation35_spill] sm:$0xff] %v12490_v43  ;;  %v12496_v50 = vrot.slane %v2191_v14, 6  ;;  %4865 = vrot.lane.b32.xlu1 %v9425_v17, %s10703_s8  ;;  %v9106_v5 = vrot.slane %v12475_v13, 9  ;;  %v1929_v8 = vrot.slane %v16236_v6, 5  ;;  %v12503_v19 = vrot.slane %v2257_v61, 5  ;;  %v16241_v61 = vld [vmem:[#allocation8_spill] sm:$0xff] }
 0x14e   : > { %16234 = vst [vmem:[#allocation31_spill] sm:$0xff] %v12494_v44  ;;  %4863 = vrot.lane.b32.xlu0 %v9424_v22, %s10703_s8  ;;  %v1937_v35 = vsel %vm11079_vm5, %v9107_v63, %v1936_v55  ;;  %v1938_v30 = vrot.slane %v1936_v55, 4  ;;  %v1932_v14 = vrot.slane %v16238_v24, 5  ;;  %v12509_v1 = vrot.slane %v2260_v10, 6  ;;  %v12515_v6 = vpop.permute.xlu0 %4687  ;;  %v9109_v10 = vld [vmem:[%s10768_s26 + $0x20] sm:$0x3] }
 0x14f   : > { %16235 = vst [vmem:[#allocation36_spill] sm:$0xff] %v12496_v50  ;;  %16237 = vst [vmem:[#allocation49_spill] sm:$0xff] %v12503_v19  ;;  %v12511_v17 = vrot.slane %v2234_v31, 5  ;;  %v1930_v49 = vsel %vm11079_vm5, %v9106_v5, %v1929_v8  ;;  %v1931_v41 = vrot.slane %v1929_v8, 4  ;;  %v12524_v55 = vsel %vm5704_vm11, %v12240_v28, %v12200_v42 }
 0x150   : > { %16239 = vst [vmem:[#allocation34_spill] sm:$0xff] %v12509_v1  ;;  %v1940_v22 = vsel %vm11079_vm5, %v1938_v30, %v1939_v40  ;;  %v12532_v8 = vsel %vm5704_vm11, %v12245_v45, %v12235_v33  ;;  %v1981_v40 = vshrl.u32 %v12162_v0, 16  ;;  %v1984_v63 = vshll.u32 %v12162_v0, 16  ;;  %v9108_v33 = vld [vmem:[%s10768_s26 + $0x14] sm:$0x3]  ;;  %v12543_v45 = vpop.permute.xlu1 %4693 }
 0x151   : > { %16240 = vst [vmem:[#allocation27_spill] sm:$0xff] %v12511_v17  ;;  %v9427_v31 = vcombine.low %v1937_v35, %v1940_v22  ;;  %v1933_v5 = vsel %vm11079_vm5, %v1931_v41, %v1932_v14  ;;  %v16242_v42 = vshrl.u32 %v16241_v61, 16  ;;  %v16243_v14 = vshll.u32 %v16241_v61, 16 }
 0x152   : > { %v9426_v24 = vcombine.low %v1930_v49, %v1933_v5  ;;  %v1983_v35 = vrot.slane %v1981_v40, 5  ;;  %v1995_v22 = vshrl.u32 %v9109_v10, 16  ;;  %v1998_v1 = vshll.u32 %v9109_v10, 16  ;;  %v16244_v49 = vld [vmem:[#allocation48_spill] sm:$0xff]  ;;  %v12552_v50 = vpop.permute.xlu0 %4691 }
 0x153   : > { %v1989_v28 = vrot.slane %v16242_v42, 5  ;;  %4869 = vrot.lane.b32.xlu1 %v9427_v31, %s10703_s8  ;;  %v1990_v41 = vrot.slane %v16243_v14, 6  ;;  %v1986_v30 = vrot.slane %v1984_v63, 6  ;;  %v1958_v5 = vshrl.u32 %v16244_v49, 16  ;;  %v16245_v42 = vld [vmem:[#allocation9_spill] sm:$0xff] }
 0x154   : > { %4867 = vrot.lane.b32.xlu0 %v9426_v24, %s10703_s8  ;;  %v1961_v0 = vshll.u32 %v16244_v49, 16  ;;  %v16246_v19 = vshrl.u32 %v16245_v42, 16  ;;  %v1997_v17 = vrot.slane %v1995_v22, 5  ;;  %v2000_v61 = vrot.slane %v1998_v1, 6  ;;  %v12561_v22 = vld [vmem:[%s10768_s26 + $0x1c] sm:$0xf] }
 0x155   : > { %v1991_v40 = vor.u32 %v1990_v41, %v1989_v28  ;;  %v16247_v14 = vshll.u32 %v16245_v42, 16  ;;  %v1987_v44 = vor.u32 %v1986_v30, %v1983_v35  ;;  %v1960_v24 = vrot.slane %v1958_v5, 5  ;;  %v9110_v42 = vld [vmem:[%s10768_s26 + $0x2c] sm:$0x3] }
 0x156   : > { %v1966_v31 = vrot.slane %v16246_v19, 5  ;;  %v1963_v63 = vrot.slane %v1961_v0, 6  ;;  %v1972_v43 = vshrl.u32 %v9108_v33, 16  ;;  %v2001_v38 = vor.u32 %v2000_v61, %v1997_v17 }
 0x157   : > { %v1967_v10 = vrot.slane %v16247_v14, 6  ;;  %v1993_v34 = vrot.slane %v1991_v40, 4  ;;  %v1975_v49 = vshll.u32 %v9108_v33, 16  ;;  %v1988_v19 = vrot.slane %v1987_v44, 4  ;;  %v12570_v44 = vpop.permute.xlu1 %4697  ;;  %v12577_v14 = vpop.permute.xlu0 %4695 }
 0x158   : > { %v1964_v28 = vor.u32 %v1963_v63, %v1960_v24  ;;  %v1974_v41 = vrot.slane %v1972_v43, 5  ;;  %v12558_v1 = vsel %vm5704_vm11, %v12251_v56, %v12255_v37  ;;  %v12568_v17 = vsel %vm5704_vm11, %v12264_v53, %v12282_v52  ;;  %v16249_v63 = vld [vmem:[#allocation12_spill] sm:$0xff] }
 0x159   : > { %v1968_v2 = vor.u32 %v1967_v10, %v1966_v31  ;;  %v2002_v35 = vsel %vm11273_vm8, %v1993_v34, %v2001_v38  ;;  %v1977_v0 = vrot.slane %v1975_v49, 6  ;;  %v1992_v43 = vsel %vm11273_vm8, %v1988_v19, %v1991_v40 }
 0x15a   : > { %v1965_v33 = vrot.slane %v1964_v28, 4  ;;  %v2375_v56 = vshrl.u32 %v9124_v57, 16  ;;  %v2378_v37 = vshll.u32 %v9124_v57, 16  ;;  %v9429_v31 = vcombine.low %v1992_v43, %v2002_v35 }
 0x15b   : > { %v1970_v5 = vrot.slane %v1968_v2, 4  ;;  %v1978_v61 = vor.u32 %v1977_v0, %v1974_v41  ;;  %v2388_v38 = vshrl.u32 %v12561_v22, 16  ;;  %v9444_v34 = vcombine.low %v9124_v57, %v12561_v22  ;;  %v16250_v57 = vld [vmem:[#allocation54_spill] sm:$0xff]  ;;  %v9156_v41 = vld [vmem:[%s10768_s26 + $0x20] sm:$0x1] }
 0x15c   : > { %v1969_v53 = vsel %vm11273_vm8, %v1965_v33, %v1968_v2  ;;  %v2377_v52 = vrot.slane %v2375_v56, 4  ;;  %v2380_v10 = vrot.slane %v2378_v37, 5  ;;  %v2010_v40 = vor.u32 %v12304_v27, %v12284_v54  ;;  %4921 = vrot.lane.b32.xlu1 %v9429_v31, %s10704_s9  ;;  %v9126_v27 = vld [vmem:[%s10768_s26 + $0x24] sm:$0xf]  ;;  %v12601_v37 = vld [vmem:[%s10768_s26 + $0x28] sm:$0xf] }
 0x15d   : > { %v1979_v24 = vsel %vm11273_vm8, %v1970_v5, %v1978_v61  ;;  %v2014_v49 = vor.u32 %v16250_v57, %v16249_v63  ;;  %v2018_v19 = vshrl.u32 %v9110_v42, 16  ;;  %v2021_v28 = vshll.u32 %v9110_v42, 16  ;;  %v12603_v42 = vpop.permute.xlu1 %4701 }
 0x15e   : > { %v9428_v35 = vcombine.low %v1969_v53, %v1979_v24  ;;  %v2011_v2 = vrot.slane %v2010_v40, 4  ;;  %v12592_v0 = vsel %vm5704_vm11, %v12290_v15, %v12299_v62  ;;  %v12597_v54 = vsel %vm5704_vm11, %v12295_v7, %v12327_v11 }
 0x15f   : > { %v2016_v5 = vrot.slane %v2014_v49, 4  ;;  %v2020_v43 = vrot.slane %v2018_v19, 5  ;;  %v2023_v33 = vrot.slane %v2021_v28, 6  ;;  %v2381_v56 = vor.u32 %v2380_v10, %v2377_v52  ;;  %v12612_v10 = vpop.permute.xlu0 %4699 }
 0x160   : > { %4919 = vrot.lane.b32.xlu0 %v9428_v35, %s10704_s9  ;;  %v2015_v15 = vsel %vm11273_vm8, %v2011_v2, %v2014_v49  ;;  %v2384_v62 = vshll.u32 %v12561_v22, 16  ;;  %v2390_v7 = vrot.slane %v2388_v38, 4  ;;  %v2394_v11 = vshll.u32 %v9156_v41, 16  ;;  %5015 = vrot.lane.b32.xlu1 %v9444_v34, %s10705_s10  ;;  %v12624_v35 = vld [vmem:[%s10768_s26 + $0x2c] sm:$0x1] }
 0x161   : > { %v2024_v31 = vor.u32 %v2023_v33, %v2020_v43  ;;  %v2382_v61 = vrot.slane %v2381_v56, 4  ;;  %v2399_v53 = vshrl.u32 %v9126_v27, 16  ;;  %v2402_v52 = vshll.u32 %v9126_v27, 16 }
 0x162   : > { %v2386_v40 = vrot.slane %v2384_v62, 5  ;;  %v2396_v24 = vrot.slane %v2394_v11, 5  ;;  %v2412_v63 = vshrl.u32 %v12601_v37, 16  ;;  %v9445_v57 = vcombine.low %v9126_v27, %v12601_v37 }
 0x163   : > { %v2025_v49 = vsel %vm11273_vm8, %v2016_v5, %v2024_v31  ;;  %v2401_v19 = vrot.slane %v2399_v53, 4  ;;  %v2404_v28 = vrot.slane %v2402_v52, 5  ;;  %v12621_v34 = vsel %vm5704_vm11, %v12320_v29, %v12339_v39  ;;  %v9172_v5 = vld [vmem:[%s10768_s26 + $0x18] sm:$0xe]  ;;  %v12635_v29 = vpop.permute.xlu1 %4705 }
 0x164   : > { %v9430_v2 = vcombine.low %v2015_v15, %v2025_v49  ;;  %v2387_v43 = vsel %vm10796_vm2, %v2382_v61, %v2386_v40  ;;  %v2391_v33 = vor.u32 %v2390_v7, %v2386_v40  ;;  %v12631_v27 = vsel %vm5704_vm11, %v12335_v9, %v12362_v59  ;;  %v12649_v40 = vpop.permute.xlu0 %4703 }
 0x165   : > { %v9188_v56 = vrot.slane %v9172_v5, 9  ;;  %v2824_v11 = vrot.slane %v12561_v22, 5  ;;  %v2827_v31 = vrot.slane %v9156_v41, 5  ;;  %v2405_v53 = vor.u32 %v2404_v28, %v2401_v19 }
 0x166   : > { %4923 = vrot.lane.b32.xlu0 %v9430_v2, %s10704_s9  ;;  %v2392_v39 = vrot.slane %v2391_v33, 4  ;;  %v16018_v15 = vshll.u32 %v12601_v37, 16  ;;  %v2414_v7 = vrot.slane %v2412_v63, 4  ;;  %v2418_v9 = vshll.u32 %v12624_v35, 16  ;;  %v9204_v33 = vld [vmem:[%s10768_s26 + $0x20] sm:$0x3] }
 0x167   : > { %v2825_v59 = vsel %vm11079_vm5, %v9188_v56, %v2824_v11  ;;  %v2826_v61 = vrot.slane %v2824_v11, 4  ;;  %v2406_v52 = vrot.slane %v2405_v53, 4  ;;  %v12647_v41 = vsel %vm5704_vm11, %v12370_v58, %v12379_v18 }
 0x168   : > { %v2397_v49 = vsel %vm10796_vm2, %v2392_v39, %v2396_v24  ;;  %v2410_v19 = vrot.slane %v16018_v15, 5  ;;  %v2420_v28 = vrot.slane %v2418_v9, 5  ;;  %v12658_v2 = vsel %vm5704_vm11, %v12375_v4, %v12406_v20 }
 0x169   : > { %v9460_v56 = vcombine.low %v2387_v43, %v2397_v49  ;;  %v2828_v58 = vsel %vm11079_vm5, %v2826_v61, %v2827_v31  ;;  %v2951_v18 = vshrl.u32 %v9172_v5, 16  ;;  %v2954_v11 = vshll.u32 %v9172_v5, 16  ;;  %v9173_v31 = vld [vmem:[%s10768_s26 + $0x24] sm:$0xe]  ;;  %v12670_v5 = vpop.permute.xlu1 %4709 }
 0x16a   : > { %5017 = vrot.lane.b32.xlu0 %v9445_v57, %s10705_s10  ;;  %v9476_v24 = vcombine.low %v2825_v59, %v2828_v58  ;;  %v2411_v53 = vsel %vm10796_vm2, %v2406_v52, %v2410_v19  ;;  %v2415_v39 = vor.u32 %v2414_v7, %v2410_v19  ;;  %v2959_v9 = vrot.slane %v2388_v38, 5 }
 0x16b   : > { %5095 = vrot.lane.b32.xlu1 %v9460_v56, %s10706_s11  ;;  %v2953_v4 = vrot.slane %v2951_v18, 5  ;;  %v2956_v20 = vrot.slane %v2954_v11, 6  ;;  %v2960_v43 = vrot.slane %v2384_v62, 6  ;;  %v2965_v49 = vshrl.u32 %v9204_v33, 16  ;;  %v12674_v56 = vpop.permute.xlu0 %4707 }
 0x16c   : > { %v2416_v57 = vrot.slane %v2415_v39, 4  ;;  %v2968_v59 = vshll.u32 %v9204_v33, 16  ;;  %v9189_v61 = vrot.slane %v9173_v31, 9  ;;  %v2831_v52 = vrot.slane %v12601_v37, 5  ;;  %v9220_v33 = vld [vmem:[%s10768_s26 + $0x24] sm:$0xf] }
 0x16d   : > { %v2957_v7 = vor.u32 %v2956_v20, %v2953_v4  ;;  %v2961_v22 = vor.u32 %v2960_v43, %v2959_v9  ;;  %v2967_v38 = vrot.slane %v2965_v49, 5  ;;  %v2834_v19 = vrot.slane %v12624_v35, 5  ;;  %v12687_v20 = vld [vmem:[%s10768_s26 + $0x28] sm:$0xf] }
 0x16e   : > { %v2421_v62 = vsel %vm10796_vm2, %v2416_v57, %v2420_v28  ;;  %v2970_v58 = vrot.slane %v2968_v59, 6  ;;  %v2832_v18 = vsel %vm11079_vm5, %v9189_v61, %v2831_v52  ;;  %v2833_v11 = vrot.slane %v2831_v52, 4  ;;  %v9205_v52 = vld [vmem:[%s10768_s26 + $0x2c] sm:$0x3] }
 0x16f   : > { %v16251_v39 = vshll.u32 %v12425_v48, 16  ;;  %5175 = vrot.lane.b32.xlu1 %v9476_v24, %s10707_s12  ;;  %v9461_v35 = vcombine.low %v2411_v53, %v2421_v62  ;;  %v2958_v9 = vrot.slane %v2957_v7, 4  ;;  %v2963_v4 = vrot.slane %v2961_v22, 4  ;;  %v12700_v7 = vpop.permute.xlu1 %4761 }
 0x170   : > { %v16253_v28 = vshrl.u32 %v12455_v60, 16  ;;  %v2280_v49 = vshrl.u32 %v12475_v13, 16  ;;  %v2971_v57 = vor.u32 %v2970_v58, %v2967_v38  ;;  %v2835_v48 = vsel %vm11079_vm5, %v2833_v11, %v2834_v19 }
 0x171   : > { %v12683_v15 = vrot.slane %v16251_v39, 6  ;;  %5097 = vrot.lane.b32.xlu0 %v9461_v35, %s10706_s11  ;;  %v2962_v24 = vsel %vm11273_vm8, %v2958_v9, %v2961_v22  ;;  %v9477_v53 = vcombine.low %v2832_v18, %v2835_v48  ;;  %v3368_v59 = vshrl.u32 %v9220_v33, 16  ;;  %v12709_v9 = vpop.permute.xlu0 %4759 }
 0x172   : > { %v12691_v43 = vrot.slane %v16253_v28, 5  ;;  %v3371_v61 = vshll.u32 %v9220_v33, 16  ;;  %v16255_v62 = vshll.u32 %v12455_v60, 16  ;;  %v2972_v38 = vsel %vm11273_vm8, %v2963_v4, %v2971_v57  ;;  %16257 = vst [vmem:[#allocation48_spill] sm:$0xff] %v12709_v9 }
 0x173   : > { %16252 = vst [vmem:[#allocation44_spill] sm:$0xff] %v12683_v15  ;;  %v16020_v19 = vshrl.u32 %v12687_v20, 16  ;;  %v2974_v58 = vshrl.u32 %v9173_v31, 16  ;;  %v9492_v11 = vcombine.low %v2962_v24, %v2972_v38  ;;  %v3370_v35 = vrot.slane %v3368_v59, 4  ;;  %v12724_v59 = vld [vmem:[%s10768_s26 + $0x30] sm:$0xf] }
 0x174   : > { %16254 = vst [vmem:[#allocation45_spill] sm:$0xff] %v12691_v43  ;;  %v12704_v39 = vrot.slane %v16255_v62, 6  ;;  %v3373_v22 = vrot.slane %v3371_v61, 5  ;;  %v2977_v18 = vshll.u32 %v9173_v31, 16  ;;  %v2982_v48 = vrot.slane %v2412_v63, 5 }
 0x175   : > { %v2976_v28 = vrot.slane %v2974_v58, 5  ;;  %v16258_v60 = vshll.u32 %v12601_v37, 16  ;;  %v12716_v43 = vld [vmem:[%s10768_s26 + $0x2c] sm:$0x1]  ;;  %v12718_v4 = vrot.slane %v2280_v49, 5  ;;  %5255 = vrot.lane.b32.xlu1 %v9492_v11, %s10708_s13  ;;  %5177 = vrot.lane.b32.xlu0 %v9477_v53, %s10707_s12  ;;  %v9508_v31 = vcombine.low %v9220_v33, %v12687_v20  ;;  %v12733_v53 = vpop.permute.xlu1 %4765 }
 0x176   : > { %16256 = vst [vmem:[#allocation8_spill] sm:$0xff] %v12704_v39  ;;  %v2988_v39 = vshrl.u32 %v9205_v52, 16  ;;  %v2979_v57 = vrot.slane %v2977_v18, 6  ;;  %v2991_v24 = vshll.u32 %v9205_v52, 16  ;;  %v3374_v61 = vor.u32 %v3373_v22, %v3370_v35  ;;  %16260 = vst [vmem:[#allocation7_spill] sm:$0xff] %v12733_v53 }
 0x177   : > { %v2983_v62 = vrot.slane %v16258_v60, 6  ;;  %16259 = vst [vmem:[#allocation9_spill] sm:$0xff] %v12718_v4  ;;  %v16019_v38 = vshll.u32 %v12687_v20, 16  ;;  %v3383_v60 = vrot.slane %v16020_v19, 4  ;;  %v3387_v11 = vshll.u32 %v12716_v43, 16 }
 0x178   : > { %v2990_v37 = vrot.slane %v2988_v39, 5  ;;  %v2980_v58 = vor.u32 %v2979_v57, %v2976_v28  ;;  %v2993_v49 = vrot.slane %v2991_v24, 6  ;;  %v12731_v4 = vld [vmem:[%s10768_s26 + $0x34] sm:$0xf]  ;;  %v3375_v52 = vrot.slane %v3374_v61, 4 }
 0x179   : > { %v2984_v63 = vor.u32 %v2983_v62, %v2982_v48  ;;  %v3379_v18 = vrot.slane %v16019_v38, 5  ;;  %v3392_v39 = vshrl.u32 %v12724_v59, 16  ;;  %v2283_v35 = vshll.u32 %v12475_v13, 16  ;;  %5351 = vrot.lane.b32.xlu1 %v9508_v31, %s10709_s14  ;;  %v12741_v62 = vpop.permute.xlu0 %4763 }
 0x17a   : > { %v2981_v22 = vrot.slane %v2980_v58, 4  ;;  %v2994_v28 = vor.u32 %v2993_v49, %v2990_v37  ;;  %v3395_v48 = vshll.u32 %v12724_v59, 16  ;;  %16261 = vst [vmem:[#allocation12_spill] sm:$0xff] %v12741_v62  ;;  %v3389_v24 = vrot.slane %v3387_v11, 5  ;;  %v12749_v58 = vld [vmem:[%s10768_s26 + $0x38] sm:$0x1] }
 0x17b   : > { %v2986_v33 = vrot.slane %v2984_v63, 4  ;;  %v3384_v57 = vor.u32 %v3383_v60, %v3379_v18  ;;  %v3394_v61 = vrot.slane %v3392_v39, 4  ;;  %v3380_v49 = vsel %vm10796_vm2, %v3375_v52, %v3379_v18  ;;  %v9268_v11 = vld [vmem:[%s10768_s26 + $0x24] sm:$0xe] }
 0x17c   : > { %v2985_v19 = vsel %vm11273_vm8, %v2981_v22, %v2984_v63  ;;  %v3397_v31 = vrot.slane %v3395_v48, 5  ;;  %v9509_v60 = vcombine.low %v12724_v59, %v12731_v4  ;;  %v9284_v39 = vrot.slane %v9268_v11, 9 }
 0x17d   : > { %v2995_v13 = vsel %vm11273_vm8, %v2986_v33, %v2994_v28  ;;  %v3385_v15 = vrot.slane %v3384_v57, 4  ;;  %v3817_v38 = vrot.slane %v12687_v20, 5  ;;  %v3820_v63 = vrot.slane %v12716_v43, 5  ;;  %v12758_v33 = vpop.permute.xlu1 %4769 }
 0x17e   : > { %v9493_v37 = vcombine.low %v2985_v19, %v2995_v13  ;;  %v3398_v22 = vor.u32 %v3397_v31, %v3394_v61  ;;  %v16021_v52 = vshll.u32 %v12731_v4, 16  ;;  %v16262_v18 = vshrl.u32 %v12731_v4, 16  ;;  %v12769_v13 = vpop.permute.xlu0 %4767 }
 0x17f   : > { %v3390_v19 = vsel %vm10796_vm2, %v3385_v15, %v3389_v24  ;;  %v3411_v28 = vshll.u32 %v12749_v58, 16  ;;  %v3818_v43 = vsel %vm11079_vm5, %v9284_v39, %v3817_v38  ;;  %v3819_v57 = vrot.slane %v3817_v38, 4 }
 0x180   : > { %5257 = vrot.lane.b32.xlu0 %v9493_v37, %s10708_s13  ;;  %v3407_v59 = vrot.slane %v16262_v18, 4  ;;  %v9524_v48 = vcombine.low %v3380_v49, %v3390_v19  ;;  %v3399_v61 = vrot.slane %v3398_v22, 4  ;;  %v12771_v31 = vrot.slane %v2283_v35, 6  ;;  %v9300_v49 = vld [vmem:[%s10768_s26 + $0x2c] sm:$0x3] }
 0x181   : > { %v12776_v15 = vsel %vm309_vm12, %v12420_v32, %v12398_v36  ;;  %v3403_v24 = vrot.slane %v16021_v52, 5  ;;  %v3413_v37 = vrot.slane %v3411_v28, 5  ;;  %v3821_v38 = vsel %vm11079_vm5, %v3819_v57, %v3820_v63  ;;  %v12787_v18 = vld [vmem:[%s10768_s26 + $0x30] sm:$0xe]  ;;  %v12794_v62 = vpop.permute.xlu1 %4773 }
 0x182   : > { %16263 = vst [vmem:[#allocation54_spill] sm:$0xff] %v12771_v31  ;;  %5431 = vrot.lane.b32.xlu1 %v9524_v48, %s10710_s15  ;;  %v3944_v39 = vshrl.u32 %v9268_v11, 16  ;;  %v3947_v22 = vshll.u32 %v9268_v11, 16  ;;  %v16264_v35 = vshrl.u32 %v12687_v20, 16  ;;  %v9540_v36 = vcombine.low %v3818_v43, %v3821_v38 }
 0x183   : > { %v3404_v32 = vsel %vm10796_vm2, %v3399_v61, %v3403_v24  ;;  %v3408_v28 = vor.u32 %v3407_v59, %v3403_v24  ;;  %v16265_v52 = vshll.u32 %v12687_v20, 16  ;;  %v3958_v57 = vshrl.u32 %v9300_v49, 16  ;;  %v9128_v61 = vld [vmem:[%s10768_s26 + $0x30] sm:$0xf]  ;;  %v12801_v24 = vpop.permute.xlu0 %4771 }
 0x184   : > { %v3952_v19 = vrot.slane %v16264_v35, 5  ;;  %5353 = vrot.lane.b32.xlu0 %v9509_v60, %s10709_s14  ;;  %v3946_v31 = vrot.slane %v3944_v39, 5  ;;  %v3949_v63 = vrot.slane %v3947_v22, 6  ;;  %v3961_v11 = vshll.u32 %v9300_v49, 16 }
 0x185   : > { %v3953_v48 = vrot.slane %v16265_v52, 6  ;;  %v3409_v35 = vrot.slane %v3408_v28, 4  ;;  %v9285_v9 = vrot.slane %v12787_v18, 9  ;;  %v3824_v60 = vrot.slane %v12731_v4, 5  ;;  %v12813_v28 = vld [vmem:[%s10768_s26 + $0x34] sm:$0xf] }
 0x186   : > { %5511 = vrot.lane.b32.xlu1 %v9540_v36, %s10711_s16  ;;  %v3950_v59 = vor.u32 %v3949_v63, %v3946_v31  ;;  %v3960_v20 = vrot.slane %v3958_v57, 5  ;;  %v3963_v52 = vrot.slane %v3961_v11, 6  ;;  %v3827_v43 = vrot.slane %v12749_v58, 5  ;;  %v12839_v63 = vpop.permute.xlu1 %4777 }
 0x187   : > { %v3954_v53 = vor.u32 %v3953_v48, %v3952_v19  ;;  %v3414_v49 = vsel %vm10796_vm2, %v3409_v35, %v3413_v37  ;;  %v3825_v39 = vsel %vm11079_vm5, %v9285_v9, %v3824_v60  ;;  %v3826_v22 = vrot.slane %v3824_v60, 4  ;;  %v16267_v60 = vld [vmem:[#allocation53_spill] sm:$0xff] }
 0x188   : > { %v12810_v31 = vsel %vm309_vm12, %v12472_v12, %v12501_v47  ;;  %v9525_v19 = vcombine.low %v3404_v32, %v3414_v49  ;;  %v3951_v58 = vrot.slane %v3950_v59, 4  ;;  %v3964_v36 = vor.u32 %v3963_v52, %v3960_v20  ;;  %v9111_v47 = vld [vmem:[%s10768_s26 + $0x38] sm:$0x3]  ;;  %v12854_v49 = vpop.permute.xlu0 %4775 }
 0x189   : > { %v3956_v38 = vrot.slane %v3954_v53, 4  ;;  %v12818_v37 = vsel %vm309_vm12, %v12484_v21, %v12515_v6  ;;  %v12823_v9 = vsel %vm309_vm12, %v12524_v55, %v12543_v45  ;;  %v3828_v48 = vsel %vm11079_vm5, %v3826_v22, %v3827_v43  ;;  %v9130_v45 = vld [vmem:[%s10768_s26 + $0x3c] sm:$0xf]  ;;  %v12852_v43 = vld [vmem:[%s10768_s26 + $0x40] sm:$0xf] }
 0x18a   : > { %v2423_v12 = vshrl.u32 %v9128_v61, 16  ;;  %5433 = vrot.lane.b32.xlu0 %v9525_v19, %s10710_s15  ;;  %v12832_v32 = vsel %vm309_vm12, %v12532_v8, %v12552_v50  ;;  %v3955_v21 = vsel %vm11273_vm8, %v3951_v58, %v3954_v53  ;;  %v9541_v55 = vcombine.low %v3825_v39, %v3828_v48  ;;  %v16266_v53 = vld [vmem:[#allocation11_spill] sm:$0xff] }
 0x18b   : > { %v3965_v6 = vsel %vm11273_vm8, %v3956_v38, %v3964_v36  ;;  %v12844_v11 = vsel %vm309_vm12, %v12558_v1, %v12570_v44  ;;  %v2426_v35 = vshll.u32 %v9128_v61, 16  ;;  %v2033_v8 = vor.u32 %v12277_v46, %v12268_v3  ;;  %v9301_v58 = vld [vmem:[%s10768_s26 + $0x38] sm:$0x3] }
 0x18c   : > { %v9556_v57 = vcombine.low %v3955_v21, %v3965_v6  ;;  %v2037_v59 = vor.u32 %v16267_v60, %v16266_v53  ;;  %v2041_v20 = vshrl.u32 %v9111_v47, 16  ;;  %v2044_v52 = vshll.u32 %v9111_v47, 16 }
 0x18d   : > { %v2425_v1 = vrot.slane %v2423_v12, 4  ;;  %v9446_v44 = vcombine.low %v9128_v61, %v12813_v28  ;;  %v2447_v38 = vshrl.u32 %v9130_v45, 16  ;;  %v2450_v39 = vshll.u32 %v9130_v45, 16 }
 0x18e   : > { %5591 = vrot.lane.b32.xlu1 %v9556_v57, %s10712_s17  ;;  %5513 = vrot.lane.b32.xlu0 %v9541_v55, %s10711_s16  ;;  %v2034_v3 = vrot.slane %v2033_v8, 4  ;;  %v2039_v46 = vrot.slane %v2037_v59, 4  ;;  %v2043_v22 = vrot.slane %v2041_v20, 5  ;;  %v2046_v19 = vrot.slane %v2044_v52, 6  ;;  %v12866_v57 = vpop.permute.xlu1 %4781 }
 0x18f   : > { %v2449_v36 = vrot.slane %v2447_v38, 4  ;;  %v2452_v48 = vrot.slane %v2450_v39, 5  ;;  %v9447_v21 = vcombine.low %v9130_v45, %v12852_v43  ;;  %v3967_v6 = vshrl.u32 %v12787_v18, 16 }
 0x190   : > { %v2038_v12 = vsel %vm11273_vm8, %v2034_v3, %v2037_v59  ;;  %v2047_v61 = vor.u32 %v2046_v19, %v2043_v22  ;;  %v3970_v55 = vshll.u32 %v12787_v18, 16  ;;  %v16268_v8 = vshrl.u32 %v12731_v4, 16  ;;  %v9159_v22 = vld [vmem:[%s10768_s26 + $0x44] sm:$0x1]  ;;  %v12876_v18 = vpop.permute.xlu0 %4779 }
 0x191   : > { %v16269_v60 = vshll.u32 %v12731_v4, 16  ;;  %v3981_v52 = vshrl.u32 %v9301_v58, 16  ;;  %v3984_v45 = vshll.u32 %v9301_v58, 16  ;;  %v2428_v38 = vrot.slane %v2426_v35, 5 }
 0x192   : > { %5019 = vrot.lane.b32.xlu1 %v9446_v44, %s10705_s10  ;;  %v3975_v53 = vrot.slane %v16268_v8, 5  ;;  %v2048_v59 = vsel %vm11273_vm8, %v2039_v46, %v2047_v61  ;;  %v3969_v39 = vrot.slane %v3967_v6, 5  ;;  %v3972_v3 = vrot.slane %v3970_v55, 6 }
 0x193   : > { %v3976_v20 = vrot.slane %v16269_v60, 6  ;;  %v9431_v19 = vcombine.low %v2038_v12, %v2048_v59  ;;  %v3983_v44 = vrot.slane %v3981_v52, 5  ;;  %v3986_v47 = vrot.slane %v3984_v45, 6 }
 0x194   : > { %v12881_v4 = vsel %vm309_vm12, %v12568_v17, %v12577_v14  ;;  %v3973_v58 = vor.u32 %v3972_v3, %v3969_v39  ;;  %v2453_v35 = vor.u32 %v2452_v48, %v2449_v36  ;;  %v2456_v8 = vshll.u32 %v12852_v43, 16  ;;  %v9158_v14 = vld [vmem:[%s10768_s26 + $0x38] sm:$0x1]  ;;  %v12891_v48 = vpop.permute.xlu1 %4785  ;;  %v12905_v3 = vpop.permute.xlu0 %4783 }
 0x195   : > { %v3977_v50 = vor.u32 %v3976_v20, %v3975_v53  ;;  %4925 = vrot.lane.b32.xlu0 %v9431_v19, %s10704_s9  ;;  %v3987_v61 = vor.u32 %v3986_v47, %v3983_v44  ;;  %v16270_v12 = vshrl.u32 %v12852_v43, 16  ;;  %v2466_v55 = vshll.u32 %v9159_v22, 16 }
 0x196   : > { %5021 = vrot.lane.b32.xlu1 %v9447_v21, %s10705_s10  ;;  %v3974_v53 = vrot.slane %v3973_v58, 4  ;;  %v2454_v60 = vrot.slane %v2453_v35, 4  ;;  %v2458_v17 = vrot.slane %v2456_v8, 5  ;;  %v2429_v36 = vor.u32 %v2428_v38, %v2425_v1  ;;  %v9175_v58 = vld [vmem:[%s10768_s26 + $0x3c] sm:$0xe] }
 0x197   : > { %v3979_v46 = vrot.slane %v3977_v50, 4  ;;  %v2462_v6 = vrot.slane %v16270_v12, 4  ;;  %v12896_v21 = vsel %vm309_vm12, %v12592_v0, %v12603_v42  ;;  %v2432_v20 = vshll.u32 %v12813_v28, 16 }
 0x198   : > { %v16271_v52 = vshrl.u32 %v12813_v28, 16  ;;  %v3978_v59 = vsel %vm11273_vm8, %v3974_v53, %v3977_v50  ;;  %v2468_v1 = vrot.slane %v2466_v55, 5  ;;  %v2430_v38 = vrot.slane %v2429_v36, 4  ;;  %v9174_v55 = vld [vmem:[%s10768_s26 + $0x30] sm:$0xe] }
 0x199   : > { %v3988_v47 = vsel %vm11273_vm8, %v3979_v46, %v3987_v61  ;;  %v2463_v39 = vor.u32 %v2462_v6, %v2458_v17  ;;  %v12910_v0 = vsel %vm309_vm12, %v12597_v54, %v12612_v10  ;;  %v2434_v19 = vrot.slane %v2432_v20, 5 }
 0x19a   : > { %v2438_v45 = vrot.slane %v16271_v52, 4  ;;  %v9557_v42 = vcombine.low %v3978_v59, %v3988_v47  ;;  %v2442_v44 = vshll.u32 %v9158_v14, 16  ;;  %v2459_v50 = vsel %vm10796_vm2, %v2454_v60, %v2458_v17  ;;  %v12926_v47 = vpop.permute.xlu1 %4789 }
 0x19b   : > { %v2464_v35 = vrot.slane %v2463_v39, 4  ;;  %v9191_v46 = vrot.slane %v9175_v58, 9  ;;  %v2845_v61 = vrot.slane %v12852_v43, 5  ;;  %v2435_v12 = vsel %vm10796_vm2, %v2430_v38, %v2434_v19 }
 0x19c   : > { %5593 = vrot.lane.b32.xlu0 %v9557_v42, %s10712_s17  ;;  %v2439_v54 = vor.u32 %v2438_v45, %v2434_v19  ;;  %v2444_v10 = vrot.slane %v2442_v44, 5  ;;  %v2848_v6 = vrot.slane %v9159_v22, 5  ;;  %v9190_v17 = vrot.slane %v9174_v55, 9  ;;  %v12936_v19 = vpop.permute.xlu0 %4787 }
 0x19d   : > { %v2469_v53 = vsel %vm10796_vm2, %v2464_v35, %v2468_v1  ;;  %v2846_v36 = vsel %vm11079_vm5, %v9191_v46, %v2845_v61  ;;  %v2847_v60 = vrot.slane %v2845_v61, 4  ;;  %v2838_v39 = vrot.slane %v12813_v28, 5 }
 0x19e   : > { %v9463_v52 = vcombine.low %v2459_v50, %v2469_v53  ;;  %v2440_v59 = vrot.slane %v2439_v54, 4  ;;  %v2841_v38 = vrot.slane %v9158_v14, 5  ;;  %v12932_v22 = vsel %vm309_vm12, %v12621_v34, %v12635_v29  ;;  %v9207_v34 = vld [vmem:[%s10768_s26 + $0x44] sm:$0x3] }
 0x19f   : > { %v2849_v45 = vsel %vm11079_vm5, %v2847_v60, %v2848_v6  ;;  %v3020_v1 = vshrl.u32 %v9175_v58, 16  ;;  %v3023_v42 = vshll.u32 %v9175_v58, 16  ;;  %v2839_v14 = vsel %vm11079_vm5, %v9190_v17, %v2838_v39  ;;  %v9206_v60 = vld [vmem:[%s10768_s26 + $0x38] sm:$0x3] }
 0x1a0   : > { %5101 = vrot.lane.b32.xlu1 %v9463_v52, %s10706_s11  ;;  %v2445_v44 = vsel %vm10796_vm2, %v2440_v59, %v2444_v10  ;;  %v9479_v50 = vcombine.low %v2846_v36, %v2849_v45  ;;  %v2840_v35 = vrot.slane %v2838_v39, 4  ;;  %v12947_v29 = vsel %vm309_vm12, %v12631_v27, %v12649_v40 }
 0x1a1   : > { %v9462_v58 = vcombine.low %v2435_v12, %v2445_v44  ;;  %v12952_v46 = vsel %vm309_vm12, %v12647_v41, %v12670_v5  ;;  %v3022_v61 = vrot.slane %v3020_v1, 5  ;;  %v3025_v10 = vrot.slane %v3023_v42, 6  ;;  %v12962_v41 = vpop.permute.xlu1 %4841  ;;  %v12969_v42 = vpop.permute.xlu0 %4839 }
 0x1a2   : > { %v2842_v54 = vsel %vm11079_vm5, %v2840_v35, %v2841_v38  ;;  %v16272_v6 = vshrl.u32 %v12852_v43, 16  ;;  %v3029_v36 = vrot.slane %v2456_v8, 6  ;;  %v3034_v40 = vshrl.u32 %v9207_v34, 16 }
 0x1a3   : > { %5099 = vrot.lane.b32.xlu0 %v9462_v58, %s10706_s11  ;;  %v9478_v27 = vcombine.low %v2839_v14, %v2842_v54  ;;  %v3037_v12 = vshll.u32 %v9207_v34, 16  ;;  %v2997_v17 = vshrl.u32 %v9174_v55, 16  ;;  %v3026_v5 = vor.u32 %v3025_v10, %v3022_v61  ;;  %v9226_v34 = vld [vmem:[%s10768_s26 + $0x48] sm:$0xf] }
 0x1a4   : > { %v3028_v53 = vrot.slane %v16272_v6, 5  ;;  %5181 = vrot.lane.b32.xlu1 %v9479_v50, %s10707_s12  ;;  %v3000_v59 = vshll.u32 %v9174_v55, 16  ;;  %v16273_v39 = vshrl.u32 %v12813_v28, 16  ;;  %v3036_v43 = vrot.slane %v3034_v40, 5 }
 0x1a5   : > { %v3039_v8 = vrot.slane %v3037_v12, 6  ;;  %v2999_v45 = vrot.slane %v2997_v17, 5  ;;  %v3006_v1 = vrot.slane %v2432_v20, 6  ;;  %v3027_v44 = vrot.slane %v3026_v5, 4  ;;  %v12979_v20 = vld [vmem:[%s10768_s26 + $0x4c] sm:$0xf] }
 0x1a6   : > { %v3030_v52 = vor.u32 %v3029_v36, %v3028_v53  ;;  %v3005_v38 = vrot.slane %v16273_v39, 5  ;;  %v3002_v35 = vrot.slane %v3000_v59, 6  ;;  %v3011_v50 = vshrl.u32 %v9206_v60, 16  ;;  %v9224_v53 = vld [vmem:[%s10768_s26 + $0x3c] sm:$0xf] }
 0x1a7   : > { %v12975_v55 = vsel %vm309_vm12, %v12658_v2, %v12674_v56  ;;  %5179 = vrot.lane.b32.xlu0 %v9478_v27, %s10707_s12  ;;  %v3040_v58 = vor.u32 %v3039_v8, %v3036_v43  ;;  %v3014_v28 = vshll.u32 %v9206_v60, 16  ;;  %v3440_v56 = vshrl.u32 %v9226_v34, 16  ;;  %v12987_v12 = vld [vmem:[%s10768_s26 + $0x40] sm:$0xf]  ;;  %v12989_v27 = vpop.permute.xlu1 %4845  ;;  %v12993_v8 = vpop.permute.xlu0 %4843 }
 0x1a8   : > { %v3032_v14 = vrot.slane %v3030_v52, 4  ;;  %v3007_v61 = vor.u32 %v3006_v1, %v3005_v38  ;;  %v3031_v54 = vsel %vm11273_vm8, %v3027_v44, %v3030_v52  ;;  %v3003_v10 = vor.u32 %v3002_v35, %v2999_v45  ;;  %v10621_v45 = vld [vmem:[%s15930_s1 + $0x18] sm:$0xff]  }
 0x1a9   : > { %v3013_v6 = vrot.slane %v3011_v50, 5  ;;  %v3016_v2 = vrot.slane %v3014_v28, 6  ;;  %v3443_v5 = vshll.u32 %v9226_v34, 16  ;;  %v16023_v59 = vshrl.u32 %v12979_v20, 16  ;;  %v13003_v50 = vld [vmem:[%s10768_s26 + $0x50] sm:$0x1]  ;;  %9672 = vmatprep.subr.bf16.mxu0 %v10621_v45  ;;  %9754 = vmatprep.subr.bf16.mxu1 %v10621_v45 }
 0x1aa   : > { %v3041_v36 = vsel %vm11273_vm8, %v3032_v14, %v3040_v58  ;;  %v3009_v40 = vrot.slane %v3007_v61, 4  ;;  %v3004_v17 = vrot.slane %v3003_v10, 4  ;;  %v3442_v39 = vrot.slane %v3440_v56, 4  ;;  %v13014_v10 = vld [vmem:[%s10768_s26 + $0x44] sm:$0x1]  ;;  %9673 = vmatpush3.bf16.msra.mxu0 %v10621_v45  ;;  %9758 = vmatpush3.bf16.msra.mxu1 %v10621_v45 }
 0x1ab   : > { %v9495_v60 = vcombine.low %v3031_v54, %v3041_v36  ;;  %v3017_v52 = vor.u32 %v3016_v2, %v3013_v6  ;;  %v9511_v38 = vcombine.low %v9226_v34, %v12979_v20  ;;  %v3416_v43 = vshrl.u32 %v9224_v53, 16  ;;  %v13026_v56 = vpop.permute.xlu1 %4849  ;;  %v9112_v45 = vld [vmem:[%s10768_s26 + $0x44] sm:$0x3] }
 0x1ac   : > { %v3008_v1 = vsel %vm11273_vm8, %v3004_v17, %v3007_v61  ;;  %v3445_v44 = vrot.slane %v3443_v5, 5  ;;  %v3419_v14 = vshll.u32 %v9224_v53, 16  ;;  %v3429_v35 = vshrl.u32 %v12987_v12, 16 }
 0x1ad   : > { %5261 = vrot.lane.b32.xlu1 %v9495_v60, %s10708_s13  ;;  %v3018_v34 = vsel %vm11273_vm8, %v3009_v40, %v3017_v52  ;;  %v3418_v58 = vrot.slane %v3416_v43, 4  ;;  %v9510_v28 = vcombine.low %v9224_v53, %v12987_v12  ;;  %v13011_v54 = vsel %vm5769_vm13, %v12810_v31, %v12758_v33 }
 0x1ae   : > { %v9494_v61 = vcombine.low %v3008_v1, %v3018_v34  ;;  %v3421_v6 = vrot.slane %v3419_v14, 5  ;;  %v13019_v36 = vsel %vm5769_vm13, %v12818_v37, %v12769_v13  ;;  %v3446_v40 = vor.u32 %v3445_v44, %v3442_v39 }
 0x1af   : > { %v16022_v53 = vshll.u32 %v12979_v20, 16  ;;  %v3455_v33 = vrot.slane %v16023_v59, 4  ;;  %v3459_v31 = vshll.u32 %v13003_v50, 16  ;;  %v3425_v2 = vshll.u32 %v12987_v12, 16 }
 0x1b0   : > { %5259 = vrot.lane.b32.xlu0 %v9494_v61, %s10708_s13  ;;  %v3447_v13 = vrot.slane %v3446_v40, 4  ;;  %v3422_v37 = vor.u32 %v3421_v6, %v3418_v58  ;;  %v3431_v60 = vrot.slane %v3429_v35, 4  ;;  %v3435_v17 = vshll.u32 %v13014_v10, 16  ;;  %v10622_v58 = vld [vmem:[%s15930_s1 + $0x10] sm:$0xff]  }
 0x1b1   : > { %5357 = vrot.lane.b32.xlu1 %v9511_v38, %s10709_s14  ;;  %v3451_v5 = vrot.slane %v16022_v53, 5  ;;  %v3461_v52 = vrot.slane %v3459_v31, 5  ;;  %v3427_v39 = vrot.slane %v3425_v2, 5  ;;  %v13038_v43 = vsel %vm5769_vm13, %v12823_v9, %v12794_v62  ;;  %v13041_v38 = vpop.permute.xlu0 %4847  ;;  %v16274_v6 = vld [vmem:[#allocation14_spill] sm:$0xff]  ;;  %9674 = vmatprep.subr.bf16.mxu0 %v10622_v58 }
 0x1b2   : > { %v3423_v1 = vrot.slane %v3422_v37, 4  ;;  %v3437_v44 = vrot.slane %v3435_v17, 5  ;;  %v13046_v14 = vsel %vm5769_vm13, %v12832_v32, %v12801_v24  ;;  %v2056_v34 = vor.u32 %v12344_v26, %v12329_v23  ;;  %v16275_v40 = vld [vmem:[#allocation58_spill] sm:$0xff]  ;;  %v9270_v26 = vld [vmem:[%s10768_s26 + $0x3c] sm:$0xe]  ;;  %9675 = vmatpush3.bf16.msra.mxu0 %v10622_v58  ;;  %9755 = vmatprep.subr.bf16.mxu1 %v10622_v58 }
 0x1b3   : > { %v3452_v62 = vsel %vm10796_vm2, %v3447_v13, %v3451_v5  ;;  %v3456_v9 = vor.u32 %v3455_v33, %v3451_v5  ;;  %v3432_v61 = vor.u32 %v3431_v60, %v3427_v39  ;;  %v2060_v31 = vor.u32 %v16275_v40, %v16274_v6  ;;  %v13061_v33 = vpop.permute.xlu1 %4853  ;;  %9759 = vmatpush3.bf16.msra.mxu1 %v10622_v58 }
 0x1b4   : > { %5355 = vrot.lane.b32.xlu0 %v9510_v28, %s10709_s14  ;;  %v3428_v24 = vsel %vm10796_vm2, %v3423_v1, %v3427_v39  ;;  %v2057_v32 = vrot.slane %v2056_v34, 4  ;;  %v2064_v37 = vshrl.u32 %v9112_v45, 16  ;;  %v2067_v23 = vshll.u32 %v9112_v45, 16 }
 0x1b5   : > { %v3457_v17 = vrot.slane %v3456_v9, 4  ;;  %v3433_v53 = vrot.slane %v3432_v61, 4  ;;  %v2062_v59 = vrot.slane %v2060_v31, 4  ;;  %v9286_v13 = vrot.slane %v9270_v26, 9  ;;  %v9302_v61 = vld [vmem:[%s10768_s26 + $0x44] sm:$0x3]  ;;  %v13077_v6 = vpop.permute.xlu0 %4851 }
 0x1b6   : > { %v2061_v28 = vsel %vm11273_vm8, %v2057_v32, %v2060_v31  ;;  %v2066_v60 = vrot.slane %v2064_v37, 5  ;;  %v2069_v5 = vrot.slane %v2067_v23, 6  ;;  %v3831_v39 = vrot.slane %v12987_v12, 5  ;;  %v13093_v37 = vld [vmem:[%s10768_s26 + $0x48] sm:$0xe] }
 0x1b7   : > { %v3462_v45 = vsel %vm10796_vm2, %v3457_v17, %v3461_v52  ;;  %v3438_v1 = vsel %vm10796_vm2, %v3433_v53, %v3437_v44  ;;  %v3834_v34 = vrot.slane %v13014_v10, 5  ;;  %v13074_v9 = vsel %vm5769_vm13, %v12844_v11, %v12839_v63 }
 0x1b8   : > { %v9527_v40 = vcombine.low %v3452_v62, %v3462_v45  ;;  %v9526_v31 = vcombine.low %v3428_v24, %v3438_v1  ;;  %v2070_v58 = vor.u32 %v2069_v5, %v2066_v60  ;;  %v3832_v52 = vsel %vm11079_vm5, %v9286_v13, %v3831_v39  ;;  %v13100_v13 = vpop.permute.xlu1 %4857  ;;  %v13103_v60 = vld [vmem:[%s10768_s26 + $0x48] sm:$0xf]  ;;  %v13109_v1 = vld [vmem:[%s10768_s26 + $0x4c] sm:$0xf] }
 0x1b9   : > { %v3833_v32 = vrot.slane %v3831_v39, 4  ;;  %v13084_v10 = vsel %vm5769_vm13, %v12881_v4, %v12854_v49  ;;  %v3990_v53 = vshrl.u32 %v9270_v26, 16  ;;  %v3993_v44 = vshll.u32 %v9270_v26, 16  ;;  %v10624_v49 = vld [vmem:[%s15930_s1 + $0x8] sm:$0xff]  }
 0x1ba   : > { %5437 = vrot.lane.b32.xlu1 %v9527_v40, %s10710_s15  ;;  %5435 = vrot.lane.b32.xlu0 %v9526_v31, %s10710_s15  ;;  %v2071_v63 = vsel %vm11273_vm8, %v2062_v59, %v2070_v58  ;;  %v3998_v11 = vrot.slane %v3429_v35, 5  ;;  %v3999_v62 = vrot.slane %v3425_v2, 6  ;;  %v4004_v24 = vshrl.u32 %v9302_v61, 16 }
 0x1bb   : > { %v9432_v4 = vcombine.low %v2061_v28, %v2071_v63  ;;  %v3835_v23 = vsel %vm11079_vm5, %v3833_v32, %v3834_v34  ;;  %v3992_v26 = vrot.slane %v3990_v53, 5  ;;  %v3995_v17 = vrot.slane %v3993_v44, 6  ;;  %9676 = vmatprep.subr.bf16.mxu0 %v10624_v49  ;;  %9756 = vmatprep.subr.bf16.mxu1 %v10624_v49  ;;  %v13111_v34 = vpop.permute.xlu0 %4855  ;;  %v10626_v44 = vld [vmem:[%s15930_s1] sm:$0xff]  }
 0x1bc   : > { %v9542_v59 = vcombine.low %v3832_v52, %v3835_v23  ;;  %v4000_v12 = vor.u32 %v3999_v62, %v3998_v11  ;;  %v4006_v35 = vrot.slane %v4004_v24, 5  ;;  %v4007_v2 = vshll.u32 %v9302_v61, 16  ;;  %9677 = vmatpush3.bf16.msra.mxu0 %v10624_v49  ;;  %9760 = vmatpush3.bf16.msra.mxu1 %v10624_v49  ;;  %v16276_v49 = vld [vmem:[#allocation51_spill] sm:$0xff]  ;;  %v9134_v23 = vld [vmem:[%s10768_s26 + $0x54] sm:$0xf] }
 0x1bd   : > { %v3996_v5 = vor.u32 %v3995_v17, %v3992_v26  ;;  %v9287_v39 = vrot.slane %v13093_v37, 9  ;;  %v3838_v28 = vrot.slane %v12979_v20, 5  ;;  %v3841_v45 = vrot.slane %v13003_v50, 5  ;;  %v13145_v26 = vpop.permute.xlu1 %4861  ;;  %9678 = vmatprep.subr.bf16.mxu0 %v10626_v44  ;;  %9757 = vmatprep.subr.bf16.mxu1 %v10626_v44 }
 0x1be   : > { %4927 = vrot.lane.b32.xlu1 %v9432_v4, %s10704_s9  ;;  %5515 = vrot.lane.b32.xlu0 %v9542_v59, %s10711_s16  ;;  %v4002_v61 = vrot.slane %v4000_v12, 4  ;;  %v4009_v40 = vrot.slane %v4007_v2, 6  ;;  %v13118_v31 = vsel %vm5769_vm13, %v12896_v21, %v12866_v57  ;;  %v13123_v50 = vsel %vm5769_vm13, %v12910_v0, %v12876_v18  ;;  %v9113_v0 = vld [vmem:[%s10768_s26 + $0x50] sm:$0x3]  ;;  %v16278_v2 = vld [vmem:[#allocation57_spill] sm:$0xff] }
 0x1bf   : > { %v3997_v58 = vrot.slane %v3996_v5, 4  ;;  %v3839_v52 = vsel %vm11079_vm5, %v9287_v39, %v3838_v28  ;;  %v3840_v32 = vrot.slane %v3838_v28, 4  ;;  %v2471_v53 = vshrl.u32 %v13103_v60, 16 }
 0x1c0   : > { %v4010_v63 = vor.u32 %v4009_v40, %v4006_v35  ;;  %v2474_v57 = vshll.u32 %v13103_v60, 16  ;;  %v16025_v21 = vshrl.u32 %v13109_v1, 16  ;;  %v9448_v18 = vcombine.low %v13103_v60, %v13109_v1  ;;  %9679 = vmatpush3.bf16.msra.mxu0 %v10626_v44  ;;  %9761 = vmatpush3.bf16.msra.mxu1 %v10626_v44  ;;  %v13156_v40 = vpop.permute.xlu0 %4859 }
 0x1c1   : > { %v4001_v11 = vsel %vm11273_vm8, %v3997_v58, %v4000_v12  ;;  %v3842_v62 = vsel %vm11079_vm5, %v3840_v32, %v3841_v45  ;;  %v13140_v24 = vrot.slane %v2471_v53, 4  ;;  %v2079_v4 = vor.u32 %v16276_v49, %v12307_v16  ;;  %v16277_v12 = vld [vmem:[#allocation13_spill] sm:$0xff]  ;;  %v13154_v45 = vld [vmem:[%s10768_s26 + $0x58] sm:$0xf] }
 0x1c2   : > { %v4011_v17 = vsel %vm11273_vm8, %v4002_v61, %v4010_v63  ;;  %v9543_v59 = vcombine.low %v3839_v52, %v3842_v62  ;;  %v13149_v35 = vrot.slane %v2474_v57, 5  ;;  %v2083_v60 = vor.u32 %v16278_v2, %v16277_v12 }
 0x1c3   : > { %v9558_v5 = vcombine.low %v4001_v11, %v4011_v17  ;;  %v2080_v39 = vrot.slane %v2079_v4, 4  ;;  %v2087_v16 = vshrl.u32 %v9113_v0, 16  ;;  %v2090_v28 = vshll.u32 %v9113_v0, 16  ;;  %v9303_v0 = vld [vmem:[%s10768_s26 + $0x50] sm:$0x3] }
 0x1c4   : > { %5517 = vrot.lane.b32.xlu0 %v9543_v59, %s10711_s16  ;;  %v2085_v61 = vrot.slane %v2083_v60, 4  ;;  %v13162_v58 = vsel %vm5769_vm13, %v12932_v22, %v12891_v48  ;;  %v13167_v52 = vsel %vm5769_vm13, %v12947_v29, %v12905_v3  ;;  %v2495_v32 = vshrl.u32 %v9134_v23, 16  ;;  %v13179_v59 = vpop.permute.xlu1 %4865 }
 0x1c5   : > { %16279 = vst [vmem:[#allocation11_spill] sm:$0xff] %v13162_v58  ;;  %16280 = vst [vmem:[#allocation53_spill] sm:$0xff] %v13167_v52  ;;  %5595 = vrot.lane.b32.xlu1 %v9558_v5, %s10712_s17  ;;  %v2084_v53 = vsel %vm11273_vm8, %v2080_v39, %v2083_v60  ;;  %v2089_v44 = vrot.slane %v2087_v16, 5  ;;  %v2092_v63 = vrot.slane %v2090_v28, 6  ;;  %v2498_v57 = vshll.u32 %v9134_v23, 16 }
 0x1c6   : > { %v2497_v11 = vrot.slane %v2495_v32, 4  ;;  %v2508_v62 = vshrl.u32 %v13154_v45, 16  ;;  %v9449_v48 = vcombine.low %v9134_v23, %v13154_v45  ;;  %v4013_v22 = vshrl.u32 %v13093_v37, 16  ;;  %16282 = vst [vmem:[#allocation14_spill] sm:$0xff] %v13179_v59  ;;  %v13199_v32 = vpop.permute.xlu0 %4863 }
 0x1c7   : > { %v2093_v3 = vor.u32 %v2092_v63, %v2089_v44  ;;  %v2500_v29 = vrot.slane %v2498_v57, 5  ;;  %v4016_v49 = vshll.u32 %v13093_v37, 16  ;;  %v16281_v4 = vshrl.u32 %v12979_v20, 16  ;;  %16286 = vst [vmem:[#allocation13_spill] sm:$0xff] %v13199_v32 }
 0x1c8   : > { %v4015_v12 = vrot.slane %v4013_v22, 5  ;;  %v16283_v2 = vshll.u32 %v12979_v20, 16  ;;  %v4027_v5 = vshrl.u32 %v9303_v0, 16  ;;  %v4030_v39 = vshll.u32 %v9303_v0, 16  ;;  %v13197_v20 = vld [vmem:[%s10768_s26 + $0x5c] sm:$0x1] }
 0x1c9   : > { %v4021_v17 = vrot.slane %v16281_v4, 5  ;;  %5023 = vrot.lane.b32.xlu1 %v9448_v18, %s10705_s10  ;;  %v2094_v23 = vsel %vm11273_vm8, %v2085_v61, %v2093_v3  ;;  %v4018_v16 = vrot.slane %v4016_v49, 6  ;;  %v13189_v37 = vsel %vm5769_vm13, %v12952_v46, %v12926_v47 }
 0x1ca   : > { %v4022_v60 = vrot.slane %v16283_v2, 6  ;;  %16284 = vst [vmem:[#allocation58_spill] sm:$0xff] %v13189_v37  ;;  %v13194_v28 = vsel %vm5769_vm13, %v12975_v55, %v12936_v19  ;;  %v9433_v44 = vcombine.low %v2084_v53, %v2094_v23  ;;  %v4029_v63 = vrot.slane %v4027_v5, 5  ;;  %v16289_v2 = vld [vmem:[#allocation61_spill] sm:$0xff]  ;;  %v16302_v37 = vld [vmem:[#allocation16_spill] sm:$0xff] }
 0x1cb   : > { %16285 = vst [vmem:[#allocation51_spill] sm:$0xff] %v13194_v28  ;;  %v4032_v61 = vrot.slane %v4030_v39, 6  ;;  %v4019_v57 = vor.u32 %v4018_v16, %v4015_v12  ;;  %v2501_v0 = vor.u32 %v2500_v29, %v2497_v11  ;;  %v2504_v22 = vshll.u32 %v13154_v45, 16  ;;  %v9160_v29 = vld [vmem:[%s10768_s26 + $0x50] sm:$0x1]  ;;  %v16288_v12 = vld [vmem:[#allocation20_spill] sm:$0xff] }
 0x1cc   : > { %v4023_v18 = vor.u32 %v4022_v60, %v4021_v17  ;;  %v2510_v47 = vrot.slane %v2508_v62, 4  ;;  %4929 = vrot.lane.b32.xlu0 %v9433_v44, %s10704_s9  ;;  %v2514_v55 = vshll.u32 %v13197_v20, 16  ;;  %v2477_v53 = vor.u32 %v13149_v35, %v13140_v24  ;;  %v13213_v17 = vpop.permute.xlu1 %4869  ;;  %v9177_v44 = vld [vmem:[%s10768_s26 + $0x54] sm:$0xe]  ;;  %v13304_v28 = vld [vmem:[%s10768_s26 + $0x58] sm:$0xf] }
 0x1cd   : > { %v4033_v46 = vor.u32 %v4032_v61, %v4029_v63  ;;  %5025 = vrot.lane.b32.xlu1 %v9449_v48, %s10705_s10  ;;  %v4020_v3 = vrot.slane %v4019_v57, 4  ;;  %v2502_v49 = vrot.slane %v2501_v0, 4  ;;  %v2506_v11 = vrot.slane %v2504_v22, 5  ;;  %16287 = vst [vmem:[#allocation57_spill] sm:$0xff] %v13213_v17  ;;  %v13227_v63 = vpop.permute.xlu0 %4867  ;;  %v16291_v61 = vld [vmem:[#allocation30_spill] sm:$0xff]  ;;  %v16292_v57 = vld [vmem:[#allocation37_spill] sm:$0xff] }
 0x1ce   : > { %v4025_v19 = vrot.slane %v4023_v18, 4  ;;  %v16024_v4 = vshll.u32 %v13109_v1, 16  ;;  %v5738_v60 = vsel %vm309_vm12, %v16289_v2, %v16288_v12  ;;  %v2478_v35 = vrot.slane %v2477_v53, 4  ;;  %16290 = vst [vmem:[#allocation20_spill] sm:$0xff] %v13227_v63  ;;  %v16293_v12 = vld [vmem:[#allocation21_spill] sm:$0xff]  ;;  %v16294_v2 = vld [vmem:[#allocation35_spill] sm:$0xff] }
 0x1cf   : > { %v2486_v48 = vrot.slane %v16025_v21, 4  ;;  %v4024_v5 = vsel %vm11273_vm8, %v4020_v3, %v4023_v18  ;;  %v2511_v39 = vor.u32 %v2510_v47, %v2506_v11  ;;  %v2516_v23 = vrot.slane %v2514_v55, 5  ;;  %v16300_v63 = vld [vmem:[#allocation43_spill] sm:$0xff]  ;;  %v16303_v17 = vld [vmem:[#allocation17_spill] sm:$0xff] }
 0x1d0   : > { %v4034_v24 = vsel %vm11273_vm8, %v4025_v19, %v4033_v46  ;;  %v2482_v16 = vrot.slane %v16024_v4, 5  ;;  %v13232_v0 = vsel %vm309_vm12, %v16292_v57, %v16291_v61  ;;  %v2490_v46 = vshll.u32 %v9160_v29, 16  ;;  %v9176_v57 = vld [vmem:[%s10768_s26 + $0x48] sm:$0xe] }
 0x1d1   : > { %v9559_v19 = vcombine.low %v4024_v5, %v4034_v24  ;;  %v9193_v53 = vrot.slane %v9177_v44, 9  ;;  %v13237_v18 = vsel %vm309_vm12, %v16294_v2, %v16293_v12  ;;  %v2507_v47 = vsel %vm10796_vm2, %v2502_v49, %v2506_v11  ;;  %v13250_v11 = vpop.permute.xlu1 %4921 }
 0x1d2   : > { %v2512_v55 = vrot.slane %v2511_v39, 4  ;;  %v2487_v3 = vor.u32 %v2486_v48, %v2482_v16  ;;  %v2483_v4 = vsel %vm10796_vm2, %v2478_v35, %v2482_v16  ;;  %v2492_v61 = vrot.slane %v2490_v46, 5 }
 0x1d3   : > { %5597 = vrot.lane.b32.xlu0 %v9559_v19, %s10712_s17  ;;  %v2859_v24 = vrot.slane %v13154_v45, 5  ;;  %v2862_v5 = vrot.slane %v13197_v20, 5  ;;  %v9192_v21 = vrot.slane %v9176_v57, 9  ;;  %v2852_v49 = vrot.slane %v13109_v1, 5 }
 0x1d4   : > { %v2517_v12 = vsel %vm10796_vm2, %v2512_v55, %v2516_v23  ;;  %v2488_v2 = vrot.slane %v2487_v3, 4  ;;  %v2855_v16 = vrot.slane %v9160_v29, 5  ;;  %v13257_v20 = vsel %vm5769_vm13, %v12776_v15, %v12700_v7  ;;  %v9209_v55 = vld [vmem:[%s10768_s26 + $0x5c] sm:$0x3]  ;;  %v13264_v3 = vpop.permute.xlu0 %4919 }
 0x1d5   : > { %v9465_v48 = vcombine.low %v2507_v47, %v2517_v12  ;;  %v2860_v35 = vsel %vm11079_vm5, %v9193_v53, %v2859_v24  ;;  %v2861_v39 = vrot.slane %v2859_v24, 4  ;;  %v2853_v19 = vsel %vm11079_vm5, %v9192_v21, %v2852_v49  ;;  %v16295_v47 = vld [vmem:[#allocation48_spill] sm:$0xff] }
 0x1d6   : > { %v2493_v23 = vsel %vm10796_vm2, %v2488_v2, %v2492_v61  ;;  %v2854_v46 = vrot.slane %v2852_v49, 4  ;;  %v13268_v53 = vsel %vm5769_vm13, %v5738_v60, %v16295_v47  ;;  %v3066_v15 = vshrl.u32 %v9177_v44, 16  ;;  %v13281_v47 = vpop.permute.xlu1 %5015 }
 0x1d7   : > { %5105 = vrot.lane.b32.xlu1 %v9465_v48, %s10706_s11  ;;  %v9464_v29 = vcombine.low %v2483_v4, %v2493_v23  ;;  %v2863_v7 = vsel %vm11079_vm5, %v2861_v39, %v2862_v5  ;;  %v3069_v24 = vshll.u32 %v9177_v44, 16  ;;  %v3074_v12 = vrot.slane %v2508_v62, 5  ;;  %v9208_v5 = vld [vmem:[%s10768_s26 + $0x50] sm:$0x3] }
 0x1d8   : > { %v9481_v61 = vcombine.low %v2860_v35, %v2863_v7  ;;  %v2856_v21 = vsel %vm11079_vm5, %v2854_v46, %v2855_v16  ;;  %v3068_v2 = vrot.slane %v3066_v15, 5  ;;  %v3075_v49 = vrot.slane %v2504_v22, 6  ;;  %v13288_v15 = vpop.permute.xlu0 %4923 }
 0x1d9   : > { %5103 = vrot.lane.b32.xlu0 %v9464_v29, %s10706_s11  ;;  %v9480_v60 = vcombine.low %v2853_v19, %v2856_v21  ;;  %v3080_v4 = vshrl.u32 %v9209_v55, 16  ;;  %v3071_v48 = vrot.slane %v3069_v24, 6  ;;  %v3083_v23 = vshll.u32 %v9209_v55, 16 }
 0x1da   : > { %v3043_v39 = vshrl.u32 %v9176_v57, 16  ;;  %v3046_v35 = vshll.u32 %v9176_v57, 16  ;;  %v3076_v44 = vor.u32 %v3075_v49, %v3074_v12  ;;  %v16296_v16 = vshrl.u32 %v13109_v1, 16  ;;  %v9230_v12 = vld [vmem:[%s10768_s26 + $0x60] sm:$0xf]  ;;  %v16298_v49 = vld [vmem:[#allocation7_spill] sm:$0xff] }
 0x1db   : > { %5185 = vrot.lane.b32.xlu1 %v9481_v61, %s10707_s12  ;;  %v3082_v62 = vrot.slane %v3080_v4, 5  ;;  %v16297_v46 = vshll.u32 %v13109_v1, 16  ;;  %v3072_v22 = vor.u32 %v3071_v48, %v3068_v2  ;;  %v3085_v29 = vrot.slane %v3083_v23, 6  ;;  %v13296_v23 = vld [vmem:[%s10768_s26 + $0x64] sm:$0xf] }
 0x1dc   : > { %v3051_v19 = vrot.slane %v16296_v16, 5  ;;  %v3045_v55 = vrot.slane %v3043_v39, 5  ;;  %v3048_v7 = vrot.slane %v3046_v35, 6  ;;  %v3078_v57 = vrot.slane %v3076_v44, 4 }
 0x1dd   : > { %v3052_v45 = vrot.slane %v16297_v46, 6  ;;  %5183 = vrot.lane.b32.xlu0 %v9480_v60, %s10707_s12  ;;  %v3057_v21 = vshrl.u32 %v9208_v5, 16  ;;  %v3060_v24 = vshll.u32 %v9208_v5, 16  ;;  %v5777_v1 = vsel %vm5769_vm13, %v13232_v0, %v16298_v49  ;;  %v9228_v60 = vld [vmem:[%s10768_s26 + $0x54] sm:$0xf]  ;;  %v13306_v0 = vpop.permute.xlu1 %5095 }
 0x1de   : > { %v3073_v4 = vrot.slane %v3072_v22, 4  ;;  %v3086_v2 = vor.u32 %v3085_v29, %v3082_v62  ;;  %v3049_v48 = vor.u32 %v3048_v7, %v3045_v55  ;;  %v3491_v29 = vshll.u32 %v9230_v12, 16 }
 0x1df   : > { %v3053_v61 = vor.u32 %v3052_v45, %v3051_v19  ;;  %v3059_v35 = vrot.slane %v3057_v21, 5  ;;  %v3062_v16 = vrot.slane %v3060_v24, 6  ;;  %v3488_v45 = vshrl.u32 %v9230_v12, 16  ;;  %v13312_v24 = vpop.permute.xlu0 %5017 }
 0x1e0   : > { %v3077_v19 = vsel %vm11273_vm8, %v3073_v4, %v3076_v44  ;;  %v3087_v5 = vsel %vm11273_vm8, %v3078_v57, %v3086_v2  ;;  %v3050_v46 = vrot.slane %v3049_v48, 4  ;;  %v16027_v55 = vshrl.u32 %v13296_v23, 16 }
 0x1e1   : > { %v3055_v39 = vrot.slane %v3053_v61, 4  ;;  %v9497_v62 = vcombine.low %v3077_v19, %v3087_v5  ;;  %v3063_v22 = vor.u32 %v3062_v16, %v3059_v35  ;;  %v3490_v44 = vrot.slane %v3488_v45, 4  ;;  %v13319_v35 = vld [vmem:[%s10768_s26 + $0x68] sm:$0x1]  ;;  %v16299_v16 = vld [vmem:[#allocation12_spill] sm:$0xff] }
 0x1e2   : > { %v3054_v7 = vsel %vm11273_vm8, %v3050_v46, %v3053_v61  ;;  %v9513_v21 = vcombine.low %v9230_v12, %v13296_v23  ;;  %v3464_v57 = vshrl.u32 %v9228_v60, 16  ;;  %v3493_v4 = vrot.slane %v3491_v29, 5  ;;  %v13330_v46 = vld [vmem:[%s10768_s26 + $0x5c] sm:$0x1] }
 0x1e3   : > { %5265 = vrot.lane.b32.xlu1 %v9497_v62, %s10708_s13  ;;  %v3064_v49 = vsel %vm11273_vm8, %v3055_v39, %v3063_v22  ;;  %v3467_v2 = vshll.u32 %v9228_v60, 16  ;;  %v16028_v48 = vshrl.u32 %v13304_v28, 16  ;;  %v5775_v61 = vsel %vm5769_vm13, %v13237_v18, %v16299_v16 }
 0x1e4   : > { %v13327_v12 = vsel %vm5802_vm14, %v13257_v20, %v12962_v41  ;;  %v9496_v19 = vcombine.low %v3054_v7, %v3064_v49  ;;  %v3466_v5 = vrot.slane %v3464_v57, 4  ;;  %v9512_v45 = vcombine.low %v9228_v60, %v13304_v28  ;;  %v13341_v7 = vpop.permute.xlu1 %5175 }
 0x1e5   : > { %v3469_v39 = vrot.slane %v3467_v2, 5  ;;  %v3494_v62 = vor.u32 %v3493_v4, %v3490_v44  ;;  %v16026_v22 = vshll.u32 %v13296_v23, 16  ;;  %v3503_v18 = vrot.slane %v16027_v55, 4  ;;  %v9114_v4 = vld [vmem:[%s10768_s26 + $0x5c] sm:$0x3] }
 0x1e6   : > { %5263 = vrot.lane.b32.xlu0 %v9496_v19, %s10708_s13  ;;  %v3507_v29 = vshll.u32 %v13319_v35, 16  ;;  %v3473_v41 = vshll.u32 %v13304_v28, 16  ;;  %v3479_v20 = vrot.slane %v16028_v48, 4  ;;  %v3483_v49 = vshll.u32 %v13330_v46, 16 }
 0x1e7   : > { %5361 = vrot.lane.b32.xlu1 %v9513_v21, %s10709_s14  ;;  %v3495_v60 = vrot.slane %v3494_v62, 4  ;;  %v3499_v44 = vrot.slane %v16026_v22, 5  ;;  %v3470_v57 = vor.u32 %v3469_v39, %v3466_v5  ;;  %v13351_v2 = vsel %vm5802_vm14, %v13268_v53, %v12969_v42  ;;  %v13357_v62 = vpop.permute.xlu0 %5097  ;;  %v16301_v42 = vld [vmem:[#allocation10_spill] sm:$0xff] }
 0x1e8   : > { %v13355_v16 = vsel %vm5802_vm14, %v5777_v1, %v12989_v27  ;;  %v3509_v19 = vrot.slane %v3507_v29, 5  ;;  %v3475_v21 = vrot.slane %v3473_v41, 5  ;;  %v3485_v55 = vrot.slane %v3483_v49, 5  ;;  %v9272_v29 = vld [vmem:[%s10768_s26 + $0x54] sm:$0xe] }
 0x1e9   : > { %v3500_v5 = vsel %vm10796_vm2, %v3495_v60, %v3499_v44  ;;  %v3504_v39 = vor.u32 %v3503_v18, %v3499_v44  ;;  %v3471_v22 = vrot.slane %v3470_v57, 4  ;;  %v2102_v53 = vor.u32 %v16301_v42, %v16300_v63 }
 0x1ea   : > { %5359 = vrot.lane.b32.xlu0 %v9512_v45, %s10709_s14  ;;  %v3480_v48 = vor.u32 %v3479_v20, %v3475_v21  ;;  %v2106_v27 = vor.u32 %v16303_v17, %v16302_v37  ;;  %v2110_v1 = vshrl.u32 %v9114_v4, 16  ;;  %v2113_v60 = vshll.u32 %v9114_v4, 16  ;;  %v13369_v20 = vpop.permute.xlu1 %5255 }
 0x1eb   : > { %v3505_v58 = vrot.slane %v3504_v39, 4  ;;  %v3476_v59 = vsel %vm10796_vm2, %v3471_v22, %v3475_v21  ;;  %v9288_v18 = vrot.slane %v9272_v29, 9  ;;  %v2103_v57 = vrot.slane %v2102_v53, 4  ;;  %v9304_v39 = vld [vmem:[%s10768_s26 + $0x5c] sm:$0x3]  ;;  %v13384_v53 = vpop.permute.xlu0 %5177 }
 0x1ec   : > { %v3481_v44 = vrot.slane %v3480_v48, 4  ;;  %v2108_v49 = vrot.slane %v2106_v27, 4  ;;  %v2112_v45 = vrot.slane %v2110_v1, 5  ;;  %v2115_v42 = vrot.slane %v2113_v60, 6  ;;  %v13397_v60 = vld [vmem:[%s10768_s26 + $0x60] sm:$0xe] }
 0x1ed   : > { %v3510_v63 = vsel %vm10796_vm2, %v3505_v58, %v3509_v19  ;;  %v3845_v37 = vrot.slane %v13304_v28, 5  ;;  %v3848_v17 = vrot.slane %v13330_v46, 5  ;;  %v13377_v22 = vsel %vm5802_vm14, %v5775_v61, %v12993_v8 }
 0x1ee   : > { %v9529_v4 = vcombine.low %v3500_v5, %v3510_v63  ;;  %v3486_v48 = vsel %vm10796_vm2, %v3481_v44, %v3485_v55  ;;  %v2107_v21 = vsel %vm11273_vm8, %v2103_v57, %v2106_v27  ;;  %v2116_v19 = vor.u32 %v2115_v42, %v2112_v45 }
 0x1ef   : > { %v9528_v58 = vcombine.low %v3476_v59, %v3486_v48  ;;  %v3846_v46 = vsel %vm11079_vm5, %v9288_v18, %v3845_v37  ;;  %v3847_v1 = vrot.slane %v3845_v37, 4  ;;  %v13391_v8 = vsel %vm5802_vm14, %v13011_v54, %v13026_v56 }
 0x1f0   : > { %5441 = vrot.lane.b32.xlu1 %v9529_v4, %s10710_s15  ;;  %v4036_v55 = vshrl.u32 %v9272_v29, 16  ;;  %v4039_v61 = vshll.u32 %v9272_v29, 16  ;;  %v16304_v5 = vshrl.u32 %v13304_v28, 16  ;;  %v2117_v59 = vsel %vm11273_vm8, %v2108_v49, %v2116_v19  ;;  %v13405_v29 = vld [vmem:[%s10768_s26 + $0x60] sm:$0xf]  ;;  %v13407_v28 = vpop.permute.xlu1 %5351 }
 0x1f1   : > { %5439 = vrot.lane.b32.xlu0 %v9528_v58, %s10710_s15  ;;  %v3849_v18 = vsel %vm11079_vm5, %v3847_v1, %v3848_v17  ;;  %v4045_v44 = vrot.slane %v3473_v41, 6  ;;  %v4050_v54 = vshrl.u32 %v9304_v39, 16  ;;  %v9434_v56 = vcombine.low %v2107_v21, %v2117_v59 }
 0x1f2   : > { %v4044_v27 = vrot.slane %v16304_v5, 5  ;;  %v9544_v57 = vcombine.low %v3846_v46, %v3849_v18  ;;  %v4038_v45 = vrot.slane %v4036_v55, 5  ;;  %v4041_v63 = vrot.slane %v4039_v61, 6  ;;  %v13418_v58 = vpop.permute.xlu0 %5257 }
 0x1f3   : > { %v4052_v37 = vrot.slane %v4050_v54, 5  ;;  %v4053_v4 = vshll.u32 %v9304_v39, 16  ;;  %v9289_v48 = vrot.slane %v13397_v60, 9  ;;  %v13413_v49 = vsel %vm5802_vm14, %v13019_v36, %v13041_v38  ;;  %v13427_v38 = vld [vmem:[%s10768_s26 + $0x64] sm:$0xf]  ;;  %v16306_v54 = vld [vmem:[#allocation50_spill] sm:$0xff] }
 0x1f4   : > { %v4046_v42 = vor.u32 %v4045_v44, %v4044_v27  ;;  %4931 = vrot.lane.b32.xlu1 %v9434_v56, %s10704_s9  ;;  %v4042_v41 = vor.u32 %v4041_v63, %v4038_v45  ;;  %v3852_v17 = vrot.slane %v13296_v23, 5  ;;  %v3855_v21 = vrot.slane %v13319_v35, 5  ;;  %v16305_v44 = vld [vmem:[#allocation42_spill] sm:$0xff]  ;;  %v13454_v45 = vpop.permute.xlu1 %5431  ;;  %v16307_v63 = vld [vmem:[#allocation15_spill] sm:$0xff] }
 0x1f5   : > { %v13423_v39 = vsel %vm5802_vm14, %v13038_v43, %v13061_v33  ;;  %5519 = vrot.lane.b32.xlu0 %v9544_v57, %s10711_s16  ;;  %v4055_v36 = vrot.slane %v4053_v4, 6  ;;  %v2519_v46 = vshrl.u32 %v13405_v29, 16  ;;  %v13433_v35 = vsel %vm5802_vm14, %v13046_v14, %v13077_v6  ;;  %v9115_v33 = vld [vmem:[%s10768_s26 + $0x68] sm:$0x3]  ;;  %v9138_v57 = vld [vmem:[%s10768_s26 + $0x6c] sm:$0xf] }
 0x1f6   : > { %v4048_v19 = vrot.slane %v4046_v42, 4  ;;  %v4043_v1 = vrot.slane %v4042_v41, 4  ;;  %v3853_v55 = vsel %vm11079_vm5, %v9289_v48, %v3852_v17  ;;  %v3854_v43 = vrot.slane %v3852_v17, 4 }
 0x1f7   : > { %v13441_v61 = vsel %vm5802_vm14, %v13074_v9, %v13100_v13  ;;  %v4056_v5 = vor.u32 %v4055_v36, %v4052_v37  ;;  %v13443_v27 = vrot.slane %v2519_v46, 4  ;;  %v2522_v59 = vshll.u32 %v13405_v29, 16  ;;  %v16308_v37 = vld [vmem:[#allocation22_spill] sm:$0xff]  ;;  %v13465_v46 = vpop.permute.xlu0 %5353 }
 0x1f8   : > { %v4047_v14 = vsel %vm11273_vm8, %v4043_v1, %v4046_v42  ;;  %v3856_v6 = vsel %vm11079_vm5, %v3854_v43, %v3855_v21  ;;  %v2125_v56 = vor.u32 %v16306_v54, %v16305_v44  ;;  %v2129_v4 = vor.u32 %v16308_v37, %v16307_v63  ;;  %v13461_v42 = vld [vmem:[%s10768_s26 + $0x70] sm:$0xf]  ;;  %v9163_v44 = vld [vmem:[%s10768_s26 + $0x74] sm:$0x1] }
 0x1f9   : > { %v4057_v9 = vsel %vm11273_vm8, %v4048_v19, %v4056_v5  ;;  %v9545_v13 = vcombine.low %v3853_v55, %v3856_v6  ;;  %v2133_v48 = vshrl.u32 %v9115_v33, 16  ;;  %v9450_v17 = vcombine.low %v13405_v29, %v13427_v38  ;;  %v9305_v29 = vld [vmem:[%s10768_s26 + $0x68] sm:$0x3] }
 0x1fa   : > { %v9560_v41 = vcombine.low %v4047_v14, %v4057_v9  ;;  %v2126_v21 = vrot.slane %v2125_v56, 4  ;;  %v2136_v36 = vshll.u32 %v9115_v33, 16  ;;  %v2524_v1 = vrot.slane %v2522_v59, 5 }
 0x1fb   : > { %5521 = vrot.lane.b32.xlu0 %v9545_v13, %s10711_s16  ;;  %v2131_v19 = vrot.slane %v2129_v4, 4  ;;  %v2135_v55 = vrot.slane %v2133_v48, 5  ;;  %v2543_v43 = vshrl.u32 %v9138_v57, 16  ;;  %v2546_v14 = vshll.u32 %v9138_v57, 16 }
 0x1fc   : > { %5599 = vrot.lane.b32.xlu1 %v9560_v41, %s10712_s17  ;;  %v2130_v5 = vsel %vm11273_vm8, %v2126_v21, %v2129_v4  ;;  %v2138_v6 = vrot.slane %v2136_v36, 6  ;;  %v9451_v33 = vcombine.low %v9138_v57, %v13461_v42  ;;  %v4059_v56 = vshrl.u32 %v13397_v60, 16  ;;  %v13480_v41 = vpop.permute.xlu1 %5511 }
 0x1fd   : > { %v2545_v54 = vrot.slane %v2543_v43, 4  ;;  %v4062_v59 = vshll.u32 %v13397_v60, 16  ;;  %v2548_v13 = vrot.slane %v2546_v14, 5  ;;  %v16309_v63 = vshrl.u32 %v13296_v23, 16 }
 0x1fe   : > { %v2139_v9 = vor.u32 %v2138_v6, %v2135_v55  ;;  %v16310_v48 = vshll.u32 %v13296_v23, 16  ;;  %v4061_v21 = vrot.slane %v4059_v56, 5  ;;  %v4073_v43 = vshrl.u32 %v9305_v29, 16  ;;  %v13485_v6 = vpop.permute.xlu0 %5433 }
 0x1ff   : > { %v4067_v37 = vrot.slane %v16309_v63, 5  ;;  %v4064_v36 = vrot.slane %v4062_v59, 6  ;;  %v4076_v18 = vshll.u32 %v9305_v29, 16  ;;  %v2549_v55 = vor.u32 %v2548_v13, %v2545_v54  ;;  %v9162_v54 = vld [vmem:[%s10768_s26 + $0x68] sm:$0x1] }
 0x200   : > { %v4068_v4 = vrot.slane %v16310_v48, 6  ;;  %5027 = vrot.lane.b32.xlu1 %v9450_v17, %s10705_s10  ;;  %v2140_v60 = vsel %vm11273_vm8, %v2131_v19, %v2139_v9  ;;  %v4075_v63 = vrot.slane %v4073_v43, 5  ;;  %v13491_v29 = vsel %vm5802_vm14, %v13084_v10, %v13111_v34 }
 0x201   : > { %v9435_v23 = vcombine.low %v2130_v5, %v2140_v60  ;;  %v4065_v14 = vor.u32 %v4064_v36, %v4061_v21  ;;  %v4078_v48 = vrot.slane %v4076_v18, 6  ;;  %v13496_v17 = vsel %vm5835_vm15, %v13327_v12, %v13250_v11 }
 0x202   : > { %v4069_v57 = vor.u32 %v4068_v4, %v4067_v37  ;;  %v2550_v19 = vrot.slane %v2549_v55, 4  ;;  %v2552_v18 = vshll.u32 %v13461_v42, 16  ;;  %v16311_v9 = vshrl.u32 %v13461_v42, 16  ;;  %v13508_v4 = vpop.permute.xlu1 %5591 }
 0x203   : > { %4933 = vrot.lane.b32.xlu0 %v9435_v23, %s10704_s9  ;;  %v4066_v5 = vrot.slane %v4065_v14, 4  ;;  %v4079_v59 = vor.u32 %v4078_v48, %v4075_v63  ;;  %v2562_v10 = vshll.u32 %v9163_v44, 16  ;;  %v2525_v34 = vor.u32 %v2524_v1, %v13443_v27  ;;  %v13519_v23 = vpop.permute.xlu0 %5513 }
 0x204   : > { %v4071_v56 = vrot.slane %v4069_v57, 4  ;;  %v2558_v13 = vrot.slane %v16311_v9, 4  ;;  %5029 = vrot.lane.b32.xlu1 %v9451_v33, %s10705_s10  ;;  %v2528_v37 = vshll.u32 %v13427_v38, 16  ;;  %v16312_v11 = vshrl.u32 %v13427_v38, 16 }
 0x205   : > { %v4070_v21 = vsel %vm11273_vm8, %v4066_v5, %v4069_v57  ;;  %v2554_v43 = vrot.slane %v2552_v18, 5  ;;  %v2538_v60 = vshll.u32 %v9162_v54, 16  ;;  %v5837_v27 = vsel %vm5835_vm15, %v13351_v2, %v13264_v3  ;;  %v9179_v5 = vld [vmem:[%s10768_s26 + $0x6c] sm:$0xe] }
 0x206   : > { %v2534_v12 = vrot.slane %v16312_v11, 4  ;;  %v4080_v36 = vsel %vm11273_vm8, %v4071_v56, %v4079_v59  ;;  %v2526_v1 = vrot.slane %v2525_v34, 4  ;;  %v2530_v55 = vrot.slane %v2528_v37, 5 }
 0x207   : > { %v9561_v33 = vcombine.low %v4070_v21, %v4080_v36  ;;  %v2555_v57 = vsel %vm10796_vm2, %v2550_v19, %v2554_v43  ;;  %v2559_v14 = vor.u32 %v2558_v13, %v2554_v43  ;;  %v2564_v63 = vrot.slane %v2562_v10, 5  ;;  %v9178_v13 = vld [vmem:[%s10768_s26 + $0x60] sm:$0xe]  ;;  %v13532_v43 = vpop.permute.xlu1 %5019 }
 0x208   : > { %v2531_v48 = vsel %vm10796_vm2, %v2526_v1, %v2530_v55  ;;  %v2535_v56 = vor.u32 %v2534_v12, %v2530_v55  ;;  %v2540_v3 = vrot.slane %v2538_v60, 5  ;;  %v5870_v2 = vsel %vm5868_vm0, %v5837_v27, %v13281_v47  ;;  %v9211_v55 = vld [vmem:[%s10768_s26 + $0x74] sm:$0x3] }
 0x209   : > { %5601 = vrot.lane.b32.xlu0 %v9561_v33, %s10712_s17  ;;  %v2560_v59 = vrot.slane %v2559_v14, 4  ;;  %v9195_v9 = vrot.slane %v9179_v5, 9  ;;  %v2873_v34 = vrot.slane %v13461_v42, 5  ;;  %v2876_v19 = vrot.slane %v9163_v44, 5 }
 0x20a   : > { %v2536_v10 = vrot.slane %v2535_v56, 4  ;;  %v9194_v11 = vrot.slane %v9178_v13, 9  ;;  %v2866_v21 = vrot.slane %v13427_v38, 5  ;;  %v2869_v36 = vrot.slane %v9162_v54, 5  ;;  %v13543_v54 = vpop.permute.xlu0 %4925 }
 0x20b   : > { %v2565_v12 = vsel %vm10796_vm2, %v2560_v59, %v2564_v63  ;;  %v2874_v47 = vsel %vm11079_vm5, %v9195_v9, %v2873_v34  ;;  %v2875_v60 = vrot.slane %v2873_v34, 4  ;;  %v13548_v63 = vsel %vm5835_vm15, %v13377_v22, %v13288_v15 }
 0x20c   : > { %v9467_v33 = vcombine.low %v2555_v57, %v2565_v12  ;;  %v2541_v44 = vsel %vm10796_vm2, %v2536_v10, %v2540_v3  ;;  %v2867_v27 = vsel %vm11079_vm5, %v9194_v11, %v2866_v21  ;;  %v2868_v1 = vrot.slane %v2866_v21, 4 }
 0x20d   : > { %v9466_v14 = vcombine.low %v2531_v48, %v2541_v44  ;;  %v2877_v57 = vsel %vm11079_vm5, %v2875_v60, %v2876_v19  ;;  %v5903_v56 = vsel %vm5901_vm1, %v5870_v2, %v13306_v0  ;;  %v3112_v9 = vshrl.u32 %v9179_v5, 16  ;;  %v9210_v0 = vld [vmem:[%s10768_s26 + $0x68] sm:$0x3]  ;;  %v13561_v60 = vpop.permute.xlu1 %5021 }
 0x20e   : > { %5109 = vrot.lane.b32.xlu1 %v9467_v33, %s10706_s11  ;;  %v9483_v3 = vcombine.low %v2874_v47, %v2877_v57  ;;  %v2870_v59 = vsel %vm11079_vm5, %v2868_v1, %v2869_v36  ;;  %v3115_v48 = vshll.u32 %v9179_v5, 16  ;;  %v16313_v15 = vshrl.u32 %v13461_v42, 16 }
 0x20f   : > { %5107 = vrot.lane.b32.xlu0 %v9466_v14, %s10706_s11  ;;  %v9482_v34 = vcombine.low %v2867_v27, %v2870_v59  ;;  %v3121_v10 = vrot.slane %v2552_v18, 6  ;;  %v3126_v11 = vshrl.u32 %v9211_v55, 16  ;;  %v3114_v19 = vrot.slane %v3112_v9, 5 }
 0x210   : > { %v3120_v22 = vrot.slane %v16313_v15, 5  ;;  %v3117_v21 = vrot.slane %v3115_v48, 6  ;;  %v3129_v12 = vshll.u32 %v9211_v55, 16  ;;  %v3089_v2 = vshrl.u32 %v9178_v13, 16  ;;  %v13568_v55 = vpop.permute.xlu0 %5593 }
 0x211   : > { %v3128_v33 = vrot.slane %v3126_v11, 5  ;;  %v3092_v36 = vshll.u32 %v9178_v13, 16  ;;  %v16314_v5 = vshrl.u32 %v13427_v38, 16  ;;  %v3098_v1 = vrot.slane %v2528_v37, 6  ;;  %v13576_v11 = vld [vmem:[%s10768_s26 + $0x7c] sm:$0xf] }
 0x212   : > { %v3122_v47 = vor.u32 %v3121_v10, %v3120_v22  ;;  %5189 = vrot.lane.b32.xlu1 %v9483_v3, %s10707_s12  ;;  %v3118_v42 = vor.u32 %v3117_v21, %v3114_v19  ;;  %v3131_v27 = vrot.slane %v3129_v12, 6  ;;  %v3091_v18 = vrot.slane %v3089_v2, 5  ;;  %v9234_v3 = vld [vmem:[%s10768_s26 + $0x78] sm:$0xf]  ;;  %v13585_v2 = vpop.permute.xlu1 %5101 }
 0x213   : > { %v3097_v44 = vrot.slane %v16314_v5, 5  ;;  %5187 = vrot.lane.b32.xlu0 %v9482_v34, %s10707_s12  ;;  %v3094_v13 = vrot.slane %v3092_v36, 6  ;;  %v3103_v57 = vshrl.u32 %v9210_v0, 16  ;;  %v3106_v59 = vshll.u32 %v9210_v0, 16  ;;  %v9232_v34 = vld [vmem:[%s10768_s26 + $0x6c] sm:$0xf] }
 0x214   : > { %v3124_v14 = vrot.slane %v3122_v47, 4  ;;  %v3119_v9 = vrot.slane %v3118_v42, 4  ;;  %v3132_v48 = vor.u32 %v3131_v27, %v3128_v33  ;;  %v5872_v38 = vsel %vm5868_vm0, %v13496_v17, %v13312_v24  ;;  %v13588_v5 = vld [vmem:[%s10768_s26 + $0x70] sm:$0xf] }
 0x215   : > { %v3099_v15 = vor.u32 %v3098_v1, %v3097_v44  ;;  %v3095_v37 = vor.u32 %v3094_v13, %v3091_v18  ;;  %v3105_v22 = vrot.slane %v3103_v57, 5  ;;  %v3108_v10 = vrot.slane %v3106_v59, 6  ;;  %v13592_v18 = vpop.permute.xlu0 %5099 }
 0x216   : > { %v3123_v19 = vsel %vm11273_vm8, %v3119_v9, %v3122_v47  ;;  %v3133_v21 = vsel %vm11273_vm8, %v3124_v14, %v3132_v48  ;;  %v5936_v0 = vsel %vm5934_vm3, %v5903_v56, %v13341_v7  ;;  %v3536_v36 = vshrl.u32 %v9234_v3, 16  ;;  %v13601_v48 = vld [vmem:[%s10768_s26 + $0x80] sm:$0x1] }
 0x217   : > { %v3101_v12 = vrot.slane %v3099_v15, 4  ;;  %v9499_v33 = vcombine.low %v3123_v19, %v3133_v21  ;;  %v3096_v24 = vrot.slane %v3095_v37, 4  ;;  %v3109_v17 = vor.u32 %v3108_v10, %v3105_v22 }
 0x218   : > { %v3539_v44 = vshll.u32 %v9234_v3, 16  ;;  %v16030_v42 = vshrl.u32 %v13576_v11, 16  ;;  %v9515_v47 = vcombine.low %v9234_v3, %v13576_v11  ;;  %v3512_v27 = vshrl.u32 %v9232_v34, 16 }
 0x219   : > { %5269 = vrot.lane.b32.xlu1 %v9499_v33, %s10708_s13  ;;  %v3100_v7 = vsel %vm11273_vm8, %v3096_v24, %v3099_v15  ;;  %v3110_v56 = vsel %vm11273_vm8, %v3101_v12, %v3109_v17  ;;  %v3538_v1 = vrot.slane %v3536_v36, 4  ;;  %v3515_v14 = vshll.u32 %v9232_v34, 16  ;;  %v13607_v15 = vld [vmem:[%s10768_s26 + $0x74] sm:$0x1]  ;;  %v13615_v33 = vpop.permute.xlu1 %5181 }
 0x21a   : > { %v9498_v13 = vcombine.low %v3100_v7, %v3110_v56  ;;  %v3541_v57 = vrot.slane %v3539_v44, 5  ;;  %v3514_v59 = vrot.slane %v3512_v27, 4  ;;  %v16031_v9 = vshrl.u32 %v13588_v5, 16  ;;  %v13625_v44 = vpop.permute.xlu0 %5179 }
 0x21b   : > { %v5905_v3 = vsel %vm5901_vm1, %v5872_v38, %v13357_v62  ;;  %v3517_v37 = vrot.slane %v3515_v14, 5  ;;  %v9514_v22 = vcombine.low %v9232_v34, %v13588_v5  ;;  %v16029_v21 = vshll.u32 %v13576_v11, 16 }
 0x21c   : > { %5267 = vrot.lane.b32.xlu0 %v9498_v13, %s10708_s13  ;;  %v5938_v10 = vsel %vm5934_vm3, %v5905_v3, %v13384_v53  ;;  %v3542_v19 = vor.u32 %v3541_v57, %v3538_v1  ;;  %v3551_v12 = vrot.slane %v16030_v42, 4  ;;  %v3555_v62 = vshll.u32 %v13601_v48, 16  ;;  %v9116_v1 = vld [vmem:[%s10768_s26 + $0x74] sm:$0x3]  ;;  %v9274_v42 = vld [vmem:[%s10768_s26 + $0x6c] sm:$0xe] }
 0x21d   : > { %5365 = vrot.lane.b32.xlu1 %v9515_v47, %s10709_s14  ;;  %v3518_v38 = vor.u32 %v3517_v37, %v3514_v59  ;;  %v3521_v34 = vshll.u32 %v13588_v5, 16  ;;  %v3527_v24 = vrot.slane %v16031_v9, 4  ;;  %v3547_v17 = vrot.slane %v16029_v21, 5 }
 0x21e   : > { %v3543_v53 = vrot.slane %v3542_v19, 4  ;;  %v3531_v36 = vshll.u32 %v13607_v15, 16  ;;  %v5969_v47 = vsel %vm5967_vm4, %v5936_v0, %v13369_v20  ;;  %v3557_v27 = vrot.slane %v3555_v62, 5  ;;  %v16315_v19 = vld [vmem:[#allocation60_spill] sm:$0xff]  ;;  %v16316_v20 = vld [vmem:[#allocation59_spill] sm:$0xff] }
 0x21f   : > { %v3519_v7 = vrot.slane %v3518_v38, 4  ;;  %v3523_v56 = vrot.slane %v3521_v34, 5  ;;  %v3552_v13 = vor.u32 %v3551_v12, %v3547_v17  ;;  %v6002_v59 = vsel %vm6000_vm6, %v5969_v47, %v13407_v28  ;;  %v16317_v62 = vld [vmem:[#allocation23_spill] sm:$0xff]  ;;  %v16318_v38 = vld [vmem:[#allocation25_spill] sm:$0xff]  ;;  %v13642_v12 = vpop.permute.xlu1 %5261 }
 0x220   : > { %5363 = vrot.lane.b32.xlu0 %v9514_v22, %s10709_s14  ;;  %v3548_v14 = vsel %vm10796_vm2, %v3543_v53, %v3547_v17  ;;  %v3533_v57 = vrot.slane %v3531_v36, 5  ;;  %v2148_v0 = vor.u32 %v16316_v20, %v16315_v19  ;;  %v2152_v21 = vor.u32 %v16318_v38, %v16317_v62 }
 0x221   : > { %v3524_v3 = vsel %vm10796_vm2, %v3519_v7, %v3523_v56  ;;  %v3528_v37 = vor.u32 %v3527_v24, %v3523_v56  ;;  %v3553_v22 = vrot.slane %v3552_v13, 4  ;;  %v2156_v9 = vshrl.u32 %v9116_v1, 16 }
 0x222   : > { %v2159_v52 = vshll.u32 %v9116_v1, 16  ;;  %v9290_v53 = vrot.slane %v9274_v42, 9  ;;  %v2149_v36 = vrot.slane %v2148_v0, 4  ;;  %v2154_v28 = vrot.slane %v2152_v21, 4  ;;  %v13648_v13 = vpop.permute.xlu0 %5259 }
 0x223   : > { %v3529_v17 = vrot.slane %v3528_v37, 4  ;;  %v3859_v47 = vrot.slane %v13588_v5, 5  ;;  %v3558_v24 = vsel %vm10796_vm2, %v3553_v22, %v3557_v27  ;;  %v2158_v7 = vrot.slane %v2156_v9, 5  ;;  %v13663_v22 = vld [vmem:[%s10768_s26 + $0x78] sm:$0xe] }
 0x224   : > { %v2161_v56 = vrot.slane %v2159_v52, 6  ;;  %v3862_v19 = vrot.slane %v13607_v15, 5  ;;  %v9531_v1 = vcombine.low %v3548_v14, %v3558_v24  ;;  %v2153_v37 = vsel %vm11273_vm8, %v2149_v36, %v2152_v21  ;;  %v9306_v15 = vld [vmem:[%s10768_s26 + $0x74] sm:$0x3] }
 0x225   : > { %v3534_v20 = vsel %vm10796_vm2, %v3529_v17, %v3533_v57  ;;  %v3860_v0 = vsel %vm11079_vm5, %v9290_v53, %v3859_v47  ;;  %v3861_v38 = vrot.slane %v3859_v47, 4  ;;  %v5971_v52 = vsel %vm5967_vm4, %v5938_v10, %v13418_v58  ;;  %v13672_v10 = vpop.permute.xlu1 %5357 }
 0x226   : > { %v9530_v62 = vcombine.low %v3524_v3, %v3534_v20  ;;  %v2162_v27 = vor.u32 %v2161_v56, %v2158_v7  ;;  %5445 = vrot.lane.b32.xlu1 %v9531_v1, %s10710_s15  ;;  %v6035_v9 = vsel %vm6033_vm7, %v6002_v59, %v13454_v45  ;;  %v4082_v14 = vshrl.u32 %v9274_v42, 16  ;;  %v13675_v56 = vpop.permute.xlu0 %5355  ;;  %v9140_v1 = vld [vmem:[%s10768_s26 + $0x78] sm:$0xf] }
 0x227   : > { %v4085_v57 = vshll.u32 %v9274_v42, 16  ;;  %v3863_v3 = vsel %vm11079_vm5, %v3861_v38, %v3862_v19  ;;  %v16319_v53 = vshrl.u32 %v13588_v5, 16  ;;  %v4091_v58 = vrot.slane %v3521_v34, 6 }
 0x228   : > { %5443 = vrot.lane.b32.xlu0 %v9530_v62, %s10710_s15  ;;  %v2163_v21 = vsel %vm11273_vm8, %v2154_v28, %v2162_v27  ;;  %v9546_v59 = vcombine.low %v3860_v0, %v3863_v3  ;;  %v4084_v42 = vrot.slane %v4082_v14, 5  ;;  %v4096_v24 = vshrl.u32 %v9306_v15, 16  ;;  %v13685_v27 = vld [vmem:[%s10768_s26 + $0x7c] sm:$0xf]  ;;  %v9117_v3 = vld [vmem:[%s10768_s26 + $0x80] sm:$0x3] }
 0x229   : > { %v4090_v17 = vrot.slane %v16319_v53, 5  ;;  %v9436_v45 = vcombine.low %v2153_v37, %v2163_v21  ;;  %v4087_v36 = vrot.slane %v4085_v57, 6  ;;  %v4099_v7 = vshll.u32 %v9306_v15, 16 }
 0x22a   : > { %v9291_v28 = vrot.slane %v13663_v22, 9  ;;  %v3866_v34 = vrot.slane %v13576_v11, 5  ;;  %v3869_v19 = vrot.slane %v13601_v48, 5  ;;  %vm6066_vm9 = vcmask 457728  }
 0x22b   : > { %v4092_v47 = vor.u32 %v4091_v58, %v4090_v17  ;;  %4935 = vrot.lane.b32.xlu1 %v9436_v45, %s10704_s9  ;;  %v4088_v5 = vor.u32 %v4087_v36, %v4084_v42  ;;  %v6004_v20 = vsel %vm6000_vm6, %v5971_v52, %v13465_v46  ;;  %v4098_v0 = vrot.slane %v4096_v24, 5  ;;  %v9142_v42 = vld [vmem:[%s10768_s26 + $0x84] sm:$0xf] }
 0x22c   : > { %5523 = vrot.lane.b32.xlu0 %v9546_v59, %s10711_s16  ;;  %v4101_v62 = vrot.slane %v4099_v7, 6  ;;  %v3867_v15 = vsel %vm11079_vm5, %v9291_v28, %v3866_v34  ;;  %v3868_v14 = vrot.slane %v3866_v34, 4  ;;  %v6068_v48 = vsel %vm6066_vm9, %v6035_v9, %v13480_v41  ;;  %v13694_v53 = vpop.permute.xlu1 %5437  ;;  %v16320_v59 = vld [vmem:[#allocation55_spill] sm:$0xff]  ;;  %v16321_v41 = vld [vmem:[#allocation56_spill] sm:$0xff]  ;;  %v13710_v28 = vld [vmem:[%s10768_s26 + $0x88] sm:$0xf] }
 0x22d   : > { %v4094_v37 = vrot.slane %v4092_v47, 4  ;;  %v4089_v38 = vrot.slane %v4088_v5, 4  ;;  %v6037_v21 = vsel %vm6033_vm7, %v6004_v20, %v13485_v6  ;;  %v2567_v46 = vshrl.u32 %v9140_v1, 16  ;;  %v16323_v20 = vld [vmem:[#allocation33_spill] sm:$0xff] }
 0x22e   : > { %v4102_v57 = vor.u32 %v4101_v62, %v4098_v0  ;;  %v2570_v52 = vshll.u32 %v9140_v1, 16  ;;  %v3870_v58 = vsel %vm11079_vm5, %v3868_v14, %v3869_v19  ;;  %v2171_v9 = vor.u32 %v16321_v41, %v16320_v59  ;;  %v16322_v19 = vld [vmem:[#allocation18_spill] sm:$0xff] }
 0x22f   : > { %v4093_v17 = vsel %vm11273_vm8, %v4089_v38, %v4092_v47  ;;  %v9547_v36 = vcombine.low %v3867_v15, %v3870_v58  ;;  %v13706_v24 = vrot.slane %v2567_v46, 4  ;;  %v9452_v7 = vcombine.low %v9140_v1, %v13685_v27  ;;  %v13712_v47 = vpop.permute.xlu0 %5435  ;;  %v9307_v58 = vld [vmem:[%s10768_s26 + $0x80] sm:$0x3] }
 0x230   : > { %v4103_v6 = vsel %vm11273_vm8, %v4094_v37, %v4102_v57  ;;  %v2172_v34 = vrot.slane %v2171_v9, 4  ;;  %v2175_v0 = vor.u32 %v16323_v20, %v16322_v19  ;;  %v2179_v62 = vshrl.u32 %v9117_v3, 16 }
 0x231   : > { %v9562_v5 = vcombine.low %v4093_v17, %v4103_v6  ;;  %5525 = vrot.lane.b32.xlu0 %v9547_v36, %s10711_s16  ;;  %v2572_v38 = vrot.slane %v2570_v52, 5  ;;  %v2182_v37 = vshll.u32 %v9117_v3, 16  ;;  %v2591_v15 = vshrl.u32 %v9142_v42, 16  ;;  %v13723_v36 = vpop.permute.xlu1 %4927 }
 0x232   : > { %v2594_v14 = vshll.u32 %v9142_v42, 16  ;;  %v2176_v1 = vsel %vm11273_vm8, %v2172_v34, %v2175_v0  ;;  %v2177_v57 = vrot.slane %v2175_v0, 4  ;;  %v2181_v46 = vrot.slane %v2179_v62, 5 }
 0x233   : > { %5603 = vrot.lane.b32.xlu1 %v9562_v5, %s10712_s17  ;;  %v2184_v59 = vrot.slane %v2182_v37, 6  ;;  %v2593_v41 = vrot.slane %v2591_v15, 4  ;;  %v9453_v6 = vcombine.low %v9142_v42, %v13710_v28  ;;  %v4105_v52 = vshrl.u32 %v13663_v22, 16  ;;  %v13731_v15 = vpop.permute.xlu0 %5515 }
 0x234   : > { %v2596_v9 = vrot.slane %v2594_v14, 5  ;;  %v4108_v3 = vshll.u32 %v13663_v22, 16  ;;  %v16324_v5 = vshrl.u32 %v13576_v11, 16  ;;  %v16325_v34 = vshll.u32 %v13576_v11, 16 }
 0x235   : > { %v2185_v0 = vor.u32 %v2184_v59, %v2181_v46  ;;  %v4119_v62 = vshrl.u32 %v9307_v58, 16  ;;  %v4122_v37 = vshll.u32 %v9307_v58, 16  ;;  %vm6099_vm11 = vcmask 490496   ;;  %v9165_v46 = vld [vmem:[%s10768_s26 + $0x8c] sm:$0x1] }
 0x236   : > { %v4113_v19 = vrot.slane %v16324_v5, 5  ;;  %v4114_v20 = vrot.slane %v16325_v34, 6  ;;  %v4107_v42 = vrot.slane %v4105_v52, 5  ;;  %v4110_v14 = vrot.slane %v4108_v3, 6 }
 0x237   : > { %5031 = vrot.lane.b32.xlu1 %v9452_v7, %s10705_s10  ;;  %v6101_v22 = vsel %vm6099_vm11, %v6068_v48, %v13508_v4  ;;  %v2186_v5 = vsel %vm11273_vm8, %v2177_v57, %v2185_v0  ;;  %v4121_v11 = vrot.slane %v4119_v62, 5  ;;  %v4124_v17 = vrot.slane %v4122_v37, 6  ;;  %v13746_v52 = vpop.permute.xlu1 %5595 }
 0x238   : > { %v4115_v45 = vor.u32 %v4114_v20, %v4113_v19  ;;  %vm6164_vm13 = vcmask 523264   ;;  %v9437_v59 = vcombine.low %v2176_v1, %v2186_v5  ;;  %v6070_v58 = vsel %vm6066_vm9, %v6037_v21, %v13519_v23  ;;  %v13757_v20 = vpop.permute.xlu0 %5517 }
 0x239   : > { %v4111_v34 = vor.u32 %v4110_v14, %v4107_v42  ;;  %9680 = vmatprep.mubr.msk.bf16.mxu0 %vm6164_vm13, %v6101_v22  ;;  %v4125_v7 = vor.u32 %v4124_v17, %v4121_v11  ;;  %v5843_v4 = vsel %vm5835_vm15, %v13355_v16, %v13543_v54  ;;  %v2597_v48 = vor.u32 %v2596_v9, %v2593_v41  ;;  %v9164_v9 = vld [vmem:[%s10768_s26 + $0x80] sm:$0x1]  ;;  %v9181_v22 = vld [vmem:[%s10768_s26 + $0x84] sm:$0xe] }
 0x23a   : > { %v4117_v32 = vrot.slane %v4115_v45, 4  ;;  %v2600_v57 = vshll.u32 %v13710_v28, 16  ;;  %4937 = vrot.lane.b32.xlu0 %v9437_v59, %s10704_s9  ;;  %v16326_v21 = vshrl.u32 %v13710_v28, 16  ;;  %v2610_v3 = vshll.u32 %v9165_v46, 16 }
 0x23b   : > { %5033 = vrot.lane.b32.xlu1 %v9453_v6, %s10705_s10  ;;  %v4112_v23 = vrot.slane %v4111_v34, 4  ;;  %v2573_v17 = vor.u32 %v2572_v38, %v13706_v24  ;;  %v2598_v54 = vrot.slane %v2597_v48, 4  ;;  %v2576_v19 = vshll.u32 %v13685_v27, 16 }
 0x23c   : > { %v2606_v1 = vrot.slane %v16326_v21, 4  ;;  %v4126_v16 = vsel %vm11273_vm8, %v4117_v32, %v4125_v7  ;;  %v2602_v41 = vrot.slane %v2600_v57, 5  ;;  %v2612_v0 = vrot.slane %v2610_v3, 5  ;;  %v9180_v21 = vld [vmem:[%s10768_s26 + $0x78] sm:$0xe] }
 0x23d   : > { %v4116_v6 = vsel %vm11273_vm8, %v4112_v23, %v4115_v45  ;;  %v2574_v62 = vrot.slane %v2573_v17, 4  ;;  %v16327_v37 = vshrl.u32 %v13685_v27, 16  ;;  %v2578_v14 = vrot.slane %v2576_v19, 5 }
 0x23e   : > { %v9563_v24 = vcombine.low %v4116_v6, %v4126_v16  ;;  %v2603_v32 = vsel %vm10796_vm2, %v2598_v54, %v2602_v41  ;;  %v2607_v38 = vor.u32 %v2606_v1, %v2602_v41  ;;  %v2586_v5 = vshll.u32 %v9164_v9, 16  ;;  %v13778_v1 = vpop.permute.xlu1 %5023  ;;  %v13785_v41 = vpop.permute.xlu0 %4929 }
 0x23f   : > { %v2582_v42 = vrot.slane %v16327_v37, 4  ;;  %v5876_v11 = vsel %vm5868_vm0, %v5843_v4, %v13561_v60  ;;  %v6103_v45 = vsel %vm6099_vm11, %v6070_v58, %v13568_v55  ;;  %v9197_v59 = vrot.slane %v9181_v22, 9 }
 0x240   : > { %5605 = vrot.lane.b32.xlu0 %v9563_v24, %s10712_s17  ;;  %v2608_v34 = vrot.slane %v2607_v38, 4  ;;  %v2579_v7 = vsel %vm10796_vm2, %v2574_v62, %v2578_v14  ;;  %v2887_v23 = vrot.slane %v13710_v28, 5  ;;  %9681 = vmatmul.mubr.msk.bf16.vlgmr.msra.gmra.mxu0 %vm6164_vm13, %v6103_v45  ;;  %v2588_v3 = vrot.slane %v2586_v5, 5 }
 0x241   : > { %v2583_v48 = vor.u32 %v2582_v42, %v2578_v14  ;;  %v2890_v60 = vrot.slane %v9165_v46, 5  ;;  %v9196_v4 = vrot.slane %v9180_v21, 9  ;;  %v2880_v55 = vrot.slane %v13685_v27, 5 }
 0x242   : > { %v2613_v58 = vsel %vm10796_vm2, %v2608_v34, %v2612_v0  ;;  %v2888_v16 = vsel %vm11079_vm5, %v9197_v59, %v2887_v23  ;;  %v2889_v54 = vrot.slane %v2887_v23, 4  ;;  %v2883_v46 = vrot.slane %v9164_v9, 5  ;;  %v13804_v23 = vpop.permute.xlu1 %5025 }
 0x243   : > { %v2584_v17 = vrot.slane %v2583_v48, 4  ;;  %v9469_v6 = vcombine.low %v2603_v32, %v2613_v58  ;;  %v2881_v62 = vsel %vm11079_vm5, %v9196_v4, %v2880_v55  ;;  %v2882_v37 = vrot.slane %v2880_v55, 4  ;;  %v9213_v32 = vld [vmem:[%s10768_s26 + $0x8c] sm:$0x3] }
 0x244   : > { %v5874_v42 = vsel %vm5868_vm0, %v13548_v63, %v13532_v43  ;;  %v2891_v24 = vsel %vm11079_vm5, %v2889_v54, %v2890_v60  ;;  %v5909_v38 = vsel %vm5901_vm1, %v5876_v11, %v13585_v2  ;;  %v3158_v45 = vshrl.u32 %v9181_v22, 16  ;;  %v9212_v60 = vld [vmem:[%s10768_s26 + $0x80] sm:$0x3] }
 0x245   : > { %v2589_v0 = vsel %vm10796_vm2, %v2584_v17, %v2588_v3  ;;  %5113 = vrot.lane.b32.xlu1 %v9469_v6, %s10706_s11  ;;  %v9485_v5 = vcombine.low %v2888_v16, %v2891_v24  ;;  %v2884_v9 = vsel %vm11079_vm5, %v2882_v37, %v2883_v46  ;;  %v3161_v63 = vshll.u32 %v9181_v22, 16  ;;  %v13810_v16 = vpop.permute.xlu0 %5597  ;;  %v9238_v24 = vld [vmem:[%s10768_s26 + $0x90] sm:$0xf] }
 0x246   : > { %v9468_v14 = vcombine.low %v2579_v7, %v2589_v0  ;;  %v9484_v43 = vcombine.low %v2881_v62, %v2884_v9  ;;  %v16328_v59 = vshrl.u32 %v13710_v28, 16  ;;  %v3167_v48 = vrot.slane %v2600_v57, 6 }
 0x247   : > { %v3160_v2 = vrot.slane %v3158_v45, 5  ;;  %v3172_v11 = vshrl.u32 %v9213_v32, 16  ;;  %v3175_v3 = vshll.u32 %v9213_v32, 16  ;;  %v3135_v7 = vshrl.u32 %v9180_v21, 16 }
 0x248   : > { %v3166_v34 = vrot.slane %v16328_v59, 5  ;;  %5111 = vrot.lane.b32.xlu0 %v9468_v14, %s10706_s11  ;;  %v3163_v4 = vrot.slane %v3161_v63, 6  ;;  %v3138_v58 = vshll.u32 %v9180_v21, 16  ;;  %v16329_v17 = vshrl.u32 %v13685_v27, 16  ;;  %v13822_v63 = vld [vmem:[%s10768_s26 + $0x94] sm:$0xf] }
 0x249   : > { %5193 = vrot.lane.b32.xlu1 %v9485_v5, %s10707_s12  ;;  %v3174_v28 = vrot.slane %v3172_v11, 5  ;;  %v3177_v57 = vrot.slane %v3175_v3, 6  ;;  %v3137_v54 = vrot.slane %v3135_v7, 5  ;;  %v3144_v6 = vrot.slane %v2576_v19, 6  ;;  %v13824_v59 = vpop.permute.xlu1 %5105 }
 0x24a   : > { %v3168_v55 = vor.u32 %v3167_v48, %v3166_v34  ;;  %v3143_v22 = vrot.slane %v16329_v17, 5  ;;  %v3164_v62 = vor.u32 %v3163_v4, %v3160_v2  ;;  %v3140_v46 = vrot.slane %v3138_v58, 6 }
 0x24b   : > { %v3149_v0 = vshrl.u32 %v9212_v60, 16  ;;  %v5907_v21 = vsel %vm5901_vm1, %v5874_v42, %v13592_v18  ;;  %v3178_v32 = vor.u32 %v3177_v57, %v3174_v28  ;;  %v3152_v5 = vshll.u32 %v9212_v60, 16  ;;  %v9236_v42 = vld [vmem:[%s10768_s26 + $0x84] sm:$0xf]  ;;  %v13836_v60 = vpop.permute.xlu0 %5103 }
 0x24c   : > { %v3170_v37 = vrot.slane %v3168_v55, 4  ;;  %5191 = vrot.lane.b32.xlu0 %v9484_v43, %s10707_s12  ;;  %v3145_v14 = vor.u32 %v3144_v6, %v3143_v22  ;;  %v3165_v9 = vrot.slane %v3164_v62, 4  ;;  %v3141_v45 = vor.u32 %v3140_v46, %v3137_v54  ;;  %v13842_v54 = vld [vmem:[%s10768_s26 + $0x98] sm:$0x1]  ;;  %v13851_v46 = vld [vmem:[%s10768_s26 + $0x8c] sm:$0x1] }
 0x24d   : > { %v3151_v27 = vrot.slane %v3149_v0, 5  ;;  %v5942_v19 = vsel %vm5934_vm3, %v5909_v38, %v13615_v33  ;;  %v3154_v48 = vrot.slane %v3152_v5, 6  ;;  %v3584_v18 = vshrl.u32 %v9238_v24, 16  ;;  %v13834_v38 = vld [vmem:[%s10768_s26 + $0x88] sm:$0xf]  ;;  %v13855_v5 = vpop.permute.xlu1 %5185 }
 0x24e   : > { %v3179_v43 = vsel %vm11273_vm8, %v3170_v37, %v3178_v32  ;;  %v3147_v34 = vrot.slane %v3145_v14, 4  ;;  %v3169_v2 = vsel %vm11273_vm8, %v3165_v9, %v3168_v55  ;;  %v3142_v11 = vrot.slane %v3141_v45, 4 }
 0x24f   : > { %v5940_v3 = vsel %vm5934_vm3, %v5907_v21, %v13625_v44  ;;  %v3587_v33 = vshll.u32 %v9238_v24, 16  ;;  %v9501_v7 = vcombine.low %v3169_v2, %v3179_v43  ;;  %v3155_v4 = vor.u32 %v3154_v48, %v3151_v27 }
 0x250   : > { %v3586_v58 = vrot.slane %v3584_v18, 4  ;;  %v3597_v17 = vshrl.u32 %v13822_v63, 16  ;;  %v3146_v22 = vsel %vm11273_vm8, %v3142_v11, %v3145_v14  ;;  %v3560_v55 = vshrl.u32 %v9236_v42, 16 }
 0x251   : > { %v3589_v28 = vrot.slane %v3587_v33, 5  ;;  %v3563_v57 = vshll.u32 %v9236_v42, 16  ;;  %5273 = vrot.lane.b32.xlu1 %v9501_v7, %s10708_s13  ;;  %v3156_v44 = vsel %vm11273_vm8, %v3147_v34, %v3155_v4  ;;  %v9517_v6 = vcombine.low %v9238_v24, %v13822_v63  ;;  %v9118_v33 = vld [vmem:[%s10768_s26 + $0x8c] sm:$0x3] }
 0x252   : > { %v3573_v62 = vshrl.u32 %v13834_v38, 16  ;;  %v9516_v37 = vcombine.low %v9236_v42, %v13834_v38  ;;  %v9500_v0 = vcombine.low %v3146_v22, %v3156_v44  ;;  %v3562_v21 = vrot.slane %v3560_v55, 4  ;;  %v16331_v44 = vld [vmem:[#allocation36_spill] sm:$0xff] }
 0x253   : > { %v3565_v32 = vrot.slane %v3563_v57, 5  ;;  %v5975_v14 = vsel %vm5967_vm4, %v5942_v19, %v13642_v12  ;;  %v3590_v9 = vor.u32 %v3589_v28, %v3586_v58  ;;  %v3593_v45 = vshll.u32 %v13822_v63, 16  ;;  %v13866_v19 = vpop.permute.xlu0 %5183  ;;  %v16330_v57 = vld [vmem:[#allocation31_spill] sm:$0xff] }
 0x254   : > { %v3599_v24 = vrot.slane %v3597_v17, 4  ;;  %v3603_v27 = vshll.u32 %v13842_v54, 16  ;;  %5271 = vrot.lane.b32.xlu0 %v9500_v0, %s10708_s13  ;;  %v3569_v34 = vshll.u32 %v13834_v38, 16  ;;  %v3575_v48 = vrot.slane %v3573_v62, 4 }
 0x255   : > { %v3566_v43 = vor.u32 %v3565_v32, %v3562_v21  ;;  %v3579_v12 = vshll.u32 %v13851_v46, 16  ;;  %5369 = vrot.lane.b32.xlu1 %v9517_v6, %s10709_s14  ;;  %v5973_v18 = vsel %vm5967_vm4, %v5940_v3, %v13648_v13  ;;  %v3591_v42 = vrot.slane %v3590_v9, 4  ;;  %v16332_v3 = vld [vmem:[#allocation32_spill] sm:$0xff]  ;;  %v16333_v6 = vld [vmem:[#allocation38_spill] sm:$0xff] }
 0x256   : > { %v3595_v2 = vrot.slane %v3593_v45, 5  ;;  %v3605_v11 = vrot.slane %v3603_v27, 5  ;;  %v3571_v4 = vrot.slane %v3569_v34, 5  ;;  %v6008_v22 = vsel %vm6000_vm6, %v5975_v14, %v13672_v10  ;;  %v13886_v10 = vpop.permute.xlu1 %5265 }
 0x257   : > { %v3567_v7 = vrot.slane %v3566_v43, 4  ;;  %v3581_v58 = vrot.slane %v3579_v12, 5  ;;  %v2194_v13 = vor.u32 %v16331_v44, %v16330_v57  ;;  %v2198_v0 = vor.u32 %v16333_v6, %v16332_v3  ;;  %v9276_v43 = vld [vmem:[%s10768_s26 + $0x84] sm:$0xe] }
 0x258   : > { %v3596_v28 = vsel %vm10796_vm2, %v3591_v42, %v3595_v2  ;;  %v3600_v55 = vor.u32 %v3599_v24, %v3595_v2  ;;  %5367 = vrot.lane.b32.xlu0 %v9516_v37, %s10709_s14  ;;  %v3576_v32 = vor.u32 %v3575_v48, %v3571_v4  ;;  %v2202_v9 = vshrl.u32 %v9118_v33, 16  ;;  %v13889_v37 = vpop.permute.xlu0 %5263 }
 0x259   : > { %v3572_v21 = vsel %vm10796_vm2, %v3567_v7, %v3571_v4  ;;  %v2205_v27 = vshll.u32 %v9118_v33, 16  ;;  %v2195_v12 = vrot.slane %v2194_v13, 4  ;;  %v2200_v24 = vrot.slane %v2198_v0, 4 }
 0x25a   : > { %v3601_v14 = vrot.slane %v3600_v55, 4  ;;  %v9292_v42 = vrot.slane %v9276_v43, 9  ;;  %v3577_v2 = vrot.slane %v3576_v32, 4  ;;  %v2204_v57 = vrot.slane %v2202_v9, 5  ;;  %v9308_v9 = vld [vmem:[%s10768_s26 + $0x8c] sm:$0x3] }
 0x25b   : > { %v2207_v44 = vrot.slane %v2205_v27, 6  ;;  %v3873_v3 = vrot.slane %v13834_v38, 5  ;;  %v6006_v33 = vsel %vm6000_vm6, %v5973_v18, %v13675_v56  ;;  %v2199_v7 = vsel %vm11273_vm8, %v2195_v12, %v2198_v0  ;;  %v13921_v38 = vld [vmem:[%s10768_s26 + $0x90] sm:$0xf] }
 0x25c   : > { %v3606_v48 = vsel %vm10796_vm2, %v3601_v14, %v3605_v11  ;;  %v3876_v4 = vrot.slane %v13851_v46, 5  ;;  %v3582_v13 = vsel %vm10796_vm2, %v3577_v2, %v3581_v58  ;;  %v13902_v32 = vsel %vm6033_vm7, %v6008_v22, %v13694_v53  ;;  %v13913_v53 = vld [vmem:[%s10768_s26 + $0x90] sm:$0xe]  ;;  %v13915_v22 = vpop.permute.xlu1 %5361 }
 0x25d   : > { %v9533_v55 = vcombine.low %v3596_v28, %v3606_v48  ;;  %v2208_v6 = vor.u32 %v2207_v44, %v2204_v57  ;;  %v9532_v11 = vcombine.low %v3572_v21, %v3582_v13  ;;  %v3874_v56 = vsel %vm11079_vm5, %v9292_v42, %v3873_v3 }
 0x25e   : > { %v3875_v18 = vrot.slane %v3873_v3, 4  ;;  %v4128_v27 = vshrl.u32 %v9276_v43, 16  ;;  %v4131_v28 = vshll.u32 %v9276_v43, 16  ;;  %v4136_v58 = vrot.slane %v3573_v62, 5  ;;  %v13923_v62 = vpop.permute.xlu0 %5359 }
 0x25f   : > { %5449 = vrot.lane.b32.xlu1 %v9533_v55, %s10710_s15  ;;  %v2209_v46 = vsel %vm11273_vm8, %v2200_v24, %v2208_v6  ;;  %v4137_v0 = vrot.slane %v3569_v34, 6  ;;  %5447 = vrot.lane.b32.xlu0 %v9532_v11, %s10710_s15  ;;  %v4142_v42 = vshrl.u32 %v9308_v9, 16  ;;  %v4145_v57 = vshll.u32 %v9308_v9, 16  ;;  %v13932_v6 = vld [vmem:[%s10768_s26 + $0x94] sm:$0xf] }
 0x260   : > { %v9438_v21 = vcombine.low %v2199_v7, %v2209_v46  ;;  %v3877_v14 = vsel %vm11079_vm5, %v3875_v18, %v3876_v4  ;;  %v4130_v12 = vrot.slane %v4128_v27, 5  ;;  %v4133_v24 = vrot.slane %v4131_v28, 6  ;;  %v9119_v46 = vld [vmem:[%s10768_s26 + $0x98] sm:$0x3] }
 0x261   : > { %v9548_v2 = vcombine.low %v3874_v56, %v3877_v14  ;;  %v4138_v43 = vor.u32 %v4137_v0, %v4136_v58  ;;  %v4144_v34 = vrot.slane %v4142_v42, 5  ;;  %v9293_v44 = vrot.slane %v13913_v53, 9 }
 0x262   : > { %v3880_v3 = vrot.slane %v13822_v63, 5  ;;  %v3883_v48 = vrot.slane %v13842_v54, 5  ;;  %v6039_v7 = vsel %vm6033_vm7, %v6006_v33, %v13712_v47  ;;  %v4134_v4 = vor.u32 %v4133_v24, %v4130_v12  ;;  %v13947_v28 = vpop.permute.xlu1 %5441  ;;  %v9146_v12 = vld [vmem:[%s10768_s26 + $0x9c] sm:$0xf] }
 0x263   : > { %4939 = vrot.lane.b32.xlu1 %v9438_v21, %s10704_s9  ;;  %v4140_v55 = vrot.slane %v4138_v43, 4  ;;  %v4147_v13 = vrot.slane %v4145_v57, 6  ;;  %5527 = vrot.lane.b32.xlu0 %v9548_v2, %s10711_s16  ;;  %v13940_v54 = vsel %vm5835_vm15, %v13413_v49, %v13723_v36  ;;  %v2615_v56 = vshrl.u32 %v13921_v38, 16  ;;  %v16334_v36 = vld [vmem:[#allocation19_spill] sm:$0xff]  ;;  %v16335_v21 = vld [vmem:[#allocation28_spill] sm:$0xff]  ;;  %v13963_v57 = vpop.permute.xlu0 %5439 }
 0x264   : > { %v3881_v9 = vsel %vm11079_vm5, %v9293_v44, %v3880_v3  ;;  %v3882_v11 = vrot.slane %v3880_v3, 4  ;;  %v4135_v47 = vrot.slane %v4134_v4, 4  ;;  %v6072_v18 = vsel %vm6066_vm9, %v6039_v7, %v13731_v15  ;;  %v16336_v3 = vld [vmem:[#allocation29_spill] sm:$0xff] }
 0x265   : > { %v4148_v33 = vor.u32 %v4147_v13, %v4144_v34  ;;  %v2618_v27 = vshll.u32 %v13921_v38, 16  ;;  %v13951_v0 = vrot.slane %v2615_v56, 4  ;;  %v2628_v49 = vshrl.u32 %v13932_v6, 16  ;;  %v13968_v13 = vld [vmem:[%s10768_s26 + $0xa0] sm:$0xf] }
 0x266   : > { %v3884_v58 = vsel %vm11079_vm5, %v3882_v11, %v3883_v48  ;;  %v2217_v14 = vor.u32 %v16335_v21, %v16334_v36  ;;  %v4139_v15 = vsel %vm11273_vm8, %v4135_v47, %v4138_v43  ;;  %v9454_v24 = vcombine.low %v13921_v38, %v13932_v6  ;;  %v16337_v48 = vld [vmem:[#allocation26_spill] sm:$0xff] }
 0x267   : > { %v4149_v42 = vsel %vm11273_vm8, %v4140_v55, %v4148_v33  ;;  %v9549_v2 = vcombine.low %v3881_v9, %v3884_v58  ;;  %v2221_v7 = vor.u32 %v16337_v48, %v16336_v3  ;;  %v2225_v4 = vshrl.u32 %v9119_v46, 16  ;;  %v9309_v58 = vld [vmem:[%s10768_s26 + $0x98] sm:$0x3] }
 0x268   : > { %v9564_v34 = vcombine.low %v4139_v15, %v4149_v42  ;;  %v2218_v44 = vrot.slane %v2217_v14, 4  ;;  %v2620_v43 = vrot.slane %v2618_v27, 5  ;;  %v2228_v11 = vshll.u32 %v9119_v46, 16 }
 0x269   : > { %5529 = vrot.lane.b32.xlu0 %v9549_v2, %s10711_s16  ;;  %v6105_v55 = vsel %vm6099_vm11, %v6072_v18, %v13746_v52  ;;  %v2639_v9 = vshrl.u32 %v9146_v12, 16  ;;  %v2227_v56 = vrot.slane %v2225_v4, 5  ;;  %v6074_v47 = vsel %vm6066_vm9, %v13902_v32, %v13757_v20  ;;  %v13982_v18 = vpop.permute.xlu1 %4931  ;;  %v9167_v4 = vld [vmem:[%s10768_s26 + $0xa4] sm:$0x1] }
 0x26a   : > { %5607 = vrot.lane.b32.xlu1 %v9564_v34, %s10712_s17  ;;  %v2222_v38 = vsel %vm11273_vm8, %v2218_v44, %v2221_v7  ;;  %v2642_v33 = vshll.u32 %v9146_v12, 16  ;;  %9684 = vmatprep.mubr.msk.bf16.mxu0 %vm6164_vm13, %v6105_v55  ;;  %v2223_v27 = vrot.slane %v2221_v7, 4  ;;  %v2230_v46 = vrot.slane %v2228_v11, 6  ;;  %v13990_v44 = vpop.permute.xlu0 %5519 }
 0x26b   : > { %v2641_v36 = vrot.slane %v2639_v9, 4  ;;  %v2652_v52 = vshrl.u32 %v13968_v13, 16  ;;  %v4151_v14 = vshrl.u32 %v13913_v53, 16  ;;  %v4154_v15 = vshll.u32 %v13913_v53, 16 }
 0x26c   : > { %v2644_v21 = vrot.slane %v2642_v33, 5  ;;  %v4159_v20 = vrot.slane %v3597_v17, 5  ;;  %v2231_v32 = vor.u32 %v2230_v46, %v2227_v56  ;;  %v4160_v42 = vrot.slane %v3593_v45, 6 }
 0x26d   : > { %v4165_v2 = vshrl.u32 %v9309_v58, 16  ;;  %v4168_v34 = vshll.u32 %v9309_v58, 16  ;;  %v9455_v3 = vcombine.low %v9146_v12, %v13968_v13  ;;  %v4153_v48 = vrot.slane %v4151_v14, 5 }
 0x26e   : > { %5035 = vrot.lane.b32.xlu1 %v9454_v24, %s10705_s10  ;;  %v4156_v7 = vrot.slane %v4154_v15, 6  ;;  %v5847_v53 = vsel %vm5835_vm15, %v13391_v8, %v13785_v41  ;;  %v2232_v17 = vsel %vm11273_vm8, %v2223_v27, %v2231_v32  ;;  %v4161_v63 = vor.u32 %v4160_v42, %v4159_v20  ;;  %v14003_v8 = vpop.permute.xlu1 %5599  ;;  %v14016_v42 = vpop.permute.xlu0 %5521 }
 0x26f   : > { %v4167_v45 = vrot.slane %v4165_v2, 5  ;;  %v4170_v11 = vrot.slane %v4168_v34, 6  ;;  %v9439_v55 = vcombine.low %v2222_v38, %v2232_v17  ;;  %v2645_v56 = vor.u32 %v2644_v21, %v2641_v36  ;;  %v9166_v36 = vld [vmem:[%s10768_s26 + $0x98] sm:$0x1] }
 0x270   : > { %v4157_v9 = vor.u32 %v4156_v7, %v4153_v48  ;;  %v2648_v24 = vshll.u32 %v13968_v13, 16  ;;  %v4163_v12 = vrot.slane %v4161_v63, 4  ;;  %v2654_v58 = vrot.slane %v2652_v52, 4 }
 0x271   : > { %v4171_v33 = vor.u32 %v4170_v11, %v4167_v45  ;;  %v2658_v46 = vshll.u32 %v9167_v4, 16  ;;  %4941 = vrot.lane.b32.xlu0 %v9439_v55, %s10704_s9  ;;  %v2646_v27 = vrot.slane %v2645_v56, 4  ;;  %v2621_v21 = vor.u32 %v2620_v43, %v13951_v0  ;;  %v9183_v45 = vld [vmem:[%s10768_s26 + $0x9c] sm:$0xe] }
 0x272   : > { %5037 = vrot.lane.b32.xlu1 %v9455_v3, %s10705_s10  ;;  %v4158_v41 = vrot.slane %v4157_v9, 4  ;;  %v2650_v38 = vrot.slane %v2648_v24, 5  ;;  %v2624_v20 = vshll.u32 %v13932_v6, 16  ;;  %v2630_v32 = vrot.slane %v2628_v49, 4 }
 0x273   : > { %v4172_v14 = vsel %vm11273_vm8, %v4163_v12, %v4171_v33  ;;  %v2660_v15 = vrot.slane %v2658_v46, 5  ;;  %v2622_v0 = vrot.slane %v2621_v21, 4  ;;  %v2634_v7 = vshll.u32 %v9166_v36, 16  ;;  %v9182_v46 = vld [vmem:[%s10768_s26 + $0x90] sm:$0xe] }
 0x274   : > { %v4162_v2 = vsel %vm11273_vm8, %v4158_v41, %v4161_v63  ;;  %v2651_v34 = vsel %vm10796_vm2, %v2646_v27, %v2650_v38  ;;  %v2655_v3 = vor.u32 %v2654_v58, %v2650_v38  ;;  %v2626_v48 = vrot.slane %v2624_v20, 5 }
 0x275   : > { %v9565_v43 = vcombine.low %v4162_v2, %v4172_v14  ;;  %v5880_v17 = vsel %vm5868_vm0, %v5847_v53, %v13804_v23  ;;  %v6107_v55 = vsel %vm6099_vm11, %v6074_v47, %v13810_v16  ;;  %v9199_v63 = vrot.slane %v9183_v45, 9  ;;  %v14035_v23 = vpop.permute.xlu1 %5027 }
 0x276   : > { %v2656_v11 = vrot.slane %v2655_v3, 4  ;;  %v2901_v9 = vrot.slane %v13968_v13, 5  ;;  %v2627_v56 = vsel %vm10796_vm2, %v2622_v0, %v2626_v48  ;;  %v2631_v12 = vor.u32 %v2630_v32, %v2626_v48  ;;  %9685 = vmatmul.mubr.msk.bf16.gmra.mxu0 %vm6164_vm13, %v6107_v55  ;;  %v9215_v3 = vld [vmem:[%s10768_s26 + $0xa4] sm:$0x3] }
 0x277   : > { %5609 = vrot.lane.b32.xlu0 %v9565_v43, %s10712_s17  ;;  %v2636_v33 = vrot.slane %v2634_v7, 5  ;;  %v2904_v58 = vrot.slane %v9167_v4, 5  ;;  %v9198_v41 = vrot.slane %v9182_v46, 9  ;;  %v2894_v21 = vrot.slane %v13932_v6, 5  ;;  %v14042_v4 = vpop.permute.xlu0 %4933 }
 0x278   : > { %v2661_v16 = vsel %vm10796_vm2, %v2656_v11, %v2660_v15  ;;  %v2902_v47 = vsel %vm11079_vm5, %v9199_v63, %v2901_v9  ;;  %v2903_v53 = vrot.slane %v2901_v9, 4  ;;  %v2632_v38 = vrot.slane %v2631_v12, 4 }
 0x279   : > { %v9471_v27 = vcombine.low %v2651_v34, %v2661_v16  ;;  %v2897_v14 = vrot.slane %v9166_v36, 5  ;;  %v5878_v32 = vsel %vm5868_vm0, %v13940_v54, %v13778_v1  ;;  %v5913_v15 = vsel %vm5901_vm1, %v5880_v17, %v13824_v59  ;;  %v14063_v9 = vpop.permute.xlu1 %5029 }
 0x27a   : > { %v2905_v2 = vsel %vm11079_vm5, %v2903_v53, %v2904_v58  ;;  %v3204_v0 = vshrl.u32 %v9183_v45, 16  ;;  %v2637_v34 = vsel %vm10796_vm2, %v2632_v38, %v2636_v33  ;;  %v2895_v43 = vsel %vm11079_vm5, %v9198_v41, %v2894_v21 }
 0x27b   : > { %5117 = vrot.lane.b32.xlu1 %v9471_v27, %s10706_s11  ;;  %v9487_v36 = vcombine.low %v2902_v47, %v2905_v2  ;;  %v2896_v48 = vrot.slane %v2894_v21, 4  ;;  %v9470_v1 = vcombine.low %v2627_v56, %v2637_v34  ;;  %v3207_v7 = vshll.u32 %v9183_v45, 16  ;;  %v9214_v56 = vld [vmem:[%s10768_s26 + $0x98] sm:$0x3] }
 0x27c   : > { %v3206_v54 = vrot.slane %v3204_v0, 5  ;;  %v3212_v11 = vrot.slane %v2652_v52, 5  ;;  %v3213_v17 = vrot.slane %v2648_v24, 6  ;;  %v3218_v55 = vshrl.u32 %v9215_v3, 16  ;;  %v14070_v24 = vpop.permute.xlu0 %5601 }
 0x27d   : > { %v2898_v59 = vsel %vm11079_vm5, %v2896_v48, %v2897_v14  ;;  %v3221_v63 = vshll.u32 %v9215_v3, 16  ;;  %5115 = vrot.lane.b32.xlu0 %v9470_v1, %s10706_s11  ;;  %v3209_v33 = vrot.slane %v3207_v7, 6  ;;  %v3181_v58 = vshrl.u32 %v9182_v46, 16  ;;  %v9242_v3 = vld [vmem:[%s10768_s26 + $0xa8] sm:$0xf] }
 0x27e   : > { %v9486_v12 = vcombine.low %v2895_v43, %v2898_v59  ;;  %v3184_v45 = vshll.u32 %v9182_v46, 16  ;;  %v3214_v52 = vor.u32 %v3213_v17, %v3212_v11  ;;  %v3220_v16 = vrot.slane %v3218_v55, 5  ;;  %v14079_v43 = vld [vmem:[%s10768_s26 + $0xac] sm:$0xf]  ;;  %v14091_v17 = vld [vmem:[%s10768_s26 + $0xa0] sm:$0xf] }
 0x27f   : > { %5197 = vrot.lane.b32.xlu1 %v9487_v36, %s10707_s12  ;;  %v3223_v47 = vrot.slane %v3221_v63, 6  ;;  %v3189_v13 = vrot.slane %v2628_v49, 5  ;;  %v3210_v53 = vor.u32 %v3209_v33, %v3206_v54  ;;  %v3183_v41 = vrot.slane %v3181_v58, 5  ;;  %v9240_v54 = vld [vmem:[%s10768_s26 + $0x9c] sm:$0xf] }
 0x280   : > { %v3186_v27 = vrot.slane %v3184_v45, 6  ;;  %v3190_v38 = vrot.slane %v2624_v20, 6  ;;  %v3216_v21 = vrot.slane %v3214_v52, 4  ;;  %v3195_v14 = vshrl.u32 %v9214_v56, 16  ;;  %v14086_v7 = vpop.permute.xlu1 %5109 }
 0x281   : > { %v3224_v46 = vor.u32 %v3223_v47, %v3220_v16  ;;  %v3198_v2 = vshll.u32 %v9214_v56, 16  ;;  %5195 = vrot.lane.b32.xlu0 %v9486_v12, %s10707_s12  ;;  %v5911_v49 = vsel %vm5901_vm1, %v5878_v32, %v13836_v60  ;;  %v3211_v0 = vrot.slane %v3210_v53, 4  ;;  %v14094_v56 = vpop.permute.xlu0 %5107  ;;  %v14104_v53 = vld [vmem:[%s10768_s26 + $0xb0] sm:$0x1] }
 0x282   : > { %v3187_v34 = vor.u32 %v3186_v27, %v3183_v41  ;;  %v3191_v36 = vor.u32 %v3190_v38, %v3189_v13  ;;  %v3197_v20 = vrot.slane %v3195_v14, 5  ;;  %v5946_v1 = vsel %vm5934_vm3, %v5913_v15, %v13855_v5 }
 0x283   : > { %v3225_v6 = vsel %vm11273_vm8, %v3216_v21, %v3224_v46  ;;  %v3200_v48 = vrot.slane %v3198_v2, 6  ;;  %v3215_v11 = vsel %vm11273_vm8, %v3211_v0, %v3214_v52  ;;  %v3632_v59 = vshrl.u32 %v9242_v3, 16  ;;  %v14110_v46 = vld [vmem:[%s10768_s26 + $0xa4] sm:$0x1] }
 0x284   : > { %v3188_v60 = vrot.slane %v3187_v34, 4  ;;  %v3193_v32 = vrot.slane %v3191_v36, 4  ;;  %v9503_v55 = vcombine.low %v3215_v11, %v3225_v6  ;;  %v3635_v12 = vshll.u32 %v9242_v3, 16  ;;  %v14115_v34 = vpop.permute.xlu1 %5189 }
 0x285   : > { %v3201_v63 = vor.u32 %v3200_v48, %v3197_v20  ;;  %v3645_v33 = vshrl.u32 %v14079_v43, 16  ;;  %v3634_v15 = vrot.slane %v3632_v59, 4  ;;  %v9519_v58 = vcombine.low %v9242_v3, %v14079_v43  ;;  %v14129_v11 = vpop.permute.xlu0 %5187 }
 0x286   : > { %v3192_v5 = vsel %vm11273_vm8, %v3188_v60, %v3191_v36  ;;  %v3608_v45 = vshrl.u32 %v9240_v54, 16  ;;  %5277 = vrot.lane.b32.xlu1 %v9503_v55, %s10708_s13  ;;  %v3637_v16 = vrot.slane %v3635_v12, 5  ;;  %v3611_v47 = vshll.u32 %v9240_v54, 16 }
 0x287   : > { %v3202_v52 = vsel %vm11273_vm8, %v3193_v32, %v3201_v63  ;;  %v3621_v13 = vshrl.u32 %v14091_v17, 16  ;;  %v5944_v27 = vsel %vm5934_vm3, %v5911_v49, %v13866_v19  ;;  %v9518_v21 = vcombine.low %v9240_v54, %v14091_v17  ;;  %v9120_v54 = vld [vmem:[%s10768_s26 + $0xa4] sm:$0x3] }
 0x288   : > { %v9502_v41 = vcombine.low %v3192_v5, %v3202_v52  ;;  %v3610_v38 = vrot.slane %v3608_v45, 4  ;;  %v3613_v14 = vrot.slane %v3611_v47, 5  ;;  %v5979_v2 = vsel %vm5967_vm4, %v5946_v1, %v13886_v10  ;;  %v16338_v45 = vld [vmem:[#allocation27_spill] sm:$0xff]  ;;  %v16339_v52 = vld [vmem:[#allocation44_spill] sm:$0xff]  ;;  %v16340_v47 = vld [vmem:[#allocation41_spill] sm:$0xff] }
 0x289   : > { %v3638_v3 = vor.u32 %v3637_v16, %v3634_v15  ;;  %v3641_v0 = vshll.u32 %v14079_v43, 16  ;;  %v3647_v19 = vrot.slane %v3645_v33, 4  ;;  %v3651_v49 = vshll.u32 %v14104_v53, 16 }
 0x28a   : > { %5275 = vrot.lane.b32.xlu0 %v9502_v41, %s10708_s13  ;;  %v3617_v36 = vshll.u32 %v14091_v17, 16  ;;  %v3623_v6 = vrot.slane %v3621_v13, 4  ;;  %5373 = vrot.lane.b32.xlu1 %v9519_v58, %s10709_s14  ;;  %v3614_v48 = vor.u32 %v3613_v14, %v3610_v38  ;;  %v3627_v1 = vshll.u32 %v14110_v46, 16  ;;  %v16341_v41 = vld [vmem:[#allocation40_spill] sm:$0xff]  ;;  %v9278_v38 = vld [vmem:[%s10768_s26 + $0x9c] sm:$0xe] }
 0x28b   : > { %v3639_v10 = vrot.slane %v3638_v3, 4  ;;  %v3643_v20 = vrot.slane %v3641_v0, 5  ;;  %v5977_v60 = vsel %vm5967_vm4, %v5944_v27, %v13889_v37  ;;  %v3653_v32 = vrot.slane %v3651_v49, 5 }
 0x28c   : > { %v3619_v59 = vrot.slane %v3617_v36, 5  ;;  %v6012_v55 = vsel %vm6000_vm6, %v5979_v2, %v13915_v22  ;;  %v3615_v5 = vrot.slane %v3614_v48, 4  ;;  %v3629_v15 = vrot.slane %v3627_v1, 5 }
 0x28d   : > { %v3644_v63 = vsel %vm10796_vm2, %v3639_v10, %v3643_v20  ;;  %v3648_v12 = vor.u32 %v3647_v19, %v3643_v20  ;;  %v2240_v16 = vor.u32 %v16339_v52, %v16338_v45  ;;  %v2244_v37 = vor.u32 %v16341_v41, %v16340_v47  ;;  %v14145_v19 = vpop.permute.xlu1 %5269  ;;  %v9310_v52 = vld [vmem:[%s10768_s26 + $0xa4] sm:$0x3] }
 0x28e   : > { %5371 = vrot.lane.b32.xlu0 %v9518_v21, %s10709_s14  ;;  %v3624_v58 = vor.u32 %v3623_v6, %v3619_v59  ;;  %v2248_v27 = vshrl.u32 %v9120_v54, 16  ;;  %v3620_v22 = vsel %vm10796_vm2, %v3615_v5, %v3619_v59  ;;  %v2251_v2 = vshll.u32 %v9120_v54, 16  ;;  %v14151_v45 = vpop.permute.xlu0 %5267 }
 0x28f   : > { %v3649_v14 = vrot.slane %v3648_v12, 4  ;;  %v9294_v3 = vrot.slane %v9278_v38, 9  ;;  %v2241_v21 = vrot.slane %v2240_v16, 4  ;;  %v2246_v6 = vrot.slane %v2244_v37, 4 }
 0x290   : > { %v3625_v49 = vrot.slane %v3624_v58, 4  ;;  %v2250_v10 = vrot.slane %v2248_v27, 5  ;;  %v2253_v48 = vrot.slane %v2251_v2, 6  ;;  %v3887_v1 = vrot.slane %v14091_v17, 5 }
 0x291   : > { %v3654_v20 = vsel %vm10796_vm2, %v3649_v14, %v3653_v32  ;;  %v3890_v12 = vrot.slane %v14110_v46, 5  ;;  %v6010_v5 = vsel %vm6000_vm6, %v5977_v60, %v13923_v62  ;;  %v2245_v58 = vsel %vm11273_vm8, %v2241_v21, %v2244_v37  ;;  %v14170_v60 = vld [vmem:[%s10768_s26 + $0xa8] sm:$0xe]  ;;  %v14177_v2 = vpop.permute.xlu1 %5365 }
 0x292   : > { %v9535_v54 = vcombine.low %v3644_v63, %v3654_v20  ;;  %v3630_v59 = vsel %vm10796_vm2, %v3625_v49, %v3629_v15  ;;  %v2254_v16 = vor.u32 %v2253_v48, %v2250_v10  ;;  %v3888_v47 = vsel %vm11079_vm5, %v9294_v3, %v3887_v1 }
 0x293   : > { %v9534_v32 = vcombine.low %v3620_v22, %v3630_v59  ;;  %v3889_v46 = vrot.slane %v3887_v1, 4  ;;  %v14165_v63 = vsel %vm6033_vm7, %v6012_v55, %v13947_v28  ;;  %v4174_v15 = vshrl.u32 %v9278_v38, 16 }
 0x294   : > { %5453 = vrot.lane.b32.xlu1 %v9535_v54, %s10710_s15  ;;  %v4177_v41 = vshll.u32 %v9278_v38, 16  ;;  %v4182_v62 = vrot.slane %v3621_v13, 5  ;;  %v2255_v37 = vsel %vm11273_vm8, %v2246_v6, %v2254_v16  ;;  %v4183_v14 = vrot.slane %v3617_v36, 6  ;;  %v14180_v13 = vld [vmem:[%s10768_s26 + $0xa8] sm:$0xf]  ;;  %v14183_v6 = vpop.permute.xlu0 %5363 }
 0x295   : > { %5451 = vrot.lane.b32.xlu0 %v9534_v32, %s10710_s15  ;;  %v3891_v27 = vsel %vm11079_vm5, %v3889_v46, %v3890_v12  ;;  %v4188_v22 = vshrl.u32 %v9310_v52, 16  ;;  %v9440_v28 = vcombine.low %v2245_v58, %v2255_v37  ;;  %v4176_v38 = vrot.slane %v4174_v15, 5  ;;  %v14191_v12 = vld [vmem:[%s10768_s26 + $0xac] sm:$0xf]  ;;  %v9121_v16 = vld [vmem:[%s10768_s26 + $0xb0] sm:$0x3] }
 0x296   : > { %v9550_v55 = vcombine.low %v3888_v47, %v3891_v27  ;;  %v4179_v17 = vrot.slane %v4177_v41, 6  ;;  %v4184_v3 = vor.u32 %v4183_v14, %v4182_v62  ;;  %v4191_v21 = vshll.u32 %v9310_v52, 16  ;;  %v16342_v37 = vld [vmem:[#allocation49_spill] sm:$0xff]  ;;  %v16343_v27 = vld [vmem:[#allocation34_spill] sm:$0xff] }
 0x297   : > { %v4190_v49 = vrot.slane %v4188_v22, 5  ;;  %v9295_v10 = vrot.slane %v14170_v60, 9  ;;  %v6043_v36 = vsel %vm6033_vm7, %v6010_v5, %v13963_v57  ;;  %v3894_v48 = vrot.slane %v14079_v43, 5  ;;  %v9150_v22 = vld [vmem:[%s10768_s26 + $0xb4] sm:$0xf] }
 0x298   : > { %4943 = vrot.lane.b32.xlu1 %v9440_v28, %s10704_s9  ;;  %v4180_v20 = vor.u32 %v4179_v17, %v4176_v38  ;;  %v3897_v1 = vrot.slane %v14104_v53, 5  ;;  %v4186_v54 = vrot.slane %v4184_v3, 4  ;;  %v4193_v59 = vrot.slane %v4191_v21, 6  ;;  %v16344_v38 = vld [vmem:[#allocation39_spill] sm:$0xff]  ;;  %v16345_v17 = vld [vmem:[#allocation24_spill] sm:$0xff] }
 0x299   : > { %5531 = vrot.lane.b32.xlu0 %v9550_v55, %s10711_s16  ;;  %v14197_v58 = vsel %vm5835_vm15, %v13433_v35, %v13982_v18  ;;  %v2663_v52 = vshrl.u32 %v14180_v13, 16  ;;  %v3895_v5 = vsel %vm11079_vm5, %v9295_v10, %v3894_v48  ;;  %v3896_v32 = vrot.slane %v3894_v48, 4  ;;  %v14209_v18 = vpop.permute.xlu1 %5445  ;;  %v14229_v48 = vld [vmem:[%s10768_s26 + $0xb8] sm:$0xf]  ;;  %v9169_v43 = vld [vmem:[%s10768_s26 + $0xbc] sm:$0x1] }
 0x29a   : > { %v4181_v57 = vrot.slane %v4180_v20, 4  ;;  %v6076_v53 = vsel %vm6066_vm9, %v6043_v36, %v13990_v44  ;;  %v4194_v47 = vor.u32 %v4193_v59, %v4190_v49  ;;  %v2666_v15 = vshll.u32 %v14180_v13, 16  ;;  %v14224_v10 = vpop.permute.xlu0 %5443 }
 0x29b   : > { %v14205_v46 = vrot.slane %v2663_v52, 4  ;;  %v2676_v35 = vshrl.u32 %v14191_v12, 16  ;;  %v3898_v62 = vsel %vm11079_vm5, %v3896_v32, %v3897_v1  ;;  %v9456_v44 = vcombine.low %v14180_v13, %v14191_v12 }
 0x29c   : > { %v4185_v41 = vsel %vm11273_vm8, %v4181_v57, %v4184_v3  ;;  %v2263_v14 = vor.u32 %v16343_v27, %v16342_v37  ;;  %v4195_v28 = vsel %vm11273_vm8, %v4186_v54, %v4194_v47  ;;  %v9551_v55 = vcombine.low %v3895_v5, %v3898_v62 }
 0x29d   : > { %v2267_v49 = vor.u32 %v16345_v17, %v16344_v38  ;;  %v2271_v21 = vshrl.u32 %v9121_v16, 16  ;;  %v9566_v3 = vcombine.low %v4185_v41, %v4195_v28  ;;  %v2274_v20 = vshll.u32 %v9121_v16, 16  ;;  %v14243_v62 = vpop.permute.xlu1 %4935 }
 0x29e   : > { %v2264_v36 = vrot.slane %v2263_v14, 4  ;;  %v6109_v13 = vsel %vm6099_vm11, %v6076_v53, %v14003_v8  ;;  %5533 = vrot.lane.b32.xlu0 %v9551_v55, %s10711_s16  ;;  %v2668_v1 = vrot.slane %v2666_v15, 5  ;;  %v2687_v52 = vshrl.u32 %v9150_v22, 16  ;;  %v9311_v53 = vld [vmem:[%s10768_s26 + $0xb0] sm:$0x3]  ;;  %v14249_v17 = vpop.permute.xlu0 %5523 }
 0x29f   : > { %v2269_v54 = vrot.slane %v2267_v49, 4  ;;  %v2273_v59 = vrot.slane %v2271_v21, 5  ;;  %9688 = vmatprep.mubr.msk.bf16.mxu0 %vm6164_vm13, %v6109_v13  ;;  %5611 = vrot.lane.b32.xlu1 %v9566_v3, %s10712_s17  ;;  %v2276_v5 = vrot.slane %v2274_v20, 6  ;;  %v6078_v8 = vsel %vm6066_vm9, %v14165_v63, %v14016_v42 }
 0x2a0   : > { %v2268_v57 = vsel %vm11273_vm8, %v2264_v36, %v2267_v49  ;;  %v2690_v32 = vshll.u32 %v9150_v22, 16  ;;  %v2689_v16 = vrot.slane %v2687_v52, 4  ;;  %v2700_v47 = vshrl.u32 %v14229_v48, 16 }
 0x2a1   : > { %v4197_v15 = vshrl.u32 %v14170_v60, 16  ;;  %v4200_v41 = vshll.u32 %v14170_v60, 16  ;;  %v2277_v37 = vor.u32 %v2276_v5, %v2273_v59  ;;  %v4205_v14 = vrot.slane %v3645_v33, 5 }
 0x2a2   : > { %v2692_v27 = vrot.slane %v2690_v32, 5  ;;  %v4206_v42 = vrot.slane %v3641_v0, 6  ;;  %v4211_v55 = vshrl.u32 %v9311_v53, 16  ;;  %v4214_v38 = vshll.u32 %v9311_v53, 16  ;;  %v9168_v53 = vld [vmem:[%s10768_s26 + $0xb0] sm:$0x1] }
 0x2a3   : > { %v4199_v63 = vrot.slane %v4197_v15, 5  ;;  %v4202_v28 = vrot.slane %v4200_v41, 6  ;;  %5039 = vrot.lane.b32.xlu1 %v9456_v44, %s10705_s10  ;;  %v2278_v60 = vsel %vm11273_vm8, %v2269_v54, %v2277_v37  ;;  %v9457_v49 = vcombine.low %v9150_v22, %v14229_v48 }
 0x2a4   : > { %v4207_v21 = vor.u32 %v4206_v42, %v4205_v14  ;;  %v5851_v33 = vsel %vm5835_vm15, %v13423_v39, %v14042_v4  ;;  %v9441_v0 = vcombine.low %v2268_v57, %v2278_v60  ;;  %v4213_v36 = vrot.slane %v4211_v55, 5  ;;  %v9185_v55 = vld [vmem:[%s10768_s26 + $0xb4] sm:$0xe] }
 0x2a5   : > { %v4203_v3 = vor.u32 %v4202_v28, %v4199_v63  ;;  %v4216_v20 = vrot.slane %v4214_v38, 6  ;;  %v2693_v59 = vor.u32 %v2692_v27, %v2689_v16  ;;  %v2696_v44 = vshll.u32 %v14229_v48, 16  ;;  %v14264_v4 = vpop.permute.xlu1 %5603  ;;  %v14275_v27 = vpop.permute.xlu0 %5525 }
 0x2a6   : > { %v4209_v13 = vrot.slane %v4207_v21, 4  ;;  %v2702_v54 = vrot.slane %v2700_v47, 4  ;;  %4945 = vrot.lane.b32.xlu0 %v9441_v0, %s10704_s9  ;;  %v2706_v5 = vshll.u32 %v9169_v43, 16  ;;  %v2669_v39 = vor.u32 %v2668_v1, %v14205_v46 }
 0x2a7   : > { %v4204_v22 = vrot.slane %v4203_v3, 4  ;;  %v4217_v52 = vor.u32 %v4216_v20, %v4213_v36  ;;  %5041 = vrot.lane.b32.xlu1 %v9457_v49, %s10705_s10  ;;  %v2694_v57 = vrot.slane %v2693_v59, 4  ;;  %v2698_v32 = vrot.slane %v2696_v44, 5 }
 0x2a8   : > { %v2672_v16 = vshll.u32 %v14191_v12, 16  ;;  %v2678_v15 = vrot.slane %v2676_v35, 4  ;;  %v2708_v46 = vrot.slane %v2706_v5, 5  ;;  %v2670_v1 = vrot.slane %v2669_v39, 4 }
 0x2a9   : > { %v4208_v41 = vsel %vm11273_vm8, %v4204_v22, %v4207_v21  ;;  %v4218_v37 = vsel %vm11273_vm8, %v4209_v13, %v4217_v52  ;;  %v2699_v42 = vsel %vm10796_vm2, %v2694_v57, %v2698_v32  ;;  %v2703_v63 = vor.u32 %v2702_v54, %v2698_v32  ;;  %v9184_v13 = vld [vmem:[%s10768_s26 + $0xa8] sm:$0xe] }
 0x2aa   : > { %v9567_v14 = vcombine.low %v4208_v41, %v4218_v37  ;;  %v2674_v28 = vrot.slane %v2672_v16, 5  ;;  %v2682_v38 = vshll.u32 %v9168_v53, 16  ;;  %v5884_v60 = vsel %vm5868_vm0, %v5851_v33, %v14063_v9 }
 0x2ab   : > { %v6111_v49 = vsel %vm6099_vm11, %v6078_v8, %v14070_v24  ;;  %v9201_v21 = vrot.slane %v9185_v55, 9  ;;  %v2704_v0 = vrot.slane %v2703_v63, 4  ;;  %v2915_v20 = vrot.slane %v14229_v48, 5  ;;  %v14293_v24 = vpop.permute.xlu1 %5031 }
 0x2ac   : > { %5613 = vrot.lane.b32.xlu0 %v9567_v14, %s10712_s17  ;;  %v2675_v3 = vsel %vm10796_vm2, %v2670_v1, %v2674_v28  ;;  %v2679_v36 = vor.u32 %v2678_v15, %v2674_v28  ;;  %9689 = vmatmul.mubr.msk.bf16.gmra.mxu0 %vm6164_vm13, %v6111_v49  ;;  %v2684_v59 = vrot.slane %v2682_v38, 5  ;;  %v2918_v54 = vrot.slane %v9169_v43, 5  ;;  %v14301_v15 = vpop.permute.xlu0 %4937  ;;  %v9217_v14 = vld [vmem:[%s10768_s26 + $0xbc] sm:$0x3] }
 0x2ad   : > { %v9200_v22 = vrot.slane %v9184_v13, 9  ;;  %v2908_v9 = vrot.slane %v14191_v12, 5  ;;  %v2709_v8 = vsel %vm10796_vm2, %v2704_v0, %v2708_v46  ;;  %v2916_v52 = vsel %vm11079_vm5, %v9201_v21, %v2915_v20 }
 0x2ae   : > { %v2680_v33 = vrot.slane %v2679_v36, 4  ;;  %v2917_v5 = vrot.slane %v2915_v20, 4  ;;  %v9473_v39 = vcombine.low %v2699_v42, %v2709_v8  ;;  %v2911_v43 = vrot.slane %v9168_v53, 5 }
 0x2af   : > { %v2909_v57 = vsel %vm11079_vm5, %v9200_v22, %v2908_v9  ;;  %v2910_v32 = vrot.slane %v2908_v9, 4  ;;  %v5882_v41 = vsel %vm5868_vm0, %v14197_v58, %v14035_v23  ;;  %v5917_v1 = vsel %vm5901_vm1, %v5884_v60, %v14086_v7  ;;  %v9216_v60 = vld [vmem:[%s10768_s26 + $0xb0] sm:$0x3] }
 0x2b0   : > { %v2685_v37 = vsel %vm10796_vm2, %v2680_v33, %v2684_v59  ;;  %v2919_v46 = vsel %vm11079_vm5, %v2917_v5, %v2918_v54  ;;  %5121 = vrot.lane.b32.xlu1 %v9473_v39, %s10706_s11  ;;  %v3250_v28 = vshrl.u32 %v9185_v55, 16  ;;  %v3253_v58 = vshll.u32 %v9185_v55, 16 }
 0x2b1   : > { %v9472_v53 = vcombine.low %v2675_v3, %v2685_v37  ;;  %v9489_v42 = vcombine.low %v2916_v52, %v2919_v46  ;;  %v2912_v63 = vsel %vm11079_vm5, %v2910_v32, %v2911_v43  ;;  %v3258_v38 = vrot.slane %v2700_v47, 5  ;;  %v14320_v3 = vpop.permute.xlu1 %5033  ;;  %v14336_v46 = vld [vmem:[%s10768_s26 + $0xc4] sm:$0xf] }
 0x2b2   : > { %v9488_v23 = vcombine.low %v2909_v57, %v2912_v63  ;;  %v3259_v49 = vrot.slane %v2696_v44, 6  ;;  %v3252_v21 = vrot.slane %v3250_v28, 5  ;;  %v3264_v0 = vshrl.u32 %v9217_v14, 16  ;;  %v14327_v9 = vpop.permute.xlu0 %5605  ;;  %v9244_v28 = vld [vmem:[%s10768_s26 + $0xb4] sm:$0xf] }
 0x2b3   : > { %5119 = vrot.lane.b32.xlu0 %v9472_v53, %s10706_s11  ;;  %v3267_v7 = vshll.u32 %v9217_v14, 16  ;;  %v3227_v36 = vshrl.u32 %v9184_v13, 16  ;;  %v3255_v20 = vrot.slane %v3253_v58, 6  ;;  %v3230_v54 = vshll.u32 %v9184_v13, 16  ;;  %v9246_v13 = vld [vmem:[%s10768_s26 + $0xc0] sm:$0xf] }
 0x2b4   : > { %v3260_v59 = vor.u32 %v3259_v49, %v3258_v38  ;;  %v3235_v55 = vrot.slane %v2676_v35, 5  ;;  %5201 = vrot.lane.b32.xlu1 %v9489_v42, %s10707_s12  ;;  %v3266_v48 = vrot.slane %v3264_v0, 5  ;;  %v3236_v22 = vrot.slane %v2672_v16, 6 }
 0x2b5   : > { %v3269_v47 = vrot.slane %v3267_v7, 6  ;;  %v3229_v44 = vrot.slane %v3227_v36, 5  ;;  %v3256_v8 = vor.u32 %v3255_v20, %v3252_v21  ;;  %v3232_v52 = vrot.slane %v3230_v54, 6  ;;  %v14356_v54 = vld [vmem:[%s10768_s26 + $0xc8] sm:$0x1] }
 0x2b6   : > { %v3262_v33 = vrot.slane %v3260_v59, 4  ;;  %v3241_v5 = vshrl.u32 %v9216_v60, 16  ;;  %v5915_v35 = vsel %vm5901_vm1, %v5882_v41, %v14094_v56  ;;  %v3237_v57 = vor.u32 %v3236_v22, %v3235_v55 }
 0x2b7   : > { %5199 = vrot.lane.b32.xlu0 %v9488_v23, %s10707_s12  ;;  %v3270_v39 = vor.u32 %v3269_v47, %v3266_v48  ;;  %v3244_v32 = vshll.u32 %v9216_v60, 16  ;;  %v3257_v12 = vrot.slane %v3256_v8, 4  ;;  %v3233_v16 = vor.u32 %v3232_v52, %v3229_v44  ;;  %v14341_v56 = vpop.permute.xlu1 %5113  ;;  %v14365_v44 = vld [vmem:[%s10768_s26 + $0xbc] sm:$0x1] }
 0x2b8   : > { %v3243_v43 = vrot.slane %v3241_v5, 5  ;;  %v5950_v37 = vsel %vm5934_vm3, %v5917_v1, %v14115_v34  ;;  %v3239_v53 = vrot.slane %v3237_v57, 4  ;;  %v3680_v63 = vshrl.u32 %v9246_v13, 16  ;;  %v14348_v1 = vld [vmem:[%s10768_s26 + $0xb8] sm:$0xf] }
 0x2b9   : > { %v3271_v14 = vsel %vm11273_vm8, %v3262_v33, %v3270_v39  ;;  %v3246_v42 = vrot.slane %v3244_v32, 6  ;;  %v3261_v41 = vsel %vm11273_vm8, %v3257_v12, %v3260_v59  ;;  %v3234_v23 = vrot.slane %v3233_v16, 4 }
 0x2ba   : > { %v5948_v58 = vsel %vm5934_vm3, %v5915_v35, %v14129_v11  ;;  %v3683_v34 = vshll.u32 %v9246_v13, 16  ;;  %v9505_v38 = vcombine.low %v3261_v41, %v3271_v14  ;;  %v3682_v21 = vrot.slane %v3680_v63, 4  ;;  %v14351_v7 = vpop.permute.xlu0 %5111 }
 0x2bb   : > { %v3247_v49 = vor.u32 %v3246_v42, %v3243_v43  ;;  %v3693_v0 = vshrl.u32 %v14336_v46, 16  ;;  %v3238_v60 = vsel %vm11273_vm8, %v3234_v23, %v3237_v57  ;;  %v3656_v20 = vshrl.u32 %v9244_v28, 16  ;;  %v14373_v57 = vpop.permute.xlu1 %5193  ;;  %v9122_v42 = vld [vmem:[%s10768_s26 + $0xbc] sm:$0x3] }
 0x2bc   : > { %v3685_v36 = vrot.slane %v3683_v34, 5  ;;  %v3659_v59 = vshll.u32 %v9244_v28, 16  ;;  %5281 = vrot.lane.b32.xlu1 %v9505_v38, %s10708_s13  ;;  %v9521_v55 = vcombine.low %v9246_v13, %v14336_v46  ;;  %v3669_v48 = vshrl.u32 %v14348_v1, 16 }
 0x2bd   : > { %v3248_v11 = vsel %vm11273_vm8, %v3239_v53, %v3247_v49  ;;  %v9520_v47 = vcombine.low %v9244_v28, %v14348_v1  ;;  %v3658_v8 = vrot.slane %v3656_v20, 4  ;;  %v5983_v52 = vsel %vm5967_vm4, %v5950_v37, %v14145_v19 }
 0x2be   : > { %v9504_v22 = vcombine.low %v3238_v60, %v3248_v11  ;;  %v3661_v33 = vrot.slane %v3659_v59, 5  ;;  %v3686_v5 = vor.u32 %v3685_v36, %v3682_v21  ;;  %v3689_v35 = vshll.u32 %v14336_v46, 16  ;;  %v14386_v63 = vpop.permute.xlu0 %5191  ;;  %v16348_v60 = vld [vmem:[#allocation52_spill] sm:$0xff]  ;;  %v16349_v36 = vld [vmem:[#allocation6_spill] sm:$0xff] }
 0x2bf   : > { %v3695_v39 = vrot.slane %v3693_v0, 4  ;;  %v3699_v13 = vshll.u32 %v14356_v54, 16  ;;  %v3665_v12 = vshll.u32 %v14348_v1, 16  ;;  %v3671_v16 = vrot.slane %v3669_v48, 4 }
 0x2c0   : > { %5279 = vrot.lane.b32.xlu0 %v9504_v22, %s10708_s13  ;;  %v3662_v32 = vor.u32 %v3661_v33, %v3658_v8  ;;  %v3675_v19 = vshll.u32 %v14365_v44, 16  ;;  %5377 = vrot.lane.b32.xlu1 %v9521_v55, %s10709_s14  ;;  %v5981_v43 = vsel %vm5967_vm4, %v5948_v58, %v14151_v45  ;;  %v3687_v37 = vrot.slane %v3686_v5, 4  ;;  %v16346_v45 = vld [vmem:[#allocation9_spill] sm:$0xff]  ;;  %v16347_v58 = vld [vmem:[#allocation54_spill] sm:$0xff] }
 0x2c1   : > { %v3691_v14 = vrot.slane %v3689_v35, 5  ;;  %v3701_v53 = vrot.slane %v3699_v13, 5  ;;  %v3667_v41 = vrot.slane %v3665_v12, 5  ;;  %v6016_v34 = vsel %vm6000_vm6, %v5983_v52, %v14177_v2  ;;  %v9280_v8 = vld [vmem:[%s10768_s26 + $0xb4] sm:$0xe] }
 0x2c2   : > { %v3663_v28 = vrot.slane %v3662_v32, 4  ;;  %v3677_v23 = vrot.slane %v3675_v19, 5  ;;  %v2286_v21 = vor.u32 %v16347_v58, %v16346_v45  ;;  %v2290_v20 = vor.u32 %v16349_v36, %v16348_v60 }
 0x2c3   : > { %v3692_v38 = vsel %vm10796_vm2, %v3687_v37, %v3691_v14  ;;  %v3696_v49 = vor.u32 %v3695_v39, %v3691_v14  ;;  %v3672_v11 = vor.u32 %v3671_v16, %v3667_v41  ;;  %v2294_v55 = vshrl.u32 %v9122_v42, 16  ;;  %v14400_v39 = vpop.permute.xlu1 %5273 }
 0x2c4   : > { %5375 = vrot.lane.b32.xlu0 %v9520_v47, %s10709_s14  ;;  %v3668_v59 = vsel %vm10796_vm2, %v3663_v28, %v3667_v41  ;;  %v2297_v22 = vshll.u32 %v9122_v42, 16  ;;  %v2287_v33 = vrot.slane %v2286_v21, 4  ;;  %v2292_v52 = vrot.slane %v2290_v20, 4 }
 0x2c5   : > { %v3697_v2 = vrot.slane %v3696_v49, 4  ;;  %v9296_v5 = vrot.slane %v9280_v8, 9  ;;  %v3673_v13 = vrot.slane %v3672_v11, 4  ;;  %v2296_v32 = vrot.slane %v2294_v55, 5 }
 0x2c6   : > { %v2299_v19 = vrot.slane %v2297_v22, 6  ;;  %v3901_v37 = vrot.slane %v14348_v1, 5  ;;  %v6014_v16 = vsel %vm6000_vm6, %v5981_v43, %v14183_v6  ;;  %v2291_v14 = vsel %vm11273_vm8, %v2287_v33, %v2290_v20  ;;  %v14410_v28 = vpop.permute.xlu0 %5271  ;;  %v14435_v1 = vld [vmem:[%s10768_s26 + $0xc0] sm:$0xf] }
 0x2c7   : > { %v3702_v47 = vsel %vm10796_vm2, %v3697_v2, %v3701_v53  ;;  %v3904_v42 = vrot.slane %v14365_v44, 5  ;;  %v3678_v49 = vsel %vm10796_vm2, %v3673_v13, %v3677_v23  ;;  %v14416_v58 = vsel %vm6033_vm7, %v6016_v34, %v14209_v18  ;;  %v9312_v53 = vld [vmem:[%s10768_s26 + $0xbc] sm:$0x3]  ;;  %v14427_v18 = vld [vmem:[%s10768_s26 + $0xc0] sm:$0xe]  ;;  %v14432_v55 = vpop.permute.xlu1 %5369 }
 0x2c8   : > { %v9537_v41 = vcombine.low %v3692_v38, %v3702_v47  ;;  %v2300_v45 = vor.u32 %v2299_v19, %v2296_v32  ;;  %v9536_v21 = vcombine.low %v3668_v59, %v3678_v49  ;;  %v3902_v6 = vsel %vm11079_vm5, %v9296_v5, %v3901_v37 }
 0x2c9   : > { %v3903_v43 = vrot.slane %v3901_v37, 4  ;;  %v4220_v60 = vshrl.u32 %v9280_v8, 16  ;;  %v4223_v38 = vshll.u32 %v9280_v8, 16  ;;  %v4228_v23 = vrot.slane %v3669_v48, 5 }
 0x2ca   : > { %5457 = vrot.lane.b32.xlu1 %v9537_v41, %s10710_s15  ;;  %v2301_v44 = vsel %vm11273_vm8, %v2292_v52, %v2300_v45  ;;  %v4229_v36 = vrot.slane %v3665_v12, 6  ;;  %5455 = vrot.lane.b32.xlu0 %v9536_v21, %s10710_s15  ;;  %v4234_v11 = vshrl.u32 %v9312_v53, 16  ;;  %v4237_v33 = vshll.u32 %v9312_v53, 16  ;;  %v14437_v48 = vpop.permute.xlu0 %5367  ;;  %v9123_v21 = vld [vmem:[%s10768_s26 + $0xc8] sm:$0x3] }
 0x2cb   : > { %v9442_v34 = vcombine.low %v2291_v14, %v2301_v44  ;;  %v3905_v20 = vsel %vm11079_vm5, %v3903_v43, %v3904_v42  ;;  %v4222_v59 = vrot.slane %v4220_v60, 5  ;;  %v4225_v2 = vrot.slane %v4223_v38, 6  ;;  %v14446_v14 = vld [vmem:[%s10768_s26 + $0xc4] sm:$0xf]  ;;  %v9154_v38 = vld [vmem:[%s10768_s26 + $0xcc] sm:$0xf] }
 0x2cc   : > { %v9552_v22 = vcombine.low %v3902_v6, %v3905_v20  ;;  %v4230_v8 = vor.u32 %v4229_v36, %v4228_v23  ;;  %v4236_v12 = vrot.slane %v4234_v11, 5  ;;  %v9297_v52 = vrot.slane %v14427_v18, 9 }
 0x2cd   : > { %v3908_v5 = vrot.slane %v14336_v46, 5  ;;  %v3911_v13 = vrot.slane %v14356_v54, 5  ;;  %v6047_v32 = vsel %vm6033_vm7, %v6014_v16, %v14224_v10  ;;  %v4226_v19 = vor.u32 %v4225_v2, %v4222_v59  ;;  %v16352_v2 = vld [vmem:[#allocation46_spill] sm:$0xff] }
 0x2ce   : > { %4947 = vrot.lane.b32.xlu1 %v9442_v34, %s10704_s9  ;;  %v4232_v37 = vrot.slane %v4230_v8, 4  ;;  %v4239_v47 = vrot.slane %v4237_v33, 6  ;;  %5535 = vrot.lane.b32.xlu0 %v9552_v22, %s10711_s16  ;;  %v14454_v54 = vsel %vm5835_vm15, %v13491_v29, %v14243_v62  ;;  %v2711_v49 = vshrl.u32 %v14435_v1, 16  ;;  %v16350_v29 = vld [vmem:[#allocation45_spill] sm:$0xff]  ;;  %v16351_v62 = vld [vmem:[#allocation8_spill] sm:$0xff]  ;;  %v16353_v33 = vld [vmem:[#allocation47_spill] sm:$0xff] }
 0x2cf   : > { %v3909_v42 = vsel %vm11079_vm5, %v9297_v52, %v3908_v5  ;;  %v3910_v41 = vrot.slane %v3908_v5, 4  ;;  %v4227_v10 = vrot.slane %v4226_v19, 4  ;;  %v6080_v45 = vsel %vm6066_vm9, %v6047_v32, %v14249_v17  ;;  %v14482_v5 = vld [vmem:[%s10768_s26 + $0xd0] sm:$0xf] }
 0x2d0   : > { %v4240_v16 = vor.u32 %v4239_v47, %v4236_v12  ;;  %v2714_v53 = vshll.u32 %v14435_v1, 16  ;;  %v14463_v43 = vrot.slane %v2711_v49, 4  ;;  %v2724_v60 = vshrl.u32 %v14446_v14, 16 }
 0x2d1   : > { %v3912_v6 = vsel %vm11079_vm5, %v3910_v41, %v3911_v13  ;;  %v2309_v44 = vor.u32 %v16351_v62, %v16350_v29  ;;  %v14469_v23 = vpop.permute.xlu1 %5449  ;;  %v4231_v17 = vsel %vm11273_vm8, %v4227_v10, %v4230_v8  ;;  %v9458_v20 = vcombine.low %v14435_v1, %v14446_v14  ;;  %v14477_v59 = vpop.permute.xlu0 %5447  ;;  %v9313_v41 = vld [vmem:[%s10768_s26 + $0xc8] sm:$0x3] }
 0x2d2   : > { %v4241_v36 = vsel %vm11273_vm8, %v4232_v37, %v4240_v16  ;;  %v9553_v34 = vcombine.low %v3909_v42, %v3912_v6  ;;  %v2313_v12 = vor.u32 %v16353_v33, %v16352_v2  ;;  %v2317_v52 = vshrl.u32 %v9123_v21, 16 }
 0x2d3   : > { %v9568_v11 = vcombine.low %v4231_v17, %v4241_v36  ;;  %v2310_v22 = vrot.slane %v2309_v44, 4  ;;  %v2716_v8 = vrot.slane %v2714_v53, 5  ;;  %v2320_v13 = vshll.u32 %v9123_v21, 16 }
 0x2d4   : > { %5537 = vrot.lane.b32.xlu0 %v9553_v34, %s10711_s16  ;;  %v6113_v32 = vsel %vm6099_vm11, %v6080_v45, %v14264_v4  ;;  %v2735_v19 = vshrl.u32 %v9154_v38, 16  ;;  %v2319_v37 = vrot.slane %v2317_v52, 5  ;;  %v6082_v47 = vsel %vm6066_vm9, %v14416_v58, %v14275_v27 }
 0x2d5   : > { %5615 = vrot.lane.b32.xlu1 %v9568_v11, %s10712_s17  ;;  %v2314_v1 = vsel %vm11273_vm8, %v2310_v22, %v2313_v12  ;;  %v2738_v42 = vshll.u32 %v9154_v38, 16  ;;  %9692 = vmatprep.mubr.msk.bf16.mxu0 %vm6164_vm13, %v6113_v32  ;;  %v2315_v49 = vrot.slane %v2313_v12, 4  ;;  %v2322_v10 = vrot.slane %v2320_v13, 6  ;;  %v14496_v45 = vpop.permute.xlu1 %4939  ;;  %v14504_v17 = vpop.permute.xlu0 %5527  ;;  %v9171_v22 = vld [vmem:[%s10768_s26 + $0xd4] sm:$0x1] }
 0x2d6   : > { %v2737_v16 = vrot.slane %v2735_v19, 4  ;;  %v2748_v4 = vshrl.u32 %v14482_v5, 16  ;;  %v4243_v21 = vshrl.u32 %v14427_v18, 16  ;;  %v4246_v6 = vshll.u32 %v14427_v18, 16 }
 0x2d7   : > { %v2740_v53 = vrot.slane %v2738_v42, 5  ;;  %v4251_v27 = vrot.slane %v3693_v0, 5  ;;  %v2323_v58 = vor.u32 %v2322_v10, %v2319_v37  ;;  %v4252_v29 = vrot.slane %v3689_v35, 6  ;;  %v9170_v42 = vld [vmem:[%s10768_s26 + $0xc8] sm:$0x1] }
 0x2d8   : > { %v4257_v62 = vshrl.u32 %v9313_v41, 16  ;;  %v4260_v44 = vshll.u32 %v9313_v41, 16  ;;  %v9459_v36 = vcombine.low %v9154_v38, %v14482_v5  ;;  %v4245_v34 = vrot.slane %v4243_v21, 5 }
 0x2d9   : > { %5043 = vrot.lane.b32.xlu1 %v9458_v20, %s10705_s10  ;;  %v4248_v11 = vrot.slane %v4246_v6, 6  ;;  %v5855_v18 = vsel %vm5835_vm15, %v13441_v61, %v14301_v15  ;;  %v2324_v0 = vsel %vm11273_vm8, %v2315_v49, %v2323_v58  ;;  %v4253_v46 = vor.u32 %v4252_v29, %v4251_v27 }
 0x2da   : > { %v4259_v35 = vrot.slane %v4257_v62, 5  ;;  %v4262_v2 = vrot.slane %v4260_v44, 6  ;;  %v9443_v33 = vcombine.low %v2314_v1, %v2324_v0  ;;  %v2741_v52 = vor.u32 %v2740_v53, %v2737_v16 }
 0x2db   : > { %v4249_v12 = vor.u32 %v4248_v11, %v4245_v34  ;;  %v2744_v20 = vshll.u32 %v14482_v5, 16  ;;  %v4255_v38 = vrot.slane %v4253_v46, 4  ;;  %v2750_v32 = vrot.slane %v2748_v4, 4  ;;  %v14530_v21 = vpop.permute.xlu0 %5529 }
 0x2dc   : > { %v4263_v13 = vor.u32 %v4262_v2, %v4259_v35  ;;  %v2754_v19 = vshll.u32 %v9171_v22, 16  ;;  %v14517_v61 = vpop.permute.xlu1 %5607  ;;  %4949 = vrot.lane.b32.xlu0 %v9443_v33, %s10704_s9  ;;  %v2742_v37 = vrot.slane %v2741_v52, 4  ;;  %v2717_v41 = vor.u32 %v2716_v8, %v14463_v43  ;;  %v9186_v52 = vld [vmem:[%s10768_s26 + $0xc0] sm:$0xe] }
 0x2dd   : > { %5045 = vrot.lane.b32.xlu1 %v9459_v36, %s10705_s10  ;;  %v4250_v15 = vrot.slane %v4249_v12, 4  ;;  %v2746_v1 = vrot.slane %v2744_v20, 5  ;;  %v2720_v16 = vshll.u32 %v14446_v14, 16  ;;  %v2726_v53 = vrot.slane %v2724_v60, 4  ;;  %v9187_v36 = vld [vmem:[%s10768_s26 + $0xcc] sm:$0xe] }
 0x2de   : > { %v4264_v49 = vsel %vm11273_vm8, %v4255_v38, %v4263_v13  ;;  %v2756_v10 = vrot.slane %v2754_v19, 5  ;;  %v2718_v43 = vrot.slane %v2717_v41, 4  ;;  %v2730_v62 = vshll.u32 %v9170_v42, 16 }
 0x2df   : > { %v4254_v6 = vsel %vm11273_vm8, %v4250_v15, %v4253_v46  ;;  %v2747_v27 = vsel %vm10796_vm2, %v2742_v37, %v2746_v1  ;;  %v2751_v58 = vor.u32 %v2750_v32, %v2746_v1  ;;  %v2722_v29 = vrot.slane %v2720_v16, 5 }
 0x2e0   : > { %v9569_v8 = vcombine.low %v4254_v6, %v4264_v49  ;;  %v5888_v44 = vsel %vm5868_vm0, %v5855_v18, %v14320_v3  ;;  %v6115_v11 = vsel %vm6099_vm11, %v6082_v47, %v14327_v9  ;;  %v9203_v0 = vrot.slane %v9187_v36, 9  ;;  %v14549_v3 = vpop.permute.xlu1 %5035  ;;  %v9219_v49 = vld [vmem:[%s10768_s26 + $0xd4] sm:$0x3] }
 0x2e1   : > { %v2752_v34 = vrot.slane %v2751_v58, 4  ;;  %v2929_v46 = vrot.slane %v14482_v5, 5  ;;  %v2723_v35 = vsel %vm10796_vm2, %v2718_v43, %v2722_v29  ;;  %v2727_v2 = vor.u32 %v2726_v53, %v2722_v29  ;;  %9693 = vmatmul.mubr.msk.bf16.gmra.mxu0 %vm6164_vm13, %v6115_v11 }
 0x2e2   : > { %5617 = vrot.lane.b32.xlu0 %v9569_v8, %s10712_s17  ;;  %v2732_v33 = vrot.slane %v2730_v62, 5  ;;  %v2932_v12 = vrot.slane %v9171_v22, 5  ;;  %v9202_v38 = vrot.slane %v9186_v52, 9  ;;  %v2922_v19 = vrot.slane %v14446_v14, 5 }
 0x2e3   : > { %v2757_v9 = vsel %vm10796_vm2, %v2752_v34, %v2756_v10  ;;  %v2930_v47 = vsel %vm11079_vm5, %v9203_v0, %v2929_v46  ;;  %v2931_v18 = vrot.slane %v2929_v46, 4  ;;  %v2728_v32 = vrot.slane %v2727_v2, 4  ;;  %v14556_v22 = vpop.permute.xlu0 %4941  ;;  %v9218_v0 = vld [vmem:[%s10768_s26 + $0xc8] sm:$0x3] }
 0x2e4   : > { %v9475_v13 = vcombine.low %v2747_v27, %v2757_v9  ;;  %v2925_v15 = vrot.slane %v9170_v42, 5  ;;  %v5886_v37 = vsel %vm5868_vm0, %v14454_v54, %v14293_v24  ;;  %v5921_v41 = vsel %vm5901_vm1, %v5888_v44, %v14341_v56  ;;  %v14577_v44 = vpop.permute.xlu1 %5037 }
 0x2e5   : > { %v2933_v1 = vsel %vm11079_vm5, %v2931_v18, %v2932_v12  ;;  %v3296_v10 = vshrl.u32 %v9187_v36, 16  ;;  %v2733_v53 = vsel %vm10796_vm2, %v2728_v32, %v2732_v33  ;;  %v2923_v6 = vsel %vm11079_vm5, %v9202_v38, %v2922_v19  ;;  %v9250_v32 = vld [vmem:[%s10768_s26 + $0xd8] sm:$0xf] }
 0x2e6   : > { %5125 = vrot.lane.b32.xlu1 %v9475_v13, %s10706_s11  ;;  %v9491_v42 = vcombine.low %v2930_v47, %v2933_v1  ;;  %v2924_v27 = vrot.slane %v2922_v19, 4  ;;  %v9474_v24 = vcombine.low %v2723_v35, %v2733_v53  ;;  %v3299_v58 = vshll.u32 %v9187_v36, 16 }
 0x2e7   : > { %v3298_v54 = vrot.slane %v3296_v10, 5  ;;  %v3304_v43 = vrot.slane %v2748_v4, 5  ;;  %v3305_v8 = vrot.slane %v2744_v20, 6  ;;  %v3310_v29 = vshrl.u32 %v9219_v49, 16 }
 0x2e8   : > { %v2926_v56 = vsel %vm11079_vm5, %v2924_v27, %v2925_v15  ;;  %v3313_v62 = vshll.u32 %v9219_v49, 16  ;;  %5123 = vrot.lane.b32.xlu0 %v9474_v24, %s10706_s11  ;;  %v3301_v11 = vrot.slane %v3299_v58, 6  ;;  %v3273_v46 = vshrl.u32 %v9186_v52, 16  ;;  %v14593_v49 = vld [vmem:[%s10768_s26 + $0xdc] sm:$0xf] }
 0x2e9   : > { %v9490_v34 = vcombine.low %v2923_v6, %v2926_v56  ;;  %v3276_v36 = vshll.u32 %v9186_v52, 16  ;;  %v3306_v4 = vor.u32 %v3305_v8, %v3304_v43  ;;  %v3312_v35 = vrot.slane %v3310_v29, 5  ;;  %v14584_v20 = vpop.permute.xlu0 %5609 }
 0x2ea   : > { %5205 = vrot.lane.b32.xlu1 %v9491_v42, %s10707_s12  ;;  %v3315_v2 = vrot.slane %v3313_v62, 6  ;;  %v3281_v5 = vrot.slane %v2724_v60, 5  ;;  %v3302_v33 = vor.u32 %v3301_v11, %v3298_v54  ;;  %v3275_v12 = vrot.slane %v3273_v46, 5  ;;  %v9248_v42 = vld [vmem:[%s10768_s26 + $0xcc] sm:$0xf] }
 0x2eb   : > { %v3278_v9 = vrot.slane %v3276_v36, 6  ;;  %v3282_v47 = vrot.slane %v2720_v16, 6  ;;  %v3308_v18 = vrot.slane %v3306_v4, 4  ;;  %v3287_v38 = vshrl.u32 %v9218_v0, 16  ;;  %v14605_v54 = vld [vmem:[%s10768_s26 + $0xd0] sm:$0xf] }
 0x2ec   : > { %v3316_v52 = vor.u32 %v3315_v2, %v3312_v35  ;;  %v3290_v13 = vshll.u32 %v9218_v0, 16  ;;  %5203 = vrot.lane.b32.xlu0 %v9490_v34, %s10707_s12  ;;  %v5919_v60 = vsel %vm5901_vm1, %v5886_v37, %v14351_v7  ;;  %v3303_v19 = vrot.slane %v3302_v33, 4 }
 0x2ed   : > { %v3279_v15 = vor.u32 %v3278_v9, %v3275_v12  ;;  %v3283_v1 = vor.u32 %v3282_v47, %v3281_v5  ;;  %v3289_v16 = vrot.slane %v3287_v38, 5  ;;  %v5954_v53 = vsel %vm5934_vm3, %v5921_v41, %v14373_v57  ;;  %v14600_v6 = vpop.permute.xlu1 %5117  ;;  %v9266_v12 = vld [vmem:[%s10768_s26 + $0xd4] sm:$0x1] }
 0x2ee   : > { %v3317_v14 = vsel %vm11273_vm8, %v3308_v18, %v3316_v52  ;;  %v3292_v10 = vrot.slane %v3290_v13, 6  ;;  %v3307_v27 = vsel %vm11273_vm8, %v3303_v19, %v3306_v4  ;;  %v3728_v24 = vshrl.u32 %v9250_v32, 16  ;;  %v9267_v4 = vld [vmem:[%s10768_s26 + $0xe0] sm:$0x1] }
 0x2ef   : > { %v3280_v7 = vrot.slane %v3279_v15, 4  ;;  %v3285_v37 = vrot.slane %v3283_v1, 4  ;;  %v9507_v58 = vcombine.low %v3307_v27, %v3317_v14  ;;  %v3731_v56 = vshll.u32 %v9250_v32, 16  ;;  %v14608_v29 = vpop.permute.xlu0 %5115 }
 0x2f0   : > { %v3293_v43 = vor.u32 %v3292_v10, %v3289_v16  ;;  %v3741_v8 = vshrl.u32 %v14593_v49, 16  ;;  %v3730_v41 = vrot.slane %v3728_v24, 4  ;;  %v9523_v62 = vcombine.low %v9250_v32, %v14593_v49 }
 0x2f1   : > { %v3284_v57 = vsel %vm11273_vm8, %v3280_v7, %v3283_v1  ;;  %v3704_v34 = vshrl.u32 %v9248_v42, 16  ;;  %5285 = vrot.lane.b32.xlu1 %v9507_v58, %s10708_s13  ;;  %v3733_v0 = vrot.slane %v3731_v56, 5  ;;  %v3707_v46 = vshll.u32 %v9248_v42, 16  ;;  %v14625_v38 = vpop.permute.xlu1 %5197  ;;  %v9283_v58 = vld [vmem:[%s10768_s26 + $0xd8] sm:$0xe] }
 0x2f2   : > { %v3294_v11 = vsel %vm11273_vm8, %v3285_v37, %v3293_v43  ;;  %v3717_v36 = vshrl.u32 %v14605_v54, 16  ;;  %v5952_v2 = vsel %vm5934_vm3, %v5919_v60, %v14386_v63  ;;  %v9522_v33 = vcombine.low %v9248_v42, %v14605_v54 }
 0x2f3   : > { %v9506_v35 = vcombine.low %v3284_v57, %v3294_v11  ;;  %v3706_v5 = vrot.slane %v3704_v34, 4  ;;  %v3709_v9 = vrot.slane %v3707_v46, 5  ;;  %v5987_v47 = vsel %vm5967_vm4, %v5954_v53, %v14400_v39  ;;  %v14634_v14 = vpop.permute.xlu0 %5195 }
 0x2f4   : > { %v3734_v18 = vor.u32 %v3733_v0, %v3730_v41  ;;  %v3737_v52 = vshll.u32 %v14593_v49, 16  ;;  %v3743_v13 = vrot.slane %v3741_v8, 4  ;;  %v3747_v32 = vshll.u32 %v9267_v4, 16  ;;  %v9282_v41 = vld [vmem:[%s10768_s26 + $0xcc] sm:$0xe] }
 0x2f5   : > { %5283 = vrot.lane.b32.xlu0 %v9506_v35, %s10708_s13  ;;  %v3713_v63 = vshll.u32 %v14605_v54, 16  ;;  %v3719_v60 = vrot.slane %v3717_v36, 4  ;;  %5381 = vrot.lane.b32.xlu1 %v9523_v62, %s10709_s14  ;;  %v3710_v15 = vor.u32 %v3709_v9, %v3706_v5  ;;  %v3723_v1 = vshll.u32 %v9266_v12, 16 }
 0x2f6   : > { %v3735_v39 = vrot.slane %v3734_v18, 4  ;;  %v3739_v19 = vrot.slane %v3737_v52, 5  ;;  %v5985_v16 = vsel %vm5967_vm4, %v5952_v2, %v14410_v28  ;;  %v3749_v10 = vrot.slane %v3747_v32, 5 }
 0x2f7   : > { %v3715_v53 = vrot.slane %v3713_v63, 5  ;;  %v6020_v42 = vsel %vm6000_vm6, %v5987_v47, %v14432_v55  ;;  %v3711_v37 = vrot.slane %v3710_v15, 4  ;;  %v3725_v24 = vrot.slane %v3723_v1, 5 }
 0x2f8   : > { %v3740_v27 = vsel %vm10796_vm2, %v3735_v39, %v3739_v19  ;;  %v3744_v7 = vor.u32 %v3743_v13, %v3739_v19  ;;  %v9299_v56 = vrot.slane %v9283_v58, 9  ;;  %v3922_v28 = vrot.slane %v14593_v49, 5  ;;  %v14651_v0 = vpop.permute.xlu1 %5277  ;;  %v9315_v39 = vld [vmem:[%s10768_s26 + $0xe0] sm:$0x3] }
 0x2f9   : > { %5379 = vrot.lane.b32.xlu0 %v9522_v33, %s10709_s14  ;;  %v3720_v43 = vor.u32 %v3719_v60, %v3715_v53  ;;  %v3925_v57 = vrot.slane %v9267_v4, 5  ;;  %v3716_v34 = vsel %vm10796_vm2, %v3711_v37, %v3715_v53  ;;  %v9298_v55 = vrot.slane %v9282_v41, 9 }
 0x2fa   : > { %v3745_v62 = vrot.slane %v3744_v7, 4  ;;  %v3915_v11 = vrot.slane %v14605_v54, 5  ;;  %v3923_v35 = vsel %vm11079_vm5, %v9299_v56, %v3922_v28  ;;  %v3924_v2 = vrot.slane %v3922_v28, 4 }
 0x2fb   : > { %v3721_v46 = vrot.slane %v3720_v43, 4  ;;  %v3918_v5 = vrot.slane %v9266_v12, 5  ;;  %v6018_v33 = vsel %vm6000_vm6, %v5985_v16, %v14437_v48  ;;  %v6053_v12 = vsel %vm6033_vm7, %v6020_v42, %v14469_v23  ;;  %v9314_v42 = vld [vmem:[%s10768_s26 + $0xd4] sm:$0x3]  ;;  %s10714_s26 = smov 64  }
 0x2fc   : > { %v3750_v4 = vsel %vm10796_vm2, %v3745_v62, %v3749_v10  ;;  %v3916_v9 = vsel %vm11079_vm5, %v9298_v55, %v3915_v11  ;;  %v3917_v47 = vrot.slane %v3915_v11, 4  ;;  %v14661_v18 = vpop.permute.xlu0 %5275  ;;  %v3926_v60 = vsel %vm11079_vm5, %v3924_v2, %v3925_v57 }
 0x2fd   : > { %v9539_v13 = vcombine.low %v3740_v27, %v3750_v4  ;;  %v3726_v32 = vsel %vm10796_vm2, %v3721_v46, %v3725_v24  ;;  %v9555_v48 = vcombine.low %v3923_v35, %v3926_v60  ;;  %v4289_v1 = vshrl.u32 %v9283_v58, 16  ;;  %v14677_v24 = vpop.permute.xlu1 %5373 }
 0x2fe   : > { %v9538_v19 = vcombine.low %v3716_v34, %v3726_v32  ;;  %v3919_v15 = vsel %vm11079_vm5, %v3917_v47, %v3918_v5  ;;  %v4292_v10 = vshll.u32 %v9283_v58, 16  ;;  %v4297_v25 = vrot.slane %v3741_v8, 5 }
 0x2ff   : > { %5461 = vrot.lane.b32.xlu1 %v9539_v13, %s10710_s15  ;;  %v9554_v16 = vcombine.low %v3916_v9, %v3919_v15  ;;  %v4298_v53 = vrot.slane %v3737_v52, 6  ;;  %v4291_v27 = vrot.slane %v4289_v1, 5  ;;  %v4303_v7 = vshrl.u32 %v9315_v39, 16 }
 0x300   : > { %5459 = vrot.lane.b32.xlu0 %v9538_v19, %s10710_s15  ;;  %v4306_v23 = vshll.u32 %v9315_v39, 16  ;;  %v4266_v37 = vshrl.u32 %v9282_v41, 16  ;;  %v4294_v51 = vrot.slane %v4292_v10, 6  ;;  %v4269_v56 = vshll.u32 %v9282_v41, 16  ;;  %v14681_v58 = vpop.permute.xlu0 %5371  ;;  %v14683_v49 = vpop.f32.mrf.mxu0 }
 0x301   : > { %v4299_v43 = vor.u32 %v4298_v53, %v4297_v25  ;;  %v4274_v28 = vrot.slane %v3717_v36, 5  ;;  %v4305_v8 = vrot.slane %v4303_v7, 5  ;;  %v4275_v62 = vrot.slane %v3713_v63, 6 }
 0x302   : > { %v4308_v52 = vrot.slane %v4306_v23, 6  ;;  %v4268_v57 = vrot.slane %v4266_v37, 5  ;;  %v4295_v34 = vor.u32 %v4294_v51, %v4291_v27  ;;  %v4271_v11 = vrot.slane %v4269_v56, 6  ;;  %v14688_v41 = vpop.f32.mrf.mxu0 }
 0x303   : > { %5541 = vrot.lane.b32.xlu1 %v9555_v48, %s10711_s16  ;;  %v4301_v55 = vrot.slane %v4299_v43, 4  ;;  %v4280_v46 = vshrl.u32 %v9314_v42, 16  ;;  %v6051_v36 = vsel %vm6033_vm7, %v6018_v33, %v14477_v59  ;;  %v14693_v2 = vor.u32 %v4275_v62, %v4274_v28 }
 0x304   : > { %5539 = vrot.lane.b32.xlu0 %v9554_v16, %s10711_s16  ;;  %v4309_v35 = vor.u32 %v4308_v52, %v4305_v8  ;;  %v4283_v5 = vshll.u32 %v9314_v42, 16  ;;  %v4296_v4 = vrot.slane %v4295_v34, 4  ;;  %v4272_v54 = vor.u32 %v4271_v11, %v4268_v57  ;;  %v14697_v47 = vpop.f32.mrf.mxu0 }
 0x305   : > { %v4282_v63 = vrot.slane %v4280_v46, 5  ;;  %v6084_v9 = vsel %vm6066_vm9, %v6051_v36, %v14504_v17  ;;  %v4278_v32 = vrot.slane %v14693_v2, 4  ;;  %v6086_v17 = vsel %vm6066_vm9, %v6053_v12, %v14530_v21 }
 0x306   : > { %v4310_v13 = vsel %vm11273_vm8, %v4301_v55, %v4309_v35  ;;  %v4285_v60 = vrot.slane %v4283_v5, 6  ;;  %v6117_v59 = vsel %vm6099_vm11, %v6084_v9, %v14517_v61  ;;  %v14704_v33 = vpop.permute.xlu1 %5453  ;;  %v4300_v39 = vsel %vm11273_vm8, %v4296_v4, %v4299_v43  ;;  %v14719_v10 = vpop.f32.mrf.mxu0 }
 0x307   : > { %v4273_v19 = vrot.slane %v4272_v54, 4  ;;  %9696 = vmatprep.mubr.msk.bf16.mxu0 %vm6164_vm13, %v6117_v59  ;;  %v14711_v48 = vpop.permute.xlu0 %5451  ;;  %v9571_v15 = vcombine.low %v4300_v39, %v4310_v13  ;;  %v6119_v16 = vsel %vm6099_vm11, %v6086_v17, %v14584_v20  ;;  %v5824_v21 = vsel %vm5802_vm14, %v13123_v50, %v13156_v40 }
 0x308   : > { %v4286_v1 = vor.u32 %v4285_v60, %v4282_v63  ;;  %9697 = vmatmul.mubr.msk.bf16.gmra.mxu0 %vm6164_vm13, %v6119_v16  ;;  %v10713_v25 = vmov 0.0   ;;  %vm256_vm2 = vcmask 58368   ;;  %v5857_v50 = vsel %vm5835_vm15, %v5824_v21, %v14496_v45 }
 0x309   : > { %v4277_v61 = vsel %vm11273_vm8, %v4273_v19, %v14693_v2  ;;  %5621 = vrot.lane.b32.xlu1 %v9571_v15, %s10712_s17  ;;  %261 = vst.msk [vmem:[#allocation2 + $0x30] sm:$0xff] %vm253_vm10, %v10713_v25  ;;  %262 = vst.msk [vmem:[#allocation2 + $0x38] sm:$0xff] %vm253_vm10, %v10713_v25  ;;  %v5890_v40 = vsel %vm5868_vm0, %v5857_v50, %v14549_v3  ;;  %v5826_v34 = vsel %vm5802_vm14, %v13118_v31, %v13145_v26  ;;  %vm8068_vm5 = vcmask 1043456  }
 0x30a   : > { %v4287_v12 = vsel %vm11273_vm8, %v4278_v32, %v4286_v1  ;;  %254 = vst.msk [vmem:[#allocation2] sm:$0xff] %vm253_vm10, %v10713_v25  ;;  %255 = vst.msk [vmem:[#allocation2 + $0x8] sm:$0xff] %vm253_vm10, %v10713_v25  ;;  %v14863_v45 = vpop.permute.xlu1 %4943  ;;  %v5923_v20 = vsel %vm5901_vm1, %v5890_v40, %v14608_v29  ;;  %v5859_v11 = vsel %vm5835_vm15, %v5826_v34, %v14556_v22  ;;  %vm8019_vm8 = vcmask 588800  }
 0x30b   : > { %258 = vst.msk [vmem:[#allocation2 + $0x18] sm:$0xff] %vm253_vm10, %v10713_v25  ;;  %259 = vst.msk [vmem:[#allocation2 + $0x20] sm:$0xff] %vm253_vm10, %v10713_v25  ;;  %v9570_v30 = vcombine.low %v4277_v61, %v4287_v12  ;;  %v5532_v53 = vpop.permute.xlu0 %5531  ;;  %v5956_v27 = vsel %vm5934_vm3, %v5923_v20, %v14634_v14  ;;  %v5892_v46 = vsel %vm5868_vm0, %v5859_v11, %v14577_v44  ;;  %v16354_v20 = vld [vmem:[#allocation13_spill] sm:$0xff] }
 0x30c   : > { %264 = vst.msk [vmem:[#allocation2 + $0x48] sm:$0xff] %vm253_vm10, %v10713_v25  ;;  %265 = vst.msk [vmem:[#allocation2 + $0x50] sm:$0xff] %vm253_vm10, %v10713_v25  ;;  %v5989_v3 = vsel %vm5967_vm4, %v5956_v27, %v14661_v18  ;;  %v5925_v2 = vsel %vm5901_vm1, %v5892_v46, %v14600_v6 }
 0x30d   : > { %267 = vst.msk [vmem:[#allocation2 + $0x60] sm:$0xff] %vm253_vm10, %v10713_v25  ;;  %268 = vst.msk [vmem:[#allocation2 + $0x68] sm:$0xff] %vm253_vm10, %v10713_v25  ;;  %5619 = vrot.lane.b32.xlu0 %v9570_v30, %s10712_s17  ;;  %v6022_v7 = vsel %vm6000_vm6, %v5989_v3, %v14681_v58  ;;  %v5958_v22 = vsel %vm5934_vm3, %v5925_v2, %v14625_v38 }
 0x30e   : > { %270 = vst.msk [vmem:[#allocation2 + $0x78] sm:$0xff] %vm253_vm10, %v10713_v25  ;;  %271 = vst.msk [vmem:[#allocation2 + $0x80] sm:$0xff] %vm253_vm10, %v10713_v25  ;;  %v6055_v23 = vsel %vm6033_vm7, %v6022_v7, %v14711_v48  ;;  %v5991_v44 = vsel %vm5967_vm4, %v5958_v22, %v14651_v0 }
 0x30f   : > { %273 = vst.msk [vmem:[#allocation2 + $0x90] sm:$0xff] %vm253_vm10, %v10713_v25  ;;  %274 = vst.msk [vmem:[#allocation2 + $0x98] sm:$0xff] %vm253_vm10, %v10713_v25  ;;  %v6088_v37 = vsel %vm6066_vm9, %v6055_v23, %v5532_v53  ;;  %v6024_v6 = vsel %vm6000_vm6, %v5991_v44, %v14677_v24  ;;  %v16355_v53 = vld [vmem:[#allocation53_spill] sm:$0xff] }
 0x310   : > { %276 = vst.msk [vmem:[#allocation2 + $0xa8] sm:$0xff] %vm253_vm10, %v10713_v25  ;;  %277 = vst.msk [vmem:[#allocation2 + $0xb0] sm:$0xff] %vm253_vm10, %v10713_v25  ;;  %v5534_v28 = vpop.permute.xlu0 %5533  ;;  %v6057_v63 = vsel %vm6033_vm7, %v6024_v6, %v14704_v33  ;;  %v5828_v27 = vsel %vm5802_vm14, %v16355_v53, %v16354_v20  ;;  %v10645_v53 = vld [vmem:[%s15931_s2] sm:$0xff]  }
 0x311   : > { %279 = vst.msk [vmem:[#allocation2 + $0xc0] sm:$0xff] %vm253_vm10, %v10713_v25  ;;  %280 = vst.msk [vmem:[#allocation2 + $0xc8] sm:$0xff] %vm253_vm10, %v10713_v25  ;;  %v6423_v42 = vld [vmem:[#allocation2 + $0x1] sm:$0xff]  ;;  %v5612_v51 = vpop.permute.xlu1 %5611  ;;  %v6090_v38 = vsel %vm6066_vm9, %v6057_v63, %v5534_v28  ;;  %v5861_v3 = vsel %vm5835_vm15, %v5828_v27, %v14863_v45 }
 0x312   : > { %282 = vst.msk [vmem:[#allocation2 + $0xd8] sm:$0xff] %vm253_vm10, %v10713_v25  ;;  %283 = vst.msk [vmem:[#allocation2 + $0xe0] sm:$0xff] %vm253_vm10, %v10713_v25  ;;  %v6455_v56 = vld [vmem:[#allocation2 + $0x2] sm:$0xff] }
 0x313   : > { %285 = vst.msk [vmem:[#allocation2 + $0xf0] sm:$0xff] %vm253_vm10, %v10713_v25  ;;  %286 = vst.msk [vmem:[#allocation2 + $0xf8] sm:$0xff] %vm253_vm10, %v10713_v25 }
 0x314   : > { %288 = vst.msk [vmem:[#allocation2 + $0x108] sm:$0xff] %vm253_vm10, %v10713_v25  ;;  %289 = vst.msk [vmem:[#allocation2 + $0x110] sm:$0xff] %vm253_vm10, %v10713_v25 }
 0x315   : > { %291 = vst.msk [vmem:[#allocation2 + $0x120] sm:$0xff] %vm253_vm10, %v10713_v25  ;;  %292 = vst.msk [vmem:[#allocation2 + $0x128] sm:$0xff] %vm253_vm10, %v10713_v25 }
 0x316   : > { %294 = vst.msk [vmem:[#allocation2 + $0x138] sm:$0xff] %vm253_vm10, %v10713_v25  ;;  %295 = vst.msk [vmem:[#allocation2 + $0x140] sm:$0xff] %vm253_vm10, %v10713_v25 }
 0x317   : > { %297 = vst.msk [vmem:[#allocation2 + $0x150] sm:$0xff] %vm253_vm10, %v10713_v25  ;;  %298 = vst.msk [vmem:[#allocation2 + $0x158] sm:$0xff] %vm253_vm10, %v10713_v25 }
 0x318   : > { %300 = vst.msk [vmem:[#allocation2 + $0x168] sm:$0xff] %vm253_vm10, %v10713_v25  ;;  %301 = vst.msk [vmem:[#allocation2 + $0x170] sm:$0xff] %vm253_vm10, %v10713_v25  ;;  %v14898_v5 = vpop.permute.xlu0 %4945 }
 0x319   : > { %303 = vst.msk [vmem:[#allocation2 + $0x180] sm:$0xff] %vm253_vm10, %v10713_v25  ;;  %304 = vst.msk [vmem:[#allocation2 + $0x188] sm:$0xff] %vm253_vm10, %v10713_v25 }
 0x31a   : > { %306 = vst.msk [vmem:[#allocation2 + $0x198] sm:$0xff] %vm253_vm10, %v10713_v25  ;;  %307 = vst.msk [vmem:[#allocation2 + $0x1a0] sm:$0xff] %vm253_vm10, %v10713_v25 }
 0x31b   : > { %310 = vst.msk [vmem:[#allocation3] sm:$0xff] %vm309_vm12, %v10713_v25  ;;  %313 = vst.msk [vmem:[#allocation3 + $0x10] sm:$0xff] %vm309_vm12, %v10713_v25 }
 0x31c   : > { %315 = vst.msk [vmem:[#allocation3 + $0x20] sm:$0xff] %vm309_vm12, %v10713_v25  ;;  %317 = vst.msk [vmem:[#allocation3 + $0x30] sm:$0xff] %vm309_vm12, %v10713_v25 }
 0x31d   : > { %319 = vst.msk [vmem:[#allocation3 + $0x40] sm:$0xff] %vm309_vm12, %v10713_v25  ;;  %321 = vst.msk [vmem:[#allocation3 + $0x50] sm:$0xff] %vm309_vm12, %v10713_v25 }
 0x31e   : > { %323 = vst.msk [vmem:[#allocation3 + $0x60] sm:$0xff] %vm309_vm12, %v10713_v25  ;;  %325 = vst.msk [vmem:[#allocation3 + $0x70] sm:$0xff] %vm309_vm12, %v10713_v25  ;;  %v5614_v13 = vpop.permute.xlu0 %5613 }
 0x31f   : > { %327 = vst.msk [vmem:[#allocation3 + $0x80] sm:$0xff] %vm309_vm12, %v10713_v25  ;;  %329 = vst.msk [vmem:[#allocation3 + $0x90] sm:$0xff] %vm309_vm12, %v10713_v25  ;;  %v6123_v0 = vsel %vm6099_vm11, %v6090_v38, %v5614_v13 }
 0x320   : > { %6361 = vst.msk [vmem:[#allocation2 + $0x31] sm:$0xff] %vm253_vm10, %v14683_v49  ;;  %6359 = vst.msk [vmem:[#allocation2 + $0x19] sm:$0xff] %vm253_vm10, %v14688_v41  ;;  %v6121_v49 = vsel %vm6099_vm11, %v6088_v37, %v5612_v51  ;;  %v5040_v41 = vpop.permute.xlu1 %5039 }
 0x321   : > { %263 = vst.msk [vmem:[#allocation2 + $0x40] sm:$0x3] %vm256_vm2, %v10713_v25  ;;  %257 = vst.msk [vmem:[#allocation2 + $0x10] sm:$0x3] %vm256_vm2, %v10713_v25  ;;  %9700 = vmatprep.mubr.msk.bf16.mxu1 %vm6164_vm13, %v6121_v49  ;;  %v5894_v7 = vsel %vm5868_vm0, %v5861_v3, %v5040_v41  ;;  %v16356_v41 = vld [vmem:[#allocation14_spill] sm:$0xff] }
 0x322   : > { %260 = vst.msk [vmem:[#allocation2 + $0x28] sm:$0x3] %vm256_vm2, %v10713_v25  ;;  %266 = vst.msk [vmem:[#allocation2 + $0x58] sm:$0x3] %vm256_vm2, %v10713_v25  ;;  %9701 = vmatmul.mubr.msk.bf16.vlgmr.msra.gmra.mxu1 %vm6164_vm13, %v6123_v0 }
 0x323   : > { %269 = vst.msk [vmem:[#allocation2 + $0x70] sm:$0x3] %vm256_vm2, %v10713_v25  ;;  %272 = vst.msk [vmem:[#allocation2 + $0x88] sm:$0x3] %vm256_vm2, %v10713_v25 }
 0x324   : > { %275 = vst.msk [vmem:[#allocation2 + $0xa0] sm:$0x3] %vm256_vm2, %v10713_v25  ;;  %278 = vst.msk [vmem:[#allocation2 + $0xb8] sm:$0x3] %vm256_vm2, %v10713_v25 }
 0x325   : > { %281 = vst.msk [vmem:[#allocation2 + $0xd0] sm:$0x3] %vm256_vm2, %v10713_v25  ;;  %284 = vst.msk [vmem:[#allocation2 + $0xe8] sm:$0x3] %vm256_vm2, %v10713_v25  ;;  %v5120_v19 = vpop.permute.xlu0 %5119 }
 0x326   : > { %287 = vst.msk [vmem:[#allocation2 + $0x100] sm:$0x3] %vm256_vm2, %v10713_v25  ;;  %290 = vst.msk [vmem:[#allocation2 + $0x118] sm:$0x3] %vm256_vm2, %v10713_v25 }
 0x327   : > { %293 = vst.msk [vmem:[#allocation2 + $0x130] sm:$0x3] %vm256_vm2, %v10713_v25  ;;  %296 = vst.msk [vmem:[#allocation2 + $0x148] sm:$0x3] %vm256_vm2, %v10713_v25  ;;  %v6425_v8 = vld [vmem:[#allocation2 + $0x19] sm:$0xff]  ;;  %v14910_v4 = vld [vmem:[#allocation2 + $0x30] sm:$0xff] }
 0x328   : > { %299 = vst.msk [vmem:[#allocation2 + $0x160] sm:$0x3] %vm256_vm2, %v10713_v25  ;;  %302 = vst.msk [vmem:[#allocation2 + $0x178] sm:$0x3] %vm256_vm2, %v10713_v25  ;;  %v6424_v43 = vld [vmem:[#allocation2 + $0x9] sm:$0xff]  ;;  %v14894_v36 = vld [vmem:[#allocation2 + $0x18] sm:$0xff] }
 0x329   : > { %305 = vst.msk [vmem:[#allocation2 + $0x190] sm:$0x3] %vm256_vm2, %v10713_v25  ;;  %308 = vst.msk [vmem:[#allocation2 + $0x1a8] sm:$0x3] %vm256_vm2, %v10713_v25  ;;  %v6456_v29 = vld [vmem:[#allocation2 + $0xa] sm:$0xff]  ;;  %v9793_v14 = vpack.i.bf16 %v6424_v43, %v6423_v42  ;;  %v5200_v48 = vpop.permute.xlu0 %5199  ;;  %v5927_v42 = vsel %vm5901_vm1, %v5894_v7, %v5120_v19 }
 0x32a   : > { %6362 = vst.msk [vmem:[#allocation2 + $0x39] sm:$0xff] %vm253_vm10, %v14697_v47  ;;  %6360 = vst.msk [vmem:[#allocation2 + $0x21] sm:$0xff] %vm253_vm10, %v14719_v10  ;;  %v9803_v58 = vpack.i.bf16 %v6456_v29, %v6455_v56  ;;  %v14920_v47 = vpop.permute.xlu1 %5041  ;;  %v6521_v32 = vld [vmem:[#allocation2 + $0x31] sm:$0xff]  ;;  %v5960_v37 = vsel %vm5934_vm3, %v5927_v42, %v5200_v48 }
 0x32b   : > { %9794 = vrot.lane.b32.xlu0 %v9793_v14, %s10699_s28 }
 0x32e   : > { %v5122_v33 = vpop.permute.xlu1 %5121 }
 0x32f   : > { %9804 = vrot.lane.b32.xlu0 %v9803_v58, %s10701_s30 }
 0x331   : > { %v6426_v52 = vld [vmem:[#allocation2 + $0x21] sm:$0xff]  ;;  %v14903_v26 = vld [vmem:[#allocation2 + $0x38] sm:$0xff] }
 0x332   : > { %v9798_v18 = vpack.i.bf16 %v6426_v52, %v6425_v8  ;;  %v6457_v57 = vld [vmem:[#allocation2 + $0x1a] sm:$0xff]  ;;  %v6458_v62 = vld [vmem:[#allocation2 + $0x22] sm:$0xff]  ;;  %v9818_v54 = vpack.i.bf16 %v14903_v26, %v14910_v4  ;;  %v6553_v60 = vld [vmem:[#allocation2 + $0x32] sm:$0xff]  ;;  %v5202_v17 = vpop.permute.xlu1 %5201  ;;  %v5280_v1 = vpop.permute.xlu0 %5279 }
 0x333   : > { %v14888_v55 = vld [vmem:[#allocation2 + $0x20] sm:$0xff]  ;;  %v9808_v35 = vpack.i.bf16 %v6458_v62, %v6457_v57  ;;  %v5993_v43 = vsel %vm5967_vm4, %v5960_v37, %v5280_v1 }
 0x334   : > { %9799 = vrot.lane.b32.xlu1 %v9798_v18, %s10699_s28  ;;  %v9813_v31 = vpack.i.bf16 %v14888_v55, %v14894_v36  ;;  %v6522_v9 = vld [vmem:[#allocation2 + $0x39] sm:$0xff] }
 0x335   : > { %v14925_v24 = vpack.i.bf16 %v6522_v9, %v6521_v32  ;;  %v6554_v59 = vld [vmem:[#allocation2 + $0x3a] sm:$0xff] }
 0x336   : > { %9814 = vrot.lane.b32.xlu0 %v9813_v31, %s10703_s8  ;;  %v9838_v39 = vpack.i.bf16 %v6554_v59, %v6553_v60  ;;  %v5282_v15 = vpop.permute.xlu1 %5281  ;;  %v5376_v61 = vpop.permute.xlu0 %5375 }
 0x337   : > { %v9686_v10 = vpop.f32.mrf.mxu0  ;;  %v6026_v29 = vsel %vm6000_vm6, %v5993_v43, %v5376_v61  ;;  %v10643_v61 = vld [vmem:[%s15931_s2 + $0x10] sm:$0xff]  }
 0x338   : > { %9809 = vrot.lane.b32.xlu1 %v9808_v35, %s10701_s30  ;;  %6365 = vst.msk [vmem:[#allocation2 + $0x61] sm:$0xff] %vm253_vm10, %v9686_v10 }
 0x339   : > { %v6247_v21 = vpop.f32.mrf.mxu0 }
 0x33a   : > { %9824 = vrot.lane.b32.xlu0 %v9798_v18, %s10705_s10  ;;  %v5378_v16 = vpop.permute.xlu1 %5377  ;;  %6363 = vst.msk [vmem:[#allocation2 + $0x49] sm:$0xff] %vm253_vm10, %v6247_v21 }
 0x33b   : > { %v9687_v12 = vpop.f32.mrf.mxu0 }
 0x33c   : > { %9819 = vrot.lane.b32.xlu1 %v9818_v54, %s10703_s8  ;;  %6366 = vst.msk [vmem:[#allocation2 + $0x69] sm:$0xff] %vm253_vm10, %v9687_v12  ;;  %v5456_v50 = vpop.permute.xlu0 %5455 }
 0x33d   : > { %v6250_v40 = vpop.f32.mrf.mxu0  ;;  %v6059_v45 = vsel %vm6033_vm7, %v6026_v29, %v5456_v50 }
 0x33e   : > { %9834 = vrot.lane.b32.xlu0 %v9808_v35, %s10707_s12  ;;  %v5458_v30 = vpop.permute.xlu1 %5457  ;;  %6364 = vst.msk [vmem:[#allocation2 + $0x51] sm:$0xff] %vm253_vm10, %v6250_v40  ;;  %v16357_v35 = vld [vmem:[#allocation11_spill] sm:$0xff]  ;;  %v10644_v40 = vld [vmem:[%s15931_s2 + $0x8] sm:$0xff]  }
 0x33f   : > { %v5830_v2 = vsel %vm5802_vm14, %v16357_v35, %v16356_v41  ;;  %v6525_v1 = vld [vmem:[#allocation2 + $0x61] sm:$0xff] }
 0x340   : > { %9829 = vrot.lane.b32.xlu1 %v14925_v24, %s10705_s10  ;;  %v5536_v51 = vpop.permute.xlu0 %5535  ;;  %v5863_v31 = vsel %vm5835_vm15, %v5830_v2, %v14898_v5  ;;  %v10641_v5 = vld [vmem:[%s15931_s2 + $0x20] ss:$0 sps:$4 sm:$0xff]  }
 0x341   : > { %v14951_v56 = vld [vmem:[#allocation2 + $0x48] sm:$0xff]  ;;  %v6092_v18 = vsel %vm6066_vm9, %v6059_v45, %v5536_v51  ;;  %v5896_v44 = vsel %vm5868_vm0, %v5863_v31, %v14920_v47  ;;  %9762 = vmatprep.subr.msk.bf16.mxu1 %vm8068_vm5, %v10641_v5  ;;  %v8070_v47 = vsel %vm8068_vm5, %v10641_v5, 0  ;;  %v16359_v45 = vld [vmem:[#allocation58_spill] sm:$0xff] }
 0x342   : > { %9844 = vrot.lane.b32.xlu0 %v9818_v54, %s10709_s14  ;;  %v14946_v23 = vpop.permute.xlu1 %4947  ;;  %v6618_v11 = vld [vmem:[#allocation2 + $0x49] sm:$0xff]  ;;  %v5929_v6 = vsel %vm5901_vm1, %v5896_v44, %v5122_v33  ;;  %9713 = vmatpush3.bf16.msra.mxu1 %v8070_v47 }
 0x343   : > { %v5962_v63 = vsel %vm5934_vm3, %v5929_v6, %v5202_v17  ;;  %v14993_v59 = vld [vmem:[#allocation2 + $0x68] sm:$0xff]  ;;  %v10642_v17 = vld [vmem:[%s15931_s2 + $0x18] sm:$0xff]  }
 0x344   : > { %9839 = vrot.lane.b32.xlu1 %v9838_v39, %s10707_s12  ;;  %v5995_v9 = vsel %vm5967_vm4, %v5962_v63, %v5282_v15  ;;  %v6526_v15 = vld [vmem:[#allocation2 + $0x69] sm:$0xff]  ;;  %9714 = vmatprep.subr.bf16.mxu1 %v10642_v17 }
 0x345   : > { %v14954_v28 = vld [vmem:[#allocation2 + $0x50] sm:$0xff]  ;;  %v6028_v38 = vsel %vm6000_vm6, %v5995_v9, %v5378_v16  ;;  %v15006_v16 = vpack.i.bf16 %v6526_v15, %v6525_v1  ;;  %v6557_v21 = vld [vmem:[#allocation2 + $0x62] sm:$0xff] }
 0x346   : > { %9854 = vrot.lane.b32.xlu0 %v14925_v24, %s10711_s16  ;;  %v6650_v49 = vld [vmem:[#allocation2 + $0x4a] sm:$0xff]  ;;  %v6651_v14 = vld [vmem:[#allocation2 + $0x52] sm:$0xff]  ;;  %v9848_v8 = vpack.i.bf16 %v14954_v28, %v14951_v56  ;;  %v5538_v34 = vpop.permute.xlu0 %5537  ;;  %v6061_v13 = vsel %vm6033_vm7, %v6028_v38, %v5458_v30  ;;  %9715 = vmatpush3.bf16.msra.mxu1 %v10642_v17 }
 0x347   : > { %v9873_v52 = vpack.i.bf16 %v6651_v14, %v6650_v49  ;;  %v5616_v58 = vpop.permute.xlu1 %5615  ;;  %v6619_v57 = vld [vmem:[#allocation2 + $0x51] sm:$0xff]  ;;  %v6094_v32 = vsel %vm6066_vm9, %v6061_v13, %v5538_v34  ;;  %9716 = vmatprep.subr.bf16.mxu1 %v10643_v61  ;;  %v16358_v14 = vld [vmem:[#allocation57_spill] sm:$0xff] }
 0x348   : > { %v6125_v62 = vsel %vm6099_vm11, %v6092_v18, %v5616_v58  ;;  %9849 = vrot.lane.b32.xlu1 %v9848_v8, %s10709_s14  ;;  %v9858_v46 = vpack.i.bf16 %v6619_v57, %v6618_v11  ;;  %v6558_v12 = vld [vmem:[#allocation2 + $0x6a] sm:$0xff]  ;;  %v16360_v18 = vld [vmem:[#allocation20_spill] sm:$0xff]  ;;  %v16361_v58 = vld [vmem:[#allocation51_spill] sm:$0xff] }
 0x349   : > { %9704 = vmatprep.mubr.msk.bf16.mxu1 %vm6164_vm13, %v6125_v62  ;;  %v9918_v50 = vpack.i.bf16 %v6558_v12, %v6557_v21  ;;  %v5832_v57 = vsel %vm5802_vm14, %v16361_v58, %v16360_v18 }
 0x34a   : > { %9864 = vrot.lane.b32.xlu0 %v9838_v39, %s10714_s26  ;;  %9717 = vmatpush3.bf16.msra.mxu1 %v10643_v61  ;;  %v5865_v34 = vsel %vm5835_vm15, %v5832_v57, %v14946_v23 }
 0x34b   : > { %v14971_v22 = vpop.permute.xlu1 %5043  ;;  %9718 = vmatprep.subr.bf16.mxu1 %v10644_v40 }
 0x34c   : > { %9859 = vrot.lane.b32.xlu1 %v9858_v46, %s10711_s16 }
 0x34e   : > { %9874 = vrot.lane.b32.xlu0 %v9873_v52, %s10714_s26  ;;  %v14976_v54 = vpop.permute.xlu0 %4949  ;;  %9719 = vmatpush3.bf16.msra.mxu1 %v10644_v40 }
 0x34f   : > { %v5046_v0 = vpop.permute.xlu1 %5045  ;;  %9720 = vmatprep.subr.bf16.mxu1 %v10645_v53 }
 0x350   : > { %9869 = vrot.lane.b32.xlu1 %v14925_v24, %s10699_s28 }
 0x352   : > { %9884 = vrot.lane.b32.xlu0 %v9838_v39, %s10701_s30  ;;  %v14997_v39 = vld [vmem:[#allocation2 + $0x60] sm:$0xff]  ;;  %9721 = vmatpush3.bf16.msra.mxu1 %v10645_v53 }
 0x353   : > { %v9898_v19 = vpack.i.bf16 %v14993_v59, %v14997_v39 }
 0x354   : > { %v5618_v24 = vpop.permute.xlu0 %5617  ;;  %9879 = vrot.lane.b32.xlu1 %v9858_v46, %s10699_s28 }
 0x355   : > { %v6127_v60 = vsel %vm6099_vm11, %v6094_v32, %v5618_v24 }
 0x356   : > { %9894 = vrot.lane.b32.xlu0 %v9848_v8, %s10703_s8  ;;  %9705 = vmatmul.mubr.msk.bf16.gmra.mxu1 %vm6164_vm13, %v6127_v60  ;;  %v5834_v8 = vsel %vm5802_vm14, %v16359_v45, %v16358_v14 }
 0x357   : > { %v5867_v62 = vsel %vm5835_vm15, %v5834_v8, %v14976_v54  ;;  %vm311_vm15 = vcmask 123904  }
 0x358   : > { %9889 = vrot.lane.b32.xlu1 %v9873_v52, %s10701_s30  ;;  %v5126_v33 = vpop.permute.xlu1 %5125  ;;  %v5900_v11 = vsel %vm5868_vm0, %v5867_v62, %v5046_v0  ;;  %312 = vst.msk [vmem:[#allocation3 + $0x8] sm:$0x3] %vm311_vm15, %v10713_v25  ;;  %314 = vst.msk [vmem:[#allocation3 + $0x18] sm:$0x3] %vm311_vm15, %v10713_v25 }
 0x359   : > { %v5933_v41 = vsel %vm5901_vm1, %v5900_v11, %v5126_v33  ;;  %316 = vst.msk [vmem:[#allocation3 + $0x28] sm:$0x3] %vm311_vm15, %v10713_v25  ;;  %318 = vst.msk [vmem:[#allocation3 + $0x38] sm:$0x3] %vm311_vm15, %v10713_v25 }
 0x35a   : > { %9904 = vrot.lane.b32.xlu0 %v9858_v46, %s10705_s10  ;;  %v5124_v48 = vpop.permute.xlu0 %5123  ;;  %v5898_v46 = vsel %vm5868_vm0, %v5865_v34, %v14971_v22  ;;  %320 = vst.msk [vmem:[#allocation3 + $0x48] sm:$0x3] %vm311_vm15, %v10713_v25  ;;  %322 = vst.msk [vmem:[#allocation3 + $0x58] sm:$0x3] %vm311_vm15, %v10713_v25 }
 0x35b   : > { %v5931_v31 = vsel %vm5901_vm1, %v5898_v46, %v5124_v48  ;;  %324 = vst.msk [vmem:[#allocation3 + $0x68] sm:$0x3] %vm311_vm15, %v10713_v25  ;;  %326 = vst.msk [vmem:[#allocation3 + $0x78] sm:$0x3] %vm311_vm15, %v10713_v25  ;;  %vm8724_vm1 = vcmask 916480  }
 0x35c   : > { %9899 = vrot.lane.b32.xlu1 %v9898_v19, %s10703_s8  ;;  %v5206_v10 = vpop.permute.xlu1 %5205  ;;  %328 = vst.msk [vmem:[#allocation3 + $0x88] sm:$0x3] %vm311_vm15, %v10713_v25  ;;  %330 = vst.msk [vmem:[#allocation3 + $0x98] sm:$0x3] %vm311_vm15, %v10713_v25 }
 0x35d   : > { %v5966_v44 = vsel %vm5934_vm3, %v5933_v41, %v5206_v10 }
 0x35e   : > { %9914 = vrot.lane.b32.xlu0 %v9873_v52, %s10707_s12  ;;  %v5204_v30 = vpop.permute.xlu0 %5203 }
 0x35f   : > { %v5964_v23 = vsel %vm5934_vm3, %v5931_v31, %v5204_v30 }
 0x360   : > { %9909 = vrot.lane.b32.xlu1 %v15006_v16, %s10705_s10 }
 0x362   : > { %9924 = vrot.lane.b32.xlu0 %v9898_v19, %s10709_s14 }
 0x363   : > { %v5286_v20 = vpop.permute.xlu1 %5285 }
 0x364   : > { %9919 = vrot.lane.b32.xlu1 %v9918_v50, %s10707_s12  ;;  %v5999_v5 = vsel %vm5967_vm4, %v5966_v44, %v5286_v20 }
 0x366   : > { %9934 = vrot.lane.b32.xlu0 %v15006_v16, %s10711_s16 }
 0x367   : > { %v5284_v27 = vpop.permute.xlu0 %5283  ;;  %v5382_v3 = vpop.permute.xlu1 %5381 }
 0x368   : > { %v5997_v38 = vsel %vm5967_vm4, %v5964_v23, %v5284_v27  ;;  %v6032_v47 = vsel %vm6000_vm6, %v5999_v5, %v5382_v3 }
 0x36a   : > { %9944 = vrot.lane.b32.xlu0 %v9918_v50, %s10714_s26 }
 0x36b   : > { %v5380_v42 = vpop.permute.xlu0 %5379 }
 0x36c   : > { %v9690_v7 = vpop.f32.mrf.mxu0  ;;  %v6030_v32 = vsel %vm6000_vm6, %v5997_v38, %v5380_v42 }
 0x36d   : > { %6369 = vst.msk [vmem:[#allocation2 + $0x91] sm:$0xff] %vm253_vm10, %v9690_v7 }
 0x36e   : > { %v6263_v37 = vpop.f32.mrf.mxu0 }
 0x36f   : > { %6367 = vst.msk [vmem:[#allocation2 + $0x79] sm:$0xff] %vm253_vm10, %v6263_v37 }
 0x370   : > { %v9691_v51 = vpop.f32.mrf.mxu0 }
 0x371   : > { %v5462_v43 = vpop.permute.xlu1 %5461  ;;  %6370 = vst.msk [vmem:[#allocation2 + $0x99] sm:$0xff] %vm253_vm10, %v9691_v51 }
 0x372   : > { %v6266_v29 = vpop.f32.mrf.mxu0  ;;  %v5460_v49 = vpop.permute.xlu0 %5459  ;;  %v6065_v24 = vsel %vm6033_vm7, %v6032_v47, %v5462_v43 }
 0x373   : > { %6368 = vst.msk [vmem:[#allocation2 + $0x81] sm:$0xff] %vm253_vm10, %v6266_v29  ;;  %v6063_v60 = vsel %vm6033_vm7, %v6030_v32, %v5460_v49  ;;  %v6391_v29 = vld [vmem:[#allocation2] sm:$0xff]  ;;  %v6392_v49 = vld [vmem:[#allocation2 + $0x8] sm:$0xff] }
 0x374   : > { %v6497_v30 = vld [vmem:[#allocation2 + $0x90] sm:$0xff] }
 0x375   : > { %v5542_v52 = vpop.permute.xlu1 %5541 }
 0x376   : > { %v5540_v35 = vpop.permute.xlu0 %5539  ;;  %v15041_v2 = vld [vmem:[#allocation2 + $0x78] sm:$0xff]  ;;  %v6098_v33 = vsel %vm6066_vm9, %v6065_v24, %v5542_v52 }
 0x377   : > { %v6622_v19 = vld [vmem:[#allocation2 + $0x79] sm:$0xff]  ;;  %v6096_v17 = vsel %vm6066_vm9, %v6063_v60, %v5540_v35 }
 0x378   : > { %v6498_v12 = vld [vmem:[#allocation2 + $0x98] sm:$0xff] }
 0x379   : > { %v9978_v40 = vpack.i.bf16 %v6498_v12, %v6497_v30  ;;  %v6561_v3 = vld [vmem:[#allocation2 + $0x92] sm:$0xff]  ;;  %v6562_v7 = vld [vmem:[#allocation2 + $0x9a] sm:$0xff] }
 0x37a   : > { %v15045_v6 = vld [vmem:[#allocation2 + $0x80] sm:$0xff]  ;;  %v15081_v42 = vpack.i.bf16 %v6562_v7, %v6561_v3 }
 0x37b   : > { %v6654_v54 = vld [vmem:[#allocation2 + $0x7a] sm:$0xff]  ;;  %v6655_v63 = vld [vmem:[#allocation2 + $0x82] sm:$0xff]  ;;  %v9928_v22 = vpack.i.bf16 %v15045_v6, %v15041_v2  ;;  %v5622_v13 = vpop.permute.xlu1 %5621 }
 0x37c   : > { %v9953_v9 = vpack.i.bf16 %v6655_v63, %v6654_v54  ;;  %v6623_v0 = vld [vmem:[#allocation2 + $0x81] sm:$0xff]  ;;  %v6131_v48 = vsel %vm6099_vm11, %v6098_v33, %v5622_v13 }
 0x37d   : > { %9929 = vrot.lane.b32.xlu1 %v9928_v22, %s10709_s14  ;;  %v9938_v1 = vpack.i.bf16 %v6623_v0, %v6622_v19 }
 0x37e   : > { %9954 = vrot.lane.b32.xlu0 %v9953_v9, %s10714_s26 }
 0x37f   : > { %v5620_v15 = vpop.permute.xlu0 %5619 }
 0x380   : > { %v6129_v61 = vsel %vm6099_vm11, %v6096_v17, %v5620_v15 }
 0x381   : > { %9708 = vmatprep.mubr.msk.bf16.mxu1 %vm6164_vm13, %v6129_v61  ;;  %9939 = vrot.lane.b32.xlu1 %v9938_v1, %s10711_s16 }
 0x382   : > { %9709 = vmatmul.mubr.msk.bf16.gmra.mxu1 %vm6164_vm13, %v6131_v48  ;;  %9964 = vrot.lane.b32.xlu0 %v9918_v50, %s10701_s30  ;;  %v6530_v50 = vld [vmem:[#allocation2 + $0x99] sm:$0xff] }
 0x385   : > { %9949 = vrot.lane.b32.xlu1 %v15006_v16, %s10699_s28  ;;  %v6529_v16 = vld [vmem:[#allocation2 + $0x91] sm:$0xff] }
 0x386   : > { %9974 = vrot.lane.b32.xlu0 %v9928_v22, %s10703_s8  ;;  %v15075_v53 = vpack.i.bf16 %v6530_v50, %v6529_v16 }
 0x389   : > { %9959 = vrot.lane.b32.xlu1 %v9938_v1, %s10699_s28 }
 0x38a   : > { %9984 = vrot.lane.b32.xlu0 %v9938_v1, %s10705_s10 }
 0x38d   : > { %9969 = vrot.lane.b32.xlu1 %v9953_v9, %s10701_s30 }
 0x38e   : > { %9994 = vrot.lane.b32.xlu0 %v9953_v9, %s10707_s12 }
 0x391   : > { %9979 = vrot.lane.b32.xlu1 %v9978_v40, %s10703_s8 }
 0x392   : > { %10004 = vrot.lane.b32.xlu0 %v9978_v40, %s10709_s14 }
 0x395   : > { %9989 = vrot.lane.b32.xlu1 %v15075_v53, %s10705_s10 }
 0x396   : > { %10014 = vrot.lane.b32.xlu0 %v15075_v53, %s10711_s16 }
 0x399   : > { %9999 = vrot.lane.b32.xlu1 %v15081_v42, %s10707_s12 }
 0x39a   : > { %10024 = vrot.lane.b32.xlu0 %v15081_v42, %s10714_s26 }
 0x39d   : > { %v9795_v10 = vpop.permute.xlu0 %9794 }
 0x39e   : > { %v9797_v37 = vunpack.i.h.bf16 %v9795_v10  ;;  %v9796_v51 = vunpack.i.l.bf16 %v9795_v10 }
 0x3a0   : > { %v7705_v8 = vsel %vm253_vm10, %v6392_v49, %v9797_v37  ;;  %v7704_v52 = vsel %vm253_vm10, %v6391_v29, %v9796_v51 }
 0x3a1   : > { %v9805_v21 = vpop.permute.xlu0 %9804  ;;  %v9694_v38 = vpop.f32.mrf.mxu0 }
 0x3a2   : > { %v9807_v14 = vunpack.i.h.bf16 %v9805_v21  ;;  %v9806_v45 = vunpack.i.l.bf16 %v9805_v21  ;;  %6373 = vst.msk [vmem:[#allocation2 + $0xc1] sm:$0xff] %vm253_vm10, %v9694_v38 }
 0x3a3   : > { %v6279_v60 = vpop.f32.mrf.mxu0 }
 0x3a4   : > { %v7736_v62 = vsel %vm309_vm12, %v7704_v52, %v9806_v45  ;;  %v7737_v34 = vsel %vm309_vm12, %v7705_v8, %v9807_v14  ;;  %6371 = vst.msk [vmem:[#allocation2 + $0xa9] sm:$0xff] %vm253_vm10, %v6279_v60 }
 0x3a5   : > { %v9695_v10 = vpop.f32.mrf.mxu0 }
 0x3a6   : > { %v15091_v11 = vpop.permute.xlu1 %9799  ;;  %6374 = vst.msk [vmem:[#allocation2 + $0xc9] sm:$0xff] %vm253_vm10, %v9695_v10 }
 0x3a7   : > { %v6282_v40 = vpop.f32.mrf.mxu0  ;;  %v9802_v45 = vunpack.i.h.bf16 %v15091_v11  ;;  %v9801_v8 = vunpack.i.l.bf16 %v15091_v11 }
 0x3a8   : > { %v9815_v20 = vpop.permute.xlu0 %9814  ;;  %6372 = vst.msk [vmem:[#allocation2 + $0xb1] sm:$0xff] %vm253_vm10, %v6282_v40 }
 0x3a9   : > { %v9817_v58 = vunpack.i.h.bf16 %v9815_v20  ;;  %v9816_v57 = vunpack.i.l.bf16 %v9815_v20 }
 0x3aa   : > { %v9810_v33 = vpop.permute.xlu1 %9809 }
 0x3ab   : > { %v7768_v23 = vsel %vm5802_vm14, %v7736_v62, %v9816_v57  ;;  %v7769_v5 = vsel %vm5802_vm14, %v7737_v34, %v9817_v58  ;;  %v6594_v50 = vld [vmem:[#allocation2 + $0xa8] sm:$0xff]  ;;  %v9812_v52 = vunpack.i.h.bf16 %v9810_v33 }
 0x3ac   : > { %v9825_v27 = vpop.permute.xlu0 %9824  ;;  %v6626_v29 = vld [vmem:[#allocation2 + $0xa9] sm:$0xff] }
 0x3ad   : > { %v9827_v46 = vunpack.i.h.bf16 %v9825_v27  ;;  %v9826_v41 = vunpack.i.l.bf16 %v9825_v27  ;;  %v6534_v40 = vld [vmem:[#allocation2 + $0xc9] sm:$0xff] }
 0x3ae   : > { %v9820_v20 = vpop.permute.xlu1 %9819 }
 0x3af   : > { %v7800_v47 = vsel %vm5868_vm0, %v7768_v23, %v9826_v41  ;;  %v7801_v13 = vsel %vm5868_vm0, %v7769_v5, %v9827_v46  ;;  %v6595_v16 = vld [vmem:[#allocation2 + $0xb0] sm:$0xff]  ;;  %v9822_v58 = vunpack.i.h.bf16 %v9820_v20  ;;  %v9821_v57 = vunpack.i.l.bf16 %v9820_v20 }
 0x3b0   : > { %v9835_v43 = vpop.permute.xlu0 %9834  ;;  %v6658_v27 = vld [vmem:[#allocation2 + $0xaa] sm:$0xff]  ;;  %v6659_v3 = vld [vmem:[#allocation2 + $0xb2] sm:$0xff]  ;;  %v10008_v37 = vpack.i.bf16 %v6595_v16, %v6594_v50  ;;  %v6533_v50 = vld [vmem:[#allocation2 + $0xc1] sm:$0xff] }
 0x3b1   : > { %v9837_v35 = vunpack.i.h.bf16 %v9835_v43  ;;  %v9836_v31 = vunpack.i.l.bf16 %v9835_v43  ;;  %v10033_v51 = vpack.i.bf16 %v6659_v3, %v6658_v27  ;;  %v6627_v43 = vld [vmem:[#allocation2 + $0xb1] sm:$0xff] }
 0x3b2   : > { %v9830_v7 = vpop.permute.xlu1 %9829  ;;  %10009 = vrot.lane.b32.xlu1 %v10008_v37, %s10709_s14  ;;  %v10018_v49 = vpack.i.bf16 %v6627_v43, %v6626_v29 }
 0x3b3   : > { %v7832_v0 = vsel %vm5934_vm3, %v7800_v47, %v9836_v31  ;;  %v7833_v32 = vsel %vm5934_vm3, %v7801_v13, %v9837_v35  ;;  %10034 = vrot.lane.b32.xlu0 %v10033_v51, %s10714_s26  ;;  %v9832_v62 = vunpack.i.h.bf16 %v9830_v7  ;;  %v9831_v34 = vunpack.i.l.bf16 %v9830_v7 }
 0x3b4   : > { %v9845_v18 = vpop.permute.xlu0 %9844  ;;  %v7706_v35 = vsel %vm253_vm10, %v14894_v36, %v9801_v8  ;;  %v7707_v31 = vsel %vm253_vm10, %v14888_v55, %v9802_v45  ;;  %v15145_v7 = vpack.i.bf16 %v6534_v40, %v6533_v50 }
 0x3b5   : > { %v9847_v54 = vunpack.i.h.bf16 %v9845_v18  ;;  %v9846_v63 = vunpack.i.l.bf16 %v9845_v18  ;;  %v9811_v18 = vunpack.i.l.bf16 %v9810_v33 }
 0x3b6   : > { %v9840_v14 = vpop.permute.xlu1 %9839  ;;  %10019 = vrot.lane.b32.xlu1 %v10018_v49, %s10711_s16 }
 0x3b7   : > { %v7864_v19 = vsel %vm6000_vm6, %v7832_v0, %v9846_v63  ;;  %v7865_v17 = vsel %vm6000_vm6, %v7833_v32, %v9847_v54  ;;  %10044 = vrot.lane.b32.xlu0 %v15081_v42, %s10701_s30  ;;  %v9842_v42 = vunpack.i.h.bf16 %v9840_v14  ;;  %v9841_v11 = vunpack.i.l.bf16 %v9840_v14 }
 0x3b8   : > { %v9855_v44 = vpop.permute.xlu0 %9854  ;;  %v7739_v54 = vsel %vm309_vm12, %v7707_v31, %v9812_v52 }
 0x3b9   : > { %v9857_v22 = vunpack.i.h.bf16 %v9855_v44  ;;  %v9856_v9 = vunpack.i.l.bf16 %v9855_v44  ;;  %v7738_v44 = vsel %vm309_vm12, %v7706_v35, %v9811_v18  ;;  %v7771_v36 = vsel %vm5802_vm14, %v7739_v54, %v9822_v58 }
 0x3ba   : > { %v9850_v46 = vpop.permute.xlu1 %9849  ;;  %10029 = vrot.lane.b32.xlu1 %v15075_v53, %s10699_s28  ;;  %v7770_v5 = vsel %vm5802_vm14, %v7738_v44, %v9821_v57  ;;  %v7803_v55 = vsel %vm5868_vm0, %v7771_v36, %v9832_v62 }
 0x3bb   : > { %v7896_v1 = vsel %vm6066_vm9, %v7864_v19, %v9856_v9  ;;  %v7897_v61 = vsel %vm6066_vm9, %v7865_v17, %v9857_v22  ;;  %10054 = vrot.lane.b32.xlu0 %v10008_v37, %s10703_s8  ;;  %v9852_v63 = vunpack.i.h.bf16 %v9850_v46  ;;  %v9851_v23 = vunpack.i.l.bf16 %v9850_v46  ;;  %v6565_v37 = vld [vmem:[#allocation2 + $0xc2] sm:$0xff] }
 0x3bc   : > { %v9865_v24 = vpop.permute.xlu0 %9864  ;;  %v7802_v22 = vsel %vm5868_vm0, %v7770_v5, %v9831_v34  ;;  %v7835_v47 = vsel %vm5934_vm3, %v7803_v55, %v9842_v42 }
 0x3bd   : > { %v9867_v48 = vunpack.i.h.bf16 %v9865_v24  ;;  %v9866_v15 = vunpack.i.l.bf16 %v9865_v24  ;;  %v7834_v38 = vsel %vm5934_vm3, %v7802_v22, %v9841_v11  ;;  %v7867_v32 = vsel %vm6000_vm6, %v7835_v47, %v9852_v63 }
 0x3be   : > { %v9860_v9 = vpop.permute.xlu1 %9859  ;;  %10039 = vrot.lane.b32.xlu1 %v10018_v49, %s10699_s28  ;;  %v7866_v24 = vsel %vm6000_vm6, %v7834_v38, %v9851_v23 }
 0x3bf   : > { %v7928_v21 = vsel %vm6164_vm13, %v7896_v1, %v9866_v15  ;;  %v7929_v12 = vsel %vm6164_vm13, %v7897_v61, %v9867_v48  ;;  %10064 = vrot.lane.b32.xlu0 %v10018_v49, %s10705_s10  ;;  %v9862_v13 = vunpack.i.h.bf16 %v9860_v9  ;;  %v9861_v0 = vunpack.i.l.bf16 %v9860_v9  ;;  %v6502_v48 = vld [vmem:[#allocation2 + $0xc8] sm:$0xff] }
 0x3c0   : > { %v7960_v30 = vpack.c.bf16 %v7929_v12, %v7928_v21  ;;  %v9875_v41 = vpop.permute.xlu0 %9874  ;;  %v6501_v21 = vld [vmem:[#allocation2 + $0xc0] sm:$0xff] }
 0x3c1   : > { %v9877_v60 = vunpack.i.h.bf16 %v9875_v41  ;;  %v9876_v33 = vunpack.i.l.bf16 %v9875_v41  ;;  %v7898_v19 = vsel %vm6066_vm9, %v7866_v24, %v9861_v0  ;;  %v7899_v17 = vsel %vm6066_vm9, %v7867_v32, %v9862_v13 }
 0x3c2   : > { %9722 = vmatprep.mubr.msk.bf16.mxu1 %vm8019_vm8, %v7960_v30  ;;  %10049 = vrot.lane.b32.xlu1 %v10033_v51, %s10701_s30  ;;  %v10058_v12 = vpack.i.bf16 %v6502_v48, %v6501_v21  ;;  %v9870_v30 = vpop.permute.xlu1 %9869 }
 0x3c3   : > { %v7930_v15 = vsel %vm6164_vm13, %v7898_v19, %v9876_v33  ;;  %v7931_v1 = vsel %vm6164_vm13, %v7899_v17, %v9877_v60  ;;  %10074 = vrot.lane.b32.xlu0 %v10033_v51, %s10707_s12  ;;  %v9872_v16 = vunpack.i.h.bf16 %v9870_v30  ;;  %v9871_v27 = vunpack.i.l.bf16 %v9870_v30  ;;  %v6566_v51 = vld [vmem:[#allocation2 + $0xca] sm:$0xff] }
 0x3c4   : > { %v9885_v53 = vpop.permute.xlu0 %9884  ;;  %v7961_v10 = vpack.c.bf16 %v7931_v1, %v7930_v15  ;;  %v10078_v8 = vpack.i.bf16 %v6566_v51, %v6565_v37 }
 0x3c5   : > { %v7709_v49 = vsel %vm253_vm10, %v14903_v26, %v9872_v16  ;;  %v7708_v14 = vsel %vm253_vm10, %v14910_v4, %v9871_v27  ;;  %v9887_v52 = vunpack.i.h.bf16 %v9885_v53  ;;  %v9886_v18 = vunpack.i.l.bf16 %v9885_v53 }
 0x3c6   : > { %9723 = vmatmul.mubr.msk.bf16.vlgmr.msra.gmra.mxu1 %vm8019_vm8, %v7961_v10  ;;  %10059 = vrot.lane.b32.xlu1 %v10058_v12, %s10703_s8  ;;  %v15165_v54 = vpop.permute.xlu1 %9879 }
 0x3c7   : > { %10084 = vrot.lane.b32.xlu0 %v10058_v12, %s10709_s14  ;;  %v7740_v62 = vsel %vm309_vm12, %v7708_v14, %v9886_v18  ;;  %v7741_v34 = vsel %vm309_vm12, %v7709_v49, %v9887_v52  ;;  %v9882_v14 = vunpack.i.h.bf16 %v15165_v54 }
 0x3c8   : > { %v9895_v61 = vpop.permute.xlu0 %9894  ;;  %v9698_v3 = vpop.f32.mrf.mxu0 }
 0x3c9   : > { %6377 = vst.msk [vmem:[#allocation2 + $0xf1] sm:$0xff] %vm253_vm10, %v9698_v3  ;;  %v9897_v26 = vunpack.i.h.bf16 %v9895_v61  ;;  %v9896_v4 = vunpack.i.l.bf16 %v9895_v61 }
 0x3ca   : > { %v6295_v29 = vpop.f32.mrf.mxu0  ;;  %10069 = vrot.lane.b32.xlu1 %v15145_v7, %s10705_s10  ;;  %v9890_v61 = vpop.permute.xlu1 %9889 }
 0x3cb   : > { %10094 = vrot.lane.b32.xlu0 %v15145_v7, %s10711_s16  ;;  %6375 = vst.msk [vmem:[#allocation2 + $0xd9] sm:$0xff] %vm253_vm10, %v6295_v29  ;;  %v7772_v35 = vsel %vm5802_vm14, %v7740_v62, %v9896_v4  ;;  %v7773_v31 = vsel %vm5802_vm14, %v7741_v34, %v9897_v26  ;;  %v9892_v52 = vunpack.i.h.bf16 %v9890_v61 }
 0x3cc   : > { %v9905_v20 = vpop.permute.xlu0 %9904  ;;  %v9699_v45 = vpop.f32.mrf.mxu0 }
 0x3cd   : > { %6378 = vst.msk [vmem:[#allocation2 + $0xf9] sm:$0xff] %vm253_vm10, %v9699_v45  ;;  %v9907_v46 = vunpack.i.h.bf16 %v9905_v20  ;;  %v9906_v41 = vunpack.i.l.bf16 %v9905_v20 }
 0x3ce   : > { %v6298_v57 = vpop.f32.mrf.mxu0  ;;  %10079 = vrot.lane.b32.xlu1 %v10078_v8, %s10707_s12  ;;  %v9900_v50 = vpop.permute.xlu1 %9899 }
 0x3cf   : > { %10104 = vrot.lane.b32.xlu0 %v10078_v8, %s10714_s26  ;;  %6376 = vst.msk [vmem:[#allocation2 + $0xe1] sm:$0xff] %vm253_vm10, %v6298_v57  ;;  %v7804_v36 = vsel %vm5868_vm0, %v7772_v35, %v9906_v41  ;;  %v7805_v22 = vsel %vm5868_vm0, %v7773_v31, %v9907_v46  ;;  %v9902_v57 = vunpack.i.h.bf16 %v9900_v50  ;;  %v7711_v31 = vsel %vm253_vm10, %v14954_v28, %v9882_v14 }
 0x3d0   : > { %v9915_v43 = vpop.permute.xlu0 %9914  ;;  %v6505_v29 = vld [vmem:[#allocation2 + $0xf0] sm:$0xff] }
 0x3d1   : > { %v9917_v42 = vunpack.i.h.bf16 %v9915_v43  ;;  %v9916_v11 = vunpack.i.l.bf16 %v9915_v43  ;;  %v6537_v26 = vld [vmem:[#allocation2 + $0xf1] sm:$0xff] }
 0x3d2   : > { %v6598_v9 = vld [vmem:[#allocation2 + $0xd8] sm:$0xff]  ;;  %v9910_v37 = vpop.permute.xlu1 %9909 }
 0x3d3   : > { %v7836_v53 = vsel %vm5934_vm3, %v7804_v36, %v9916_v11  ;;  %v7837_v38 = vsel %vm5934_vm3, %v7805_v22, %v9917_v42  ;;  %v6630_v30 = vld [vmem:[#allocation2 + $0xd9] sm:$0xff]  ;;  %v9911_v62 = vunpack.i.l.bf16 %v9910_v37  ;;  %v9912_v4 = vunpack.i.h.bf16 %v9910_v37 }
 0x3d4   : > { %v9925_v58 = vpop.permute.xlu0 %9924  ;;  %v6506_v43 = vld [vmem:[#allocation2 + $0xf8] sm:$0xff] }
 0x3d5   : > { %v9927_v63 = vunpack.i.h.bf16 %v9925_v58  ;;  %v9926_v23 = vunpack.i.l.bf16 %v9925_v58  ;;  %v10138_v45 = vpack.i.bf16 %v6506_v43, %v6505_v29  ;;  %v6538_v18 = vld [vmem:[#allocation2 + $0xf9] sm:$0xff]  ;;  %v9901_v58 = vunpack.i.l.bf16 %v9900_v50 }
 0x3d6   : > { %v6599_v13 = vld [vmem:[#allocation2 + $0xe0] sm:$0xff]  ;;  %v9920_v49 = vpop.permute.xlu1 %9919  ;;  %v10148_v11 = vpack.i.bf16 %v6538_v18, %v6537_v26 }
 0x3d7   : > { %v6662_v0 = vld [vmem:[#allocation2 + $0xda] sm:$0xff]  ;;  %v6663_v32 = vld [vmem:[#allocation2 + $0xe2] sm:$0xff]  ;;  %v7868_v24 = vsel %vm6000_vm6, %v7836_v53, %v9926_v23  ;;  %v7869_v60 = vsel %vm6000_vm6, %v7837_v38, %v9927_v63  ;;  %v10088_v19 = vpack.i.bf16 %v6599_v13, %v6598_v9  ;;  %v9921_v46 = vunpack.i.l.bf16 %v9920_v49 }
 0x3d8   : > { %v9935_v44 = vpop.permute.xlu0 %9934  ;;  %v10113_v17 = vpack.i.bf16 %v6663_v32, %v6662_v0  ;;  %v6631_v1 = vld [vmem:[#allocation2 + $0xe1] sm:$0xff]  ;;  %v9922_v63 = vunpack.i.h.bf16 %v9920_v49  ;;  %v7743_v23 = vsel %vm309_vm12, %v7711_v31, %v9892_v52 }
 0x3d9   : > { %v9937_v5 = vunpack.i.h.bf16 %v9935_v44  ;;  %v9936_v55 = vunpack.i.l.bf16 %v9935_v44  ;;  %10089 = vrot.lane.b32.xlu1 %v10088_v19, %s10709_s14  ;;  %v10098_v20 = vpack.i.bf16 %v6631_v1, %v6630_v30  ;;  %v6569_v44 = vld [vmem:[#allocation2 + $0xf2] sm:$0xff] }
 0x3da   : > { %10114 = vrot.lane.b32.xlu0 %v10113_v17, %s10714_s26 }
 0x3db   : > { %v7901_v48 = vsel %vm6066_vm9, %v7869_v60, %v9937_v5  ;;  %v7900_v10 = vsel %vm6066_vm9, %v7868_v24, %v9936_v55  ;;  %v7775_v55 = vsel %vm5802_vm14, %v7743_v23, %v9902_v57 }
 0x3dc   : > { %v9945_v47 = vpop.permute.xlu0 %9944  ;;  %v7807_v53 = vsel %vm5868_vm0, %v7775_v55, %v9912_v4 }
 0x3dd   : > { %v9947_v33 = vunpack.i.h.bf16 %v9945_v47  ;;  %v9946_v15 = vunpack.i.l.bf16 %v9945_v47  ;;  %10099 = vrot.lane.b32.xlu1 %v10098_v20, %s10711_s16  ;;  %v7839_v24 = vsel %vm5934_vm3, %v7807_v53, %v9922_v63 }
 0x3de   : > { %10124 = vrot.lane.b32.xlu0 %v10078_v8, %s10701_s30  ;;  %v9891_v8 = vunpack.i.l.bf16 %v9890_v61 }
 0x3df   : > { %v7933_v21 = vsel %vm6164_vm13, %v7901_v48, %v9947_v33  ;;  %v7932_v12 = vsel %vm6164_vm13, %v7900_v10, %v9946_v15 }
 0x3e0   : > { %v7962_v40 = vpack.c.bf16 %v7933_v21, %v7932_v12 }
 0x3e1   : > { %10109 = vrot.lane.b32.xlu1 %v15145_v7, %s10699_s28  ;;  %v9881_v7 = vunpack.i.l.bf16 %v15165_v54  ;;  %v6570_v54 = vld [vmem:[#allocation2 + $0xfa] sm:$0xff] }
 0x3e2   : > { %9726 = vmatprep.mubr.msk.bf16.mxu1 %vm8019_vm8, %v7962_v40  ;;  %v9702_v16 = vpop.f32.mrf.mxu1  ;;  %10134 = vrot.lane.b32.xlu0 %v10088_v19, %s10703_s8  ;;  %v10158_v9 = vpack.i.bf16 %v6570_v54, %v6569_v44 }
 0x3e3   : > { %6381 = vst.msk [vmem:[#allocation2 + $0x121] sm:$0xff] %vm253_vm10, %v9702_v16  ;;  %v7710_v34 = vsel %vm253_vm10, %v14951_v56, %v9881_v7 }
 0x3e4   : > { %v6311_v27 = vpop.f32.mrf.mxu1  ;;  %v7742_v42 = vsel %vm309_vm12, %v7710_v34, %v9891_v8 }
 0x3e5   : > { %6379 = vst.msk [vmem:[#allocation2 + $0x109] sm:$0xff] %vm253_vm10, %v6311_v27  ;;  %10119 = vrot.lane.b32.xlu1 %v10098_v20, %s10699_s28  ;;  %v7774_v5 = vsel %vm5802_vm14, %v7742_v42, %v9901_v58 }
 0x3e6   : > { %v9703_v3 = vpop.f32.mrf.mxu1  ;;  %10144 = vrot.lane.b32.xlu0 %v10098_v20, %s10705_s10  ;;  %v7806_v28 = vsel %vm5868_vm0, %v7774_v5, %v9911_v62 }
 0x3e7   : > { %6382 = vst.msk [vmem:[#allocation2 + $0x129] sm:$0xff] %vm253_vm10, %v9703_v3  ;;  %v7838_v38 = vsel %vm5934_vm3, %v7806_v28, %v9921_v46 }
 0x3e8   : > { %v6314_v51 = vpop.f32.mrf.mxu1 }
 0x3e9   : > { %6380 = vst.msk [vmem:[#allocation2 + $0x111] sm:$0xff] %vm253_vm10, %v6314_v51  ;;  %10129 = vrot.lane.b32.xlu1 %v10113_v17, %s10701_s30 }
 0x3ea   : > { %10154 = vrot.lane.b32.xlu0 %v10113_v17, %s10707_s12  ;;  %v15244_v5 = vld [vmem:[#allocation2 + $0x120] sm:$0xff] }
 0x3ec   : > { %v6602_v47 = vld [vmem:[#allocation2 + $0x108] sm:$0xff] }
 0x3ed   : > { %10139 = vrot.lane.b32.xlu1 %v10138_v45, %s10703_s8  ;;  %v6634_v27 = vld [vmem:[#allocation2 + $0x109] sm:$0xff] }
 0x3ee   : > { %10164 = vrot.lane.b32.xlu0 %v10138_v45, %s10709_s14  ;;  %v15238_v31 = vld [vmem:[#allocation2 + $0x128] sm:$0xff] }
 0x3ef   : > { %v9930_v41 = vpop.permute.xlu1 %9929  ;;  %v6542_v28 = vld [vmem:[#allocation2 + $0x129] sm:$0xff] }
 0x3f0   : > { %v9955_v35 = vpop.permute.xlu0 %9954  ;;  %v6603_v36 = vld [vmem:[#allocation2 + $0x110] sm:$0xff]  ;;  %v9932_v56 = vunpack.i.h.bf16 %v9930_v41  ;;  %v9931_v22 = vunpack.i.l.bf16 %v9930_v41 }
 0x3f1   : > { %10149 = vrot.lane.b32.xlu1 %v10148_v11, %s10705_s10  ;;  %v6666_v13 = vld [vmem:[#allocation2 + $0x10a] sm:$0xff]  ;;  %v6667_v0 = vld [vmem:[#allocation2 + $0x112] sm:$0xff]  ;;  %v10168_v60 = vpack.i.bf16 %v6603_v36, %v6602_v47  ;;  %v9957_v1 = vunpack.i.h.bf16 %v9955_v35  ;;  %v9956_v61 = vunpack.i.l.bf16 %v9955_v35  ;;  %v10218_v36 = vpack.i.bf16 %v15238_v31, %v15244_v5 }
 0x3f2   : > { %10174 = vrot.lane.b32.xlu0 %v10148_v11, %s10711_s16  ;;  %v7871_v48 = vsel %vm6000_vm6, %v7839_v24, %v9932_v56  ;;  %v7870_v15 = vsel %vm6000_vm6, %v7838_v38, %v9931_v22  ;;  %v10193_v10 = vpack.i.bf16 %v6667_v0, %v6666_v13  ;;  %v6635_v16 = vld [vmem:[#allocation2 + $0x111] sm:$0xff]  ;;  %v6541_v24 = vld [vmem:[#allocation2 + $0x121] sm:$0xff] }
 0x3f3   : > { %v9940_v32 = vpop.permute.xlu1 %9939  ;;  %v10178_v37 = vpack.i.bf16 %v6635_v16, %v6634_v27 }
 0x3f4   : > { %v9942_v33 = vunpack.i.h.bf16 %v9940_v32  ;;  %v9941_v19 = vunpack.i.l.bf16 %v9940_v32  ;;  %v9965_v17 = vpop.permute.xlu0 %9964 }
 0x3f5   : > { %10159 = vrot.lane.b32.xlu1 %v10158_v9, %s10707_s12  ;;  %v9967_v45 = vunpack.i.h.bf16 %v9965_v17  ;;  %v9966_v8 = vunpack.i.l.bf16 %v9965_v17 }
 0x3f6   : > { %10184 = vrot.lane.b32.xlu0 %v10158_v9, %s10714_s26  ;;  %v7902_v21 = vsel %vm6066_vm9, %v7870_v15, %v9941_v19  ;;  %v7903_v12 = vsel %vm6066_vm9, %v7871_v48, %v9942_v33  ;;  %v15258_v19 = vpack.i.bf16 %v6542_v28, %v6541_v24  ;;  %v6573_v48 = vld [vmem:[#allocation2 + $0x122] sm:$0xff]  ;;  %v6574_v15 = vld [vmem:[#allocation2 + $0x12a] sm:$0xff] }
 0x3f7   : > { %v7934_v30 = vsel %vm6164_vm13, %v7902_v21, %v9956_v61  ;;  %v7935_v40 = vsel %vm6164_vm13, %v7903_v12, %v9957_v1  ;;  %v9950_v3 = vpop.permute.xlu1 %9949  ;;  %v10238_v1 = vpack.i.bf16 %v6574_v15, %v6573_v48 }
 0x3f8   : > { %v9975_v20 = vpop.permute.xlu0 %9974  ;;  %v7963_v50 = vpack.c.bf16 %v7935_v40, %v7934_v30  ;;  %v9952_v43 = vunpack.i.h.bf16 %v9950_v3  ;;  %v9951_v7 = vunpack.i.l.bf16 %v9950_v3 }
 0x3f9   : > { %10169 = vrot.lane.b32.xlu1 %v10168_v60, %s10709_s14  ;;  %v9977_v57 = vunpack.i.h.bf16 %v9975_v20  ;;  %v9976_v62 = vunpack.i.l.bf16 %v9975_v20 }
 0x3fa   : > { %10194 = vrot.lane.b32.xlu0 %v10193_v10, %s10714_s26  ;;  %9727 = vmatmul.mubr.msk.bf16.gmra.mxu1 %vm8019_vm8, %v7963_v50  ;;  %v7713_v49 = vsel %vm253_vm10, %v14993_v59, %v9952_v43  ;;  %v7712_v14 = vsel %vm253_vm10, %v14997_v39, %v9951_v7 }
 0x3fb   : > { %v7744_v18 = vsel %vm309_vm12, %v7712_v14, %v9966_v8  ;;  %v7745_v58 = vsel %vm309_vm12, %v7713_v49, %v9967_v45  ;;  %v15236_v35 = vpop.permute.xlu1 %9959 }
 0x3fc   : > { %v9985_v51 = vpop.permute.xlu0 %9984  ;;  %v7776_v59 = vsel %vm5802_vm14, %v7744_v18, %v9976_v62  ;;  %v7777_v4 = vsel %vm5802_vm14, %v7745_v58, %v9977_v57  ;;  %v9962_v50 = vunpack.i.h.bf16 %v15236_v35  ;;  %v9961_v16 = vunpack.i.l.bf16 %v15236_v35 }
 0x3fd   : > { %10179 = vrot.lane.b32.xlu1 %v10178_v37, %s10711_s16  ;;  %v9987_v34 = vunpack.i.h.bf16 %v9985_v51  ;;  %v9986_v26 = vunpack.i.l.bf16 %v9985_v51 }
 0x3fe   : > { %10204 = vrot.lane.b32.xlu0 %v10158_v9, %s10701_s30  ;;  %v7714_v57 = vsel %vm253_vm10, %v15041_v2, %v9961_v16  ;;  %v7715_v62 = vsel %vm253_vm10, %v15045_v6, %v9962_v50 }
 0x3ff   : > { %v7808_v63 = vsel %vm5868_vm0, %v7776_v59, %v9986_v26  ;;  %v7809_v23 = vsel %vm5868_vm0, %v7777_v4, %v9987_v34  ;;  %v9970_v32 = vpop.permute.xlu1 %9969 }
 0x400   : > { %v9995_v29 = vpop.permute.xlu0 %9994  ;;  %v9972_v27 = vunpack.i.h.bf16 %v9970_v32  ;;  %v9971_v3 = vunpack.i.l.bf16 %v9970_v32 }
 0x401   : > { %10189 = vrot.lane.b32.xlu1 %v10148_v11, %s10699_s28  ;;  %v9997_v39 = vunpack.i.h.bf16 %v9995_v29  ;;  %v9996_v46 = vunpack.i.l.bf16 %v9995_v29 }
 0x402   : > { %10214 = vrot.lane.b32.xlu0 %v10168_v60, %s10703_s8  ;;  %v7746_v4 = vsel %vm309_vm12, %v7714_v57, %v9971_v3 }
 0x403   : > { %v7840_v56 = vsel %vm5934_vm3, %v7808_v63, %v9996_v46  ;;  %v7841_v22 = vsel %vm5934_vm3, %v7809_v23, %v9997_v39  ;;  %v9980_v61 = vpop.permute.xlu1 %9979  ;;  %v7747_v39 = vsel %vm309_vm12, %v7715_v62, %v9972_v27 }
 0x404   : > { %v10005_v52 = vpop.permute.xlu0 %10004  ;;  %v9982_v51 = vunpack.i.h.bf16 %v9980_v61  ;;  %v9981_v43 = vunpack.i.l.bf16 %v9980_v61  ;;  %v6403_v61 = vld [vmem:[#allocation2 + $0x90] sm:$0xff] }
 0x405   : > { %10199 = vrot.lane.b32.xlu1 %v10178_v37, %s10699_s28  ;;  %v10007_v42 = vunpack.i.h.bf16 %v10005_v52  ;;  %v10006_v11 = vunpack.i.l.bf16 %v10005_v52 }
 0x406   : > { %10224 = vrot.lane.b32.xlu0 %v10178_v37, %s10705_s10  ;;  %v7778_v35 = vsel %vm5802_vm14, %v7746_v4, %v9981_v43  ;;  %v7779_v2 = vsel %vm5802_vm14, %v7747_v39, %v9982_v51 }
 0x407   : > { %v7872_v9 = vsel %vm6000_vm6, %v7840_v56, %v10006_v11  ;;  %v7873_v53 = vsel %vm6000_vm6, %v7841_v22, %v10007_v42  ;;  %v9990_v30 = vpop.permute.xlu1 %9989 }
 0x408   : > { %v10015_v41 = vpop.permute.xlu0 %10014  ;;  %v9992_v14 = vunpack.i.h.bf16 %v9990_v30  ;;  %v9991_v45 = vunpack.i.l.bf16 %v9990_v30 }
 0x409   : > { %10209 = vrot.lane.b32.xlu1 %v10193_v10, %s10701_s30  ;;  %v10017_v44 = vunpack.i.h.bf16 %v10015_v41  ;;  %v10016_v54 = vunpack.i.l.bf16 %v10015_v41 }
 0x40a   : > { %10234 = vrot.lane.b32.xlu0 %v10193_v10, %s10707_s12  ;;  %v7810_v6 = vsel %vm5868_vm0, %v7778_v35, %v9991_v45  ;;  %v7811_v11 = vsel %vm5868_vm0, %v7779_v2, %v9992_v14 }
 0x40b   : > { %v7904_v13 = vsel %vm6066_vm9, %v7872_v9, %v10016_v54  ;;  %v7905_v0 = vsel %vm6066_vm9, %v7873_v53, %v10017_v44  ;;  %v10000_v20 = vpop.permute.xlu1 %9999 }
 0x40c   : > { %v10025_v55 = vpop.permute.xlu0 %10024  ;;  %v10002_v34 = vunpack.i.h.bf16 %v10000_v20  ;;  %v10001_v26 = vunpack.i.l.bf16 %v10000_v20 }
 0x40d   : > { %v10027_v38 = vunpack.i.h.bf16 %v10025_v55  ;;  %v10026_v47 = vunpack.i.l.bf16 %v10025_v55  ;;  %10219 = vrot.lane.b32.xlu1 %v10218_v36, %s10703_s8 }
 0x40e   : > { %10244 = vrot.lane.b32.xlu0 %v10218_v36, %s10709_s14  ;;  %v7842_v23 = vsel %vm5934_vm3, %v7810_v6, %v10001_v26  ;;  %v7843_v36 = vsel %vm5934_vm3, %v7811_v11, %v10002_v34 }
 0x40f   : > { %v7936_v60 = vsel %vm6164_vm13, %v7904_v13, %v10026_v47  ;;  %v7937_v33 = vsel %vm6164_vm13, %v7905_v0, %v10027_v38 }
 0x410   : > { %v7964_v17 = vpack.c.bf16 %v7937_v33, %v7936_v60 }
 0x411   : > { %10229 = vrot.lane.b32.xlu1 %v15258_v19, %s10705_s10 }
 0x412   : > { %10254 = vrot.lane.b32.xlu0 %v15258_v19, %s10711_s16  ;;  %9730 = vmatprep.mubr.msk.bf16.mxu1 %vm8019_vm8, %v7964_v17 }
 0x415   : > { %10239 = vrot.lane.b32.xlu1 %v10238_v1, %s10707_s12 }
 0x416   : > { %v9706_v10 = vpop.f32.mrf.mxu1  ;;  %10264 = vrot.lane.b32.xlu0 %v10238_v1, %s10714_s26 }
 0x417   : > { %6385 = vst.msk [vmem:[#allocation2 + $0x151] sm:$0xff] %vm253_vm10, %v9706_v10  ;;  %v6404_v10 = vld [vmem:[#allocation2 + $0x98] sm:$0xff] }
 0x418   : > { %v6327_v21 = vpop.f32.mrf.mxu1 }
 0x419   : > { %6383 = vst.msk [vmem:[#allocation2 + $0x139] sm:$0xff] %vm253_vm10, %v6327_v21 }
 0x41a   : > { %v9707_v12 = vpop.f32.mrf.mxu1 }
 0x41b   : > { %6386 = vst.msk [vmem:[#allocation2 + $0x159] sm:$0xff] %vm253_vm10, %v9707_v12 }
 0x41c   : > { %v6330_v40 = vpop.f32.mrf.mxu1 }
 0x41d   : > { %6384 = vst.msk [vmem:[#allocation2 + $0x141] sm:$0xff] %vm253_vm10, %v6330_v40 }
 0x41e   : > { %v15317_v50 = vld [vmem:[#allocation2 + $0x150] sm:$0xff] }
 0x41f   : > { %v6545_v14 = vld [vmem:[#allocation2 + $0x151] sm:$0xff] }
 0x420   : > { %v15273_v37 = vld [vmem:[#allocation2 + $0x138] sm:$0xff] }
 0x421   : > { %v6638_v42 = vld [vmem:[#allocation2 + $0x139] sm:$0xff] }
 0x422   : > { %v15309_v21 = vld [vmem:[#allocation2 + $0x158] sm:$0xff] }
 0x423   : > { %v10298_v16 = vpack.i.bf16 %v15309_v21, %v15317_v50  ;;  %v6546_v27 = vld [vmem:[#allocation2 + $0x159] sm:$0xff] }
 0x424   : > { %v15275_v7 = vld [vmem:[#allocation2 + $0x140] sm:$0xff]  ;;  %v10010_v18 = vpop.permute.xlu1 %10009  ;;  %v6577_v39 = vld [vmem:[#allocation2 + $0x152] sm:$0xff] }
 0x425   : > { %v6670_v29 = vld [vmem:[#allocation2 + $0x13a] sm:$0xff]  ;;  %v6671_v49 = vld [vmem:[#allocation2 + $0x142] sm:$0xff]  ;;  %v10248_v8 = vpack.i.bf16 %v15275_v7, %v15273_v37  ;;  %v10035_v58 = vpop.permute.xlu0 %10034  ;;  %v10012_v46 = vunpack.i.h.bf16 %v10010_v18  ;;  %v10011_v41 = vunpack.i.l.bf16 %v10010_v18 }
 0x426   : > { %v10273_v52 = vpack.i.bf16 %v6671_v49, %v6670_v29  ;;  %v6639_v59 = vld [vmem:[#allocation2 + $0x141] sm:$0xff]  ;;  %v10037_v9 = vunpack.i.h.bf16 %v10035_v58  ;;  %v10036_v53 = vunpack.i.l.bf16 %v10035_v58 }
 0x427   : > { %10249 = vrot.lane.b32.xlu1 %v10248_v8, %s10709_s14  ;;  %v10258_v44 = vpack.i.bf16 %v6639_v59, %v6638_v42  ;;  %v7875_v55 = vsel %vm6000_vm6, %v7843_v36, %v10012_v46  ;;  %v7874_v28 = vsel %vm6000_vm6, %v7842_v23, %v10011_v41  ;;  %v6578_v46 = vld [vmem:[#allocation2 + $0x15a] sm:$0xff] }
 0x428   : > { %10274 = vrot.lane.b32.xlu0 %v10273_v52, %s10714_s26  ;;  %v10020_v54 = vpop.permute.xlu1 %10019 }
 0x429   : > { %v10045_v63 = vpop.permute.xlu0 %10044  ;;  %v10022_v56 = vunpack.i.h.bf16 %v10020_v54  ;;  %v10021_v22 = vunpack.i.l.bf16 %v10020_v54 }
 0x42a   : > { %v10047_v40 = vunpack.i.h.bf16 %v10045_v63  ;;  %v10046_v20 = vunpack.i.l.bf16 %v10045_v63 }
 0x42b   : > { %10259 = vrot.lane.b32.xlu1 %v10258_v44, %s10711_s16  ;;  %v7906_v38 = vsel %vm6066_vm9, %v7874_v28, %v10021_v22  ;;  %v7907_v47 = vsel %vm6066_vm9, %v7875_v55, %v10022_v56 }
 0x42c   : > { %10284 = vrot.lane.b32.xlu0 %v10238_v1, %s10701_s30  ;;  %v10030_v13 = vpop.permute.xlu1 %10029  ;;  %v7938_v32 = vsel %vm6164_vm13, %v7906_v38, %v10036_v53  ;;  %v7939_v24 = vsel %vm6164_vm13, %v7907_v47, %v10037_v9 }
 0x42d   : > { %v10055_v0 = vpop.permute.xlu0 %10054  ;;  %v7965_v60 = vpack.c.bf16 %v7939_v24, %v7938_v32  ;;  %v10032_v48 = vunpack.i.h.bf16 %v10030_v13  ;;  %v10031_v15 = vunpack.i.l.bf16 %v10030_v13 }
 0x42e   : > { %v10057_v29 = vunpack.i.h.bf16 %v10055_v0  ;;  %v10056_v49 = vunpack.i.l.bf16 %v10055_v0 }
 0x42f   : > { %10269 = vrot.lane.b32.xlu1 %v15258_v19, %s10699_s28  ;;  %9731 = vmatmul.mubr.msk.bf16.gmra.mxu1 %vm8019_vm8, %v7965_v60  ;;  %v7717_v12 = vsel %vm253_vm10, %v6404_v10, %v10032_v48  ;;  %v7716_v30 = vsel %vm253_vm10, %v6403_v61, %v10031_v15  ;;  %v6405_v10 = vld [vmem:[#allocation2 + $0xa8] sm:$0xff] }
 0x430   : > { %10294 = vrot.lane.b32.xlu0 %v10248_v8, %s10703_s8  ;;  %v15305_v33 = vpop.permute.xlu1 %10039  ;;  %v7748_v51 = vsel %vm309_vm12, %v7716_v30, %v10046_v20  ;;  %v7749_v43 = vsel %vm309_vm12, %v7717_v12, %v10047_v40  ;;  %v6406_v12 = vld [vmem:[#allocation2 + $0xb0] sm:$0xff] }
 0x431   : > { %v10065_v17 = vpop.permute.xlu0 %10064  ;;  %v7780_v58 = vsel %vm5802_vm14, %v7748_v51, %v10056_v49  ;;  %v7781_v57 = vsel %vm5802_vm14, %v7749_v43, %v10057_v29  ;;  %v10042_v32 = vunpack.i.h.bf16 %v15305_v33  ;;  %v10041_v24 = vunpack.i.l.bf16 %v15305_v33 }
 0x432   : > { %v10067_v45 = vunpack.i.h.bf16 %v10065_v17  ;;  %v10066_v8 = vunpack.i.l.bf16 %v10065_v17 }
 0x433   : > { %10279 = vrot.lane.b32.xlu1 %v10258_v44, %s10699_s28  ;;  %v7718_v20 = vsel %vm253_vm10, %v6405_v10, %v10041_v24  ;;  %v7719_v33 = vsel %vm253_vm10, %v6406_v12, %v10042_v32 }
 0x434   : > { %10304 = vrot.lane.b32.xlu0 %v10258_v44, %s10705_s10  ;;  %v15311_v19 = vpop.permute.xlu1 %10049  ;;  %v7812_v2 = vsel %vm5868_vm0, %v7780_v58, %v10066_v8  ;;  %v7813_v42 = vsel %vm5868_vm0, %v7781_v57, %v10067_v45  ;;  %v15339_v44 = vpack.i.bf16 %v6578_v46, %v6577_v39 }
 0x435   : > { %v10075_v1 = vpop.permute.xlu0 %10074  ;;  %v10052_v48 = vunpack.i.h.bf16 %v15311_v19  ;;  %v10051_v15 = vunpack.i.l.bf16 %v15311_v19 }
 0x436   : > { %v10077_v62 = vunpack.i.h.bf16 %v10075_v1  ;;  %v10076_v34 = vunpack.i.l.bf16 %v10075_v1 }
 0x437   : > { %10289 = vrot.lane.b32.xlu1 %v10273_v52, %s10701_s30  ;;  %v7750_v43 = vsel %vm309_vm12, %v7718_v20, %v10051_v15  ;;  %v7751_v19 = vsel %vm309_vm12, %v7719_v33, %v10052_v48 }
 0x438   : > { %10314 = vrot.lane.b32.xlu0 %v10273_v52, %s10707_s12  ;;  %v15325_v52 = vpack.i.bf16 %v6546_v27, %v6545_v14  ;;  %v15327_v18 = vpop.permute.xlu1 %10059  ;;  %v7844_v6 = vsel %vm5934_vm3, %v7812_v2, %v10076_v34  ;;  %v7845_v11 = vsel %vm5934_vm3, %v7813_v42, %v10077_v62 }
 0x439   : > { %v10085_v3 = vpop.permute.xlu0 %10084  ;;  %v10062_v1 = vunpack.i.h.bf16 %v15327_v18  ;;  %v10061_v61 = vunpack.i.l.bf16 %v15327_v18 }
 0x43a   : > { %v10087_v59 = vunpack.i.h.bf16 %v10085_v3  ;;  %v10086_v4 = vunpack.i.l.bf16 %v10085_v3 }
 0x43b   : > { %10299 = vrot.lane.b32.xlu1 %v10298_v16, %s10703_s8  ;;  %v7782_v29 = vsel %vm5802_vm14, %v7750_v43, %v10061_v61  ;;  %v7783_v49 = vsel %vm5802_vm14, %v7751_v19, %v10062_v1 }
 0x43c   : > { %10324 = vrot.lane.b32.xlu0 %v10298_v16, %s10709_s14  ;;  %v7876_v23 = vsel %vm6000_vm6, %v7844_v6, %v10086_v4  ;;  %v7877_v36 = vsel %vm6000_vm6, %v7845_v11, %v10087_v59  ;;  %v10070_v56 = vpop.permute.xlu1 %10069 }
 0x43d   : > { %v10095_v26 = vpop.permute.xlu0 %10094  ;;  %v10072_v30 = vunpack.i.h.bf16 %v10070_v56  ;;  %v10071_v40 = vunpack.i.l.bf16 %v10070_v56 }
 0x43e   : > { %v10097_v41 = vunpack.i.h.bf16 %v10095_v26  ;;  %v10096_v35 = vunpack.i.l.bf16 %v10095_v26 }
 0x43f   : > { %10309 = vrot.lane.b32.xlu1 %v15325_v52, %s10705_s10  ;;  %v7814_v8 = vsel %vm5868_vm0, %v7782_v29, %v10071_v40  ;;  %v7815_v18 = vsel %vm5868_vm0, %v7783_v49, %v10072_v30 }
 0x440   : > { %10334 = vrot.lane.b32.xlu0 %v15325_v52, %s10711_s16  ;;  %v7908_v28 = vsel %vm6066_vm9, %v7876_v23, %v10096_v35  ;;  %v7909_v9 = vsel %vm6066_vm9, %v7877_v36, %v10097_v41  ;;  %v10080_v17 = vpop.permute.xlu1 %10079 }
 0x441   : > { %v10105_v54 = vpop.permute.xlu0 %10104  ;;  %v10082_v16 = vunpack.i.h.bf16 %v10080_v17  ;;  %v10081_v27 = vunpack.i.l.bf16 %v10080_v17  ;;  %v6408_v17 = vld [vmem:[#allocation2 + $0xc8] sm:$0xff] }
 0x442   : > { %v9710_v63 = vpop.f32.mrf.mxu1  ;;  %v10107_v22 = vunpack.i.h.bf16 %v10105_v54  ;;  %v10106_v55 = vunpack.i.l.bf16 %v10105_v54 }
 0x443   : > { %6389 = vst.msk [vmem:[#allocation2 + $0x181] sm:$0xff] %vm253_vm10, %v9710_v63  ;;  %10319 = vrot.lane.b32.xlu1 %v15339_v44, %s10707_s12  ;;  %v7846_v26 = vsel %vm5934_vm3, %v7814_v8, %v10081_v27  ;;  %v7847_v59 = vsel %vm5934_vm3, %v7815_v18, %v10082_v16 }
 0x444   : > { %10344 = vrot.lane.b32.xlu0 %v15339_v44, %s10714_s26  ;;  %v6343_v53 = vpop.f32.mrf.mxu1  ;;  %v7940_v38 = vsel %vm6164_vm13, %v7908_v28, %v10106_v55  ;;  %v7941_v47 = vsel %vm6164_vm13, %v7909_v9, %v10107_v22 }
 0x445   : > { %6387 = vst.msk [vmem:[#allocation2 + $0x169] sm:$0xff] %vm253_vm10, %v6343_v53  ;;  %v7966_v13 = vpack.c.bf16 %v7941_v47, %v7940_v38 }
 0x446   : > { %v9711_v0 = vpop.f32.mrf.mxu1 }
 0x447   : > { %6390 = vst.msk [vmem:[#allocation2 + $0x189] sm:$0xff] %vm253_vm10, %v9711_v0  ;;  %9734 = vmatprep.mubr.msk.bf16.mxu1 %vm8019_vm8, %v7966_v13 }
 0x448   : > { %v6346_v60 = vpop.f32.mrf.mxu1 }
 0x449   : > { %6388 = vst.msk [vmem:[#allocation2 + $0x171] sm:$0xff] %vm253_vm10, %v6346_v60  ;;  %v6407_v60 = vld [vmem:[#allocation2 + $0xc0] sm:$0xff] }
 0x44a   : > { %v6517_v33 = vld [vmem:[#allocation2 + $0x180] sm:$0xff] }
 0x44b   : > { %v10090_v3 = vpop.permute.xlu1 %10089 }
 0x44c   : > { %v10115_v51 = vpop.permute.xlu0 %10114  ;;  %v10092_v14 = vunpack.i.h.bf16 %v10090_v3  ;;  %v10091_v45 = vunpack.i.l.bf16 %v10090_v3  ;;  %v15370_v58 = vld [vmem:[#allocation2 + $0x168] sm:$0xff] }
 0x44d   : > { %v10117_v54 = vunpack.i.h.bf16 %v10115_v51  ;;  %v10116_v63 = vunpack.i.l.bf16 %v10115_v51  ;;  %v6642_v56 = vld [vmem:[#allocation2 + $0x169] sm:$0xff] }
 0x44e   : > { %v7879_v6 = vsel %vm6000_vm6, %v7847_v59, %v10092_v14  ;;  %v7878_v11 = vsel %vm6000_vm6, %v7846_v26, %v10091_v45  ;;  %v6518_v40 = vld [vmem:[#allocation2 + $0x188] sm:$0xff] }
 0x44f   : > { %v10100_v4 = vpop.permute.xlu1 %10099  ;;  %v6550_v51 = vld [vmem:[#allocation2 + $0x189] sm:$0xff]  ;;  %v10378_v8 = vpack.i.bf16 %v6518_v40, %v6517_v33 }
 0x450   : > { %v15372_v57 = vld [vmem:[#allocation2 + $0x170] sm:$0xff]  ;;  %v10125_v39 = vpop.permute.xlu0 %10124  ;;  %v10102_v35 = vunpack.i.h.bf16 %v10100_v4  ;;  %v10101_v2 = vunpack.i.l.bf16 %v10100_v4  ;;  %v6581_v19 = vld [vmem:[#allocation2 + $0x182] sm:$0xff] }
 0x451   : > { %v6674_v62 = vld [vmem:[#allocation2 + $0x16a] sm:$0xff]  ;;  %v6675_v34 = vld [vmem:[#allocation2 + $0x172] sm:$0xff]  ;;  %v10328_v46 = vpack.i.bf16 %v15372_v57, %v15370_v58  ;;  %v10126_v25 = vunpack.i.l.bf16 %v10125_v39  ;;  %v10127_v1 = vunpack.i.h.bf16 %v10125_v39 }
 0x452   : > { %v10353_v41 = vpack.i.bf16 %v6675_v34, %v6674_v62  ;;  %v6643_v42 = vld [vmem:[#allocation2 + $0x171] sm:$0xff]  ;;  %v7910_v23 = vsel %vm6066_vm9, %v7878_v11, %v10101_v2  ;;  %v7911_v36 = vsel %vm6066_vm9, %v7879_v6, %v10102_v35  ;;  %v6549_v34 = vld [vmem:[#allocation2 + $0x181] sm:$0xff] }
 0x453   : > { %10329 = vrot.lane.b32.xlu1 %v10328_v46, %s10709_s14  ;;  %v10110_v22 = vpop.permute.xlu1 %10109  ;;  %v7942_v28 = vsel %vm6164_vm13, %v7910_v23, %v10116_v63  ;;  %v7943_v9 = vsel %vm6164_vm13, %v7911_v36, %v10117_v54  ;;  %v10338_v53 = vpack.i.bf16 %v6643_v42, %v6642_v56  ;;  %v6582_v29 = vld [vmem:[#allocation2 + $0x18a] sm:$0xff]  ;;  %v10388_v39 = vpack.i.bf16 %v6550_v51, %v6549_v34 }
 0x454   : > { %10354 = vrot.lane.b32.xlu0 %v10353_v41, %s10714_s26  ;;  %v10135_v55 = vpop.permute.xlu0 %10134  ;;  %v7967_v38 = vpack.c.bf16 %v7943_v9, %v7942_v28  ;;  %v10111_v13 = vunpack.i.l.bf16 %v10110_v22  ;;  %v10112_v0 = vunpack.i.h.bf16 %v10110_v22 }
 0x455   : > { %v10136_v12 = vunpack.i.l.bf16 %v10135_v55  ;;  %v10137_v20 = vunpack.i.h.bf16 %v10135_v55 }
 0x456   : > { %9735 = vmatmul.mubr.msk.bf16.gmra.mxu1 %vm8019_vm8, %v7967_v38  ;;  %v7720_v48 = vsel %vm253_vm10, %v6407_v60, %v10111_v13  ;;  %v7721_v15 = vsel %vm253_vm10, %v6408_v17, %v10112_v0  ;;  %v6410_v0 = vld [vmem:[#allocation2 + $0xe0] sm:$0xff] }
 0x457   : > { %10339 = vrot.lane.b32.xlu1 %v10338_v53, %s10711_s16  ;;  %v7752_v10 = vsel %vm309_vm12, %v7720_v48, %v10126_v25  ;;  %v7753_v30 = vsel %vm309_vm12, %v7721_v15, %v10127_v1  ;;  %v6615_v60 = vld [vmem:[#allocation2 + $0x1a0] sm:$0xff] }
 0x458   : > { %10364 = vrot.lane.b32.xlu0 %v15339_v44, %s10701_s30  ;;  %v15400_v44 = vpop.permute.xlu1 %10119  ;;  %v10145_v47 = vpop.permute.xlu0 %10144  ;;  %v7784_v27 = vsel %vm5802_vm14, %v7752_v10, %v10136_v12  ;;  %v7785_v45 = vsel %vm5802_vm14, %v7753_v30, %v10137_v20 }
 0x459   : > { %v10146_v16 = vunpack.i.l.bf16 %v10145_v47  ;;  %v10147_v3 = vunpack.i.h.bf16 %v10145_v47  ;;  %v10122_v35 = vunpack.i.h.bf16 %v15400_v44  ;;  %v10121_v2 = vunpack.i.l.bf16 %v15400_v44 }
 0x45b   : > { %10349 = vrot.lane.b32.xlu1 %v15325_v52, %s10699_s28  ;;  %v7816_v4 = vsel %vm5868_vm0, %v7784_v27, %v10146_v16  ;;  %v7817_v42 = vsel %vm5868_vm0, %v7785_v45, %v10147_v3 }
 0x45c   : > { %10374 = vrot.lane.b32.xlu0 %v10328_v46, %s10703_s8  ;;  %v15405_v32 = vpop.permute.xlu1 %10129  ;;  %v10155_v24 = vpop.permute.xlu0 %10154  ;;  %v10398_v46 = vpack.i.bf16 %v6582_v29, %v6581_v19  ;;  %v6646_v19 = vld [vmem:[#allocation2 + $0x199] sm:$0xff]  ;;  %v6647_v29 = vld [vmem:[#allocation2 + $0x1a1] sm:$0xff] }
 0x45d   : > { %v10156_v43 = vunpack.i.l.bf16 %v10155_v24  ;;  %v10157_v18 = vunpack.i.h.bf16 %v10155_v24  ;;  %v10132_v22 = vunpack.i.h.bf16 %v15405_v32  ;;  %v10131_v55 = vunpack.i.l.bf16 %v15405_v32  ;;  %v6614_v24 = vld [vmem:[#allocation2 + $0x198] sm:$0xff] }
 0x45e   : > { %v10408_v3 = vpack.i.bf16 %v6615_v60, %v6614_v24 }
 0x45f   : > { %10359 = vrot.lane.b32.xlu1 %v10338_v53, %s10699_s28  ;;  %v7848_v6 = vsel %vm5934_vm3, %v7816_v4, %v10156_v43  ;;  %v7849_v63 = vsel %vm5934_vm3, %v7817_v42, %v10157_v18 }
 0x460   : > { %10384 = vrot.lane.b32.xlu0 %v10338_v53, %s10705_s10  ;;  %v15411_v61 = vpop.permute.xlu1 %10139  ;;  %v10165_v52 = vpop.permute.xlu0 %10164  ;;  %v6409_v53 = vld [vmem:[#allocation2 + $0xd8] sm:$0xff] }
 0x461   : > { %v10166_v62 = vunpack.i.l.bf16 %v10165_v52  ;;  %v10167_v26 = vunpack.i.h.bf16 %v10165_v52  ;;  %v10142_v38 = vunpack.i.h.bf16 %v15411_v61  ;;  %v10141_v44 = vunpack.i.l.bf16 %v15411_v61 }
 0x462   : > { %v7722_v32 = vsel %vm253_vm10, %v6409_v53, %v10121_v2  ;;  %v7723_v52 = vsel %vm253_vm10, %v6410_v0, %v10122_v35  ;;  %v6678_v35 = vld [vmem:[#allocation2 + $0x19a] sm:$0xff]  ;;  %v6679_v2 = vld [vmem:[#allocation2 + $0x1a2] sm:$0xff] }
 0x463   : > { %10369 = vrot.lane.b32.xlu1 %v10353_v41, %s10701_s30  ;;  %v7880_v23 = vsel %vm6000_vm6, %v7848_v6, %v10166_v62  ;;  %v7881_v28 = vsel %vm6000_vm6, %v7849_v63, %v10167_v26  ;;  %v7754_v30 = vsel %vm309_vm12, %v7722_v32, %v10131_v55  ;;  %v7755_v40 = vsel %vm309_vm12, %v7723_v52, %v10132_v22 }
 0x464   : > { %10394 = vrot.lane.b32.xlu0 %v10353_v41, %s10707_s12  ;;  %v10150_v49 = vpop.permute.xlu1 %10149  ;;  %v10175_v14 = vpop.permute.xlu0 %10174  ;;  %v7786_v16 = vsel %vm5802_vm14, %v7754_v30, %v10141_v44  ;;  %v7787_v27 = vsel %vm5802_vm14, %v7755_v40, %v10142_v38  ;;  %v10428_v63 = vpack.i.bf16 %v6679_v2, %v6678_v35 }
 0x465   : > { %v10176_v59 = vunpack.i.l.bf16 %v10175_v14  ;;  %v10177_v41 = vunpack.i.h.bf16 %v10175_v14  ;;  %v10152_v17 = vunpack.i.h.bf16 %v10150_v49  ;;  %v10151_v48 = vunpack.i.l.bf16 %v10150_v49 }
 0x467   : > { %10379 = vrot.lane.b32.xlu1 %v10378_v8, %s10703_s8  ;;  %v7912_v9 = vsel %vm6066_vm9, %v7880_v23, %v10176_v59  ;;  %v7913_v47 = vsel %vm6066_vm9, %v7881_v28, %v10177_v41  ;;  %v7818_v51 = vsel %vm5868_vm0, %v7786_v16, %v10151_v48  ;;  %v7819_v43 = vsel %vm5868_vm0, %v7787_v27, %v10152_v17  ;;  %v6411_v28 = vld [vmem:[#allocation2 + $0xf0] sm:$0xff] }
 0x468   : > { %10404 = vrot.lane.b32.xlu0 %v10378_v8, %s10709_s14  ;;  %v10160_v11 = vpop.permute.xlu1 %10159  ;;  %v10185_v54 = vpop.permute.xlu0 %10184 }
 0x469   : > { %v10187_v36 = vunpack.i.h.bf16 %v10185_v54  ;;  %v10186_v56 = vunpack.i.l.bf16 %v10185_v54  ;;  %v10162_v10 = vunpack.i.h.bf16 %v10160_v11  ;;  %v10161_v12 = vunpack.i.l.bf16 %v10160_v11 }
 0x46b   : > { %10389 = vrot.lane.b32.xlu1 %v10388_v39, %s10705_s10  ;;  %v7944_v13 = vsel %vm6164_vm13, %v7912_v9, %v10186_v56  ;;  %v7945_v25 = vsel %vm6164_vm13, %v7913_v47, %v10187_v36  ;;  %v7850_v45 = vsel %vm5934_vm3, %v7818_v51, %v10161_v12  ;;  %v7851_v8 = vsel %vm5934_vm3, %v7819_v43, %v10162_v10  ;;  %v6412_v9 = vld [vmem:[#allocation2 + $0xf8] sm:$0xff] }
 0x46c   : > { %10414 = vrot.lane.b32.xlu0 %v10388_v39, %s10711_s16  ;;  %v10170_v15 = vpop.permute.xlu1 %10169  ;;  %v10195_v1 = vpop.permute.xlu0 %10194  ;;  %v7968_v61 = vpack.c.bf16 %v7945_v25, %v7944_v13  ;;  %v10418_v39 = vpack.i.bf16 %v6647_v29, %v6646_v19 }
 0x46d   : > { %v10172_v20 = vunpack.i.h.bf16 %v10170_v15  ;;  %v10171_v33 = vunpack.i.l.bf16 %v10170_v15  ;;  %v10197_v59 = vunpack.i.h.bf16 %v10195_v1  ;;  %v10196_v4 = vunpack.i.l.bf16 %v10195_v1  ;;  %v15473_v1 = vld [vmem:[%s15933_s4] ss:$0 sm:$0xff] }
 0x46e   : > { %9738 = vmatprep.mubr.msk.bf16.mxu1 %vm8019_vm8, %v7968_v61 }
 0x46f   : > { %10399 = vrot.lane.b32.xlu1 %v10398_v46, %s10707_s12  ;;  %v7883_v34 = vsel %vm6000_vm6, %v7851_v8, %v10172_v20  ;;  %v7882_v26 = vsel %vm6000_vm6, %v7850_v45, %v10171_v33  ;;  %s10715_s12 = smov 80  }
 0x470   : > { %10424 = vrot.lane.b32.xlu0 %v10398_v46, %s10714_s26  ;;  %v10180_v49 = vpop.permute.xlu1 %10179  ;;  %v10205_v14 = vpop.permute.xlu0 %10204 }
 0x471   : > { %v10182_v18 = vunpack.i.h.bf16 %v10180_v49  ;;  %v10181_v62 = vunpack.i.l.bf16 %v10180_v49  ;;  %v10207_v47 = vunpack.i.h.bf16 %v10205_v14  ;;  %v10206_v13 = vunpack.i.l.bf16 %v10205_v14 }
 0x473   : > { %10409 = vrot.lane.b32.xlu1 %v10408_v3, %s10709_s14  ;;  %v7914_v46 = vsel %vm6066_vm9, %v7882_v26, %v10181_v62  ;;  %v7915_v41 = vsel %vm6066_vm9, %v7883_v34, %v10182_v18 }
 0x474   : > { %v10215_v42 = vpop.permute.xlu0 %10214  ;;  %v7946_v6 = vsel %vm6164_vm13, %v7914_v46, %v10196_v4  ;;  %v7947_v11 = vsel %vm6164_vm13, %v7915_v41, %v10197_v59  ;;  %v10190_v23 = vpop.permute.xlu1 %10189 }
 0x475   : > { %v7969_v54 = vpack.c.bf16 %v7947_v11, %v7946_v6  ;;  %v10192_v56 = vunpack.i.h.bf16 %v10190_v23  ;;  %v10191_v22 = vunpack.i.l.bf16 %v10190_v23  ;;  %v10217_v60 = vunpack.i.h.bf16 %v10215_v42 }
 0x476   : > { %v10216_v17 = vunpack.i.l.bf16 %v10215_v42 }
 0x477   : > { %10419 = vrot.lane.b32.xlu1 %v10418_v39, %s10711_s16  ;;  %9739 = vmatmul.mubr.msk.bf16.gmra.mxu1 %vm8019_vm8, %v7969_v54  ;;  %v7725_v38 = vsel %vm253_vm10, %v6412_v9, %v10192_v56  ;;  %v7724_v44 = vsel %vm253_vm10, %v6411_v28, %v10191_v22 }
 0x478   : > { %v10225_v36 = vpop.permute.xlu0 %10224  ;;  %v15462_v53 = vpop.permute.xlu1 %10199  ;;  %v7756_v32 = vsel %vm309_vm12, %v7724_v44, %v10206_v13  ;;  %v7757_v24 = vsel %vm309_vm12, %v7725_v38, %v10207_v47 }
 0x479   : > { %v10227_v48 = vunpack.i.h.bf16 %v10225_v36  ;;  %v10226_v25 = vunpack.i.l.bf16 %v10225_v36  ;;  %v7788_v52 = vsel %vm5802_vm14, %v7756_v32, %v10216_v17  ;;  %v7789_v10 = vsel %vm5802_vm14, %v7757_v24, %v10217_v60  ;;  %v6413_v24 = vld [vmem:[#allocation2 + $0x108] sm:$0xff] }
 0x47a   : > { %v10201_v44 = vunpack.i.l.bf16 %v15462_v53  ;;  %v10202_v13 = vunpack.i.h.bf16 %v15462_v53 }
 0x47b   : > { %10429 = vrot.lane.b32.xlu1 %v10428_v63, %s10714_s26  ;;  %v7820_v51 = vsel %vm5868_vm0, %v7788_v52, %v10226_v25  ;;  %v7821_v43 = vsel %vm5868_vm0, %v7789_v10, %v10227_v48  ;;  %v6414_v48 = vld [vmem:[#allocation2 + $0x110] sm:$0xff] }
 0x47c   : > { %v10235_v55 = vpop.permute.xlu0 %10234  ;;  %v15468_v15 = vpop.permute.xlu1 %10209  ;;  %v7726_v25 = vsel %vm253_vm10, %v6413_v24, %v10201_v44 }
 0x47d   : > { %v10237_v12 = vunpack.i.h.bf16 %v10235_v55  ;;  %v10236_v61 = vunpack.i.l.bf16 %v10235_v55  ;;  %v10212_v32 = vunpack.i.h.bf16 %v15468_v15 }
 0x47f   : > { %v7852_v29 = vsel %vm5934_vm3, %v7820_v51, %v10236_v61  ;;  %v7853_v49 = vsel %vm5934_vm3, %v7821_v43, %v10237_v12 }
 0x480   : > { %v10245_v0 = vpop.permute.xlu0 %10244  ;;  %v10220_v18 = vpop.permute.xlu1 %10219 }
 0x481   : > { %v10247_v40 = vunpack.i.h.bf16 %v10245_v0  ;;  %v10246_v20 = vunpack.i.l.bf16 %v10245_v0  ;;  %v10211_v0 = vunpack.i.l.bf16 %v15468_v15  ;;  %v10222_v60 = vunpack.i.h.bf16 %v10220_v18 }
 0x482   : > { %v10221_v17 = vunpack.i.l.bf16 %v10220_v18 }
 0x483   : > { %v7884_v62 = vsel %vm6000_vm6, %v7852_v29, %v10246_v20  ;;  %v7885_v34 = vsel %vm6000_vm6, %v7853_v49, %v10247_v40  ;;  %v7758_v40 = vsel %vm309_vm12, %v7726_v25, %v10211_v0 }
 0x484   : > { %v10255_v30 = vpop.permute.xlu0 %10254  ;;  %v10230_v55 = vpop.permute.xlu1 %10229  ;;  %v7790_v43 = vsel %vm5802_vm14, %v7758_v40, %v10221_v17 }
 0x485   : > { %v10257_v16 = vunpack.i.h.bf16 %v10255_v30  ;;  %v10256_v27 = vunpack.i.l.bf16 %v10255_v30  ;;  %v10232_v52 = vunpack.i.h.bf16 %v10230_v55  ;;  %v10231_v10 = vunpack.i.l.bf16 %v10230_v55 }
 0x486   : > { %v9724_v33 = vpop.f32.mrf.mxu1  ;;  %v7727_v30 = vsel %vm253_vm10, %v6414_v48, %v10202_v13 }
 0x487   : > { %v8115_v3 = vadd.f32 %v9724_v33, %v15473_v1  ;;  %v7916_v39 = vsel %vm6066_vm9, %v7884_v62, %v10256_v27  ;;  %v7917_v46 = vsel %vm6066_vm9, %v7885_v34, %v10257_v16  ;;  %v7759_v15 = vsel %vm309_vm12, %v7727_v30, %v10212_v32 }
 0x488   : > { %v8106_v19 = vpop.f32.mrf.mxu1  ;;  %v10265_v14 = vpop.permute.xlu0 %10264  ;;  %v7822_v29 = vsel %vm5868_vm0, %v7790_v43, %v10231_v10 }
 0x489   : > { %v8235_v45 = vmax.f32 %v8115_v3, 0.0  ;;  %v8107_v8 = vadd.f32 %v15473_v1, %v8106_v19  ;;  %v10267_v26 = vunpack.i.h.bf16 %v10265_v14  ;;  %v10266_v59 = vunpack.i.l.bf16 %v10265_v14  ;;  %v10240_v47 = vpop.permute.xlu1 %10239 }
 0x48a   : > { %v9725_v4 = vpop.f32.mrf.mxu1  ;;  %v10242_v20 = vunpack.i.h.bf16 %v10240_v47  ;;  %v10241_v53 = vunpack.i.l.bf16 %v10240_v47  ;;  %v7791_v19 = vsel %vm5802_vm14, %v7759_v15, %v10222_v60 }
 0x48b   : > { %v8233_v41 = vmax.f32 %v8107_v8, 0.0  ;;  %v8118_v35 = vadd.f32 %v9725_v4, %v15473_v1  ;;  %v7948_v2 = vsel %vm6164_vm13, %v7916_v39, %v10266_v59  ;;  %v7949_v42 = vsel %vm6164_vm13, %v7917_v46, %v10267_v26 }
 0x48c   : > { %v8266_v6 = vsel %vm309_vm12, %v8235_v45, -inf  ;;  %v8109_v11 = vpop.f32.mrf.mxu1  ;;  %v7970_v54 = vpack.c.bf16 %v7949_v42, %v7948_v2  ;;  %v7823_v49 = vsel %vm5868_vm0, %v7791_v19, %v10232_v52  ;;  %v7854_v8 = vsel %vm5934_vm3, %v7822_v29, %v10241_v53 }
 0x48d   : > { %v8265_v63 = vsel %vm309_vm12, %v8233_v41, -inf  ;;  %v8236_v23 = vmax.f32 %v8118_v35, 0.0  ;;  %v8110_v36 = vadd.f32 %v15473_v1, %v8109_v11  ;;  %v7855_v18 = vsel %vm5934_vm3, %v7823_v49, %v10242_v20  ;;  %v8393_v11 = vld [vmem:[#allocation3 + $0x2] sm:$0xff] }
 0x48e   : > { %v8267_v56 = vmax.f32 %v8265_v63, %v8266_v6  ;;  %9742 = vmatprep.mubr.msk.bf16.mxu1 %vm8019_vm8, %v7970_v54  ;;  %v8385_v54 = vld [vmem:[#allocation3 + $0x1] sm:$0xff] }
 0x48f   : > { %v8234_v22 = vmax.f32 %v8110_v36, 0.0  ;;  %v8269_v28 = vsel %vm309_vm12, %v8236_v23, -inf }
 0x490   : > { %8313 = vst.msk [vmem:[#allocation4] sm:$0xff] %vm309_vm12, %v8267_v56 }
 0x491   : > { %v8268_v9 = vsel %vm309_vm12, %v8234_v22, -inf }
 0x492   : > { %v8270_v38 = vmax.f32 %v8268_v9, %v8269_v28 }
 0x494   : > { %8314 = vst.msk [vmem:[#allocation4 + $0x8] sm:$0xff] %vm309_vm12, %v8270_v38 }
 0x499   : > { %v10250_v12 = vpop.permute.xlu1 %10249 }
 0x49a   : > { %v10275_v61 = vpop.permute.xlu0 %10274  ;;  %v10252_v27 = vunpack.i.h.bf16 %v10250_v12  ;;  %v10251_v3 = vunpack.i.l.bf16 %v10250_v12 }
 0x49b   : > { %v8329_v33 = vld [vmem:[#allocation4] ss:$2 sm:$0xff]  ;;  %v8345_v16 = vld [vmem:[#allocation4 + $0x1] ss:$2 sm:$0xff]  ;;  %v10277_v4 = vunpack.i.h.bf16 %v10275_v61  ;;  %v10276_v39 = vunpack.i.l.bf16 %v10275_v61 }
 0x49c   : > { %v8360_v51 = vmax.f32 %v8329_v33, %v8345_v16  ;;  %v7887_v26 = vsel %vm6000_vm6, %v7855_v18, %v10252_v27  ;;  %v7886_v59 = vsel %vm6000_vm6, %v7854_v8, %v10251_v3 }
 0x49d   : > { %v10260_v14 = vpop.permute.xlu1 %10259 }
 0x49e   : > { %v10285_v45 = vpop.permute.xlu0 %10284  ;;  %8369 = vst.msk [vmem:[#allocation3 + $0x11] sm:$0xff] %vm309_vm12, %v8360_v51  ;;  %v10262_v62 = vunpack.i.h.bf16 %v10260_v14  ;;  %v10261_v34 = vunpack.i.l.bf16 %v10260_v14 }
 0x49f   : > { %v10287_v0 = vunpack.i.h.bf16 %v10285_v45  ;;  %v10286_v32 = vunpack.i.l.bf16 %v10285_v45 }
 0x4a0   : > { %v7918_v46 = vsel %vm6066_vm9, %v7886_v59, %v10261_v34  ;;  %v7919_v41 = vsel %vm6066_vm9, %v7887_v26, %v10262_v62 }
 0x4a1   : > { %v10270_v35 = vpop.permute.xlu1 %10269  ;;  %v7950_v42 = vsel %vm6164_vm13, %v7918_v46, %v10276_v39  ;;  %v7951_v6 = vsel %vm6164_vm13, %v7919_v41, %v10277_v4 }
 0x4a2   : > { %v10295_v2 = vpop.permute.xlu0 %10294  ;;  %v7971_v63 = vpack.c.bf16 %v7951_v6, %v7950_v42  ;;  %v10272_v28 = vunpack.i.h.bf16 %v10270_v35  ;;  %v10271_v9 = vunpack.i.l.bf16 %v10270_v35 }
 0x4a3   : > { %v10297_v25 = vunpack.i.h.bf16 %v10295_v2  ;;  %v10296_v52 = vunpack.i.l.bf16 %v10295_v2 }
 0x4a4   : > { %9743 = vmatmul.mubr.msk.bf16.gmra.mxu1 %vm8019_vm8, %v7971_v63  ;;  %v7729_v47 = vsel %vm253_vm10, %v15238_v31, %v10272_v28  ;;  %v7728_v13 = vsel %vm253_vm10, %v15244_v5, %v10271_v9 }
 0x4a5   : > { %v15519_v23 = vld [vmem:[#allocation3 + $0x12] sm:$0xff]  ;;  %v15526_v38 = vpop.permute.xlu1 %10279  ;;  %v7760_v17 = vsel %vm309_vm12, %v7728_v13, %v10286_v32  ;;  %v7761_v48 = vsel %vm309_vm12, %v7729_v47, %v10287_v0 }
 0x4a6   : > { %v15521_v36 = vld [vmem:[#allocation3 + $0x11] sm:$0xff]  ;;  %v10305_v56 = vpop.permute.xlu0 %10304  ;;  %v10438_v22 = vpack.i.bf16 %v15519_v23, %v8393_v11  ;;  %v7792_v61 = vsel %vm5802_vm14, %v7760_v17, %v10296_v52  ;;  %v7793_v31 = vsel %vm5802_vm14, %v7761_v48, %v10297_v25  ;;  %v10281_v63 = vunpack.i.l.bf16 %v15526_v38 }
 0x4a7   : > { %v10433_v55 = vpack.i.bf16 %v15521_v36, %v8385_v54  ;;  %v10307_v10 = vunpack.i.h.bf16 %v10305_v56  ;;  %v10306_v12 = vunpack.i.l.bf16 %v10305_v56  ;;  %v10282_v54 = vunpack.i.h.bf16 %v15526_v38 }
 0x4a8   : > { %10439 = vrot.lane.b32.xlu1 %v10438_v22, %s10705_s10  ;;  %v7730_v17 = vsel %vm253_vm10, %v15273_v37, %v10281_v63 }
 0x4a9   : > { %10434 = vrot.lane.b32.xlu0 %v10433_v55, %s10701_s30  ;;  %v15534_v24 = vpop.permute.xlu1 %10289  ;;  %v7824_v27 = vsel %vm5868_vm0, %v7792_v61, %v10306_v12  ;;  %v7825_v3 = vsel %vm5868_vm0, %v7793_v31, %v10307_v10  ;;  %v7731_v38 = vsel %vm253_vm10, %v15275_v7, %v10282_v54 }
 0x4aa   : > { %v10315_v44 = vpop.permute.xlu0 %10314  ;;  %v10292_v56 = vunpack.i.h.bf16 %v15534_v24  ;;  %v10291_v55 = vunpack.i.l.bf16 %v15534_v24 }
 0x4ab   : > { %v10317_v30 = vunpack.i.h.bf16 %v10315_v44  ;;  %v10316_v40 = vunpack.i.l.bf16 %v10315_v44 }
 0x4ac   : > { %v7762_v10 = vsel %vm309_vm12, %v7730_v17, %v10291_v55  ;;  %v7763_v12 = vsel %vm309_vm12, %v7731_v38, %v10292_v56 }
 0x4ad   : > { %v10300_v33 = vpop.permute.xlu1 %10299  ;;  %v7856_v51 = vsel %vm5934_vm3, %v7824_v27, %v10316_v40  ;;  %v7857_v43 = vsel %vm5934_vm3, %v7825_v3, %v10317_v30 }
 0x4ae   : > { %v10325_v60 = vpop.permute.xlu0 %10324  ;;  %v10302_v0 = vunpack.i.h.bf16 %v10300_v33  ;;  %v10301_v32 = vunpack.i.l.bf16 %v10300_v33 }
 0x4af   : > { %v10327_v20 = vunpack.i.h.bf16 %v10325_v60  ;;  %v10326_v53 = vunpack.i.l.bf16 %v10325_v60 }
 0x4b0   : > { %v7794_v7 = vsel %vm5802_vm14, %v7762_v10, %v10301_v32 }
 0x4b1   : > { %v7888_v29 = vsel %vm6000_vm6, %v7856_v51, %v10326_v53  ;;  %v7889_v49 = vsel %vm6000_vm6, %v7857_v43, %v10327_v20  ;;  %v10310_v26 = vpop.permute.xlu1 %10309  ;;  %v7795_v20 = vsel %vm5802_vm14, %v7763_v12, %v10302_v0 }
 0x4b2   : > { %v10335_v5 = vpop.permute.xlu0 %10334  ;;  %v10312_v48 = vunpack.i.h.bf16 %v10310_v26  ;;  %v10311_v25 = vunpack.i.l.bf16 %v10310_v26 }
 0x4b3   : > { %v10337_v16 = vunpack.i.h.bf16 %v10335_v5  ;;  %v10336_v15 = vunpack.i.l.bf16 %v10335_v5 }
 0x4b4   : > { %v7826_v33 = vsel %vm5868_vm0, %v7794_v7, %v10311_v25 }
 0x4b5   : > { %v7920_v8 = vsel %vm6066_vm9, %v7888_v29, %v10336_v15  ;;  %v7921_v18 = vsel %vm6066_vm9, %v7889_v49, %v10337_v16  ;;  %v10320_v2 = vpop.permute.xlu1 %10319  ;;  %v7827_v16 = vsel %vm5868_vm0, %v7795_v20, %v10312_v48 }
 0x4b6   : > { %v10345_v19 = vpop.permute.xlu0 %10344  ;;  %v10322_v61 = vunpack.i.h.bf16 %v10320_v2  ;;  %v10321_v31 = vunpack.i.l.bf16 %v10320_v2 }
 0x4b7   : > { %v10347_v14 = vunpack.i.h.bf16 %v10345_v19  ;;  %v10346_v45 = vunpack.i.l.bf16 %v10345_v19 }
 0x4b8   : > { %v7858_v3 = vsel %vm5934_vm3, %v7826_v33, %v10321_v31  ;;  %v7859_v51 = vsel %vm5934_vm3, %v7827_v16, %v10322_v61 }
 0x4b9   : > { %v7952_v62 = vsel %vm6164_vm13, %v7920_v8, %v10346_v45  ;;  %v7953_v34 = vsel %vm6164_vm13, %v7921_v18, %v10347_v14 }
 0x4ba   : > { %v7972_v59 = vpack.c.bf16 %v7953_v34, %v7952_v62  ;;  %v9728_v4 = vpop.f32.mrf.mxu1 }
 0x4bb   : > { %v8131_v39 = vadd.f32 %v9728_v4, %v15473_v1 }
 0x4bc   : > { %9746 = vmatprep.mubr.msk.bf16.mxu1 %vm8019_vm8, %v7972_v59  ;;  %v8122_v46 = vpop.f32.mrf.mxu1 }
 0x4bd   : > { %v8239_v41 = vmax.f32 %v8131_v39, 0.0  ;;  %v8123_v35 = vadd.f32 %v15473_v1, %v8122_v46 }
 0x4be   : > { %v9729_v42 = vpop.f32.mrf.mxu1 }
 0x4bf   : > { %v8237_v6 = vmax.f32 %v8123_v35, 0.0  ;;  %v8134_v11 = vadd.f32 %v9729_v42, %v15473_v1  ;;  %v8272_v28 = vsel %vm309_vm12, %v8239_v41, -inf }
 0x4c0   : > { %v8125_v22 = vpop.f32.mrf.mxu1 }
 0x4c1   : > { %v8271_v9 = vsel %vm309_vm12, %v8237_v6, -inf  ;;  %v8126_v44 = vadd.f32 %v15473_v1, %v8125_v22  ;;  %v8240_v13 = vmax.f32 %v8134_v11, 0.0 }
 0x4c2   : > { %v8273_v47 = vmax.f32 %v8271_v9, %v8272_v28 }
 0x4c3   : > { %v8238_v60 = vmax.f32 %v8126_v44, 0.0  ;;  %v8275_v5 = vsel %vm309_vm12, %v8240_v13, -inf }
 0x4c4   : > { %8315 = vst.msk [vmem:[#allocation4 + $0x10] sm:$0xff] %vm309_vm12, %v8273_v47 }
 0x4c5   : > { %v10330_v24 = vpop.permute.xlu1 %10329  ;;  %v8274_v37 = vsel %vm309_vm12, %v8238_v60, -inf }
 0x4c6   : > { %v10355_v52 = vpop.permute.xlu0 %10354  ;;  %v10332_v30 = vunpack.i.h.bf16 %v10330_v24  ;;  %v10331_v40 = vunpack.i.l.bf16 %v10330_v24  ;;  %v8276_v53 = vmax.f32 %v8274_v37, %v8275_v5 }
 0x4c7   : > { %v10357_v14 = vunpack.i.h.bf16 %v10355_v52  ;;  %v10356_v45 = vunpack.i.l.bf16 %v10355_v52 }
 0x4c8   : > { %8316 = vst.msk [vmem:[#allocation4 + $0x18] sm:$0xff] %vm309_vm12, %v8276_v53  ;;  %v7891_v29 = vsel %vm6000_vm6, %v7859_v51, %v10332_v30  ;;  %v7890_v49 = vsel %vm6000_vm6, %v7858_v3, %v10331_v40 }
 0x4c9   : > { %v10340_v15 = vpop.permute.xlu1 %10339 }
 0x4ca   : > { %v10365_v27 = vpop.permute.xlu0 %10364  ;;  %v10342_v43 = vunpack.i.h.bf16 %v10340_v15  ;;  %v10341_v19 = vunpack.i.l.bf16 %v10340_v15 }
 0x4cb   : > { %v10367_v22 = vunpack.i.h.bf16 %v10365_v27  ;;  %v10366_v55 = vunpack.i.l.bf16 %v10365_v27 }
 0x4cc   : > { %v7922_v8 = vsel %vm6066_vm9, %v7890_v49, %v10341_v19  ;;  %v7923_v18 = vsel %vm6066_vm9, %v7891_v29, %v10342_v43 }
 0x4cd   : > { %v10350_v62 = vpop.permute.xlu1 %10349  ;;  %v7954_v26 = vsel %vm6164_vm13, %v7922_v8, %v10356_v45  ;;  %v7955_v59 = vsel %vm6164_vm13, %v7923_v18, %v10357_v14 }
 0x4ce   : > { %v10375_v34 = vpop.permute.xlu0 %10374  ;;  %v7973_v4 = vpack.c.bf16 %v7955_v59, %v7954_v26  ;;  %v10352_v2 = vunpack.i.h.bf16 %v10350_v62  ;;  %v10351_v42 = vunpack.i.l.bf16 %v10350_v62 }
 0x4cf   : > { %v8331_v41 = vld [vmem:[#allocation4 + $0x10] ss:$2 sm:$0xff]  ;;  %v8347_v35 = vld [vmem:[#allocation4 + $0x11] ss:$2 sm:$0xff]  ;;  %v10377_v13 = vunpack.i.h.bf16 %v10375_v34  ;;  %v10376_v0 = vunpack.i.l.bf16 %v10375_v34 }
 0x4d0   : > { %9747 = vmatmul.mubr.msk.bf16.gmra.mxu1 %vm8019_vm8, %v7973_v4  ;;  %v8361_v6 = vmax.f32 %v8331_v41, %v8347_v35  ;;  %v7733_v63 = vsel %vm253_vm10, %v15309_v21, %v10352_v2  ;;  %v7732_v56 = vsel %vm253_vm10, %v15317_v50, %v10351_v42  ;;  %v15601_v50 = vld [vmem:[#allocation3 + $0x10] sm:$0xff] }
 0x4d1   : > { %v15584_v39 = vpop.permute.xlu1 %10359  ;;  %v7764_v28 = vsel %vm309_vm12, %v7732_v56, %v10366_v55  ;;  %v7765_v9 = vsel %vm309_vm12, %v7733_v63, %v10367_v22 }
 0x4d2   : > { %v10385_v46 = vpop.permute.xlu0 %10384  ;;  %8370 = vst.msk [vmem:[#allocation3 + $0x21] sm:$0xff] %vm309_vm12, %v8361_v6  ;;  %v7796_v32 = vsel %vm5802_vm14, %v7764_v28, %v10376_v0  ;;  %v7797_v60 = vsel %vm5802_vm14, %v7765_v9, %v10377_v13  ;;  %v10362_v45 = vunpack.i.h.bf16 %v15584_v39 }
 0x4d3   : > { %v10387_v17 = vunpack.i.h.bf16 %v10385_v46  ;;  %v10386_v21 = vunpack.i.l.bf16 %v10385_v46 }
 0x4d5   : > { %v15586_v11 = vpop.permute.xlu1 %10369  ;;  %v7828_v7 = vsel %vm5868_vm0, %v7796_v32, %v10386_v21  ;;  %v7829_v20 = vsel %vm5868_vm0, %v7797_v60, %v10387_v17 }
 0x4d6   : > { %v10395_v54 = vpop.permute.xlu0 %10394  ;;  %v10372_v62 = vunpack.i.h.bf16 %v15586_v11  ;;  %v10371_v34 = vunpack.i.l.bf16 %v15586_v11 }
 0x4d7   : > { %v10397_v25 = vunpack.i.h.bf16 %v10395_v54  ;;  %v10396_v24 = vunpack.i.l.bf16 %v10395_v54 }
 0x4d9   : > { %v15595_v44 = vpop.permute.xlu1 %10379  ;;  %v15599_v38 = vld [vmem:[#allocation3 + $0x21] sm:$0xff]  ;;  %v7860_v53 = vsel %vm5934_vm3, %v7828_v7, %v10396_v24 }
 0x4da   : > { %v10405_v47 = vpop.permute.xlu0 %10404  ;;  %v15603_v48 = vld [vmem:[#allocation3 + $0x20] sm:$0xff]  ;;  %v10448_v12 = vpack.i.bf16 %v15599_v38, %v15521_v36  ;;  %v7861_v36 = vsel %vm5934_vm3, %v7829_v20, %v10397_v25  ;;  %v10382_v26 = vunpack.i.h.bf16 %v15595_v44  ;;  %v10381_v59 = vunpack.i.l.bf16 %v15595_v44 }
 0x4db   : > { %v10443_v61 = vpack.i.bf16 %v15603_v48, %v15601_v50  ;;  %v10407_v31 = vunpack.i.h.bf16 %v10405_v47  ;;  %v10406_v30 = vunpack.i.l.bf16 %v10405_v47  ;;  %v15609_v40 = vld [vmem:[#allocation3 + $0x22] sm:$0xff] }
 0x4dc   : > { %10449 = vrot.lane.b32.xlu1 %v10448_v12, %s10714_s26  ;;  %v10453_v15 = vpack.i.bf16 %v15609_v40, %v15519_v23  ;;  %v10361_v23 = vunpack.i.l.bf16 %v15584_v39  ;;  %v7735_v39 = vsel %vm253_vm10, %v15372_v57, %v10362_v45 }
 0x4dd   : > { %v10390_v52 = vpop.permute.xlu1 %10389  ;;  %10444 = vrot.lane.b32.xlu0 %v10443_v61, %s10709_s14  ;;  %v7892_v27 = vsel %vm6000_vm6, %v7860_v53, %v10406_v30  ;;  %v7893_v3 = vsel %vm6000_vm6, %v7861_v36, %v10407_v31  ;;  %v7767_v11 = vsel %vm309_vm12, %v7735_v39, %v10372_v62  ;;  %v10650_v62 = vld [vmem:[%s15932_s3 + $0x18] sm:$0xff]   ;;  %v10651_v39 = vld [vmem:[%s15932_s3 + $0x10] sm:$0xff]  }
 0x4de   : > { %v10415_v10 = vpop.permute.xlu0 %10414  ;;  %v10392_v4 = vunpack.i.h.bf16 %v10390_v52  ;;  %v10391_v46 = vunpack.i.l.bf16 %v10390_v52  ;;  %v7734_v41 = vsel %vm253_vm10, %v15370_v58, %v10361_v23  ;;  %v7799_v22 = vsel %vm5802_vm14, %v7767_v11, %v10382_v26  ;;  %v10653_v11 = vld [vmem:[%s15932_s3] sm:$0xff]  }
 0x4df   : > { %v10417_v5 = vunpack.i.h.bf16 %v10415_v10  ;;  %v10416_v37 = vunpack.i.l.bf16 %v10415_v10  ;;  %v7766_v6 = vsel %vm309_vm12, %v7734_v41, %v10371_v34  ;;  %vm8706_vm10 = vcmask 654336  }
 0x4e0   : > { %v7798_v56 = vsel %vm5802_vm14, %v7766_v6, %v10381_v59  ;;  %v7831_v9 = vsel %vm5868_vm0, %v7799_v22, %v10392_v4  ;;  %vm8715_vm14 = vcmask 785408  }
 0x4e1   : > { %v10400_v33 = vpop.permute.xlu1 %10399  ;;  %v7924_v19 = vsel %vm6066_vm9, %v7892_v27, %v10416_v37  ;;  %v7925_v29 = vsel %vm6066_vm9, %v7893_v3, %v10417_v5  ;;  %10454 = vrot.lane.b32.xlu0 %v10453_v15, %s10715_s12  ;;  %v7830_v58 = vsel %vm5868_vm0, %v7798_v56, %v10391_v46 }
 0x4e2   : > { %v10425_v16 = vpop.permute.xlu0 %10424  ;;  %v10402_v35 = vunpack.i.h.bf16 %v10400_v33  ;;  %v10401_v2 = vunpack.i.l.bf16 %v10400_v33 }
 0x4e3   : > { %v10427_v51 = vunpack.i.h.bf16 %v10425_v16  ;;  %v10426_v43 = vunpack.i.l.bf16 %v10425_v16 }
 0x4e4   : > { %v7862_v57 = vsel %vm5934_vm3, %v7830_v58, %v10401_v2  ;;  %v7863_v44 = vsel %vm5934_vm3, %v7831_v9, %v10402_v35 }
 0x4e5   : > { %v7956_v49 = vsel %vm6164_vm13, %v7924_v19, %v10426_v43  ;;  %v7957_v14 = vsel %vm6164_vm13, %v7925_v29, %v10427_v51  ;;  %v10410_v18 = vpop.permute.xlu1 %10409  ;;  %v10646_v19 = vld [vmem:[%s15932_s3 + $0x38] sm:$0xff]   ;;  %v10716_v29 = vmov 0  }
 0x4e6   : > { %v7974_v8 = vpack.c.bf16 %v7957_v14, %v7956_v49  ;;  %v10412_v54 = vunpack.i.h.bf16 %v10410_v18  ;;  %v10411_v63 = vunpack.i.l.bf16 %v10410_v18  ;;  %8832 = vmatprep.subr.bf16.mxu0 %v10716_v29  ;;  %v10647_v49 = vld [vmem:[%s15932_s3 + $0x30] sm:$0xff]   ;;  %v10648_v14 = vld [vmem:[%s15932_s3 + $0x28] sm:$0xff]   ;;  %v10649_v18 = vld [vmem:[%s15932_s3 + $0x20] sm:$0xff]  }
 0x4e7   : > { %8833 = vmatpush1.bf16.msra.mxu0 %v10646_v19 }
 0x4e8   : > { %9750 = vmatprep.mubr.msk.bf16.mxu1 %vm8019_vm8, %v7974_v8  ;;  %v7894_v13 = vsel %vm6000_vm6, %v7862_v57, %v10411_v63  ;;  %v7895_v0 = vsel %vm6000_vm6, %v7863_v44, %v10412_v54  ;;  %8834 = vmatprep.subr.bf16.mxu0 %v10716_v29 }
 0x4e9   : > { %v10420_v42 = vpop.permute.xlu1 %10419 }
 0x4ea   : > { %v10422_v55 = vunpack.i.h.bf16 %v10420_v42  ;;  %v10421_v28 = vunpack.i.l.bf16 %v10420_v42 }
 0x4eb   : > { %8835 = vmatpush1.bf16.msra.mxu0 %v10647_v49 }
 0x4ec   : > { %v7926_v17 = vsel %vm6066_vm9, %v7894_v13, %v10421_v28  ;;  %v7927_v21 = vsel %vm6066_vm9, %v7895_v0, %v10422_v55  ;;  %8836 = vmatprep.subr.bf16.mxu0 %v10716_v29  ;;  %v10654_v28 = vld [vmem:[%s15932_s3 + $0x40] sm:$0xff]  }
 0x4ed   : > { %v10430_v47 = vpop.permute.xlu1 %10429 }
 0x4ee   : > { %v10432_v32 = vunpack.i.h.bf16 %v10430_v47  ;;  %v10431_v60 = vunpack.i.l.bf16 %v10430_v47 }
 0x4ef   : > { %v9732_v10 = vpop.f32.mrf.mxu1  ;;  %8837 = vmatpush1.bf16.msra.mxu0 %v10648_v14 }
 0x4f0   : > { %v7958_v25 = vsel %vm6164_vm13, %v7926_v17, %v10431_v60  ;;  %v7959_v24 = vsel %vm6164_vm13, %v7927_v21, %v10432_v32  ;;  %v8147_v12 = vadd.f32 %v9732_v10, %v15473_v1  ;;  %8838 = vmatprep.subr.bf16.mxu0 %v10716_v29 }
 0x4f1   : > { %v7975_v52 = vpack.c.bf16 %v7959_v24, %v7958_v25  ;;  %v8138_v61 = vpop.f32.mrf.mxu1 }
 0x4f2   : > { %v8243_v31 = vmax.f32 %v8147_v12, 0.0  ;;  %v8139_v30 = vadd.f32 %v15473_v1, %v8138_v61 }
 0x4f3   : > { %9751 = vmatmul.mubr.msk.bf16.gmra.mxu1 %vm8019_vm8, %v7975_v52  ;;  %v9733_v5 = vpop.f32.mrf.mxu1  ;;  %8839 = vmatpush1.bf16.msra.mxu0 %v10649_v18 }
 0x4f4   : > { %v8241_v37 = vmax.f32 %v8139_v30, 0.0  ;;  %v8150_v7 = vadd.f32 %v9733_v5, %v15473_v1  ;;  %v8278_v53 = vsel %vm309_vm12, %v8243_v31, -inf  ;;  %8840 = vmatprep.subr.bf16.mxu0 %v10716_v29 }
 0x4f5   : > { %v8141_v20 = vpop.f32.mrf.mxu1 }
 0x4f6   : > { %v8277_v36 = vsel %vm309_vm12, %v8241_v37, -inf  ;;  %v8244_v33 = vmax.f32 %v8150_v7, 0.0  ;;  %v8142_v16 = vadd.f32 %v15473_v1, %v8141_v20 }
 0x4f7   : > { %v8279_v15 = vmax.f32 %v8277_v36, %v8278_v53  ;;  %8841 = vmatpush1.bf16.msra.mxu0 %v10650_v62 }
 0x4f8   : > { %v8242_v27 = vmax.f32 %v8142_v16, 0.0  ;;  %v8281_v3 = vsel %vm309_vm12, %v8244_v33, -inf  ;;  %8842 = vmatprep.subr.bf16.mxu0 %v10716_v29 }
 0x4f9   : > { %8317 = vst.msk [vmem:[#allocation4 + $0x20] sm:$0xff] %vm309_vm12, %v8279_v15 }
 0x4fa   : > { %v8280_v51 = vsel %vm309_vm12, %v8242_v27, -inf }
 0x4fb   : > { %v8282_v43 = vmax.f32 %v8280_v51, %v8281_v3  ;;  %8843 = vmatpush1.bf16.msra.mxu0 %v10651_v39 }
 0x4fc   : > { %8844 = vmatprep.subr.bf16.mxu0 %v10716_v29 }
 0x4fd   : > { %8318 = vst.msk [vmem:[#allocation4 + $0x28] sm:$0xff] %vm309_vm12, %v8282_v43 }
 0x504   : > { %v8333_v45 = vld [vmem:[#allocation4 + $0x20] ss:$2 sm:$0xff]  ;;  %v8349_v23 = vld [vmem:[#allocation4 + $0x21] ss:$2 sm:$0xff] }
 0x505   : > { %v8362_v8 = vmax.f32 %v8333_v45, %v8349_v23 }
 0x507   : > { %8371 = vst.msk [vmem:[#allocation3 + $0x31] sm:$0xff] %vm309_vm12, %v8362_v8 }
 0x50e   : > { %v15678_v34 = vld [vmem:[#allocation3 + $0x32] sm:$0xff] }
 0x50f   : > { %v15680_v26 = vld [vmem:[#allocation3 + $0x30] sm:$0xff]  ;;  %v8734_v4 = vpack.c.bf16 %v15678_v34, %v15609_v40  ;;  %v10473_v35 = vpack.i.bf16 %v15678_v34, %v15609_v40 }
 0x510   : > { %v8435_v59 = vld [vmem:[#allocation3 + $0x31] sm:$0xff]  ;;  %v10458_v46 = vpack.i.bf16 %v15680_v26, %v15603_v48 }
 0x511   : > { %v10463_v41 = vpack.i.bf16 %v8435_v59, %v15599_v38  ;;  %9624 = vmatprep.mubr.msk.bf16.mxu0 %vm309_vm12, %v8734_v4  ;;  %v10652_v38 = vld [vmem:[%s15932_s3 + $0x8] sm:$0xff]  }
 0x512   : > { %10459 = vrot.lane.b32.xlu1 %v10458_v46, %s10717_s19  ;;  %8845 = vmatpush1.bf16.msra.mxu0 %v10652_v38 }
 0x513   : > { %10464 = vrot.lane.b32.xlu0 %v10463_v41, %s10718_s20  ;;  %8846 = vmatprep.subr.bf16.mxu0 %v10716_v29 }
 0x516   : > { %10469 = vrot.lane.b32.xlu1 %v10463_v41, %s10701_s30  ;;  %v9736_v2 = vpop.f32.mrf.mxu1  ;;  %8847 = vmatpush1.bf16.msra.mxu0 %v10653_v11 }
 0x517   : > { %10474 = vrot.lane.b32.xlu0 %v10473_v35, %s10705_s10  ;;  %v8163_v42 = vadd.f32 %v9736_v2, %v15473_v1  ;;  %8862 = vmatprep.subr.bf16.mxu0 %v10716_v29 }
 0x518   : > { %v8154_v6 = vpop.f32.mrf.mxu1 }
 0x519   : > { %v8247_v54 = vmax.f32 %v8163_v42, 0.0  ;;  %v8155_v40 = vadd.f32 %v15473_v1, %v8154_v6 }
 0x51a   : > { %v9737_v63 = vpop.f32.mrf.mxu1  ;;  %8863 = vmatpush2.bf16.msra.mxu0 %v10654_v28 }
 0x51b   : > { %v8245_v56 = vmax.f32 %v8155_v40, 0.0  ;;  %v8166_v22 = vadd.f32 %v9737_v63, %v15473_v1  ;;  %v8284_v58 = vsel %vm309_vm12, %v8247_v54, -inf }
 0x51c   : > { %v8157_v55 = vpop.f32.mrf.mxu1 }
 0x51d   : > { %v8283_v9 = vsel %vm309_vm12, %v8245_v56, -inf  ;;  %v8248_v57 = vmax.f32 %v8166_v22, 0.0  ;;  %v8158_v44 = vadd.f32 %v15473_v1, %v8157_v55 }
 0x51e   : > { %v8285_v47 = vmax.f32 %v8283_v9, %v8284_v58 }
 0x51f   : > { %v8246_v13 = vmax.f32 %v8158_v44, 0.0  ;;  %v8287_v0 = vsel %vm309_vm12, %v8248_v57, -inf  ;;  %v10435_v44 = vpop.permute.xlu0 %10434 }
 0x520   : > { %8319 = vst.msk [vmem:[#allocation4 + $0x30] sm:$0xff] %vm309_vm12, %v8285_v47 }
 0x521   : > { %v8286_v32 = vsel %vm309_vm12, %v8246_v13, -inf }
 0x522   : > { %v8288_v60 = vmax.f32 %v8286_v32, %v8287_v0  ;;  %v10440_v32 = vpop.permute.xlu1 %10439 }
 0x524   : > { %8320 = vst.msk [vmem:[#allocation4 + $0x38] sm:$0xff] %vm309_vm12, %v8288_v60  ;;  %v10437_v60 = vunpack.i.h.bf16 %v10435_v44 }
 0x52b   : > { %v8335_v17 = vld [vmem:[#allocation4 + $0x30] ss:$2 sm:$0xff]  ;;  %v8351_v21 = vld [vmem:[#allocation4 + $0x31] ss:$2 sm:$0xff] }
 0x52c   : > { %v8363_v25 = vmax.f32 %v8335_v17, %v8351_v21  ;;  %v10436_v17 = vunpack.i.l.bf16 %v10435_v44 }
 0x52e   : > { %8372 = vst.msk [vmem:[#allocation3 + $0x41] sm:$0xff] %vm309_vm12, %v8363_v25  ;;  %v10442_v25 = vunpack.i.h.bf16 %v10440_v32 }
 0x535   : > { %v15717_v24 = vld [vmem:[#allocation3 + $0x40] sm:$0xff] }
 0x536   : > { %v8412_v52 = vld [vmem:[#allocation3 + $0x41] sm:$0xff]  ;;  %v10478_v10 = vpack.i.bf16 %v15717_v24, %v15680_v26 }
 0x537   : > { %v10483_v12 = vpack.i.bf16 %v8412_v52, %v8435_v59  ;;  %v9740_v61 = vpop.f32.mrf.mxu1  ;;  %v15722_v30 = vld [vmem:[#allocation3 + $0x42] sm:$0xff] }
 0x538   : > { %v8179_v31 = vadd.f32 %v9740_v61, %v15473_v1  ;;  %10479 = vrot.lane.b32.xlu1 %v10478_v10, %s10709_s14  ;;  %v10488_v20 = vpack.i.bf16 %v15722_v30, %v15678_v34 }
 0x539   : > { %10484 = vrot.lane.b32.xlu0 %v10483_v12, %s10714_s26  ;;  %v8170_v5 = vpop.f32.mrf.mxu1  ;;  %v8675_v12 = vsel %vm309_vm12, %v15601_v50, %v10437_v60 }
 0x53a   : > { %v8251_v37 = vmax.f32 %v8179_v31, 0.0  ;;  %v8171_v7 = vadd.f32 %v15473_v1, %v8170_v5 }
 0x53b   : > { %v9741_v53 = vpop.f32.mrf.mxu1 }
 0x53c   : > { %v8249_v36 = vmax.f32 %v8171_v7, 0.0  ;;  %v8182_v33 = vadd.f32 %v9741_v53, %v15473_v1  ;;  %10489 = vrot.lane.b32.xlu1 %v10488_v20, %s10715_s12  ;;  %v8290_v15 = vsel %vm309_vm12, %v8251_v37, -inf }
 0x53d   : > { %v8173_v16 = vpop.f32.mrf.mxu1 }
 0x53e   : > { %v8289_v27 = vsel %vm309_vm12, %v8249_v36, -inf  ;;  %v8252_v3 = vmax.f32 %v8182_v33, 0.0  ;;  %v8174_v51 = vadd.f32 %v15473_v1, %v8173_v16  ;;  %v8683_v36 = vsel %vm5868_vm0, %v8675_v12, %v10442_v25 }
 0x53f   : > { %v8291_v43 = vmax.f32 %v8289_v27, %v8290_v15 }
 0x540   : > { %v8250_v19 = vmax.f32 %v8174_v51, 0.0  ;;  %v8293_v29 = vsel %vm309_vm12, %v8252_v3, -inf }
 0x541   : > { %8321 = vst.msk [vmem:[#allocation4 + $0x40] sm:$0xff] %vm309_vm12, %v8291_v43 }
 0x542   : > { %v8292_v49 = vsel %vm309_vm12, %v8250_v19, -inf }
 0x543   : > { %v8294_v14 = vmax.f32 %v8292_v49, %v8293_v29 }
 0x545   : > { %8322 = vst.msk [vmem:[#allocation4 + $0x48] sm:$0xff] %vm309_vm12, %v8294_v14 }
 0x54c   : > { %v8337_v45 = vld [vmem:[#allocation4 + $0x40] ss:$2 sm:$0xff]  ;;  %v8353_v23 = vld [vmem:[#allocation4 + $0x41] ss:$2 sm:$0xff] }
 0x54d   : > { %v8364_v8 = vmax.f32 %v8337_v45, %v8353_v23 }
 0x54e   : > { %v10450_v61 = vpop.permute.xlu1 %10449 }
 0x54f   : > { %8373 = vst.msk [vmem:[#allocation3 + $0x51] sm:$0xff] %vm309_vm12, %v8364_v8  ;;  %v10445_v47 = vpop.permute.xlu0 %10444  ;;  %v10452_v7 = vunpack.i.h.bf16 %v10450_v61  ;;  %v10451_v20 = vunpack.i.l.bf16 %v10450_v61 }
 0x550   : > { %v10447_v31 = vunpack.i.h.bf16 %v10445_v47  ;;  %v10446_v5 = vunpack.i.l.bf16 %v10445_v47 }
 0x552   : > { %v8691_v16 = vsel %vm6000_vm6, %v8683_v36, %v10447_v31 }
 0x553   : > { %v10455_v37 = vpop.permute.xlu0 %10454  ;;  %v8699_v49 = vsel %vm6164_vm13, %v8691_v16, %v10452_v7 }
 0x554   : > { %v10457_v15 = vunpack.i.h.bf16 %v10455_v37  ;;  %v10456_v27 = vunpack.i.l.bf16 %v10455_v37 }
 0x556   : > { %v15739_v18 = vld [vmem:[#allocation3 + $0x51] sm:$0xff] }
 0x557   : > { %v15741_v62 = vld [vmem:[#allocation3 + $0x50] sm:$0xff]  ;;  %v10498_v34 = vpack.i.bf16 %v15739_v18, %v8412_v52  ;;  %v10441_v52 = vunpack.i.l.bf16 %v10440_v32 }
 0x558   : > { %v10493_v59 = vpack.i.bf16 %v15741_v62, %v15717_v24  ;;  %v15746_v4 = vld [vmem:[#allocation3 + $0x52] sm:$0xff] }
 0x559   : > { %10499 = vrot.lane.b32.xlu1 %v10498_v34, %s10718_s20  ;;  %v10508_v46 = vpack.i.bf16 %v15746_v4, %v15722_v30 }
 0x55a   : > { %10494 = vrot.lane.b32.xlu0 %v10493_v59, %s10717_s19  ;;  %v8708_v59 = vsel %vm8706_vm10, %v8699_v49, %v10457_v15 }
 0x55d   : > { %10509 = vrot.lane.b32.xlu1 %v10508_v46, %s10705_s10 }
 0x55e   : > { %10504 = vrot.lane.b32.xlu0 %v10498_v34, %s10701_s30 }
 0x564   : > { %v9744_v41 = vpop.f32.mrf.mxu1 }
 0x565   : > { %v8195_v39 = vadd.f32 %v9744_v41, %v15473_v1 }
 0x566   : > { %v8186_v35 = vpop.f32.mrf.mxu1 }
 0x567   : > { %v8255_v38 = vmax.f32 %v8195_v39, 0.0  ;;  %v8187_v2 = vadd.f32 %v15473_v1, %v8186_v35 }
 0x568   : > { %v9745_v42 = vpop.f32.mrf.mxu1 }
 0x569   : > { %v8253_v6 = vmax.f32 %v8187_v2, 0.0  ;;  %v8198_v11 = vadd.f32 %v9745_v42, %v15473_v1  ;;  %v8296_v40 = vsel %vm309_vm12, %v8255_v38, -inf }
 0x56a   : > { %v8189_v54 = vpop.f32.mrf.mxu1 }
 0x56b   : > { %v8295_v63 = vsel %vm309_vm12, %v8253_v6, -inf  ;;  %v8256_v56 = vmax.f32 %v8198_v11, 0.0  ;;  %v8190_v22 = vadd.f32 %v15473_v1, %v8189_v54  ;;  %v8377_v1 = vld [vmem:[#allocation3] sm:$0xff]  ;;  %v8736_v6 = vpack.c.bf16 %v15746_v4, %v15722_v30  ;;  %v10689_v54 = vld [vmem:[%s15933_s4] ss:$0 sm:$0xff] }
 0x56c   : > { %v8297_v55 = vmax.f32 %v8295_v63, %v8296_v40  ;;  %v8674_v10 = vsel %vm309_vm12, %v8377_v1, %v10436_v17 }
 0x56d   : > { %v8254_v28 = vmax.f32 %v8190_v22, 0.0  ;;  %v8299_v58 = vsel %vm309_vm12, %v8256_v56, -inf  ;;  %v8682_v53 = vsel %vm5868_vm0, %v8674_v10, %v10441_v52 }
 0x56e   : > { %8323 = vst.msk [vmem:[#allocation4 + $0x50] sm:$0xff] %vm309_vm12, %v8297_v55  ;;  %v8690_v33 = vsel %vm6000_vm6, %v8682_v53, %v10446_v5 }
 0x56f   : > { %v8298_v9 = vsel %vm309_vm12, %v8254_v28, -inf  ;;  %v8698_v29 = vsel %vm6164_vm13, %v8690_v33, %v10451_v20 }
 0x570   : > { %v8300_v57 = vmax.f32 %v8298_v9, %v8299_v58  ;;  %v8707_v34 = vsel %vm8706_vm10, %v8698_v29, %v10456_v27 }
 0x572   : > { %8324 = vst.msk [vmem:[#allocation4 + $0x58] sm:$0xff] %vm309_vm12, %v8300_v57 }
 0x579   : > { %v8339_v13 = vld [vmem:[#allocation4 + $0x50] ss:$2 sm:$0xff]  ;;  %v8355_v0 = vld [vmem:[#allocation4 + $0x51] ss:$2 sm:$0xff] }
 0x57a   : > { %v8365_v21 = vmax.f32 %v8339_v13, %v8355_v0 }
 0x57c   : > { %8374 = vst.msk [vmem:[#allocation3 + $0x61] sm:$0xff] %vm309_vm12, %v8365_v21 }
 0x583   : > { %v8414_v3 = vld [vmem:[#allocation3 + $0x61] sm:$0xff] }
 0x584   : > { %v15772_v51 = vld [vmem:[#allocation3 + $0x60] sm:$0xff]  ;;  %v10518_v50 = vpack.i.bf16 %v8414_v3, %v15739_v18  ;;  %v10460_v19 = vpop.permute.xlu1 %10459 }
 0x585   : > { %v10513_v43 = vpack.i.bf16 %v15772_v51, %v15741_v62  ;;  %v15779_v14 = vld [vmem:[#allocation3 + $0x62] sm:$0xff]  ;;  %v10462_v45 = vunpack.i.h.bf16 %v10460_v19  ;;  %v10461_v23 = vunpack.i.l.bf16 %v10460_v19  ;;  %v10465_v8 = vpop.permute.xlu0 %10464 }
 0x586   : > { %10519 = vrot.lane.b32.xlu1 %v10518_v50, %s10714_s26  ;;  %v10467_v18 = vunpack.i.h.bf16 %v10465_v8  ;;  %v10466_v46 = vunpack.i.l.bf16 %v10465_v8  ;;  %v10523_v35 = vpack.i.bf16 %v15779_v14, %v15746_v4 }
 0x587   : > { %10514 = vrot.lane.b32.xlu0 %v10513_v43, %s10709_s14  ;;  %v8716_v41 = vsel %vm8715_vm14, %v8707_v34, %v10461_v23  ;;  %v8717_v39 = vsel %vm8715_vm14, %v8708_v59, %v10462_v45 }
 0x588   : > { %v8725_v38 = vsel %vm8724_vm1, %v8716_v41, %v10466_v46  ;;  %v8726_v2 = vsel %vm8724_vm1, %v8717_v39, %v10467_v18  ;;  %v10470_v49 = vpop.permute.xlu1 %10469 }
 0x589   : > { %v8733_v42 = vpack.c.bf16 %v8726_v2, %v8725_v38  ;;  %v10472_v34 = vunpack.i.h.bf16 %v10470_v49  ;;  %v10471_v59 = vunpack.i.l.bf16 %v10470_v49  ;;  %v10475_v18 = vpop.permute.xlu0 %10474 }
 0x58a   : > { %v10477_v41 = vunpack.i.h.bf16 %v10475_v18  ;;  %v10476_v39 = vunpack.i.l.bf16 %v10475_v18 }
 0x58b   : > { %10524 = vrot.lane.b32.xlu0 %v10523_v35, %s10715_s12  ;;  %8865 = vmatmul.mubr.bf16.vlgmr.msra.gmra.mxu0 %v8733_v42  ;;  %v8677_v35 = vsel %vm309_vm12, %v15680_v26, %v10472_v34  ;;  %v8676_v38 = vsel %vm309_vm12, %v15603_v48, %v10471_v59 }
 0x58c   : > { %9625 = vmatprep.mubr.msk.bf16.mxu0 %vm309_vm12, %v8736_v6 }
 0x590   : > { %v9748_v11 = vpop.f32.mrf.mxu1 }
 0x591   : > { %v8211_v40 = vadd.f32 %v10689_v54, %v9748_v11 }
 0x592   : > { %v8202_v63 = vpop.f32.mrf.mxu1 }
 0x593   : > { %v8259_v56 = vmax.f32 %v8211_v40, 0.0  ;;  %v8203_v22 = vadd.f32 %v10689_v54, %v8202_v63  ;;  %v8684_v40 = vsel %vm5868_vm0, %v8676_v38, %v10476_v39 }
 0x594   : > { %v9749_v55 = vpop.f32.mrf.mxu1 }
 0x595   : > { %v8257_v28 = vmax.f32 %v8203_v22, 0.0  ;;  %v8214_v58 = vadd.f32 %v10689_v54, %v9749_v55  ;;  %v8302_v57 = vsel %vm309_vm12, %v8259_v56, -inf }
 0x596   : > { %v8205_v9 = vpop.f32.mrf.mxu1 }
 0x597   : > { %v8301_v30 = vsel %vm309_vm12, %v8257_v28, -inf  ;;  %v8260_v4 = vmax.f32 %v8214_v58, 0.0  ;;  %v8206_v44 = vadd.f32 %v10689_v54, %v8205_v9 }
 0x598   : > { %v8303_v47 = vmax.f32 %v8301_v30, %v8302_v57 }
 0x599   : > { %v8258_v13 = vmax.f32 %v8206_v44, 0.0  ;;  %v8305_v0 = vsel %vm309_vm12, %v8260_v4, -inf }
 0x59a   : > { %8325 = vst.msk [vmem:[#allocation4 + $0x60] sm:$0xff] %vm309_vm12, %v8303_v47 }
 0x59b   : > { %v8304_v32 = vsel %vm309_vm12, %v8258_v13, -inf }
 0x59c   : > { %v8306_v60 = vmax.f32 %v8304_v32, %v8305_v0 }
 0x59e   : > { %8326 = vst.msk [vmem:[#allocation4 + $0x68] sm:$0xff] %vm309_vm12, %v8306_v60 }
 0x5a5   : > { %v8341_v17 = vld [vmem:[#allocation4 + $0x60] ss:$2 sm:$0xff]  ;;  %v8357_v21 = vld [vmem:[#allocation4 + $0x61] ss:$2 sm:$0xff] }
 0x5a6   : > { %v8366_v1 = vmax.f32 %v8341_v17, %v8357_v21 }
 0x5a8   : > { %8375 = vst.msk [vmem:[#allocation3 + $0x71] sm:$0xff] %vm309_vm12, %v8366_v1 }
 0x5aa   : > { %v10480_v46 = vpop.permute.xlu1 %10479 }
 0x5ab   : > { %v10482_v2 = vunpack.i.h.bf16 %v10480_v46  ;;  %v10481_v42 = vunpack.i.l.bf16 %v10480_v46  ;;  %v10485_v6 = vpop.permute.xlu0 %10484 }
 0x5ac   : > { %v10487_v22 = vunpack.i.h.bf16 %v10485_v6  ;;  %v10486_v55 = vunpack.i.l.bf16 %v10485_v6 }
 0x5ad   : > { %v8692_v58 = vsel %vm6000_vm6, %v8684_v40, %v10481_v42 }
 0x5ae   : > { %v10490_v11 = vpop.permute.xlu1 %10489  ;;  %v8700_v48 = vsel %vm6164_vm13, %v8692_v58, %v10486_v55 }
 0x5af   : > { %v15805_v25 = vld [vmem:[#allocation3 + $0x70] sm:$0xff]  ;;  %v10492_v9 = vunpack.i.h.bf16 %v10490_v11  ;;  %v10491_v57 = vunpack.i.l.bf16 %v10490_v11 }
 0x5b0   : > { %v15807_v52 = vld [vmem:[#allocation3 + $0x71] sm:$0xff]  ;;  %v10528_v10 = vpack.i.bf16 %v15805_v25, %v15772_v51 }
 0x5b1   : > { %v10533_v12 = vpack.i.bf16 %v15807_v52, %v8414_v3  ;;  %v15812_v61 = vld [vmem:[#allocation3 + $0x72] sm:$0xff]  ;;  %v8709_v60 = vsel %vm8706_vm10, %v8700_v48, %v10491_v57 }
 0x5b2   : > { %10529 = vrot.lane.b32.xlu1 %v10528_v10, %s10717_s19  ;;  %v10543_v7 = vpack.i.bf16 %v15812_v61, %v15779_v14  ;;  %v8449_v57 = vld [vmem:[#allocation3 + $0x92] sm:$0xff] }
 0x5b3   : > { %10534 = vrot.lane.b32.xlu0 %v10533_v12, %s10718_s20  ;;  %v9752_v31 = vpop.f32.mrf.mxu1 }
 0x5b4   : > { %v8227_v5 = vadd.f32 %v10689_v54, %v9752_v31 }
 0x5b5   : > { %v8218_v37 = vpop.f32.mrf.mxu1 }
 0x5b6   : > { %v8263_v20 = vmax.f32 %v8227_v5, 0.0  ;;  %v8219_v53 = vadd.f32 %v10689_v54, %v8218_v37  ;;  %10539 = vrot.lane.b32.xlu1 %v10533_v12, %s10701_s30 }
 0x5b7   : > { %10544 = vrot.lane.b32.xlu0 %v10543_v7, %s10705_s10  ;;  %v9753_v36 = vpop.f32.mrf.mxu1 }
 0x5b8   : > { %v8261_v33 = vmax.f32 %v8219_v53, 0.0  ;;  %v8230_v16 = vadd.f32 %v10689_v54, %v9753_v36  ;;  %v8308_v27 = vsel %vm309_vm12, %v8263_v20, -inf  ;;  %v8433_v36 = vld [vmem:[#allocation3 + $0x90] sm:$0xff] }
 0x5b9   : > { %v8221_v15 = vpop.f32.mrf.mxu1 }
 0x5ba   : > { %v8307_v3 = vsel %vm309_vm12, %v8261_v33, -inf  ;;  %v8264_v50 = vmax.f32 %v8230_v16, 0.0  ;;  %v8222_v43 = vadd.f32 %v10689_v54, %v8221_v15  ;;  %v8685_v54 = vsel %vm5868_vm0, %v8677_v35, %v10477_v41 }
 0x5bb   : > { %v8309_v19 = vmax.f32 %v8307_v3, %v8308_v27  ;;  %v8693_v26 = vsel %vm6000_vm6, %v8685_v54, %v10482_v2  ;;  %v8738_v33 = vpack.c.bf16 %v15812_v61, %v15779_v14  ;;  %v8441_v27 = vld [vmem:[#allocation3 + $0x91] sm:$0xff] }
 0x5bc   : > { %v8262_v29 = vmax.f32 %v8222_v43, 0.0  ;;  %v8311_v45 = vsel %vm309_vm12, %v8264_v50, -inf  ;;  %v8701_v30 = vsel %vm6164_vm13, %v8693_v26, %v10487_v22 }
 0x5bd   : > { %8327 = vst.msk [vmem:[#allocation4 + $0x70] sm:$0xff] %vm309_vm12, %v8309_v19  ;;  %v8710_v17 = vsel %vm8706_vm10, %v8701_v30, %v10492_v9 }
 0x5be   : > { %v8310_v23 = vsel %vm309_vm12, %v8262_v29, -inf }
 0x5bf   : > { %v8312_v8 = vmax.f32 %v8310_v23, %v8311_v45 }
 0x5c1   : > { %8328 = vst.msk [vmem:[#allocation4 + $0x78] sm:$0xff] %vm309_vm12, %v8312_v8 }
 0x5c8   : > { %v8343_v63 = vld [vmem:[#allocation4 + $0x70] ss:$2 sm:$0xff]  ;;  %v8359_v56 = vld [vmem:[#allocation4 + $0x71] ss:$2 sm:$0xff] }
 0x5c9   : > { %v8367_v28 = vmax.f32 %v8343_v63, %v8359_v56 }
 0x5cb   : > { %8376 = vst.msk [vmem:[#allocation3 + $0x81] sm:$0xff] %vm309_vm12, %v8367_v28  ;;  %v10500_v4 = vpop.permute.xlu1 %10499 }
 0x5cc   : > { %v10495_v44 = vpop.permute.xlu0 %10494  ;;  %v10502_v47 = vunpack.i.h.bf16 %v10500_v4  ;;  %v10501_v13 = vunpack.i.l.bf16 %v10500_v4 }
 0x5cd   : > { %v10497_v0 = vunpack.i.h.bf16 %v10495_v44  ;;  %v10496_v32 = vunpack.i.l.bf16 %v10495_v44 }
 0x5cf   : > { %v8718_v21 = vsel %vm8715_vm14, %v8709_v60, %v10496_v32  ;;  %v8719_v1 = vsel %vm8715_vm14, %v8710_v17, %v10497_v0  ;;  %v10510_v50 = vpop.permute.xlu1 %10509 }
 0x5d0   : > { %v8727_v10 = vsel %vm8724_vm1, %v8718_v21, %v10501_v13  ;;  %v8728_v12 = vsel %vm8724_vm1, %v8719_v1, %v10502_v47  ;;  %v10505_v3 = vpop.permute.xlu0 %10504  ;;  %v10512_v29 = vunpack.i.h.bf16 %v10510_v50  ;;  %v10511_v49 = vunpack.i.l.bf16 %v10510_v50 }
 0x5d1   : > { %v8735_v37 = vpack.c.bf16 %v8728_v12, %v8727_v10  ;;  %v10507_v14 = vunpack.i.h.bf16 %v10505_v3  ;;  %v10506_v43 = vunpack.i.l.bf16 %v10505_v3 }
 0x5d2   : > { %v8408_v31 = vld [vmem:[#allocation3 + $0x80] sm:$0xff] }
 0x5d3   : > { %v8416_v5 = vld [vmem:[#allocation3 + $0x81] sm:$0xff]  ;;  %v10548_v7 = vpack.i.bf16 %v8408_v31, %v15805_v25  ;;  %8873 = vmatmul.mubr.bf16.gmra.mxu0 %v8735_v37  ;;  %v10563_v15 = vpack.i.bf16 %v8433_v36, %v8408_v31  ;;  %v8679_v45 = vsel %vm309_vm12, %v15741_v62, %v10507_v14 }
 0x5d4   : > { %v10553_v20 = vpack.i.bf16 %v8416_v5, %v15807_v52  ;;  %v8424_v53 = vld [vmem:[#allocation3 + $0x82] sm:$0xff]  ;;  %9626 = vmatprep.mubr.msk.bf16.mxu0 %vm309_vm12, %v8738_v33  ;;  %v10568_v52 = vpack.i.bf16 %v8441_v27, %v8416_v5  ;;  %v8687_v39 = vsel %vm5868_vm0, %v8679_v45, %v10512_v29 }
 0x5d5   : > { %10549 = vrot.lane.b32.xlu1 %v10548_v7, %s10709_s14  ;;  %v10558_v16 = vpack.i.bf16 %v8424_v53, %v15812_v61  ;;  %v8678_v61 = vsel %vm309_vm12, %v15717_v24, %v10506_v43  ;;  %v8740_v30 = vpack.c.bf16 %v8449_v57, %v8424_v53  ;;  %s9630_s14 = sshll.u32 %s16363_s22, 3 }
 0x5d6   : > { %10554 = vrot.lane.b32.xlu0 %v10553_v20, %s10714_s26  ;;  %v8686_v41 = vsel %vm5868_vm0, %v8678_v61, %v10511_v49  ;;  %s15901_s7 = scalar_lea.vmem %s15935_s6, %s9630_s14 }
 0x5d9   : > { %10559 = vrot.lane.b32.xlu1 %v10558_v16, %s10715_s12 }
 0x5da   : > { %10564 = vrot.lane.b32.xlu0 %v10563_v15, %s10717_s19 }
 0x5dd   : > { %10569 = vrot.lane.b32.xlu1 %v10568_v52, %s10718_s20 }
 0x5f8   : > { %v10520_v23 = vpop.permute.xlu1 %10519 }
 0x5f9   : > { %v10515_v19 = vpop.permute.xlu0 %10514  ;;  %v10522_v18 = vunpack.i.h.bf16 %v10520_v23  ;;  %v10521_v46 = vunpack.i.l.bf16 %v10520_v23 }
 0x5fa   : > { %v10517_v8 = vunpack.i.h.bf16 %v10515_v19  ;;  %v10516_v34 = vunpack.i.l.bf16 %v10515_v19 }
 0x5fc   : > { %v8694_v35 = vsel %vm6000_vm6, %v8686_v41, %v10516_v34  ;;  %v8695_v38 = vsel %vm6000_vm6, %v8687_v39, %v10517_v8 }
 0x5fd   : > { %v10525_v59 = vpop.permute.xlu0 %10524  ;;  %v8702_v62 = vsel %vm6164_vm13, %v8694_v35, %v10521_v46  ;;  %v8703_v24 = vsel %vm6164_vm13, %v8695_v38, %v10522_v18 }
 0x5fe   : > { %v10527_v2 = vunpack.i.h.bf16 %v10525_v59  ;;  %v10526_v42 = vunpack.i.l.bf16 %v10525_v59 }
 0x600   : > { %v8711_v22 = vsel %vm8706_vm10, %v8702_v62, %v10526_v42  ;;  %v8712_v55 = vsel %vm8706_vm10, %v8703_v24, %v10527_v2 }
 0x624   : > { %v10530_v6 = vpop.permute.xlu1 %10529 }
 0x625   : > { %v10535_v11 = vpop.permute.xlu0 %10534  ;;  %v10532_v54 = vunpack.i.h.bf16 %v10530_v6  ;;  %v10531_v40 = vunpack.i.l.bf16 %v10530_v6 }
 0x626   : > { %v10537_v63 = vunpack.i.h.bf16 %v10535_v11  ;;  %v10536_v56 = vunpack.i.l.bf16 %v10535_v11 }
 0x627   : > { %v8720_v28 = vsel %vm8715_vm14, %v8711_v22, %v10531_v40  ;;  %v8721_v58 = vsel %vm8715_vm14, %v8712_v55, %v10532_v54 }
 0x628   : > { %v8729_v26 = vsel %vm8724_vm1, %v8720_v28, %v10536_v56  ;;  %v8730_v9 = vsel %vm8724_vm1, %v8721_v58, %v10537_v63  ;;  %v10540_v4 = vpop.permute.xlu1 %10539 }
 0x629   : > { %v8737_v48 = vpack.c.bf16 %v8730_v9, %v8729_v26  ;;  %v10542_v44 = vunpack.i.h.bf16 %v10540_v4  ;;  %v10541_v47 = vunpack.i.l.bf16 %v10540_v4  ;;  %v10545_v13 = vpop.permute.xlu0 %10544 }
 0x62a   : > { %v10547_v0 = vunpack.i.h.bf16 %v10545_v13  ;;  %v10546_v32 = vunpack.i.l.bf16 %v10545_v13 }
 0x62b   : > { %8881 = vmatmul.mubr.bf16.gmra.mxu0 %v8737_v48  ;;  %v8681_v60 = vsel %vm309_vm12, %v15805_v25, %v10542_v44  ;;  %v8680_v17 = vsel %vm309_vm12, %v15772_v51, %v10541_v47  ;;  %v15882_v25 = vld [vmem:[%s15934_s5] ss:$0 sm:$0xff] }
 0x62c   : > { %9627 = vmatprep.mubr.msk.bf16.mxu0 %vm309_vm12, %v8740_v30  ;;  %v8689_v5 = vsel %vm5868_vm0, %v8681_v60, %v10547_v0  ;;  %v8688_v37 = vsel %vm5868_vm0, %v8680_v17, %v10546_v32  ;;  %vm8944_vm12 = vcmask 254976  }
 0x647   : > { %v10550_v21 = vpop.permute.xlu1 %10549 }
 0x648   : > { %v10555_v1 = vpop.permute.xlu0 %10554  ;;  %v10552_v10 = vunpack.i.h.bf16 %v10550_v21  ;;  %v10551_v12 = vunpack.i.l.bf16 %v10550_v21 }
 0x649   : > { %v10556_v31 = vunpack.i.l.bf16 %v10555_v1  ;;  %v10557_v7 = vunpack.i.h.bf16 %v10555_v1 }
 0x64a   : > { %v8696_v20 = vsel %vm6000_vm6, %v8688_v37, %v10551_v12  ;;  %v8697_v53 = vsel %vm6000_vm6, %v8689_v5, %v10552_v10 }
 0x64b   : > { %v10560_v51 = vpop.permute.xlu1 %10559  ;;  %v8704_v33 = vsel %vm6164_vm13, %v8696_v20, %v10556_v31  ;;  %v8866_v27 = vpop.f32.mrf.mxu0  ;;  %v8705_v52 = vsel %vm6164_vm13, %v8697_v53, %v10557_v7 }
 0x64c   : > { %v10565_v36 = vpop.permute.xlu0 %10564  ;;  %v10562_v16 = vunpack.i.h.bf16 %v10560_v51  ;;  %v10561_v15 = vunpack.i.l.bf16 %v10560_v51  ;;  %v8867_v14 = vadd.f32 %v15882_v25, %v8866_v27 }
 0x64d   : > { %v10567_v3 = vunpack.i.h.bf16 %v10565_v36  ;;  %v10566_v50 = vunpack.i.l.bf16 %v10565_v36  ;;  %v8868_v29 = vpop.f32.mrf.mxu0 }
 0x64e   : > { %v8713_v43 = vsel %vm8706_vm10, %v8704_v33, %v10561_v15  ;;  %v8714_v19 = vsel %vm8706_vm10, %v8705_v52, %v10562_v16  ;;  %v8897_v59 = vmax.f32 %v8867_v14, 0.0 }
 0x64f   : > { %v10570_v49 = vpop.permute.xlu1 %10569  ;;  %v8869_v23 = vpop.f32.mrf.mxu0  ;;  %v8722_v8 = vsel %vm8715_vm14, %v8713_v43, %v10566_v50  ;;  %v8723_v34 = vsel %vm8715_vm14, %v8714_v19, %v10567_v3 }
 0x650   : > { %v10572_v45 = vunpack.i.h.bf16 %v10570_v49  ;;  %v10571_v61 = vunpack.i.l.bf16 %v10570_v49  ;;  %v8870_v18 = vadd.f32 %v15882_v25, %v8869_v23  ;;  %v8905_v2 = vsel %vm5868_vm0, %v8897_v59, -inf }
 0x651   : > { %v8871_v39 = vpop.f32.mrf.mxu0 }
 0x652   : > { %v8731_v46 = vsel %vm8724_vm1, %v8722_v8, %v10571_v61  ;;  %v8732_v41 = vsel %vm8724_vm1, %v8723_v34, %v10572_v45  ;;  %v8898_v38 = vmax.f32 %v8870_v18, 0.0 }
 0x653   : > { %v8739_v35 = vpack.c.bf16 %v8732_v41, %v8731_v46 }
 0x654   : > { %v8906_v42 = vsel %vm5868_vm0, %v8898_v38, -inf }
 0x655   : > { %8889 = vmatmul.mubr.bf16.gmra.mxu0 %v8739_v35  ;;  %v8907_v62 = vmax.f32 %v8905_v2, %v8906_v42 }
 0x657   : > { %8917 = vst.msk [vmem:[#allocation5] sm:$0xff] %vm5868_vm0, %v8907_v62 }
 0x65e   : > { %v8921_v24 = vld [vmem:[#allocation5] ss:$2 sm:$0xf]  ;;  %v8929_v6 = vld [vmem:[#allocation5 + $0x1] ss:$2 sm:$0xf] }
 0x65f   : > { %v8936_v11 = vmax.f32 %v8921_v24, %v8929_v6 }
 0x661   : > { %v8940_v54 = vpack.c.bf16 %v8936_v11, %v8936_v11 }
 0x663   : > { %8945 = vst.msk [vmem:[%s15901_s7] sm:$0x3] %vm8944_vm12, %v8940_v54 }
 0x693   : > { %v8874_v40 = vpop.f32.mrf.mxu0 }
 0x694   : > { %v8875_v63 = vadd.f32 %v15882_v25, %v8874_v40 }
 0x695   : > { %v8876_v56 = vpop.f32.mrf.mxu0 }
 0x696   : > { %v8899_v55 = vmax.f32 %v8875_v63, 0.0 }
 0x697   : > { %v8877_v22 = vpop.f32.mrf.mxu0 }
 0x698   : > { %v8878_v28 = vadd.f32 %v15882_v25, %v8877_v22  ;;  %v8908_v9 = vsel %vm5868_vm0, %v8899_v55, -inf }
 0x699   : > { %v8879_v58 = vpop.f32.mrf.mxu0 }
 0x69a   : > { %v8900_v26 = vmax.f32 %v8878_v28, 0.0 }
 0x69c   : > { %v8909_v57 = vsel %vm5868_vm0, %v8900_v26, -inf }
 0x69d   : > { %v8910_v48 = vmax.f32 %v8908_v9, %v8909_v57 }
 0x69f   : > { %8918 = vst.msk [vmem:[#allocation5 + $0x8] sm:$0xff] %vm5868_vm0, %v8910_v48 }
 0x6a6   : > { %v8923_v30 = vld [vmem:[#allocation5 + $0x8] ss:$2 sm:$0xf]  ;;  %v8931_v4 = vld [vmem:[#allocation5 + $0x9] ss:$2 sm:$0xf] }
 0x6a7   : > { %v8937_v44 = vmax.f32 %v8923_v30, %v8931_v4 }
 0x6a9   : > { %v8941_v47 = vpack.c.bf16 %v8937_v44, %v8937_v44 }
 0x6ab   : > { %8946 = vst.msk [vmem:[%s15901_s7 + $0x2] sm:$0x3] %vm8944_vm12, %v8941_v47 }
 0x6eb   : > { %v8882_v13 = vpop.f32.mrf.mxu0 }
 0x6ec   : > { %v8883_v0 = vadd.f32 %v15882_v25, %v8882_v13 }
 0x6ed   : > { %v8884_v32 = vpop.f32.mrf.mxu0 }
 0x6ee   : > { %v8901_v17 = vmax.f32 %v8883_v0, 0.0 }
 0x6ef   : > { %v8885_v60 = vpop.f32.mrf.mxu0 }
 0x6f0   : > { %v8886_v21 = vadd.f32 %v15882_v25, %v8885_v60  ;;  %v8911_v12 = vsel %vm5868_vm0, %v8901_v17, -inf }
 0x6f1   : > { %v8887_v1 = vpop.f32.mrf.mxu0 }
 0x6f2   : > { %v8902_v10 = vmax.f32 %v8886_v21, 0.0 }
 0x6f4   : > { %v8912_v31 = vsel %vm5868_vm0, %v8902_v10, -inf }
 0x6f5   : > { %v8913_v5 = vmax.f32 %v8911_v12, %v8912_v31 }
 0x6f7   : > { %8919 = vst.msk [vmem:[#allocation5 + $0x10] sm:$0xff] %vm5868_vm0, %v8913_v5 }
 0x6fe   : > { %v8925_v37 = vld [vmem:[#allocation5 + $0x10] ss:$2 sm:$0xf]  ;;  %v8933_v7 = vld [vmem:[#allocation5 + $0x11] ss:$2 sm:$0xf] }
 0x6ff   : > { %v8938_v20 = vmax.f32 %v8925_v37, %v8933_v7 }
 0x701   : > { %v8942_v53 = vpack.c.bf16 %v8938_v20, %v8938_v20 }
 0x703   : > { %8947 = vst.msk [vmem:[%s15901_s7 + $0x4] sm:$0x3] %vm8944_vm12, %v8942_v53 }
 0x715   : > { %v8890_v51 = vpop.f32.mrf.mxu0 }
 0x716   : > { %v8891_v36 = vadd.f32 %v15882_v25, %v8890_v51 }
 0x717   : > { %v8892_v33 = vpop.f32.mrf.mxu0 }
 0x718   : > { %v8903_v15 = vmax.f32 %v8891_v36, 0.0 }
 0x719   : > { %v8893_v16 = vpop.f32.mrf.mxu0 }
 0x71a   : > { %v8894_v27 = vadd.f32 %v15882_v25, %v8893_v16  ;;  %v8914_v50 = vsel %vm5868_vm0, %v8903_v15, -inf }
 0x71b   : > { %v8895_v52 = vpop.f32.mrf.mxu0 }
 0x71c   : > { %v8904_v3 = vmax.f32 %v8894_v27, 0.0 }
 0x71e   : > { %v8915_v14 = vsel %vm5868_vm0, %v8904_v3, -inf }
 0x71f   : > { %v8916_v43 = vmax.f32 %v8914_v50, %v8915_v14 }
 0x721   : > { %8920 = vst.msk [vmem:[#allocation5 + $0x18] sm:$0xff] %vm5868_vm0, %v8916_v43 }
 0x728   : > { %v8927_v19 = vld [vmem:[#allocation5 + $0x18] ss:$2 sm:$0xf]  ;;  %v8935_v29 = vld [vmem:[#allocation5 + $0x19] ss:$2 sm:$0xf] }
 0x729   : > { %v8939_v49 = vmax.f32 %v8927_v19, %v8935_v29 }
 0x72b   : > { %v8943_v45 = vpack.c.bf16 %v8939_v49, %v8939_v49 }
 0x72d   : > { %8948 = vst.msk [vmem:[%s15901_s7 + $0x6] sm:$0x3] %vm8944_vm12, %v8943_v45 }
 0x72e PF: > { %s16_s21 = sadd.s32 1, %s10696_s21  }
 0x72f   : > { %p13_p4 = scmp.ge.s32.totalorder %s16_s21, 4  }
 0x731   :  { %15 = sbr.rel (!%p13_p4) target bundleno = 1 (0x1), region = 103 }

</bundles_post_ra>
